<compile_context>
chip_gen: v7x
topology: tpu7x:2x2x1
jax: 0.10.0
libtpu: 0.0.40
codegen_flags: <defaults>
</compile_context>

<pallas_src>
import functools

import jax
import jax.numpy as jnp
import numpy as np
from jax.experimental import pallas as pl
from jax.experimental.pallas import tpu as pltpu

_VMEM = pl.BlockSpec(memory_space=pltpu.MemorySpace.VMEM)


def _round_up(x, m):
    return (x + m - 1) // m * m


# ---------------------------------------------------------------------------
# Fused kernel (factory: loop bounds / layer count are baked in statically)
# ---------------------------------------------------------------------------
def make_seq2seq_kernel(num_layers, seq_len, pred_length, h_pad):
    """Ref layout (all full-array VMEM refs, no grid):
         in_ref      : (seq_len, Bp, In)        encoder input, time-major
         loc_ref     : (Bp, Op)                 initial decoder input (padded lanes zero)
         per enc/dec layer l: wih (in_l, 3*Hp), whh (Hp, 3*Hp), bih (1, 3*Hp), bhh (1, 3*Hp)
         lin_w_ref   : (Hp, Op), lin_b_ref: (1, Op)
         out_ref     : (pred_length, Bp, Op)
       Gate layout is [r | z | n], each padded to Hp=128 lanes (PyTorch nn.GRU order).
    """
    Hp = h_pad

    def gru_cell(x, h, wih_ref, whh_ref, bih_ref, bhh_ref):
        gi = jnp.dot(x, wih_ref[...], preferred_element_type=jnp.float32) + bih_ref[...]
        gh = jnp.dot(h, whh_ref[...], preferred_element_type=jnp.float32) + bhh_ref[...]
        r = jax.nn.sigmoid(gi[:, 0 * Hp:1 * Hp] + gh[:, 0 * Hp:1 * Hp])
        z = jax.nn.sigmoid(gi[:, 1 * Hp:2 * Hp] + gh[:, 1 * Hp:2 * Hp])
        n = jnp.tanh(gi[:, 2 * Hp:3 * Hp] + r * gh[:, 2 * Hp:3 * Hp])
        return (1.0 - z) * n + z * h

    def kernel(*refs):
        in_ref, loc_ref = refs[0], refs[1]
        idx = 2
        enc = [refs[idx + 4 * l: idx + 4 * (l + 1)] for l in range(num_layers)]
        idx += 4 * num_layers
        dec = [refs[idx + 4 * l: idx + 4 * (l + 1)] for l in range(num_layers)]
        idx += 4 * num_layers
        lin_w_ref, lin_b_ref = refs[idx], refs[idx + 1]
        out_ref = refs[idx + 2]

        Bp = in_ref.shape[1]

        # ---------------- encoder: unrolled over time and layers ------------
        h = [jnp.zeros((Bp, Hp), jnp.float32) for _ in range(num_layers)]
        for t in range(seq_len):
            x = in_ref[t, :, :]
            for l in range(num_layers):
                h[l] = gru_cell(x, h[l], *enc[l])
                x = h[l]

        # -------- decoder: autoregressive GRU + Linear + residual (fused) ---
        dec_in = loc_ref[...]
        for t in range(pred_length):
            x = dec_in
            for l in range(num_layers):
                h[l] = gru_cell(x, h[l], *dec[l])
                x = h[l]
            # Dropout(p=0.5) is identity in eval mode.
            now = (jnp.dot(x, lin_w_ref[...], preferred_element_type=jnp.float32)
                   + lin_b_ref[...] + dec_in)
            out_ref[t, :, :] = now
            dec_in = now

    return kernel


# ---------------------------------------------------------------------------
# Parameter init (unpadded, PyTorch-style uniform) + padding to kernel layout
# ---------------------------------------------------------------------------
def _uniform(key, shape, k):
    return jax.random.uniform(key, shape, jnp.float32, -k, k)


def init_params(seed, input_size, hidden_size, num_layers):
    """Unpadded params; weights already transposed to (in, 3H) / (H, out)."""
    H = hidden_size * 30
    k = 1.0 / np.sqrt(H)
    key = jax.random.PRNGKey(seed)

    def gru_layers(key, in0):
        layers = []
        for l in range(num_layers):
            in_dim = in0 if l == 0 else H
            key, k1, k2, k3, k4 = jax.random.split(key, 5)
            layers.append((_uniform(k1, (in_dim, 3 * H), k),
                           _uniform(k2, (H, 3 * H), k),
                           _uniform(k3, (1, 3 * H), k),
                           _uniform(k4, (1, 3 * H), k)))
        return layers, key

    enc, key = gru_layers(key, input_size)
    dec, key = gru_layers(key, hidden_size)
    key, k1, k2 = jax.random.split(key, 3)
    lin_w = _uniform(k1, (H, hidden_size), k)
    lin_b = _uniform(k2, (1, hidden_size), k)
    return dict(enc=enc, dec=dec, lin_w=lin_w, lin_b=lin_b)


def _pad_gru_layer(layer, in_pad, h_pad):
    wih, whh, bih, bhh = layer
    in_real, h_real = wih.shape[0], whh.shape[0]
    wih_p = jnp.zeros((in_pad, 3 * h_pad), jnp.float32)
    whh_p = jnp.zeros((h_pad, 3 * h_pad), jnp.float32)
    bih_p = jnp.zeros((1, 3 * h_pad), jnp.float32)
    bhh_p = jnp.zeros((1, 3 * h_pad), jnp.float32)
    for g in range(3):  # per-gate copy so r/z/n slices land on 128 boundaries
        src = slice(g * h_real, (g + 1) * h_real)
        dst = slice(g * h_pad, g * h_pad + h_real)
        wih_p = wih_p.at[:in_real, dst].set(wih[:, src])
        whh_p = whh_p.at[:h_real, dst].set(whh[:, src])
        bih_p = bih_p.at[:, dst].set(bih[:, src])
        bhh_p = bhh_p.at[:, dst].set(bhh[:, src])
    return wih_p, whh_p, bih_p, bhh_p


def pad_params(params, input_size, hidden_size):
    H = hidden_size * 30
    Hp = _round_up(H, 128)
    Op = _round_up(hidden_size, 128)
    enc = [_pad_gru_layer(l, (input_size if i == 0 else Hp), Hp)
           for i, l in enumerate(params["enc"])]
    dec = [_pad_gru_layer(l, (Op if i == 0 else Hp), Hp)
           for i, l in enumerate(params["dec"])]
    lin_w = jnp.zeros((Hp, Op), jnp.float32).at[:H, :hidden_size].set(params["lin_w"])
    lin_b = jnp.zeros((1, Op), jnp.float32).at[:, :hidden_size].set(params["lin_b"])
    return dict(enc=enc, dec=dec, lin_w=lin_w, lin_b=lin_b)


# ---------------------------------------------------------------------------
# Forward wrapper: one pallas_call for the whole model
# ---------------------------------------------------------------------------
@functools.partial(jax.jit, static_argnames=("pred_length", "num_layers", "hidden_size"))
def seq2seq_forward(padded_params, in_data, last_location, *, pred_length,
                    num_layers, hidden_size):
    B, S, _ = in_data.shape
    H = hidden_size * 30
    Hp = _round_up(H, 128)
    Op = _round_up(hidden_size, 128)
    Bp = _round_up(max(B, 8), 8)

    # time-major + batch padded to sublane width; decoder input padded to 128 lanes
    in_p = jnp.zeros((S, Bp, in_data.shape[2]), jnp.float32).at[:, :B, :].set(
        jnp.transpose(in_data, (1, 0, 2)))
    loc_p = jnp.zeros((Bp, Op), jnp.float32).at[:B, :hidden_size].set(
        last_location[:, 0, :])

    args = [in_p, loc_p]
    for layer in padded_params["enc"]:
        args.extend(layer)
    for layer in padded_params["dec"]:
        args.extend(layer)
    args.extend([padded_params["lin_w"], padded_params["lin_b"]])

    kernel = make_seq2seq_kernel(num_layers, S, pred_length, Hp)
    out_p = pl.pallas_call(
        kernel,
        out_shape=jax.ShapeDtypeStruct((pred_length, Bp, Op), jnp.float32),
        in_specs=[_VMEM] * len(args),
        out_specs=_VMEM,
    )(*args)

    # (pred_length, Bp, Op) -> (B, pred_length, hidden_size)
    return jnp.transpose(out_p, (1, 0, 2))[:B, :, :hidden_size]


# ---------------------------------------------------------------------------
# Pure-JAX reference (unpadded) for a correctness check
# ---------------------------------------------------------------------------
def _ref_gru_cell(x, h, wih, whh, bih, bhh):
    H = h.shape[-1]
    hi = jnp.dot(x, wih, precision=jax.lax.Precision.HIGHEST) + bih
    hh = jnp.dot(h, whh, precision=jax.lax.Precision.HIGHEST) + bhh
    r = jax.nn.sigmoid(hi[:, :H] + hh[:, :H])
    z = jax.nn.sigmoid(hi[:, H:2 * H] + hh[:, H:2 * H])
    n = jnp.tanh(hi[:, 2 * H:] + r * hh[:, 2 * H:])
    return (1.0 - z) * n + z * h


def seq2seq_reference(params, in_data, last_location, pred_length, num_layers, hidden_size):
    B, S, _ = in_data.shape
    H = hidden_size * 30
    h = [jnp.zeros((B, H), jnp.float32) for _ in range(num_layers)]
    for t in range(S):
        x = in_data[:, t, :]
        for l in range(num_layers):
            h[l] = _ref_gru_cell(x, h[l], *params["enc"][l])
            x = h[l]
    dec_in = last_location[:, 0, :]
    outs = []
    for _ in range(pred_length):
        x = dec_in
        for l in range(num_layers):
            h[l] = _ref_gru_cell(x, h[l], *params["dec"][l])
            x = h[l]
        now = (jnp.dot(x, params["lin_w"], precision=jax.lax.Precision.HIGHEST)
               + params["lin_b"] + dec_in)
        outs.append(now[:, None, :])
        dec_in = now
    return jnp.concatenate(outs, axis=1)


# ---------------------------------------------------------------------------
# Main
# ---------------------------------------------------------------------------
if __name__ == "__main__":
    batch = 2
    seq_len = 8
    input_size = 4
    hidden_size = 4          # GRU hidden = hidden_size * 30 = 120 -> padded to 128
    num_layers = 2
    pred_length = 5

    params = init_params(0, input_size, hidden_size, num_layers)
    padded = pad_params(params, input_size, hidden_size)

    key = jax.random.PRNGKey(0)
    k_in, k_loc = jax.random.split(key)
    in_data = jax.random.normal(k_in, (batch, seq_len, input_size), jnp.float32)
    last_location = jax.random.normal(k_loc, (batch, 1, hidden_size), jnp.float32)

    out = seq2seq_forward(padded, in_data, last_location,
                          pred_length=pred_length, num_layers=num_layers,
                          hidden_size=hidden_size)
    out = jax.block_until_ready(out)

    assert out.shape == (batch, pred_length, hidden_size), out.shape
    assert jnp.all(jnp.isfinite(out))

    ref = seq2seq_reference(params, in_data, last_location,
                            pred_length, num_layers, hidden_size)
    max_err = float(jnp.max(jnp.abs(out - ref)))
    assert max_err < 1e-2, f"max abs err vs reference: {max_err}"

    print("KERNEL_OK")
</pallas_src>

<mosaic_0001>
module attributes {stable_mosaic.version = 11 : i64} {
  func.func @kernel(%arg0: memref<8x8x4xf32, #tpu.memory_space<vmem>>, %arg1: memref<8x128xf32, #tpu.memory_space<vmem>>, %arg2: memref<4x384xf32, #tpu.memory_space<vmem>>, %arg3: memref<128x384xf32, #tpu.memory_space<vmem>>, %arg4: memref<1x384xf32, #tpu.memory_space<vmem>>, %arg5: memref<1x384xf32, #tpu.memory_space<vmem>>, %arg6: memref<128x384xf32, #tpu.memory_space<vmem>>, %arg7: memref<128x384xf32, #tpu.memory_space<vmem>>, %arg8: memref<1x384xf32, #tpu.memory_space<vmem>>, %arg9: memref<1x384xf32, #tpu.memory_space<vmem>>, %arg10: memref<128x384xf32, #tpu.memory_space<vmem>>, %arg11: memref<128x384xf32, #tpu.memory_space<vmem>>, %arg12: memref<1x384xf32, #tpu.memory_space<vmem>>, %arg13: memref<1x384xf32, #tpu.memory_space<vmem>>, %arg14: memref<128x384xf32, #tpu.memory_space<vmem>>, %arg15: memref<128x384xf32, #tpu.memory_space<vmem>>, %arg16: memref<1x384xf32, #tpu.memory_space<vmem>>, %arg17: memref<1x384xf32, #tpu.memory_space<vmem>>, %arg18: memref<128x128xf32, #tpu.memory_space<vmem>>, %arg19: memref<1x128xf32, #tpu.memory_space<vmem>>, %arg20: memref<5x8x128xf32, #tpu.memory_space<vmem>>) attributes {dimension_semantics = [], scalar_prefetch = 0 : i64, scratch_operands = 0 : i64, tpu.core_type = #tpu.core_type<tc>} {
    %cst = arith.constant 0.000000e+00 : f32
    %0 = vector.broadcast %cst : f32 to vector<8x128xf32>
    %cst_0 = arith.constant 0.000000e+00 : f32
    %1 = vector.broadcast %cst_0 : f32 to vector<8x128xf32>
    %c0 = arith.constant 0 : index
    %c0_1 = arith.constant 0 : index
    %c0_2 = arith.constant 0 : index
    %2 = vector.load %arg0[%c0, %c0_1, %c0_2] : memref<8x8x4xf32, #tpu.memory_space<vmem>>, vector<1x8x4xf32>
    %3 = vector.shape_cast %2 : vector<1x8x4xf32> to vector<8x4xf32>
    %c0_3 = arith.constant 0 : index
    %c0_4 = arith.constant 0 : index
    %4 = vector.load %arg2[%c0_3, %c0_4] : memref<4x384xf32, #tpu.memory_space<vmem>>, vector<4x384xf32>
    %cst_5 = arith.constant dense<0.000000e+00> : vector<8x384xf32>
    %5 = tpu.matmul %3, %4, %cst_5 {dimension_numbers = #tpu.dot_dimension_numbers<[1], [0], [0], [1], [0, 0, 1, 1], [], []>} : vector<8x4xf32>, vector<4x384xf32>, vector<8x384xf32> -> vector<8x384xf32>
    %c0_6 = arith.constant 0 : index
    %c0_7 = arith.constant 0 : index
    %6 = vector.load %arg4[%c0_6, %c0_7] : memref<1x384xf32, #tpu.memory_space<vmem>>, vector<1x384xf32>
    %7 = vector.broadcast %6 : vector<1x384xf32> to vector<8x384xf32>
    %8 = arith.addf %5, %7 : vector<8x384xf32>
    %c0_8 = arith.constant 0 : index
    %c0_9 = arith.constant 0 : index
    %9 = vector.load %arg3[%c0_8, %c0_9] : memref<128x384xf32, #tpu.memory_space<vmem>>, vector<128x384xf32>
    %cst_10 = arith.constant dense<0.000000e+00> : vector<8x384xf32>
    %10 = tpu.matmul %0, %9, %cst_10 {dimension_numbers = #tpu.dot_dimension_numbers<[1], [0], [0], [1], [0, 0, 1, 1], [], []>} : vector<8x128xf32>, vector<128x384xf32>, vector<8x384xf32> -> vector<8x384xf32>
    %c0_11 = arith.constant 0 : index
    %c0_12 = arith.constant 0 : index
    %11 = vector.load %arg5[%c0_11, %c0_12] : memref<1x384xf32, #tpu.memory_space<vmem>>, vector<1x384xf32>
    %12 = vector.broadcast %11 : vector<1x384xf32> to vector<8x384xf32>
    %13 = arith.addf %10, %12 : vector<8x384xf32>
    %14 = vector.extract_strided_slice %8 {offsets = [0, 0], sizes = [8, 128], strides = [1, 1]} : vector<8x384xf32> to vector<8x128xf32>
    %15 = vector.extract_strided_slice %13 {offsets = [0, 0], sizes = [8, 128], strides = [1, 1]} : vector<8x384xf32> to vector<8x128xf32>
    %16 = arith.addf %14, %15 : vector<8x128xf32>
    %17 = arith.negf %16 : vector<8x128xf32>
    %18 = math.exp %17 : vector<8x128xf32>
    %cst_13 = arith.constant 1.000000e+00 : f32
    %19 = vector.broadcast %cst_13 : f32 to vector<8x128xf32>
    %20 = arith.addf %19, %18 : vector<8x128xf32>
    %21 = arith.divf %19, %20 : vector<8x128xf32>
    %22 = vector.extract_strided_slice %8 {offsets = [0, 128], sizes = [8, 128], strides = [1, 1]} : vector<8x384xf32> to vector<8x128xf32>
    %23 = vector.extract_strided_slice %13 {offsets = [0, 128], sizes = [8, 128], strides = [1, 1]} : vector<8x384xf32> to vector<8x128xf32>
    %24 = arith.addf %22, %23 : vector<8x128xf32>
    %25 = arith.negf %24 : vector<8x128xf32>
    %26 = math.exp %25 : vector<8x128xf32>
    %cst_14 = arith.constant 1.000000e+00 : f32
    %27 = vector.broadcast %cst_14 : f32 to vector<8x128xf32>
    %28 = arith.addf %27, %26 : vector<8x128xf32>
    %29 = arith.divf %27, %28 : vector<8x128xf32>
    %30 = vector.extract_strided_slice %8 {offsets = [0, 256], sizes = [8, 128], strides = [1, 1]} : vector<8x384xf32> to vector<8x128xf32>
    %31 = vector.extract_strided_slice %13 {offsets = [0, 256], sizes = [8, 128], strides = [1, 1]} : vector<8x384xf32> to vector<8x128xf32>
    %32 = arith.mulf %21, %31 : vector<8x128xf32>
    %33 = arith.addf %30, %32 : vector<8x128xf32>
    %34 = math.tanh %33 : vector<8x128xf32>
    %cst_15 = arith.constant 1.000000e+00 : f32
    %35 = vector.broadcast %cst_15 : f32 to vector<8x128xf32>
    %36 = arith.subf %35, %29 : vector<8x128xf32>
    %37 = arith.mulf %36, %34 : vector<8x128xf32>
    %38 = arith.mulf %29, %0 : vector<8x128xf32>
    %39 = arith.addf %37, %38 : vector<8x128xf32>
    %c0_16 = arith.constant 0 : index
    %c0_17 = arith.constant 0 : index
    %40 = vector.load %arg6[%c0_16, %c0_17] : memref<128x384xf32, #tpu.memory_space<vmem>>, vector<128x384xf32>
    %cst_18 = arith.constant dense<0.000000e+00> : vector<8x384xf32>
    %41 = tpu.matmul %39, %40, %cst_18 {dimension_numbers = #tpu.dot_dimension_numbers<[1], [0], [0], [1], [0, 0, 1, 1], [], []>} : vector<8x128xf32>, vector<128x384xf32>, vector<8x384xf32> -> vector<8x384xf32>
    %c0_19 = arith.constant 0 : index
    %c0_20 = arith.constant 0 : index
    %42 = vector.load %arg8[%c0_19, %c0_20] : memref<1x384xf32, #tpu.memory_space<vmem>>, vector<1x384xf32>
    %43 = vector.broadcast %42 : vector<1x384xf32> to vector<8x384xf32>
    %44 = arith.addf %41, %43 : vector<8x384xf32>
    %c0_21 = arith.constant 0 : index
    %c0_22 = arith.constant 0 : index
    %45 = vector.load %arg7[%c0_21, %c0_22] : memref<128x384xf32, #tpu.memory_space<vmem>>, vector<128x384xf32>
    %cst_23 = arith.constant dense<0.000000e+00> : vector<8x384xf32>
    %46 = tpu.matmul %1, %45, %cst_23 {dimension_numbers = #tpu.dot_dimension_numbers<[1], [0], [0], [1], [0, 0, 1, 1], [], []>} : vector<8x128xf32>, vector<128x384xf32>, vector<8x384xf32> -> vector<8x384xf32>
    %c0_24 = arith.constant 0 : index
    %c0_25 = arith.constant 0 : index
    %47 = vector.load %arg9[%c0_24, %c0_25] : memref<1x384xf32, #tpu.memory_space<vmem>>, vector<1x384xf32>
    %48 = vector.broadcast %47 : vector<1x384xf32> to vector<8x384xf32>
    %49 = arith.addf %46, %48 : vector<8x384xf32>
    %50 = vector.extract_strided_slice %44 {offsets = [0, 0], sizes = [8, 128], strides = [1, 1]} : vector<8x384xf32> to vector<8x128xf32>
    %51 = vector.extract_strided_slice %49 {offsets = [0, 0], sizes = [8, 128], strides = [1, 1]} : vector<8x384xf32> to vector<8x128xf32>
    %52 = arith.addf %50, %51 : vector<8x128xf32>
    %53 = arith.negf %52 : vector<8x128xf32>
    %54 = math.exp %53 : vector<8x128xf32>
    %cst_26 = arith.constant 1.000000e+00 : f32
    %55 = vector.broadcast %cst_26 : f32 to vector<8x128xf32>
    %56 = arith.addf %55, %54 : vector<8x128xf32>
    %57 = arith.divf %55, %56 : vector<8x128xf32>
    %58 = vector.extract_strided_slice %44 {offsets = [0, 128], sizes = [8, 128], strides = [1, 1]} : vector<8x384xf32> to vector<8x128xf32>
    %59 = vector.extract_strided_slice %49 {offsets = [0, 128], sizes = [8, 128], strides = [1, 1]} : vector<8x384xf32> to vector<8x128xf32>
    %60 = arith.addf %58, %59 : vector<8x128xf32>
    %61 = arith.negf %60 : vector<8x128xf32>
    %62 = math.exp %61 : vector<8x128xf32>
    %cst_27 = arith.constant 1.000000e+00 : f32
    %63 = vector.broadcast %cst_27 : f32 to vector<8x128xf32>
    %64 = arith.addf %63, %62 : vector<8x128xf32>
    %65 = arith.divf %63, %64 : vector<8x128xf32>
    %66 = vector.extract_strided_slice %44 {offsets = [0, 256], sizes = [8, 128], strides = [1, 1]} : vector<8x384xf32> to vector<8x128xf32>
    %67 = vector.extract_strided_slice %49 {offsets = [0, 256], sizes = [8, 128], strides = [1, 1]} : vector<8x384xf32> to vector<8x128xf32>
    %68 = arith.mulf %57, %67 : vector<8x128xf32>
    %69 = arith.addf %66, %68 : vector<8x128xf32>
    %70 = math.tanh %69 : vector<8x128xf32>
    %cst_28 = arith.constant 1.000000e+00 : f32
    %71 = vector.broadcast %cst_28 : f32 to vector<8x128xf32>
    %72 = arith.subf %71, %65 : vector<8x128xf32>
    %73 = arith.mulf %72, %70 : vector<8x128xf32>
    %74 = arith.mulf %65, %1 : vector<8x128xf32>
    %75 = arith.addf %73, %74 : vector<8x128xf32>
    %c1 = arith.constant 1 : index
    %c0_29 = arith.constant 0 : index
    %c0_30 = arith.constant 0 : index
    %76 = vector.load %arg0[%c1, %c0_29, %c0_30] : memref<8x8x4xf32, #tpu.memory_space<vmem>>, vector<1x8x4xf32>
    %77 = vector.shape_cast %76 : vector<1x8x4xf32> to vector<8x4xf32>
    %c0_31 = arith.constant 0 : index
    %c0_32 = arith.constant 0 : index
    %78 = vector.load %arg2[%c0_31, %c0_32] : memref<4x384xf32, #tpu.memory_space<vmem>>, vector<4x384xf32>
    %cst_33 = arith.constant dense<0.000000e+00> : vector<8x384xf32>
    %79 = tpu.matmul %77, %78, %cst_33 {dimension_numbers = #tpu.dot_dimension_numbers<[1], [0], [0], [1], [0, 0, 1, 1], [], []>} : vector<8x4xf32>, vector<4x384xf32>, vector<8x384xf32> -> vector<8x384xf32>
    %c0_34 = arith.constant 0 : index
    %c0_35 = arith.constant 0 : index
    %80 = vector.load %arg4[%c0_34, %c0_35] : memref<1x384xf32, #tpu.memory_space<vmem>>, vector<1x384xf32>
    %81 = vector.broadcast %80 : vector<1x384xf32> to vector<8x384xf32>
    %82 = arith.addf %79, %81 : vector<8x384xf32>
    %c0_36 = arith.constant 0 : index
    %c0_37 = arith.constant 0 : index
    %83 = vector.load %arg3[%c0_36, %c0_37] : memref<128x384xf32, #tpu.memory_space<vmem>>, vector<128x384xf32>
    %cst_38 = arith.constant dense<0.000000e+00> : vector<8x384xf32>
    %84 = tpu.matmul %39, %83, %cst_38 {dimension_numbers = #tpu.dot_dimension_numbers<[1], [0], [0], [1], [0, 0, 1, 1], [], []>} : vector<8x128xf32>, vector<128x384xf32>, vector<8x384xf32> -> vector<8x384xf32>
    %c0_39 = arith.constant 0 : index
    %c0_40 = arith.constant 0 : index
    %85 = vector.load %arg5[%c0_39, %c0_40] : memref<1x384xf32, #tpu.memory_space<vmem>>, vector<1x384xf32>
    %86 = vector.broadcast %85 : vector<1x384xf32> to vector<8x384xf32>
    %87 = arith.addf %84, %86 : vector<8x384xf32>
    %88 = vector.extract_strided_slice %82 {offsets = [0, 0], sizes = [8, 128], strides = [1, 1]} : vector<8x384xf32> to vector<8x128xf32>
    %89 = vector.extract_strided_slice %87 {offsets = [0, 0], sizes = [8, 128], strides = [1, 1]} : vector<8x384xf32> to vector<8x128xf32>
    %90 = arith.addf %88, %89 : vector<8x128xf32>
    %91 = arith.negf %90 : vector<8x128xf32>
    %92 = math.exp %91 : vector<8x128xf32>
    %cst_41 = arith.constant 1.000000e+00 : f32
    %93 = vector.broadcast %cst_41 : f32 to vector<8x128xf32>
    %94 = arith.addf %93, %92 : vector<8x128xf32>
    %95 = arith.divf %93, %94 : vector<8x128xf32>
    %96 = vector.extract_strided_slice %82 {offsets = [0, 128], sizes = [8, 128], strides = [1, 1]} : vector<8x384xf32> to vector<8x128xf32>
    %97 = vector.extract_strided_slice %87 {offsets = [0, 128], sizes = [8, 128], strides = [1, 1]} : vector<8x384xf32> to vector<8x128xf32>
    %98 = arith.addf %96, %97 : vector<8x128xf32>
    %99 = arith.negf %98 : vector<8x128xf32>
    %100 = math.exp %99 : vector<8x128xf32>
    %cst_42 = arith.constant 1.000000e+00 : f32
    %101 = vector.broadcast %cst_42 : f32 to vector<8x128xf32>
    %102 = arith.addf %101, %100 : vector<8x128xf32>
    %103 = arith.divf %101, %102 : vector<8x128xf32>
    %104 = vector.extract_strided_slice %82 {offsets = [0, 256], sizes = [8, 128], strides = [1, 1]} : vector<8x384xf32> to vector<8x128xf32>
    %105 = vector.extract_strided_slice %87 {offsets = [0, 256], sizes = [8, 128], strides = [1, 1]} : vector<8x384xf32> to vector<8x128xf32>
    %106 = arith.mulf %95, %105 : vector<8x128xf32>
    %107 = arith.addf %104, %106 : vector<8x128xf32>
    %108 = math.tanh %107 : vector<8x128xf32>
    %cst_43 = arith.constant 1.000000e+00 : f32
    %109 = vector.broadcast %cst_43 : f32 to vector<8x128xf32>
    %110 = arith.subf %109, %103 : vector<8x128xf32>
    %111 = arith.mulf %110, %108 : vector<8x128xf32>
    %112 = arith.mulf %103, %39 : vector<8x128xf32>
    %113 = arith.addf %111, %112 : vector<8x128xf32>
    %c0_44 = arith.constant 0 : index
    %c0_45 = arith.constant 0 : index
    %114 = vector.load %arg6[%c0_44, %c0_45] : memref<128x384xf32, #tpu.memory_space<vmem>>, vector<128x384xf32>
    %cst_46 = arith.constant dense<0.000000e+00> : vector<8x384xf32>
    %115 = tpu.matmul %113, %114, %cst_46 {dimension_numbers = #tpu.dot_dimension_numbers<[1], [0], [0], [1], [0, 0, 1, 1], [], []>} : vector<8x128xf32>, vector<128x384xf32>, vector<8x384xf32> -> vector<8x384xf32>
    %c0_47 = arith.constant 0 : index
    %c0_48 = arith.constant 0 : index
    %116 = vector.load %arg8[%c0_47, %c0_48] : memref<1x384xf32, #tpu.memory_space<vmem>>, vector<1x384xf32>
    %117 = vector.broadcast %116 : vector<1x384xf32> to vector<8x384xf32>
    %118 = arith.addf %115, %117 : vector<8x384xf32>
    %c0_49 = arith.constant 0 : index
    %c0_50 = arith.constant 0 : index
    %119 = vector.load %arg7[%c0_49, %c0_50] : memref<128x384xf32, #tpu.memory_space<vmem>>, vector<128x384xf32>
    %cst_51 = arith.constant dense<0.000000e+00> : vector<8x384xf32>
    %120 = tpu.matmul %75, %119, %cst_51 {dimension_numbers = #tpu.dot_dimension_numbers<[1], [0], [0], [1], [0, 0, 1, 1], [], []>} : vector<8x128xf32>, vector<128x384xf32>, vector<8x384xf32> -> vector<8x384xf32>
    %c0_52 = arith.constant 0 : index
    %c0_53 = arith.constant 0 : index
    %121 = vector.load %arg9[%c0_52, %c0_53] : memref<1x384xf32, #tpu.memory_space<vmem>>, vector<1x384xf32>
    %122 = vector.broadcast %121 : vector<1x384xf32> to vector<8x384xf32>
    %123 = arith.addf %120, %122 : vector<8x384xf32>
    %124 = vector.extract_strided_slice %118 {offsets = [0, 0], sizes = [8, 128], strides = [1, 1]} : vector<8x384xf32> to vector<8x128xf32>
    %125 = vector.extract_strided_slice %123 {offsets = [0, 0], sizes = [8, 128], strides = [1, 1]} : vector<8x384xf32> to vector<8x128xf32>
    %126 = arith.addf %124, %125 : vector<8x128xf32>
    %127 = arith.negf %126 : vector<8x128xf32>
    %128 = math.exp %127 : vector<8x128xf32>
    %cst_54 = arith.constant 1.000000e+00 : f32
    %129 = vector.broadcast %cst_54 : f32 to vector<8x128xf32>
    %130 = arith.addf %129, %128 : vector<8x128xf32>
    %131 = arith.divf %129, %130 : vector<8x128xf32>
    %132 = vector.extract_strided_slice %118 {offsets = [0, 128], sizes = [8, 128], strides = [1, 1]} : vector<8x384xf32> to vector<8x128xf32>
    %133 = vector.extract_strided_slice %123 {offsets = [0, 128], sizes = [8, 128], strides = [1, 1]} : vector<8x384xf32> to vector<8x128xf32>
    %134 = arith.addf %132, %133 : vector<8x128xf32>
    %135 = arith.negf %134 : vector<8x128xf32>
    %136 = math.exp %135 : vector<8x128xf32>
    %cst_55 = arith.constant 1.000000e+00 : f32
    %137 = vector.broadcast %cst_55 : f32 to vector<8x128xf32>
    %138 = arith.addf %137, %136 : vector<8x128xf32>
    %139 = arith.divf %137, %138 : vector<8x128xf32>
    %140 = vector.extract_strided_slice %118 {offsets = [0, 256], sizes = [8, 128], strides = [1, 1]} : vector<8x384xf32> to vector<8x128xf32>
    %141 = vector.extract_strided_slice %123 {offsets = [0, 256], sizes = [8, 128], strides = [1, 1]} : vector<8x384xf32> to vector<8x128xf32>
    %142 = arith.mulf %131, %141 : vector<8x128xf32>
    %143 = arith.addf %140, %142 : vector<8x128xf32>
    %144 = math.tanh %143 : vector<8x128xf32>
    %cst_56 = arith.constant 1.000000e+00 : f32
    %145 = vector.broadcast %cst_56 : f32 to vector<8x128xf32>
    %146 = arith.subf %145, %139 : vector<8x128xf32>
    %147 = arith.mulf %146, %144 : vector<8x128xf32>
    %148 = arith.mulf %139, %75 : vector<8x128xf32>
    %149 = arith.addf %147, %148 : vector<8x128xf32>
    %c2 = arith.constant 2 : index
    %c0_57 = arith.constant 0 : index
    %c0_58 = arith.constant 0 : index
    %150 = vector.load %arg0[%c2, %c0_57, %c0_58] : memref<8x8x4xf32, #tpu.memory_space<vmem>>, vector<1x8x4xf32>
    %151 = vector.shape_cast %150 : vector<1x8x4xf32> to vector<8x4xf32>
    %c0_59 = arith.constant 0 : index
    %c0_60 = arith.constant 0 : index
    %152 = vector.load %arg2[%c0_59, %c0_60] : memref<4x384xf32, #tpu.memory_space<vmem>>, vector<4x384xf32>
    %cst_61 = arith.constant dense<0.000000e+00> : vector<8x384xf32>
    %153 = tpu.matmul %151, %152, %cst_61 {dimension_numbers = #tpu.dot_dimension_numbers<[1], [0], [0], [1], [0, 0, 1, 1], [], []>} : vector<8x4xf32>, vector<4x384xf32>, vector<8x384xf32> -> vector<8x384xf32>
    %c0_62 = arith.constant 0 : index
    %c0_63 = arith.constant 0 : index
    %154 = vector.load %arg4[%c0_62, %c0_63] : memref<1x384xf32, #tpu.memory_space<vmem>>, vector<1x384xf32>
    %155 = vector.broadcast %154 : vector<1x384xf32> to vector<8x384xf32>
    %156 = arith.addf %153, %155 : vector<8x384xf32>
    %c0_64 = arith.constant 0 : index
    %c0_65 = arith.constant 0 : index
    %157 = vector.load %arg3[%c0_64, %c0_65] : memref<128x384xf32, #tpu.memory_space<vmem>>, vector<128x384xf32>
    %cst_66 = arith.constant dense<0.000000e+00> : vector<8x384xf32>
    %158 = tpu.matmul %113, %157, %cst_66 {dimension_numbers = #tpu.dot_dimension_numbers<[1], [0], [0], [1], [0, 0, 1, 1], [], []>} : vector<8x128xf32>, vector<128x384xf32>, vector<8x384xf32> -> vector<8x384xf32>
    %c0_67 = arith.constant 0 : index
    %c0_68 = arith.constant 0 : index
    %159 = vector.load %arg5[%c0_67, %c0_68] : memref<1x384xf32, #tpu.memory_space<vmem>>, vector<1x384xf32>
    %160 = vector.broadcast %159 : vector<1x384xf32> to vector<8x384xf32>
    %161 = arith.addf %158, %160 : vector<8x384xf32>
    %162 = vector.extract_strided_slice %156 {offsets = [0, 0], sizes = [8, 128], strides = [1, 1]} : vector<8x384xf32> to vector<8x128xf32>
    %163 = vector.extract_strided_slice %161 {offsets = [0, 0], sizes = [8, 128], strides = [1, 1]} : vector<8x384xf32> to vector<8x128xf32>
    %164 = arith.addf %162, %163 : vector<8x128xf32>
    %165 = arith.negf %164 : vector<8x128xf32>
    %166 = math.exp %165 : vector<8x128xf32>
    %cst_69 = arith.constant 1.000000e+00 : f32
    %167 = vector.broadcast %cst_69 : f32 to vector<8x128xf32>
    %168 = arith.addf %167, %166 : vector<8x128xf32>
    %169 = arith.divf %167, %168 : vector<8x128xf32>
    %170 = vector.extract_strided_slice %156 {offsets = [0, 128], sizes = [8, 128], strides = [1, 1]} : vector<8x384xf32> to vector<8x128xf32>
    %171 = vector.extract_strided_slice %161 {offsets = [0, 128], sizes = [8, 128], strides = [1, 1]} : vector<8x384xf32> to vector<8x128xf32>
    %172 = arith.addf %170, %171 : vector<8x128xf32>
    %173 = arith.negf %172 : vector<8x128xf32>
    %174 = math.exp %173 : vector<8x128xf32>
    %cst_70 = arith.constant 1.000000e+00 : f32
    %175 = vector.broadcast %cst_70 : f32 to vector<8x128xf32>
    %176 = arith.addf %175, %174 : vector<8x128xf32>
    %177 = arith.divf %175, %176 : vector<8x128xf32>
    %178 = vector.extract_strided_slice %156 {offsets = [0, 256], sizes = [8, 128], strides = [1, 1]} : vector<8x384xf32> to vector<8x128xf32>
    %179 = vector.extract_strided_slice %161 {offsets = [0, 256], sizes = [8, 128], strides = [1, 1]} : vector<8x384xf32> to vector<8x128xf32>
    %180 = arith.mulf %169, %179 : vector<8x128xf32>
    %181 = arith.addf %178, %180 : vector<8x128xf32>
    %182 = math.tanh %181 : vector<8x128xf32>
    %cst_71 = arith.constant 1.000000e+00 : f32
    %183 = vector.broadcast %cst_71 : f32 to vector<8x128xf32>
    %184 = arith.subf %183, %177 : vector<8x128xf32>
    %185 = arith.mulf %184, %182 : vector<8x128xf32>
    %186 = arith.mulf %177, %113 : vector<8x128xf32>
    %187 = arith.addf %185, %186 : vector<8x128xf32>
    %c0_72 = arith.constant 0 : index
    %c0_73 = arith.constant 0 : index
    %188 = vector.load %arg6[%c0_72, %c0_73] : memref<128x384xf32, #tpu.memory_space<vmem>>, vector<128x384xf32>
    %cst_74 = arith.constant dense<0.000000e+00> : vector<8x384xf32>
    %189 = tpu.matmul %187, %188, %cst_74 {dimension_numbers = #tpu.dot_dimension_numbers<[1], [0], [0], [1], [0, 0, 1, 1], [], []>} : vector<8x128xf32>, vector<128x384xf32>, vector<8x384xf32> -> vector<8x384xf32>
    %c0_75 = arith.constant 0 : index
    %c0_76 = arith.constant 0 : index
    %190 = vector.load %arg8[%c0_75, %c0_76] : memref<1x384xf32, #tpu.memory_space<vmem>>, vector<1x384xf32>
    %191 = vector.broadcast %190 : vector<1x384xf32> to vector<8x384xf32>
    %192 = arith.addf %189, %191 : vector<8x384xf32>
    %c0_77 = arith.constant 0 : index
    %c0_78 = arith.constant 0 : index
    %193 = vector.load %arg7[%c0_77, %c0_78] : memref<128x384xf32, #tpu.memory_space<vmem>>, vector<128x384xf32>
    %cst_79 = arith.constant dense<0.000000e+00> : vector<8x384xf32>
    %194 = tpu.matmul %149, %193, %cst_79 {dimension_numbers = #tpu.dot_dimension_numbers<[1], [0], [0], [1], [0, 0, 1, 1], [], []>} : vector<8x128xf32>, vector<128x384xf32>, vector<8x384xf32> -> vector<8x384xf32>
    %c0_80 = arith.constant 0 : index
    %c0_81 = arith.constant 0 : index
    %195 = vector.load %arg9[%c0_80, %c0_81] : memref<1x384xf32, #tpu.memory_space<vmem>>, vector<1x384xf32>
    %196 = vector.broadcast %195 : vector<1x384xf32> to vector<8x384xf32>
    %197 = arith.addf %194, %196 : vector<8x384xf32>
    %198 = vector.extract_strided_slice %192 {offsets = [0, 0], sizes = [8, 128], strides = [1, 1]} : vector<8x384xf32> to vector<8x128xf32>
    %199 = vector.extract_strided_slice %197 {offsets = [0, 0], sizes = [8, 128], strides = [1, 1]} : vector<8x384xf32> to vector<8x128xf32>
    %200 = arith.addf %198, %199 : vector<8x128xf32>
    %201 = arith.negf %200 : vector<8x128xf32>
    %202 = math.exp %201 : vector<8x128xf32>
    %cst_82 = arith.constant 1.000000e+00 : f32
    %203 = vector.broadcast %cst_82 : f32 to vector<8x128xf32>
    %204 = arith.addf %203, %202 : vector<8x128xf32>
    %205 = arith.divf %203, %204 : vector<8x128xf32>
    %206 = vector.extract_strided_slice %192 {offsets = [0, 128], sizes = [8, 128], strides = [1, 1]} : vector<8x384xf32> to vector<8x128xf32>
    %207 = vector.extract_strided_slice %197 {offsets = [0, 128], sizes = [8, 128], strides = [1, 1]} : vector<8x384xf32> to vector<8x128xf32>
    %208 = arith.addf %206, %207 : vector<8x128xf32>
    %209 = arith.negf %208 : vector<8x128xf32>
    %210 = math.exp %209 : vector<8x128xf32>
    %cst_83 = arith.constant 1.000000e+00 : f32
    %211 = vector.broadcast %cst_83 : f32 to vector<8x128xf32>
    %212 = arith.addf %211, %210 : vector<8x128xf32>
    %213 = arith.divf %211, %212 : vector<8x128xf32>
    %214 = vector.extract_strided_slice %192 {offsets = [0, 256], sizes = [8, 128], strides = [1, 1]} : vector<8x384xf32> to vector<8x128xf32>
    %215 = vector.extract_strided_slice %197 {offsets = [0, 256], sizes = [8, 128], strides = [1, 1]} : vector<8x384xf32> to vector<8x128xf32>
    %216 = arith.mulf %205, %215 : vector<8x128xf32>
    %217 = arith.addf %214, %216 : vector<8x128xf32>
    %218 = math.tanh %217 : vector<8x128xf32>
    %cst_84 = arith.constant 1.000000e+00 : f32
    %219 = vector.broadcast %cst_84 : f32 to vector<8x128xf32>
    %220 = arith.subf %219, %213 : vector<8x128xf32>
    %221 = arith.mulf %220, %218 : vector<8x128xf32>
    %222 = arith.mulf %213, %149 : vector<8x128xf32>
    %223 = arith.addf %221, %222 : vector<8x128xf32>
    %c3 = arith.constant 3 : index
    %c0_85 = arith.constant 0 : index
    %c0_86 = arith.constant 0 : index
    %224 = vector.load %arg0[%c3, %c0_85, %c0_86] : memref<8x8x4xf32, #tpu.memory_space<vmem>>, vector<1x8x4xf32>
    %225 = vector.shape_cast %224 : vector<1x8x4xf32> to vector<8x4xf32>
    %c0_87 = arith.constant 0 : index
    %c0_88 = arith.constant 0 : index
    %226 = vector.load %arg2[%c0_87, %c0_88] : memref<4x384xf32, #tpu.memory_space<vmem>>, vector<4x384xf32>
    %cst_89 = arith.constant dense<0.000000e+00> : vector<8x384xf32>
    %227 = tpu.matmul %225, %226, %cst_89 {dimension_numbers = #tpu.dot_dimension_numbers<[1], [0], [0], [1], [0, 0, 1, 1], [], []>} : vector<8x4xf32>, vector<4x384xf32>, vector<8x384xf32> -> vector<8x384xf32>
    %c0_90 = arith.constant 0 : index
    %c0_91 = arith.constant 0 : index
    %228 = vector.load %arg4[%c0_90, %c0_91] : memref<1x384xf32, #tpu.memory_space<vmem>>, vector<1x384xf32>
    %229 = vector.broadcast %228 : vector<1x384xf32> to vector<8x384xf32>
    %230 = arith.addf %227, %229 : vector<8x384xf32>
    %c0_92 = arith.constant 0 : index
    %c0_93 = arith.constant 0 : index
    %231 = vector.load %arg3[%c0_92, %c0_93] : memref<128x384xf32, #tpu.memory_space<vmem>>, vector<128x384xf32>
    %cst_94 = arith.constant dense<0.000000e+00> : vector<8x384xf32>
    %232 = tpu.matmul %187, %231, %cst_94 {dimension_numbers = #tpu.dot_dimension_numbers<[1], [0], [0], [1], [0, 0, 1, 1], [], []>} : vector<8x128xf32>, vector<128x384xf32>, vector<8x384xf32> -> vector<8x384xf32>
    %c0_95 = arith.constant 0 : index
    %c0_96 = arith.constant 0 : index
    %233 = vector.load %arg5[%c0_95, %c0_96] : memref<1x384xf32, #tpu.memory_space<vmem>>, vector<1x384xf32>
    %234 = vector.broadcast %233 : vector<1x384xf32> to vector<8x384xf32>
    %235 = arith.addf %232, %234 : vector<8x384xf32>
    %236 = vector.extract_strided_slice %230 {offsets = [0, 0], sizes = [8, 128], strides = [1, 1]} : vector<8x384xf32> to vector<8x128xf32>
    %237 = vector.extract_strided_slice %235 {offsets = [0, 0], sizes = [8, 128], strides = [1, 1]} : vector<8x384xf32> to vector<8x128xf32>
    %238 = arith.addf %236, %237 : vector<8x128xf32>
    %239 = arith.negf %238 : vector<8x128xf32>
    %240 = math.exp %239 : vector<8x128xf32>
    %cst_97 = arith.constant 1.000000e+00 : f32
    %241 = vector.broadcast %cst_97 : f32 to vector<8x128xf32>
    %242 = arith.addf %241, %240 : vector<8x128xf32>
    %243 = arith.divf %241, %242 : vector<8x128xf32>
    %244 = vector.extract_strided_slice %230 {offsets = [0, 128], sizes = [8, 128], strides = [1, 1]} : vector<8x384xf32> to vector<8x128xf32>
    %245 = vector.extract_strided_slice %235 {offsets = [0, 128], sizes = [8, 128], strides = [1, 1]} : vector<8x384xf32> to vector<8x128xf32>
    %246 = arith.addf %244, %245 : vector<8x128xf32>
    %247 = arith.negf %246 : vector<8x128xf32>
    %248 = math.exp %247 : vector<8x128xf32>
    %cst_98 = arith.constant 1.000000e+00 : f32
    %249 = vector.broadcast %cst_98 : f32 to vector<8x128xf32>
    %250 = arith.addf %249, %248 : vector<8x128xf32>
    %251 = arith.divf %249, %250 : vector<8x128xf32>
    %252 = vector.extract_strided_slice %230 {offsets = [0, 256], sizes = [8, 128], strides = [1, 1]} : vector<8x384xf32> to vector<8x128xf32>
    %253 = vector.extract_strided_slice %235 {offsets = [0, 256], sizes = [8, 128], strides = [1, 1]} : vector<8x384xf32> to vector<8x128xf32>
    %254 = arith.mulf %243, %253 : vector<8x128xf32>
    %255 = arith.addf %252, %254 : vector<8x128xf32>
    %256 = math.tanh %255 : vector<8x128xf32>
    %cst_99 = arith.constant 1.000000e+00 : f32
    %257 = vector.broadcast %cst_99 : f32 to vector<8x128xf32>
    %258 = arith.subf %257, %251 : vector<8x128xf32>
    %259 = arith.mulf %258, %256 : vector<8x128xf32>
    %260 = arith.mulf %251, %187 : vector<8x128xf32>
    %261 = arith.addf %259, %260 : vector<8x128xf32>
    %c0_100 = arith.constant 0 : index
    %c0_101 = arith.constant 0 : index
    %262 = vector.load %arg6[%c0_100, %c0_101] : memref<128x384xf32, #tpu.memory_space<vmem>>, vector<128x384xf32>
    %cst_102 = arith.constant dense<0.000000e+00> : vector<8x384xf32>
    %263 = tpu.matmul %261, %262, %cst_102 {dimension_numbers = #tpu.dot_dimension_numbers<[1], [0], [0], [1], [0, 0, 1, 1], [], []>} : vector<8x128xf32>, vector<128x384xf32>, vector<8x384xf32> -> vector<8x384xf32>
    %c0_103 = arith.constant 0 : index
    %c0_104 = arith.constant 0 : index
    %264 = vector.load %arg8[%c0_103, %c0_104] : memref<1x384xf32, #tpu.memory_space<vmem>>, vector<1x384xf32>
    %265 = vector.broadcast %264 : vector<1x384xf32> to vector<8x384xf32>
    %266 = arith.addf %263, %265 : vector<8x384xf32>
    %c0_105 = arith.constant 0 : index
    %c0_106 = arith.constant 0 : index
    %267 = vector.load %arg7[%c0_105, %c0_106] : memref<128x384xf32, #tpu.memory_space<vmem>>, vector<128x384xf32>
    %cst_107 = arith.constant dense<0.000000e+00> : vector<8x384xf32>
    %268 = tpu.matmul %223, %267, %cst_107 {dimension_numbers = #tpu.dot_dimension_numbers<[1], [0], [0], [1], [0, 0, 1, 1], [], []>} : vector<8x128xf32>, vector<128x384xf32>, vector<8x384xf32> -> vector<8x384xf32>
    %c0_108 = arith.constant 0 : index
    %c0_109 = arith.constant 0 : index
    %269 = vector.load %arg9[%c0_108, %c0_109] : memref<1x384xf32, #tpu.memory_space<vmem>>, vector<1x384xf32>
    %270 = vector.broadcast %269 : vector<1x384xf32> to vector<8x384xf32>
    %271 = arith.addf %268, %270 : vector<8x384xf32>
    %272 = vector.extract_strided_slice %266 {offsets = [0, 0], sizes = [8, 128], strides = [1, 1]} : vector<8x384xf32> to vector<8x128xf32>
    %273 = vector.extract_strided_slice %271 {offsets = [0, 0], sizes = [8, 128], strides = [1, 1]} : vector<8x384xf32> to vector<8x128xf32>
    %274 = arith.addf %272, %273 : vector<8x128xf32>
    %275 = arith.negf %274 : vector<8x128xf32>
    %276 = math.exp %275 : vector<8x128xf32>
    %cst_110 = arith.constant 1.000000e+00 : f32
    %277 = vector.broadcast %cst_110 : f32 to vector<8x128xf32>
    %278 = arith.addf %277, %276 : vector<8x128xf32>
    %279 = arith.divf %277, %278 : vector<8x128xf32>
    %280 = vector.extract_strided_slice %266 {offsets = [0, 128], sizes = [8, 128], strides = [1, 1]} : vector<8x384xf32> to vector<8x128xf32>
    %281 = vector.extract_strided_slice %271 {offsets = [0, 128], sizes = [8, 128], strides = [1, 1]} : vector<8x384xf32> to vector<8x128xf32>
    %282 = arith.addf %280, %281 : vector<8x128xf32>
    %283 = arith.negf %282 : vector<8x128xf32>
    %284 = math.exp %283 : vector<8x128xf32>
    %cst_111 = arith.constant 1.000000e+00 : f32
    %285 = vector.broadcast %cst_111 : f32 to vector<8x128xf32>
    %286 = arith.addf %285, %284 : vector<8x128xf32>
    %287 = arith.divf %285, %286 : vector<8x128xf32>
    %288 = vector.extract_strided_slice %266 {offsets = [0, 256], sizes = [8, 128], strides = [1, 1]} : vector<8x384xf32> to vector<8x128xf32>
    %289 = vector.extract_strided_slice %271 {offsets = [0, 256], sizes = [8, 128], strides = [1, 1]} : vector<8x384xf32> to vector<8x128xf32>
    %290 = arith.mulf %279, %289 : vector<8x128xf32>
    %291 = arith.addf %288, %290 : vector<8x128xf32>
    %292 = math.tanh %291 : vector<8x128xf32>
    %cst_112 = arith.constant 1.000000e+00 : f32
    %293 = vector.broadcast %cst_112 : f32 to vector<8x128xf32>
    %294 = arith.subf %293, %287 : vector<8x128xf32>
    %295 = arith.mulf %294, %292 : vector<8x128xf32>
    %296 = arith.mulf %287, %223 : vector<8x128xf32>
    %297 = arith.addf %295, %296 : vector<8x128xf32>
    %c4 = arith.constant 4 : index
    %c0_113 = arith.constant 0 : index
    %c0_114 = arith.constant 0 : index
    %298 = vector.load %arg0[%c4, %c0_113, %c0_114] : memref<8x8x4xf32, #tpu.memory_space<vmem>>, vector<1x8x4xf32>
    %299 = vector.shape_cast %298 : vector<1x8x4xf32> to vector<8x4xf32>
    %c0_115 = arith.constant 0 : index
    %c0_116 = arith.constant 0 : index
    %300 = vector.load %arg2[%c0_115, %c0_116] : memref<4x384xf32, #tpu.memory_space<vmem>>, vector<4x384xf32>
    %cst_117 = arith.constant dense<0.000000e+00> : vector<8x384xf32>
    %301 = tpu.matmul %299, %300, %cst_117 {dimension_numbers = #tpu.dot_dimension_numbers<[1], [0], [0], [1], [0, 0, 1, 1], [], []>} : vector<8x4xf32>, vector<4x384xf32>, vector<8x384xf32> -> vector<8x384xf32>
    %c0_118 = arith.constant 0 : index
    %c0_119 = arith.constant 0 : index
    %302 = vector.load %arg4[%c0_118, %c0_119] : memref<1x384xf32, #tpu.memory_space<vmem>>, vector<1x384xf32>
    %303 = vector.broadcast %302 : vector<1x384xf32> to vector<8x384xf32>
    %304 = arith.addf %301, %303 : vector<8x384xf32>
    %c0_120 = arith.constant 0 : index
    %c0_121 = arith.constant 0 : index
    %305 = vector.load %arg3[%c0_120, %c0_121] : memref<128x384xf32, #tpu.memory_space<vmem>>, vector<128x384xf32>
    %cst_122 = arith.constant dense<0.000000e+00> : vector<8x384xf32>
    %306 = tpu.matmul %261, %305, %cst_122 {dimension_numbers = #tpu.dot_dimension_numbers<[1], [0], [0], [1], [0, 0, 1, 1], [], []>} : vector<8x128xf32>, vector<128x384xf32>, vector<8x384xf32> -> vector<8x384xf32>
    %c0_123 = arith.constant 0 : index
    %c0_124 = arith.constant 0 : index
    %307 = vector.load %arg5[%c0_123, %c0_124] : memref<1x384xf32, #tpu.memory_space<vmem>>, vector<1x384xf32>
    %308 = vector.broadcast %307 : vector<1x384xf32> to vector<8x384xf32>
    %309 = arith.addf %306, %308 : vector<8x384xf32>
    %310 = vector.extract_strided_slice %304 {offsets = [0, 0], sizes = [8, 128], strides = [1, 1]} : vector<8x384xf32> to vector<8x128xf32>
    %311 = vector.extract_strided_slice %309 {offsets = [0, 0], sizes = [8, 128], strides = [1, 1]} : vector<8x384xf32> to vector<8x128xf32>
    %312 = arith.addf %310, %311 : vector<8x128xf32>
    %313 = arith.negf %312 : vector<8x128xf32>
    %314 = math.exp %313 : vector<8x128xf32>
    %cst_125 = arith.constant 1.000000e+00 : f32
    %315 = vector.broadcast %cst_125 : f32 to vector<8x128xf32>
    %316 = arith.addf %315, %314 : vector<8x128xf32>
    %317 = arith.divf %315, %316 : vector<8x128xf32>
    %318 = vector.extract_strided_slice %304 {offsets = [0, 128], sizes = [8, 128], strides = [1, 1]} : vector<8x384xf32> to vector<8x128xf32>
    %319 = vector.extract_strided_slice %309 {offsets = [0, 128], sizes = [8, 128], strides = [1, 1]} : vector<8x384xf32> to vector<8x128xf32>
    %320 = arith.addf %318, %319 : vector<8x128xf32>
    %321 = arith.negf %320 : vector<8x128xf32>
    %322 = math.exp %321 : vector<8x128xf32>
    %cst_126 = arith.constant 1.000000e+00 : f32
    %323 = vector.broadcast %cst_126 : f32 to vector<8x128xf32>
    %324 = arith.addf %323, %322 : vector<8x128xf32>
    %325 = arith.divf %323, %324 : vector<8x128xf32>
    %326 = vector.extract_strided_slice %304 {offsets = [0, 256], sizes = [8, 128], strides = [1, 1]} : vector<8x384xf32> to vector<8x128xf32>
    %327 = vector.extract_strided_slice %309 {offsets = [0, 256], sizes = [8, 128], strides = [1, 1]} : vector<8x384xf32> to vector<8x128xf32>
    %328 = arith.mulf %317, %327 : vector<8x128xf32>
    %329 = arith.addf %326, %328 : vector<8x128xf32>
    %330 = math.tanh %329 : vector<8x128xf32>
    %cst_127 = arith.constant 1.000000e+00 : f32
    %331 = vector.broadcast %cst_127 : f32 to vector<8x128xf32>
    %332 = arith.subf %331, %325 : vector<8x128xf32>
    %333 = arith.mulf %332, %330 : vector<8x128xf32>
    %334 = arith.mulf %325, %261 : vector<8x128xf32>
    %335 = arith.addf %333, %334 : vector<8x128xf32>
    %c0_128 = arith.constant 0 : index
    %c0_129 = arith.constant 0 : index
    %336 = vector.load %arg6[%c0_128, %c0_129] : memref<128x384xf32, #tpu.memory_space<vmem>>, vector<128x384xf32>
    %cst_130 = arith.constant dense<0.000000e+00> : vector<8x384xf32>
    %337 = tpu.matmul %335, %336, %cst_130 {dimension_numbers = #tpu.dot_dimension_numbers<[1], [0], [0], [1], [0, 0, 1, 1], [], []>} : vector<8x128xf32>, vector<128x384xf32>, vector<8x384xf32> -> vector<8x384xf32>
    %c0_131 = arith.constant 0 : index
    %c0_132 = arith.constant 0 : index
    %338 = vector.load %arg8[%c0_131, %c0_132] : memref<1x384xf32, #tpu.memory_space<vmem>>, vector<1x384xf32>
    %339 = vector.broadcast %338 : vector<1x384xf32> to vector<8x384xf32>
    %340 = arith.addf %337, %339 : vector<8x384xf32>
    %c0_133 = arith.constant 0 : index
    %c0_134 = arith.constant 0 : index
    %341 = vector.load %arg7[%c0_133, %c0_134] : memref<128x384xf32, #tpu.memory_space<vmem>>, vector<128x384xf32>
    %cst_135 = arith.constant dense<0.000000e+00> : vector<8x384xf32>
    %342 = tpu.matmul %297, %341, %cst_135 {dimension_numbers = #tpu.dot_dimension_numbers<[1], [0], [0], [1], [0, 0, 1, 1], [], []>} : vector<8x128xf32>, vector<128x384xf32>, vector<8x384xf32> -> vector<8x384xf32>
    %c0_136 = arith.constant 0 : index
    %c0_137 = arith.constant 0 : index
    %343 = vector.load %arg9[%c0_136, %c0_137] : memref<1x384xf32, #tpu.memory_space<vmem>>, vector<1x384xf32>
    %344 = vector.broadcast %343 : vector<1x384xf32> to vector<8x384xf32>
    %345 = arith.addf %342, %344 : vector<8x384xf32>
    %346 = vector.extract_strided_slice %340 {offsets = [0, 0], sizes = [8, 128], strides = [1, 1]} : vector<8x384xf32> to vector<8x128xf32>
    %347 = vector.extract_strided_slice %345 {offsets = [0, 0], sizes = [8, 128], strides = [1, 1]} : vector<8x384xf32> to vector<8x128xf32>
    %348 = arith.addf %346, %347 : vector<8x128xf32>
    %349 = arith.negf %348 : vector<8x128xf32>
    %350 = math.exp %349 : vector<8x128xf32>
    %cst_138 = arith.constant 1.000000e+00 : f32
    %351 = vector.broadcast %cst_138 : f32 to vector<8x128xf32>
    %352 = arith.addf %351, %350 : vector<8x128xf32>
    %353 = arith.divf %351, %352 : vector<8x128xf32>
    %354 = vector.extract_strided_slice %340 {offsets = [0, 128], sizes = [8, 128], strides = [1, 1]} : vector<8x384xf32> to vector<8x128xf32>
    %355 = vector.extract_strided_slice %345 {offsets = [0, 128], sizes = [8, 128], strides = [1, 1]} : vector<8x384xf32> to vector<8x128xf32>
    %356 = arith.addf %354, %355 : vector<8x128xf32>
    %357 = arith.negf %356 : vector<8x128xf32>
    %358 = math.exp %357 : vector<8x128xf32>
    %cst_139 = arith.constant 1.000000e+00 : f32
    %359 = vector.broadcast %cst_139 : f32 to vector<8x128xf32>
    %360 = arith.addf %359, %358 : vector<8x128xf32>
    %361 = arith.divf %359, %360 : vector<8x128xf32>
    %362 = vector.extract_strided_slice %340 {offsets = [0, 256], sizes = [8, 128], strides = [1, 1]} : vector<8x384xf32> to vector<8x128xf32>
    %363 = vector.extract_strided_slice %345 {offsets = [0, 256], sizes = [8, 128], strides = [1, 1]} : vector<8x384xf32> to vector<8x128xf32>
    %364 = arith.mulf %353, %363 : vector<8x128xf32>
    %365 = arith.addf %362, %364 : vector<8x128xf32>
    %366 = math.tanh %365 : vector<8x128xf32>
    %cst_140 = arith.constant 1.000000e+00 : f32
    %367 = vector.broadcast %cst_140 : f32 to vector<8x128xf32>
    %368 = arith.subf %367, %361 : vector<8x128xf32>
    %369 = arith.mulf %368, %366 : vector<8x128xf32>
    %370 = arith.mulf %361, %297 : vector<8x128xf32>
    %371 = arith.addf %369, %370 : vector<8x128xf32>
    %c5 = arith.constant 5 : index
    %c0_141 = arith.constant 0 : index
    %c0_142 = arith.constant 0 : index
    %372 = vector.load %arg0[%c5, %c0_141, %c0_142] : memref<8x8x4xf32, #tpu.memory_space<vmem>>, vector<1x8x4xf32>
    %373 = vector.shape_cast %372 : vector<1x8x4xf32> to vector<8x4xf32>
    %c0_143 = arith.constant 0 : index
    %c0_144 = arith.constant 0 : index
    %374 = vector.load %arg2[%c0_143, %c0_144] : memref<4x384xf32, #tpu.memory_space<vmem>>, vector<4x384xf32>
    %cst_145 = arith.constant dense<0.000000e+00> : vector<8x384xf32>
    %375 = tpu.matmul %373, %374, %cst_145 {dimension_numbers = #tpu.dot_dimension_numbers<[1], [0], [0], [1], [0, 0, 1, 1], [], []>} : vector<8x4xf32>, vector<4x384xf32>, vector<8x384xf32> -> vector<8x384xf32>
    %c0_146 = arith.constant 0 : index
    %c0_147 = arith.constant 0 : index
    %376 = vector.load %arg4[%c0_146, %c0_147] : memref<1x384xf32, #tpu.memory_space<vmem>>, vector<1x384xf32>
    %377 = vector.broadcast %376 : vector<1x384xf32> to vector<8x384xf32>
    %378 = arith.addf %375, %377 : vector<8x384xf32>
    %c0_148 = arith.constant 0 : index
    %c0_149 = arith.constant 0 : index
    %379 = vector.load %arg3[%c0_148, %c0_149] : memref<128x384xf32, #tpu.memory_space<vmem>>, vector<128x384xf32>
    %cst_150 = arith.constant dense<0.000000e+00> : vector<8x384xf32>
    %380 = tpu.matmul %335, %379, %cst_150 {dimension_numbers = #tpu.dot_dimension_numbers<[1], [0], [0], [1], [0, 0, 1, 1], [], []>} : vector<8x128xf32>, vector<128x384xf32>, vector<8x384xf32> -> vector<8x384xf32>
    %c0_151 = arith.constant 0 : index
    %c0_152 = arith.constant 0 : index
    %381 = vector.load %arg5[%c0_151, %c0_152] : memref<1x384xf32, #tpu.memory_space<vmem>>, vector<1x384xf32>
    %382 = vector.broadcast %381 : vector<1x384xf32> to vector<8x384xf32>
    %383 = arith.addf %380, %382 : vector<8x384xf32>
    %384 = vector.extract_strided_slice %378 {offsets = [0, 0], sizes = [8, 128], strides = [1, 1]} : vector<8x384xf32> to vector<8x128xf32>
    %385 = vector.extract_strided_slice %383 {offsets = [0, 0], sizes = [8, 128], strides = [1, 1]} : vector<8x384xf32> to vector<8x128xf32>
    %386 = arith.addf %384, %385 : vector<8x128xf32>
    %387 = arith.negf %386 : vector<8x128xf32>
    %388 = math.exp %387 : vector<8x128xf32>
    %cst_153 = arith.constant 1.000000e+00 : f32
    %389 = vector.broadcast %cst_153 : f32 to vector<8x128xf32>
    %390 = arith.addf %389, %388 : vector<8x128xf32>
    %391 = arith.divf %389, %390 : vector<8x128xf32>
    %392 = vector.extract_strided_slice %378 {offsets = [0, 128], sizes = [8, 128], strides = [1, 1]} : vector<8x384xf32> to vector<8x128xf32>
    %393 = vector.extract_strided_slice %383 {offsets = [0, 128], sizes = [8, 128], strides = [1, 1]} : vector<8x384xf32> to vector<8x128xf32>
    %394 = arith.addf %392, %393 : vector<8x128xf32>
    %395 = arith.negf %394 : vector<8x128xf32>
    %396 = math.exp %395 : vector<8x128xf32>
    %cst_154 = arith.constant 1.000000e+00 : f32
    %397 = vector.broadcast %cst_154 : f32 to vector<8x128xf32>
    %398 = arith.addf %397, %396 : vector<8x128xf32>
    %399 = arith.divf %397, %398 : vector<8x128xf32>
    %400 = vector.extract_strided_slice %378 {offsets = [0, 256], sizes = [8, 128], strides = [1, 1]} : vector<8x384xf32> to vector<8x128xf32>
    %401 = vector.extract_strided_slice %383 {offsets = [0, 256], sizes = [8, 128], strides = [1, 1]} : vector<8x384xf32> to vector<8x128xf32>
    %402 = arith.mulf %391, %401 : vector<8x128xf32>
    %403 = arith.addf %400, %402 : vector<8x128xf32>
    %404 = math.tanh %403 : vector<8x128xf32>
    %cst_155 = arith.constant 1.000000e+00 : f32
    %405 = vector.broadcast %cst_155 : f32 to vector<8x128xf32>
    %406 = arith.subf %405, %399 : vector<8x128xf32>
    %407 = arith.mulf %406, %404 : vector<8x128xf32>
    %408 = arith.mulf %399, %335 : vector<8x128xf32>
    %409 = arith.addf %407, %408 : vector<8x128xf32>
    %c0_156 = arith.constant 0 : index
    %c0_157 = arith.constant 0 : index
    %410 = vector.load %arg6[%c0_156, %c0_157] : memref<128x384xf32, #tpu.memory_space<vmem>>, vector<128x384xf32>
    %cst_158 = arith.constant dense<0.000000e+00> : vector<8x384xf32>
    %411 = tpu.matmul %409, %410, %cst_158 {dimension_numbers = #tpu.dot_dimension_numbers<[1], [0], [0], [1], [0, 0, 1, 1], [], []>} : vector<8x128xf32>, vector<128x384xf32>, vector<8x384xf32> -> vector<8x384xf32>
    %c0_159 = arith.constant 0 : index
    %c0_160 = arith.constant 0 : index
    %412 = vector.load %arg8[%c0_159, %c0_160] : memref<1x384xf32, #tpu.memory_space<vmem>>, vector<1x384xf32>
    %413 = vector.broadcast %412 : vector<1x384xf32> to vector<8x384xf32>
    %414 = arith.addf %411, %413 : vector<8x384xf32>
    %c0_161 = arith.constant 0 : index
    %c0_162 = arith.constant 0 : index
    %415 = vector.load %arg7[%c0_161, %c0_162] : memref<128x384xf32, #tpu.memory_space<vmem>>, vector<128x384xf32>
    %cst_163 = arith.constant dense<0.000000e+00> : vector<8x384xf32>
    %416 = tpu.matmul %371, %415, %cst_163 {dimension_numbers = #tpu.dot_dimension_numbers<[1], [0], [0], [1], [0, 0, 1, 1], [], []>} : vector<8x128xf32>, vector<128x384xf32>, vector<8x384xf32> -> vector<8x384xf32>
    %c0_164 = arith.constant 0 : index
    %c0_165 = arith.constant 0 : index
    %417 = vector.load %arg9[%c0_164, %c0_165] : memref<1x384xf32, #tpu.memory_space<vmem>>, vector<1x384xf32>
    %418 = vector.broadcast %417 : vector<1x384xf32> to vector<8x384xf32>
    %419 = arith.addf %416, %418 : vector<8x384xf32>
    %420 = vector.extract_strided_slice %414 {offsets = [0, 0], sizes = [8, 128], strides = [1, 1]} : vector<8x384xf32> to vector<8x128xf32>
    %421 = vector.extract_strided_slice %419 {offsets = [0, 0], sizes = [8, 128], strides = [1, 1]} : vector<8x384xf32> to vector<8x128xf32>
    %422 = arith.addf %420, %421 : vector<8x128xf32>
    %423 = arith.negf %422 : vector<8x128xf32>
    %424 = math.exp %423 : vector<8x128xf32>
    %cst_166 = arith.constant 1.000000e+00 : f32
    %425 = vector.broadcast %cst_166 : f32 to vector<8x128xf32>
    %426 = arith.addf %425, %424 : vector<8x128xf32>
    %427 = arith.divf %425, %426 : vector<8x128xf32>
    %428 = vector.extract_strided_slice %414 {offsets = [0, 128], sizes = [8, 128], strides = [1, 1]} : vector<8x384xf32> to vector<8x128xf32>
    %429 = vector.extract_strided_slice %419 {offsets = [0, 128], sizes = [8, 128], strides = [1, 1]} : vector<8x384xf32> to vector<8x128xf32>
    %430 = arith.addf %428, %429 : vector<8x128xf32>
    %431 = arith.negf %430 : vector<8x128xf32>
    %432 = math.exp %431 : vector<8x128xf32>
    %cst_167 = arith.constant 1.000000e+00 : f32
    %433 = vector.broadcast %cst_167 : f32 to vector<8x128xf32>
    %434 = arith.addf %433, %432 : vector<8x128xf32>
    %435 = arith.divf %433, %434 : vector<8x128xf32>
    %436 = vector.extract_strided_slice %414 {offsets = [0, 256], sizes = [8, 128], strides = [1, 1]} : vector<8x384xf32> to vector<8x128xf32>
    %437 = vector.extract_strided_slice %419 {offsets = [0, 256], sizes = [8, 128], strides = [1, 1]} : vector<8x384xf32> to vector<8x128xf32>
    %438 = arith.mulf %427, %437 : vector<8x128xf32>
    %439 = arith.addf %436, %438 : vector<8x128xf32>
    %440 = math.tanh %439 : vector<8x128xf32>
    %cst_168 = arith.constant 1.000000e+00 : f32
    %441 = vector.broadcast %cst_168 : f32 to vector<8x128xf32>
    %442 = arith.subf %441, %435 : vector<8x128xf32>
    %443 = arith.mulf %442, %440 : vector<8x128xf32>
    %444 = arith.mulf %435, %371 : vector<8x128xf32>
    %445 = arith.addf %443, %444 : vector<8x128xf32>
    %c6 = arith.constant 6 : index
    %c0_169 = arith.constant 0 : index
    %c0_170 = arith.constant 0 : index
    %446 = vector.load %arg0[%c6, %c0_169, %c0_170] : memref<8x8x4xf32, #tpu.memory_space<vmem>>, vector<1x8x4xf32>
    %447 = vector.shape_cast %446 : vector<1x8x4xf32> to vector<8x4xf32>
    %c0_171 = arith.constant 0 : index
    %c0_172 = arith.constant 0 : index
    %448 = vector.load %arg2[%c0_171, %c0_172] : memref<4x384xf32, #tpu.memory_space<vmem>>, vector<4x384xf32>
    %cst_173 = arith.constant dense<0.000000e+00> : vector<8x384xf32>
    %449 = tpu.matmul %447, %448, %cst_173 {dimension_numbers = #tpu.dot_dimension_numbers<[1], [0], [0], [1], [0, 0, 1, 1], [], []>} : vector<8x4xf32>, vector<4x384xf32>, vector<8x384xf32> -> vector<8x384xf32>
    %c0_174 = arith.constant 0 : index
    %c0_175 = arith.constant 0 : index
    %450 = vector.load %arg4[%c0_174, %c0_175] : memref<1x384xf32, #tpu.memory_space<vmem>>, vector<1x384xf32>
    %451 = vector.broadcast %450 : vector<1x384xf32> to vector<8x384xf32>
    %452 = arith.addf %449, %451 : vector<8x384xf32>
    %c0_176 = arith.constant 0 : index
    %c0_177 = arith.constant 0 : index
    %453 = vector.load %arg3[%c0_176, %c0_177] : memref<128x384xf32, #tpu.memory_space<vmem>>, vector<128x384xf32>
    %cst_178 = arith.constant dense<0.000000e+00> : vector<8x384xf32>
    %454 = tpu.matmul %409, %453, %cst_178 {dimension_numbers = #tpu.dot_dimension_numbers<[1], [0], [0], [1], [0, 0, 1, 1], [], []>} : vector<8x128xf32>, vector<128x384xf32>, vector<8x384xf32> -> vector<8x384xf32>
    %c0_179 = arith.constant 0 : index
    %c0_180 = arith.constant 0 : index
    %455 = vector.load %arg5[%c0_179, %c0_180] : memref<1x384xf32, #tpu.memory_space<vmem>>, vector<1x384xf32>
    %456 = vector.broadcast %455 : vector<1x384xf32> to vector<8x384xf32>
    %457 = arith.addf %454, %456 : vector<8x384xf32>
    %458 = vector.extract_strided_slice %452 {offsets = [0, 0], sizes = [8, 128], strides = [1, 1]} : vector<8x384xf32> to vector<8x128xf32>
    %459 = vector.extract_strided_slice %457 {offsets = [0, 0], sizes = [8, 128], strides = [1, 1]} : vector<8x384xf32> to vector<8x128xf32>
    %460 = arith.addf %458, %459 : vector<8x128xf32>
    %461 = arith.negf %460 : vector<8x128xf32>
    %462 = math.exp %461 : vector<8x128xf32>
    %cst_181 = arith.constant 1.000000e+00 : f32
    %463 = vector.broadcast %cst_181 : f32 to vector<8x128xf32>
    %464 = arith.addf %463, %462 : vector<8x128xf32>
    %465 = arith.divf %463, %464 : vector<8x128xf32>
    %466 = vector.extract_strided_slice %452 {offsets = [0, 128], sizes = [8, 128], strides = [1, 1]} : vector<8x384xf32> to vector<8x128xf32>
    %467 = vector.extract_strided_slice %457 {offsets = [0, 128], sizes = [8, 128], strides = [1, 1]} : vector<8x384xf32> to vector<8x128xf32>
    %468 = arith.addf %466, %467 : vector<8x128xf32>
    %469 = arith.negf %468 : vector<8x128xf32>
    %470 = math.exp %469 : vector<8x128xf32>
    %cst_182 = arith.constant 1.000000e+00 : f32
    %471 = vector.broadcast %cst_182 : f32 to vector<8x128xf32>
    %472 = arith.addf %471, %470 : vector<8x128xf32>
    %473 = arith.divf %471, %472 : vector<8x128xf32>
    %474 = vector.extract_strided_slice %452 {offsets = [0, 256], sizes = [8, 128], strides = [1, 1]} : vector<8x384xf32> to vector<8x128xf32>
    %475 = vector.extract_strided_slice %457 {offsets = [0, 256], sizes = [8, 128], strides = [1, 1]} : vector<8x384xf32> to vector<8x128xf32>
    %476 = arith.mulf %465, %475 : vector<8x128xf32>
    %477 = arith.addf %474, %476 : vector<8x128xf32>
    %478 = math.tanh %477 : vector<8x128xf32>
    %cst_183 = arith.constant 1.000000e+00 : f32
    %479 = vector.broadcast %cst_183 : f32 to vector<8x128xf32>
    %480 = arith.subf %479, %473 : vector<8x128xf32>
    %481 = arith.mulf %480, %478 : vector<8x128xf32>
    %482 = arith.mulf %473, %409 : vector<8x128xf32>
    %483 = arith.addf %481, %482 : vector<8x128xf32>
    %c0_184 = arith.constant 0 : index
    %c0_185 = arith.constant 0 : index
    %484 = vector.load %arg6[%c0_184, %c0_185] : memref<128x384xf32, #tpu.memory_space<vmem>>, vector<128x384xf32>
    %cst_186 = arith.constant dense<0.000000e+00> : vector<8x384xf32>
    %485 = tpu.matmul %483, %484, %cst_186 {dimension_numbers = #tpu.dot_dimension_numbers<[1], [0], [0], [1], [0, 0, 1, 1], [], []>} : vector<8x128xf32>, vector<128x384xf32>, vector<8x384xf32> -> vector<8x384xf32>
    %c0_187 = arith.constant 0 : index
    %c0_188 = arith.constant 0 : index
    %486 = vector.load %arg8[%c0_187, %c0_188] : memref<1x384xf32, #tpu.memory_space<vmem>>, vector<1x384xf32>
    %487 = vector.broadcast %486 : vector<1x384xf32> to vector<8x384xf32>
    %488 = arith.addf %485, %487 : vector<8x384xf32>
    %c0_189 = arith.constant 0 : index
    %c0_190 = arith.constant 0 : index
    %489 = vector.load %arg7[%c0_189, %c0_190] : memref<128x384xf32, #tpu.memory_space<vmem>>, vector<128x384xf32>
    %cst_191 = arith.constant dense<0.000000e+00> : vector<8x384xf32>
    %490 = tpu.matmul %445, %489, %cst_191 {dimension_numbers = #tpu.dot_dimension_numbers<[1], [0], [0], [1], [0, 0, 1, 1], [], []>} : vector<8x128xf32>, vector<128x384xf32>, vector<8x384xf32> -> vector<8x384xf32>
    %c0_192 = arith.constant 0 : index
    %c0_193 = arith.constant 0 : index
    %491 = vector.load %arg9[%c0_192, %c0_193] : memref<1x384xf32, #tpu.memory_space<vmem>>, vector<1x384xf32>
    %492 = vector.broadcast %491 : vector<1x384xf32> to vector<8x384xf32>
    %493 = arith.addf %490, %492 : vector<8x384xf32>
    %494 = vector.extract_strided_slice %488 {offsets = [0, 0], sizes = [8, 128], strides = [1, 1]} : vector<8x384xf32> to vector<8x128xf32>
    %495 = vector.extract_strided_slice %493 {offsets = [0, 0], sizes = [8, 128], strides = [1, 1]} : vector<8x384xf32> to vector<8x128xf32>
    %496 = arith.addf %494, %495 : vector<8x128xf32>
    %497 = arith.negf %496 : vector<8x128xf32>
    %498 = math.exp %497 : vector<8x128xf32>
    %cst_194 = arith.constant 1.000000e+00 : f32
    %499 = vector.broadcast %cst_194 : f32 to vector<8x128xf32>
    %500 = arith.addf %499, %498 : vector<8x128xf32>
    %501 = arith.divf %499, %500 : vector<8x128xf32>
    %502 = vector.extract_strided_slice %488 {offsets = [0, 128], sizes = [8, 128], strides = [1, 1]} : vector<8x384xf32> to vector<8x128xf32>
    %503 = vector.extract_strided_slice %493 {offsets = [0, 128], sizes = [8, 128], strides = [1, 1]} : vector<8x384xf32> to vector<8x128xf32>
    %504 = arith.addf %502, %503 : vector<8x128xf32>
    %505 = arith.negf %504 : vector<8x128xf32>
    %506 = math.exp %505 : vector<8x128xf32>
    %cst_195 = arith.constant 1.000000e+00 : f32
    %507 = vector.broadcast %cst_195 : f32 to vector<8x128xf32>
    %508 = arith.addf %507, %506 : vector<8x128xf32>
    %509 = arith.divf %507, %508 : vector<8x128xf32>
    %510 = vector.extract_strided_slice %488 {offsets = [0, 256], sizes = [8, 128], strides = [1, 1]} : vector<8x384xf32> to vector<8x128xf32>
    %511 = vector.extract_strided_slice %493 {offsets = [0, 256], sizes = [8, 128], strides = [1, 1]} : vector<8x384xf32> to vector<8x128xf32>
    %512 = arith.mulf %501, %511 : vector<8x128xf32>
    %513 = arith.addf %510, %512 : vector<8x128xf32>
    %514 = math.tanh %513 : vector<8x128xf32>
    %cst_196 = arith.constant 1.000000e+00 : f32
    %515 = vector.broadcast %cst_196 : f32 to vector<8x128xf32>
    %516 = arith.subf %515, %509 : vector<8x128xf32>
    %517 = arith.mulf %516, %514 : vector<8x128xf32>
    %518 = arith.mulf %509, %445 : vector<8x128xf32>
    %519 = arith.addf %517, %518 : vector<8x128xf32>
    %c7 = arith.constant 7 : index
    %c0_197 = arith.constant 0 : index
    %c0_198 = arith.constant 0 : index
    %520 = vector.load %arg0[%c7, %c0_197, %c0_198] : memref<8x8x4xf32, #tpu.memory_space<vmem>>, vector<1x8x4xf32>
    %521 = vector.shape_cast %520 : vector<1x8x4xf32> to vector<8x4xf32>
    %c0_199 = arith.constant 0 : index
    %c0_200 = arith.constant 0 : index
    %522 = vector.load %arg2[%c0_199, %c0_200] : memref<4x384xf32, #tpu.memory_space<vmem>>, vector<4x384xf32>
    %cst_201 = arith.constant dense<0.000000e+00> : vector<8x384xf32>
    %523 = tpu.matmul %521, %522, %cst_201 {dimension_numbers = #tpu.dot_dimension_numbers<[1], [0], [0], [1], [0, 0, 1, 1], [], []>} : vector<8x4xf32>, vector<4x384xf32>, vector<8x384xf32> -> vector<8x384xf32>
    %c0_202 = arith.constant 0 : index
    %c0_203 = arith.constant 0 : index
    %524 = vector.load %arg4[%c0_202, %c0_203] : memref<1x384xf32, #tpu.memory_space<vmem>>, vector<1x384xf32>
    %525 = vector.broadcast %524 : vector<1x384xf32> to vector<8x384xf32>
    %526 = arith.addf %523, %525 : vector<8x384xf32>
    %c0_204 = arith.constant 0 : index
    %c0_205 = arith.constant 0 : index
    %527 = vector.load %arg3[%c0_204, %c0_205] : memref<128x384xf32, #tpu.memory_space<vmem>>, vector<128x384xf32>
    %cst_206 = arith.constant dense<0.000000e+00> : vector<8x384xf32>
    %528 = tpu.matmul %483, %527, %cst_206 {dimension_numbers = #tpu.dot_dimension_numbers<[1], [0], [0], [1], [0, 0, 1, 1], [], []>} : vector<8x128xf32>, vector<128x384xf32>, vector<8x384xf32> -> vector<8x384xf32>
    %c0_207 = arith.constant 0 : index
    %c0_208 = arith.constant 0 : index
    %529 = vector.load %arg5[%c0_207, %c0_208] : memref<1x384xf32, #tpu.memory_space<vmem>>, vector<1x384xf32>
    %530 = vector.broadcast %529 : vector<1x384xf32> to vector<8x384xf32>
    %531 = arith.addf %528, %530 : vector<8x384xf32>
    %532 = vector.extract_strided_slice %526 {offsets = [0, 0], sizes = [8, 128], strides = [1, 1]} : vector<8x384xf32> to vector<8x128xf32>
    %533 = vector.extract_strided_slice %531 {offsets = [0, 0], sizes = [8, 128], strides = [1, 1]} : vector<8x384xf32> to vector<8x128xf32>
    %534 = arith.addf %532, %533 : vector<8x128xf32>
    %535 = arith.negf %534 : vector<8x128xf32>
    %536 = math.exp %535 : vector<8x128xf32>
    %cst_209 = arith.constant 1.000000e+00 : f32
    %537 = vector.broadcast %cst_209 : f32 to vector<8x128xf32>
    %538 = arith.addf %537, %536 : vector<8x128xf32>
    %539 = arith.divf %537, %538 : vector<8x128xf32>
    %540 = vector.extract_strided_slice %526 {offsets = [0, 128], sizes = [8, 128], strides = [1, 1]} : vector<8x384xf32> to vector<8x128xf32>
    %541 = vector.extract_strided_slice %531 {offsets = [0, 128], sizes = [8, 128], strides = [1, 1]} : vector<8x384xf32> to vector<8x128xf32>
    %542 = arith.addf %540, %541 : vector<8x128xf32>
    %543 = arith.negf %542 : vector<8x128xf32>
    %544 = math.exp %543 : vector<8x128xf32>
    %cst_210 = arith.constant 1.000000e+00 : f32
    %545 = vector.broadcast %cst_210 : f32 to vector<8x128xf32>
    %546 = arith.addf %545, %544 : vector<8x128xf32>
    %547 = arith.divf %545, %546 : vector<8x128xf32>
    %548 = vector.extract_strided_slice %526 {offsets = [0, 256], sizes = [8, 128], strides = [1, 1]} : vector<8x384xf32> to vector<8x128xf32>
    %549 = vector.extract_strided_slice %531 {offsets = [0, 256], sizes = [8, 128], strides = [1, 1]} : vector<8x384xf32> to vector<8x128xf32>
    %550 = arith.mulf %539, %549 : vector<8x128xf32>
    %551 = arith.addf %548, %550 : vector<8x128xf32>
    %552 = math.tanh %551 : vector<8x128xf32>
    %cst_211 = arith.constant 1.000000e+00 : f32
    %553 = vector.broadcast %cst_211 : f32 to vector<8x128xf32>
    %554 = arith.subf %553, %547 : vector<8x128xf32>
    %555 = arith.mulf %554, %552 : vector<8x128xf32>
    %556 = arith.mulf %547, %483 : vector<8x128xf32>
    %557 = arith.addf %555, %556 : vector<8x128xf32>
    %c0_212 = arith.constant 0 : index
    %c0_213 = arith.constant 0 : index
    %558 = vector.load %arg6[%c0_212, %c0_213] : memref<128x384xf32, #tpu.memory_space<vmem>>, vector<128x384xf32>
    %cst_214 = arith.constant dense<0.000000e+00> : vector<8x384xf32>
    %559 = tpu.matmul %557, %558, %cst_214 {dimension_numbers = #tpu.dot_dimension_numbers<[1], [0], [0], [1], [0, 0, 1, 1], [], []>} : vector<8x128xf32>, vector<128x384xf32>, vector<8x384xf32> -> vector<8x384xf32>
    %c0_215 = arith.constant 0 : index
    %c0_216 = arith.constant 0 : index
    %560 = vector.load %arg8[%c0_215, %c0_216] : memref<1x384xf32, #tpu.memory_space<vmem>>, vector<1x384xf32>
    %561 = vector.broadcast %560 : vector<1x384xf32> to vector<8x384xf32>
    %562 = arith.addf %559, %561 : vector<8x384xf32>
    %c0_217 = arith.constant 0 : index
    %c0_218 = arith.constant 0 : index
    %563 = vector.load %arg7[%c0_217, %c0_218] : memref<128x384xf32, #tpu.memory_space<vmem>>, vector<128x384xf32>
    %cst_219 = arith.constant dense<0.000000e+00> : vector<8x384xf32>
    %564 = tpu.matmul %519, %563, %cst_219 {dimension_numbers = #tpu.dot_dimension_numbers<[1], [0], [0], [1], [0, 0, 1, 1], [], []>} : vector<8x128xf32>, vector<128x384xf32>, vector<8x384xf32> -> vector<8x384xf32>
    %c0_220 = arith.constant 0 : index
    %c0_221 = arith.constant 0 : index
    %565 = vector.load %arg9[%c0_220, %c0_221] : memref<1x384xf32, #tpu.memory_space<vmem>>, vector<1x384xf32>
    %566 = vector.broadcast %565 : vector<1x384xf32> to vector<8x384xf32>
    %567 = arith.addf %564, %566 : vector<8x384xf32>
    %568 = vector.extract_strided_slice %562 {offsets = [0, 0], sizes = [8, 128], strides = [1, 1]} : vector<8x384xf32> to vector<8x128xf32>
    %569 = vector.extract_strided_slice %567 {offsets = [0, 0], sizes = [8, 128], strides = [1, 1]} : vector<8x384xf32> to vector<8x128xf32>
    %570 = arith.addf %568, %569 : vector<8x128xf32>
    %571 = arith.negf %570 : vector<8x128xf32>
    %572 = math.exp %571 : vector<8x128xf32>
    %cst_222 = arith.constant 1.000000e+00 : f32
    %573 = vector.broadcast %cst_222 : f32 to vector<8x128xf32>
    %574 = arith.addf %573, %572 : vector<8x128xf32>
    %575 = arith.divf %573, %574 : vector<8x128xf32>
    %576 = vector.extract_strided_slice %562 {offsets = [0, 128], sizes = [8, 128], strides = [1, 1]} : vector<8x384xf32> to vector<8x128xf32>
    %577 = vector.extract_strided_slice %567 {offsets = [0, 128], sizes = [8, 128], strides = [1, 1]} : vector<8x384xf32> to vector<8x128xf32>
    %578 = arith.addf %576, %577 : vector<8x128xf32>
    %579 = arith.negf %578 : vector<8x128xf32>
    %580 = math.exp %579 : vector<8x128xf32>
    %cst_223 = arith.constant 1.000000e+00 : f32
    %581 = vector.broadcast %cst_223 : f32 to vector<8x128xf32>
    %582 = arith.addf %581, %580 : vector<8x128xf32>
    %583 = arith.divf %581, %582 : vector<8x128xf32>
    %584 = vector.extract_strided_slice %562 {offsets = [0, 256], sizes = [8, 128], strides = [1, 1]} : vector<8x384xf32> to vector<8x128xf32>
    %585 = vector.extract_strided_slice %567 {offsets = [0, 256], sizes = [8, 128], strides = [1, 1]} : vector<8x384xf32> to vector<8x128xf32>
    %586 = arith.mulf %575, %585 : vector<8x128xf32>
    %587 = arith.addf %584, %586 : vector<8x128xf32>
    %588 = math.tanh %587 : vector<8x128xf32>
    %cst_224 = arith.constant 1.000000e+00 : f32
    %589 = vector.broadcast %cst_224 : f32 to vector<8x128xf32>
    %590 = arith.subf %589, %583 : vector<8x128xf32>
    %591 = arith.mulf %590, %588 : vector<8x128xf32>
    %592 = arith.mulf %583, %519 : vector<8x128xf32>
    %593 = arith.addf %591, %592 : vector<8x128xf32>
    %c0_225 = arith.constant 0 : index
    %c0_226 = arith.constant 0 : index
    %594 = vector.load %arg1[%c0_225, %c0_226] : memref<8x128xf32, #tpu.memory_space<vmem>>, vector<8x128xf32>
    %c0_227 = arith.constant 0 : index
    %c0_228 = arith.constant 0 : index
    %595 = vector.load %arg10[%c0_227, %c0_228] : memref<128x384xf32, #tpu.memory_space<vmem>>, vector<128x384xf32>
    %cst_229 = arith.constant dense<0.000000e+00> : vector<8x384xf32>
    %596 = tpu.matmul %594, %595, %cst_229 {dimension_numbers = #tpu.dot_dimension_numbers<[1], [0], [0], [1], [0, 0, 1, 1], [], []>} : vector<8x128xf32>, vector<128x384xf32>, vector<8x384xf32> -> vector<8x384xf32>
    %c0_230 = arith.constant 0 : index
    %c0_231 = arith.constant 0 : index
    %597 = vector.load %arg12[%c0_230, %c0_231] : memref<1x384xf32, #tpu.memory_space<vmem>>, vector<1x384xf32>
    %598 = vector.broadcast %597 : vector<1x384xf32> to vector<8x384xf32>
    %599 = arith.addf %596, %598 : vector<8x384xf32>
    %c0_232 = arith.constant 0 : index
    %c0_233 = arith.constant 0 : index
    %600 = vector.load %arg11[%c0_232, %c0_233] : memref<128x384xf32, #tpu.memory_space<vmem>>, vector<128x384xf32>
    %cst_234 = arith.constant dense<0.000000e+00> : vector<8x384xf32>
    %601 = tpu.matmul %557, %600, %cst_234 {dimension_numbers = #tpu.dot_dimension_numbers<[1], [0], [0], [1], [0, 0, 1, 1], [], []>} : vector<8x128xf32>, vector<128x384xf32>, vector<8x384xf32> -> vector<8x384xf32>
    %c0_235 = arith.constant 0 : index
    %c0_236 = arith.constant 0 : index
    %602 = vector.load %arg13[%c0_235, %c0_236] : memref<1x384xf32, #tpu.memory_space<vmem>>, vector<1x384xf32>
    %603 = vector.broadcast %602 : vector<1x384xf32> to vector<8x384xf32>
    %604 = arith.addf %601, %603 : vector<8x384xf32>
    %605 = vector.extract_strided_slice %599 {offsets = [0, 0], sizes = [8, 128], strides = [1, 1]} : vector<8x384xf32> to vector<8x128xf32>
    %606 = vector.extract_strided_slice %604 {offsets = [0, 0], sizes = [8, 128], strides = [1, 1]} : vector<8x384xf32> to vector<8x128xf32>
    %607 = arith.addf %605, %606 : vector<8x128xf32>
    %608 = arith.negf %607 : vector<8x128xf32>
    %609 = math.exp %608 : vector<8x128xf32>
    %cst_237 = arith.constant 1.000000e+00 : f32
    %610 = vector.broadcast %cst_237 : f32 to vector<8x128xf32>
    %611 = arith.addf %610, %609 : vector<8x128xf32>
    %612 = arith.divf %610, %611 : vector<8x128xf32>
    %613 = vector.extract_strided_slice %599 {offsets = [0, 128], sizes = [8, 128], strides = [1, 1]} : vector<8x384xf32> to vector<8x128xf32>
    %614 = vector.extract_strided_slice %604 {offsets = [0, 128], sizes = [8, 128], strides = [1, 1]} : vector<8x384xf32> to vector<8x128xf32>
    %615 = arith.addf %613, %614 : vector<8x128xf32>
    %616 = arith.negf %615 : vector<8x128xf32>
    %617 = math.exp %616 : vector<8x128xf32>
    %cst_238 = arith.constant 1.000000e+00 : f32
    %618 = vector.broadcast %cst_238 : f32 to vector<8x128xf32>
    %619 = arith.addf %618, %617 : vector<8x128xf32>
    %620 = arith.divf %618, %619 : vector<8x128xf32>
    %621 = vector.extract_strided_slice %599 {offsets = [0, 256], sizes = [8, 128], strides = [1, 1]} : vector<8x384xf32> to vector<8x128xf32>
    %622 = vector.extract_strided_slice %604 {offsets = [0, 256], sizes = [8, 128], strides = [1, 1]} : vector<8x384xf32> to vector<8x128xf32>
    %623 = arith.mulf %612, %622 : vector<8x128xf32>
    %624 = arith.addf %621, %623 : vector<8x128xf32>
    %625 = math.tanh %624 : vector<8x128xf32>
    %cst_239 = arith.constant 1.000000e+00 : f32
    %626 = vector.broadcast %cst_239 : f32 to vector<8x128xf32>
    %627 = arith.subf %626, %620 : vector<8x128xf32>
    %628 = arith.mulf %627, %625 : vector<8x128xf32>
    %629 = arith.mulf %620, %557 : vector<8x128xf32>
    %630 = arith.addf %628, %629 : vector<8x128xf32>
    %c0_240 = arith.constant 0 : index
    %c0_241 = arith.constant 0 : index
    %631 = vector.load %arg14[%c0_240, %c0_241] : memref<128x384xf32, #tpu.memory_space<vmem>>, vector<128x384xf32>
    %cst_242 = arith.constant dense<0.000000e+00> : vector<8x384xf32>
    %632 = tpu.matmul %630, %631, %cst_242 {dimension_numbers = #tpu.dot_dimension_numbers<[1], [0], [0], [1], [0, 0, 1, 1], [], []>} : vector<8x128xf32>, vector<128x384xf32>, vector<8x384xf32> -> vector<8x384xf32>
    %c0_243 = arith.constant 0 : index
    %c0_244 = arith.constant 0 : index
    %633 = vector.load %arg16[%c0_243, %c0_244] : memref<1x384xf32, #tpu.memory_space<vmem>>, vector<1x384xf32>
    %634 = vector.broadcast %633 : vector<1x384xf32> to vector<8x384xf32>
    %635 = arith.addf %632, %634 : vector<8x384xf32>
    %c0_245 = arith.constant 0 : index
    %c0_246 = arith.constant 0 : index
    %636 = vector.load %arg15[%c0_245, %c0_246] : memref<128x384xf32, #tpu.memory_space<vmem>>, vector<128x384xf32>
    %cst_247 = arith.constant dense<0.000000e+00> : vector<8x384xf32>
    %637 = tpu.matmul %593, %636, %cst_247 {dimension_numbers = #tpu.dot_dimension_numbers<[1], [0], [0], [1], [0, 0, 1, 1], [], []>} : vector<8x128xf32>, vector<128x384xf32>, vector<8x384xf32> -> vector<8x384xf32>
    %c0_248 = arith.constant 0 : index
    %c0_249 = arith.constant 0 : index
    %638 = vector.load %arg17[%c0_248, %c0_249] : memref<1x384xf32, #tpu.memory_space<vmem>>, vector<1x384xf32>
    %639 = vector.broadcast %638 : vector<1x384xf32> to vector<8x384xf32>
    %640 = arith.addf %637, %639 : vector<8x384xf32>
    %641 = vector.extract_strided_slice %635 {offsets = [0, 0], sizes = [8, 128], strides = [1, 1]} : vector<8x384xf32> to vector<8x128xf32>
    %642 = vector.extract_strided_slice %640 {offsets = [0, 0], sizes = [8, 128], strides = [1, 1]} : vector<8x384xf32> to vector<8x128xf32>
    %643 = arith.addf %641, %642 : vector<8x128xf32>
    %644 = arith.negf %643 : vector<8x128xf32>
    %645 = math.exp %644 : vector<8x128xf32>
    %cst_250 = arith.constant 1.000000e+00 : f32
    %646 = vector.broadcast %cst_250 : f32 to vector<8x128xf32>
    %647 = arith.addf %646, %645 : vector<8x128xf32>
    %648 = arith.divf %646, %647 : vector<8x128xf32>
    %649 = vector.extract_strided_slice %635 {offsets = [0, 128], sizes = [8, 128], strides = [1, 1]} : vector<8x384xf32> to vector<8x128xf32>
    %650 = vector.extract_strided_slice %640 {offsets = [0, 128], sizes = [8, 128], strides = [1, 1]} : vector<8x384xf32> to vector<8x128xf32>
    %651 = arith.addf %649, %650 : vector<8x128xf32>
    %652 = arith.negf %651 : vector<8x128xf32>
    %653 = math.exp %652 : vector<8x128xf32>
    %cst_251 = arith.constant 1.000000e+00 : f32
    %654 = vector.broadcast %cst_251 : f32 to vector<8x128xf32>
    %655 = arith.addf %654, %653 : vector<8x128xf32>
    %656 = arith.divf %654, %655 : vector<8x128xf32>
    %657 = vector.extract_strided_slice %635 {offsets = [0, 256], sizes = [8, 128], strides = [1, 1]} : vector<8x384xf32> to vector<8x128xf32>
    %658 = vector.extract_strided_slice %640 {offsets = [0, 256], sizes = [8, 128], strides = [1, 1]} : vector<8x384xf32> to vector<8x128xf32>
    %659 = arith.mulf %648, %658 : vector<8x128xf32>
    %660 = arith.addf %657, %659 : vector<8x128xf32>
    %661 = math.tanh %660 : vector<8x128xf32>
    %cst_252 = arith.constant 1.000000e+00 : f32
    %662 = vector.broadcast %cst_252 : f32 to vector<8x128xf32>
    %663 = arith.subf %662, %656 : vector<8x128xf32>
    %664 = arith.mulf %663, %661 : vector<8x128xf32>
    %665 = arith.mulf %656, %593 : vector<8x128xf32>
    %666 = arith.addf %664, %665 : vector<8x128xf32>
    %c0_253 = arith.constant 0 : index
    %c0_254 = arith.constant 0 : index
    %667 = vector.load %arg18[%c0_253, %c0_254] : memref<128x128xf32, #tpu.memory_space<vmem>>, vector<128x128xf32>
    %cst_255 = arith.constant dense<0.000000e+00> : vector<8x128xf32>
    %668 = tpu.matmul %666, %667, %cst_255 {dimension_numbers = #tpu.dot_dimension_numbers<[1], [0], [0], [1], [0, 0, 1, 1], [], []>} : vector<8x128xf32>, vector<128x128xf32>, vector<8x128xf32> -> vector<8x128xf32>
    %c0_256 = arith.constant 0 : index
    %c0_257 = arith.constant 0 : index
    %669 = vector.load %arg19[%c0_256, %c0_257] : memref<1x128xf32, #tpu.memory_space<vmem>>, vector<1x128xf32>
    %670 = vector.broadcast %669 : vector<1x128xf32> to vector<8x128xf32>
    %671 = arith.addf %668, %670 : vector<8x128xf32>
    %672 = arith.addf %671, %594 : vector<8x128xf32>
    %c0_258 = arith.constant 0 : index
    %c0_259 = arith.constant 0 : index
    %c0_260 = arith.constant 0 : index
    %673 = vector.load %arg20[%c0_258, %c0_259, %c0_260] : memref<5x8x128xf32, #tpu.memory_space<vmem>>, vector<1x8x128xf32>
    %674 = vector.shape_cast %673 : vector<1x8x128xf32> to vector<8x128xf32>
    %675 = vector.shape_cast %672 : vector<8x128xf32> to vector<1x8x128xf32>
    tpu.vector_store %arg20[%c0_258, %c0_259, %c0_260], %675 {strides = array<i32>} : memref<5x8x128xf32, #tpu.memory_space<vmem>>, vector<1x8x128xf32>,
    %c0_261 = arith.constant 0 : index
    %c0_262 = arith.constant 0 : index
    %676 = vector.load %arg10[%c0_261, %c0_262] : memref<128x384xf32, #tpu.memory_space<vmem>>, vector<128x384xf32>
    %cst_263 = arith.constant dense<0.000000e+00> : vector<8x384xf32>
    %677 = tpu.matmul %672, %676, %cst_263 {dimension_numbers = #tpu.dot_dimension_numbers<[1], [0], [0], [1], [0, 0, 1, 1], [], []>} : vector<8x128xf32>, vector<128x384xf32>, vector<8x384xf32> -> vector<8x384xf32>
    %c0_264 = arith.constant 0 : index
    %c0_265 = arith.constant 0 : index
    %678 = vector.load %arg12[%c0_264, %c0_265] : memref<1x384xf32, #tpu.memory_space<vmem>>, vector<1x384xf32>
    %679 = vector.broadcast %678 : vector<1x384xf32> to vector<8x384xf32>
    %680 = arith.addf %677, %679 : vector<8x384xf32>
    %c0_266 = arith.constant 0 : index
    %c0_267 = arith.constant 0 : index
    %681 = vector.load %arg11[%c0_266, %c0_267] : memref<128x384xf32, #tpu.memory_space<vmem>>, vector<128x384xf32>
    %cst_268 = arith.constant dense<0.000000e+00> : vector<8x384xf32>
    %682 = tpu.matmul %630, %681, %cst_268 {dimension_numbers = #tpu.dot_dimension_numbers<[1], [0], [0], [1], [0, 0, 1, 1], [], []>} : vector<8x128xf32>, vector<128x384xf32>, vector<8x384xf32> -> vector<8x384xf32>
    %c0_269 = arith.constant 0 : index
    %c0_270 = arith.constant 0 : index
    %683 = vector.load %arg13[%c0_269, %c0_270] : memref<1x384xf32, #tpu.memory_space<vmem>>, vector<1x384xf32>
    %684 = vector.broadcast %683 : vector<1x384xf32> to vector<8x384xf32>
    %685 = arith.addf %682, %684 : vector<8x384xf32>
    %686 = vector.extract_strided_slice %680 {offsets = [0, 0], sizes = [8, 128], strides = [1, 1]} : vector<8x384xf32> to vector<8x128xf32>
    %687 = vector.extract_strided_slice %685 {offsets = [0, 0], sizes = [8, 128], strides = [1, 1]} : vector<8x384xf32> to vector<8x128xf32>
    %688 = arith.addf %686, %687 : vector<8x128xf32>
    %689 = arith.negf %688 : vector<8x128xf32>
    %690 = math.exp %689 : vector<8x128xf32>
    %cst_271 = arith.constant 1.000000e+00 : f32
    %691 = vector.broadcast %cst_271 : f32 to vector<8x128xf32>
    %692 = arith.addf %691, %690 : vector<8x128xf32>
    %693 = arith.divf %691, %692 : vector<8x128xf32>
    %694 = vector.extract_strided_slice %680 {offsets = [0, 128], sizes = [8, 128], strides = [1, 1]} : vector<8x384xf32> to vector<8x128xf32>
    %695 = vector.extract_strided_slice %685 {offsets = [0, 128], sizes = [8, 128], strides = [1, 1]} : vector<8x384xf32> to vector<8x128xf32>
    %696 = arith.addf %694, %695 : vector<8x128xf32>
    %697 = arith.negf %696 : vector<8x128xf32>
    %698 = math.exp %697 : vector<8x128xf32>
    %cst_272 = arith.constant 1.000000e+00 : f32
    %699 = vector.broadcast %cst_272 : f32 to vector<8x128xf32>
    %700 = arith.addf %699, %698 : vector<8x128xf32>
    %701 = arith.divf %699, %700 : vector<8x128xf32>
    %702 = vector.extract_strided_slice %680 {offsets = [0, 256], sizes = [8, 128], strides = [1, 1]} : vector<8x384xf32> to vector<8x128xf32>
    %703 = vector.extract_strided_slice %685 {offsets = [0, 256], sizes = [8, 128], strides = [1, 1]} : vector<8x384xf32> to vector<8x128xf32>
    %704 = arith.mulf %693, %703 : vector<8x128xf32>
    %705 = arith.addf %702, %704 : vector<8x128xf32>
    %706 = math.tanh %705 : vector<8x128xf32>
    %cst_273 = arith.constant 1.000000e+00 : f32
    %707 = vector.broadcast %cst_273 : f32 to vector<8x128xf32>
    %708 = arith.subf %707, %701 : vector<8x128xf32>
    %709 = arith.mulf %708, %706 : vector<8x128xf32>
    %710 = arith.mulf %701, %630 : vector<8x128xf32>
    %711 = arith.addf %709, %710 : vector<8x128xf32>
    %c0_274 = arith.constant 0 : index
    %c0_275 = arith.constant 0 : index
    %712 = vector.load %arg14[%c0_274, %c0_275] : memref<128x384xf32, #tpu.memory_space<vmem>>, vector<128x384xf32>
    %cst_276 = arith.constant dense<0.000000e+00> : vector<8x384xf32>
    %713 = tpu.matmul %711, %712, %cst_276 {dimension_numbers = #tpu.dot_dimension_numbers<[1], [0], [0], [1], [0, 0, 1, 1], [], []>} : vector<8x128xf32>, vector<128x384xf32>, vector<8x384xf32> -> vector<8x384xf32>
    %c0_277 = arith.constant 0 : index
    %c0_278 = arith.constant 0 : index
    %714 = vector.load %arg16[%c0_277, %c0_278] : memref<1x384xf32, #tpu.memory_space<vmem>>, vector<1x384xf32>
    %715 = vector.broadcast %714 : vector<1x384xf32> to vector<8x384xf32>
    %716 = arith.addf %713, %715 : vector<8x384xf32>
    %c0_279 = arith.constant 0 : index
    %c0_280 = arith.constant 0 : index
    %717 = vector.load %arg15[%c0_279, %c0_280] : memref<128x384xf32, #tpu.memory_space<vmem>>, vector<128x384xf32>
    %cst_281 = arith.constant dense<0.000000e+00> : vector<8x384xf32>
    %718 = tpu.matmul %666, %717, %cst_281 {dimension_numbers = #tpu.dot_dimension_numbers<[1], [0], [0], [1], [0, 0, 1, 1], [], []>} : vector<8x128xf32>, vector<128x384xf32>, vector<8x384xf32> -> vector<8x384xf32>
    %c0_282 = arith.constant 0 : index
    %c0_283 = arith.constant 0 : index
    %719 = vector.load %arg17[%c0_282, %c0_283] : memref<1x384xf32, #tpu.memory_space<vmem>>, vector<1x384xf32>
    %720 = vector.broadcast %719 : vector<1x384xf32> to vector<8x384xf32>
    %721 = arith.addf %718, %720 : vector<8x384xf32>
    %722 = vector.extract_strided_slice %716 {offsets = [0, 0], sizes = [8, 128], strides = [1, 1]} : vector<8x384xf32> to vector<8x128xf32>
    %723 = vector.extract_strided_slice %721 {offsets = [0, 0], sizes = [8, 128], strides = [1, 1]} : vector<8x384xf32> to vector<8x128xf32>
    %724 = arith.addf %722, %723 : vector<8x128xf32>
    %725 = arith.negf %724 : vector<8x128xf32>
    %726 = math.exp %725 : vector<8x128xf32>
    %cst_284 = arith.constant 1.000000e+00 : f32
    %727 = vector.broadcast %cst_284 : f32 to vector<8x128xf32>
    %728 = arith.addf %727, %726 : vector<8x128xf32>
    %729 = arith.divf %727, %728 : vector<8x128xf32>
    %730 = vector.extract_strided_slice %716 {offsets = [0, 128], sizes = [8, 128], strides = [1, 1]} : vector<8x384xf32> to vector<8x128xf32>
    %731 = vector.extract_strided_slice %721 {offsets = [0, 128], sizes = [8, 128], strides = [1, 1]} : vector<8x384xf32> to vector<8x128xf32>
    %732 = arith.addf %730, %731 : vector<8x128xf32>
    %733 = arith.negf %732 : vector<8x128xf32>
    %734 = math.exp %733 : vector<8x128xf32>
    %cst_285 = arith.constant 1.000000e+00 : f32
    %735 = vector.broadcast %cst_285 : f32 to vector<8x128xf32>
    %736 = arith.addf %735, %734 : vector<8x128xf32>
    %737 = arith.divf %735, %736 : vector<8x128xf32>
    %738 = vector.extract_strided_slice %716 {offsets = [0, 256], sizes = [8, 128], strides = [1, 1]} : vector<8x384xf32> to vector<8x128xf32>
    %739 = vector.extract_strided_slice %721 {offsets = [0, 256], sizes = [8, 128], strides = [1, 1]} : vector<8x384xf32> to vector<8x128xf32>
    %740 = arith.mulf %729, %739 : vector<8x128xf32>
    %741 = arith.addf %738, %740 : vector<8x128xf32>
    %742 = math.tanh %741 : vector<8x128xf32>
    %cst_286 = arith.constant 1.000000e+00 : f32
    %743 = vector.broadcast %cst_286 : f32 to vector<8x128xf32>
    %744 = arith.subf %743, %737 : vector<8x128xf32>
    %745 = arith.mulf %744, %742 : vector<8x128xf32>
    %746 = arith.mulf %737, %666 : vector<8x128xf32>
    %747 = arith.addf %745, %746 : vector<8x128xf32>
    %c0_287 = arith.constant 0 : index
    %c0_288 = arith.constant 0 : index
    %748 = vector.load %arg18[%c0_287, %c0_288] : memref<128x128xf32, #tpu.memory_space<vmem>>, vector<128x128xf32>
    %cst_289 = arith.constant dense<0.000000e+00> : vector<8x128xf32>
    %749 = tpu.matmul %747, %748, %cst_289 {dimension_numbers = #tpu.dot_dimension_numbers<[1], [0], [0], [1], [0, 0, 1, 1], [], []>} : vector<8x128xf32>, vector<128x128xf32>, vector<8x128xf32> -> vector<8x128xf32>
    %c0_290 = arith.constant 0 : index
    %c0_291 = arith.constant 0 : index
    %750 = vector.load %arg19[%c0_290, %c0_291] : memref<1x128xf32, #tpu.memory_space<vmem>>, vector<1x128xf32>
    %751 = vector.broadcast %750 : vector<1x128xf32> to vector<8x128xf32>
    %752 = arith.addf %749, %751 : vector<8x128xf32>
    %753 = arith.addf %752, %672 : vector<8x128xf32>
    %c1_292 = arith.constant 1 : index
    %c0_293 = arith.constant 0 : index
    %c0_294 = arith.constant 0 : index
    %754 = vector.load %arg20[%c1_292, %c0_293, %c0_294] : memref<5x8x128xf32, #tpu.memory_space<vmem>>, vector<1x8x128xf32>
    %755 = vector.shape_cast %754 : vector<1x8x128xf32> to vector<8x128xf32>
    %756 = vector.shape_cast %753 : vector<8x128xf32> to vector<1x8x128xf32>
    tpu.vector_store %arg20[%c1_292, %c0_293, %c0_294], %756 {strides = array<i32>} : memref<5x8x128xf32, #tpu.memory_space<vmem>>, vector<1x8x128xf32>,
    %c0_295 = arith.constant 0 : index
    %c0_296 = arith.constant 0 : index
    %757 = vector.load %arg10[%c0_295, %c0_296] : memref<128x384xf32, #tpu.memory_space<vmem>>, vector<128x384xf32>
    %cst_297 = arith.constant dense<0.000000e+00> : vector<8x384xf32>
    %758 = tpu.matmul %753, %757, %cst_297 {dimension_numbers = #tpu.dot_dimension_numbers<[1], [0], [0], [1], [0, 0, 1, 1], [], []>} : vector<8x128xf32>, vector<128x384xf32>, vector<8x384xf32> -> vector<8x384xf32>
    %c0_298 = arith.constant 0 : index
    %c0_299 = arith.constant 0 : index
    %759 = vector.load %arg12[%c0_298, %c0_299] : memref<1x384xf32, #tpu.memory_space<vmem>>, vector<1x384xf32>
    %760 = vector.broadcast %759 : vector<1x384xf32> to vector<8x384xf32>
    %761 = arith.addf %758, %760 : vector<8x384xf32>
    %c0_300 = arith.constant 0 : index
    %c0_301 = arith.constant 0 : index
    %762 = vector.load %arg11[%c0_300, %c0_301] : memref<128x384xf32, #tpu.memory_space<vmem>>, vector<128x384xf32>
    %cst_302 = arith.constant dense<0.000000e+00> : vector<8x384xf32>
    %763 = tpu.matmul %711, %762, %cst_302 {dimension_numbers = #tpu.dot_dimension_numbers<[1], [0], [0], [1], [0, 0, 1, 1], [], []>} : vector<8x128xf32>, vector<128x384xf32>, vector<8x384xf32> -> vector<8x384xf32>
    %c0_303 = arith.constant 0 : index
    %c0_304 = arith.constant 0 : index
    %764 = vector.load %arg13[%c0_303, %c0_304] : memref<1x384xf32, #tpu.memory_space<vmem>>, vector<1x384xf32>
    %765 = vector.broadcast %764 : vector<1x384xf32> to vector<8x384xf32>
    %766 = arith.addf %763, %765 : vector<8x384xf32>
    %767 = vector.extract_strided_slice %761 {offsets = [0, 0], sizes = [8, 128], strides = [1, 1]} : vector<8x384xf32> to vector<8x128xf32>
    %768 = vector.extract_strided_slice %766 {offsets = [0, 0], sizes = [8, 128], strides = [1, 1]} : vector<8x384xf32> to vector<8x128xf32>
    %769 = arith.addf %767, %768 : vector<8x128xf32>
    %770 = arith.negf %769 : vector<8x128xf32>
    %771 = math.exp %770 : vector<8x128xf32>
    %cst_305 = arith.constant 1.000000e+00 : f32
    %772 = vector.broadcast %cst_305 : f32 to vector<8x128xf32>
    %773 = arith.addf %772, %771 : vector<8x128xf32>
    %774 = arith.divf %772, %773 : vector<8x128xf32>
    %775 = vector.extract_strided_slice %761 {offsets = [0, 128], sizes = [8, 128], strides = [1, 1]} : vector<8x384xf32> to vector<8x128xf32>
    %776 = vector.extract_strided_slice %766 {offsets = [0, 128], sizes = [8, 128], strides = [1, 1]} : vector<8x384xf32> to vector<8x128xf32>
    %777 = arith.addf %775, %776 : vector<8x128xf32>
    %778 = arith.negf %777 : vector<8x128xf32>
    %779 = math.exp %778 : vector<8x128xf32>
    %cst_306 = arith.constant 1.000000e+00 : f32
    %780 = vector.broadcast %cst_306 : f32 to vector<8x128xf32>
    %781 = arith.addf %780, %779 : vector<8x128xf32>
    %782 = arith.divf %780, %781 : vector<8x128xf32>
    %783 = vector.extract_strided_slice %761 {offsets = [0, 256], sizes = [8, 128], strides = [1, 1]} : vector<8x384xf32> to vector<8x128xf32>
    %784 = vector.extract_strided_slice %766 {offsets = [0, 256], sizes = [8, 128], strides = [1, 1]} : vector<8x384xf32> to vector<8x128xf32>
    %785 = arith.mulf %774, %784 : vector<8x128xf32>
    %786 = arith.addf %783, %785 : vector<8x128xf32>
    %787 = math.tanh %786 : vector<8x128xf32>
    %cst_307 = arith.constant 1.000000e+00 : f32
    %788 = vector.broadcast %cst_307 : f32 to vector<8x128xf32>
    %789 = arith.subf %788, %782 : vector<8x128xf32>
    %790 = arith.mulf %789, %787 : vector<8x128xf32>
    %791 = arith.mulf %782, %711 : vector<8x128xf32>
    %792 = arith.addf %790, %791 : vector<8x128xf32>
    %c0_308 = arith.constant 0 : index
    %c0_309 = arith.constant 0 : index
    %793 = vector.load %arg14[%c0_308, %c0_309] : memref<128x384xf32, #tpu.memory_space<vmem>>, vector<128x384xf32>
    %cst_310 = arith.constant dense<0.000000e+00> : vector<8x384xf32>
    %794 = tpu.matmul %792, %793, %cst_310 {dimension_numbers = #tpu.dot_dimension_numbers<[1], [0], [0], [1], [0, 0, 1, 1], [], []>} : vector<8x128xf32>, vector<128x384xf32>, vector<8x384xf32> -> vector<8x384xf32>
    %c0_311 = arith.constant 0 : index
    %c0_312 = arith.constant 0 : index
    %795 = vector.load %arg16[%c0_311, %c0_312] : memref<1x384xf32, #tpu.memory_space<vmem>>, vector<1x384xf32>
    %796 = vector.broadcast %795 : vector<1x384xf32> to vector<8x384xf32>
    %797 = arith.addf %794, %796 : vector<8x384xf32>
    %c0_313 = arith.constant 0 : index
    %c0_314 = arith.constant 0 : index
    %798 = vector.load %arg15[%c0_313, %c0_314] : memref<128x384xf32, #tpu.memory_space<vmem>>, vector<128x384xf32>
    %cst_315 = arith.constant dense<0.000000e+00> : vector<8x384xf32>
    %799 = tpu.matmul %747, %798, %cst_315 {dimension_numbers = #tpu.dot_dimension_numbers<[1], [0], [0], [1], [0, 0, 1, 1], [], []>} : vector<8x128xf32>, vector<128x384xf32>, vector<8x384xf32> -> vector<8x384xf32>
    %c0_316 = arith.constant 0 : index
    %c0_317 = arith.constant 0 : index
    %800 = vector.load %arg17[%c0_316, %c0_317] : memref<1x384xf32, #tpu.memory_space<vmem>>, vector<1x384xf32>
    %801 = vector.broadcast %800 : vector<1x384xf32> to vector<8x384xf32>
    %802 = arith.addf %799, %801 : vector<8x384xf32>
    %803 = vector.extract_strided_slice %797 {offsets = [0, 0], sizes = [8, 128], strides = [1, 1]} : vector<8x384xf32> to vector<8x128xf32>
    %804 = vector.extract_strided_slice %802 {offsets = [0, 0], sizes = [8, 128], strides = [1, 1]} : vector<8x384xf32> to vector<8x128xf32>
    %805 = arith.addf %803, %804 : vector<8x128xf32>
    %806 = arith.negf %805 : vector<8x128xf32>
    %807 = math.exp %806 : vector<8x128xf32>
    %cst_318 = arith.constant 1.000000e+00 : f32
    %808 = vector.broadcast %cst_318 : f32 to vector<8x128xf32>
    %809 = arith.addf %808, %807 : vector<8x128xf32>
    %810 = arith.divf %808, %809 : vector<8x128xf32>
    %811 = vector.extract_strided_slice %797 {offsets = [0, 128], sizes = [8, 128], strides = [1, 1]} : vector<8x384xf32> to vector<8x128xf32>
    %812 = vector.extract_strided_slice %802 {offsets = [0, 128], sizes = [8, 128], strides = [1, 1]} : vector<8x384xf32> to vector<8x128xf32>
    %813 = arith.addf %811, %812 : vector<8x128xf32>
    %814 = arith.negf %813 : vector<8x128xf32>
    %815 = math.exp %814 : vector<8x128xf32>
    %cst_319 = arith.constant 1.000000e+00 : f32
    %816 = vector.broadcast %cst_319 : f32 to vector<8x128xf32>
    %817 = arith.addf %816, %815 : vector<8x128xf32>
    %818 = arith.divf %816, %817 : vector<8x128xf32>
    %819 = vector.extract_strided_slice %797 {offsets = [0, 256], sizes = [8, 128], strides = [1, 1]} : vector<8x384xf32> to vector<8x128xf32>
    %820 = vector.extract_strided_slice %802 {offsets = [0, 256], sizes = [8, 128], strides = [1, 1]} : vector<8x384xf32> to vector<8x128xf32>
    %821 = arith.mulf %810, %820 : vector<8x128xf32>
    %822 = arith.addf %819, %821 : vector<8x128xf32>
    %823 = math.tanh %822 : vector<8x128xf32>
    %cst_320 = arith.constant 1.000000e+00 : f32
    %824 = vector.broadcast %cst_320 : f32 to vector<8x128xf32>
    %825 = arith.subf %824, %818 : vector<8x128xf32>
    %826 = arith.mulf %825, %823 : vector<8x128xf32>
    %827 = arith.mulf %818, %747 : vector<8x128xf32>
    %828 = arith.addf %826, %827 : vector<8x128xf32>
    %c0_321 = arith.constant 0 : index
    %c0_322 = arith.constant 0 : index
    %829 = vector.load %arg18[%c0_321, %c0_322] : memref<128x128xf32, #tpu.memory_space<vmem>>, vector<128x128xf32>
    %cst_323 = arith.constant dense<0.000000e+00> : vector<8x128xf32>
    %830 = tpu.matmul %828, %829, %cst_323 {dimension_numbers = #tpu.dot_dimension_numbers<[1], [0], [0], [1], [0, 0, 1, 1], [], []>} : vector<8x128xf32>, vector<128x128xf32>, vector<8x128xf32> -> vector<8x128xf32>
    %c0_324 = arith.constant 0 : index
    %c0_325 = arith.constant 0 : index
    %831 = vector.load %arg19[%c0_324, %c0_325] : memref<1x128xf32, #tpu.memory_space<vmem>>, vector<1x128xf32>
    %832 = vector.broadcast %831 : vector<1x128xf32> to vector<8x128xf32>
    %833 = arith.addf %830, %832 : vector<8x128xf32>
    %834 = arith.addf %833, %753 : vector<8x128xf32>
    %c2_326 = arith.constant 2 : index
    %c0_327 = arith.constant 0 : index
    %c0_328 = arith.constant 0 : index
    %835 = vector.load %arg20[%c2_326, %c0_327, %c0_328] : memref<5x8x128xf32, #tpu.memory_space<vmem>>, vector<1x8x128xf32>
    %836 = vector.shape_cast %835 : vector<1x8x128xf32> to vector<8x128xf32>
    %837 = vector.shape_cast %834 : vector<8x128xf32> to vector<1x8x128xf32>
    tpu.vector_store %arg20[%c2_326, %c0_327, %c0_328], %837 {strides = array<i32>} : memref<5x8x128xf32, #tpu.memory_space<vmem>>, vector<1x8x128xf32>,
    %c0_329 = arith.constant 0 : index
    %c0_330 = arith.constant 0 : index
    %838 = vector.load %arg10[%c0_329, %c0_330] : memref<128x384xf32, #tpu.memory_space<vmem>>, vector<128x384xf32>
    %cst_331 = arith.constant dense<0.000000e+00> : vector<8x384xf32>
    %839 = tpu.matmul %834, %838, %cst_331 {dimension_numbers = #tpu.dot_dimension_numbers<[1], [0], [0], [1], [0, 0, 1, 1], [], []>} : vector<8x128xf32>, vector<128x384xf32>, vector<8x384xf32> -> vector<8x384xf32>
    %c0_332 = arith.constant 0 : index
    %c0_333 = arith.constant 0 : index
    %840 = vector.load %arg12[%c0_332, %c0_333] : memref<1x384xf32, #tpu.memory_space<vmem>>, vector<1x384xf32>
    %841 = vector.broadcast %840 : vector<1x384xf32> to vector<8x384xf32>
    %842 = arith.addf %839, %841 : vector<8x384xf32>
    %c0_334 = arith.constant 0 : index
    %c0_335 = arith.constant 0 : index
    %843 = vector.load %arg11[%c0_334, %c0_335] : memref<128x384xf32, #tpu.memory_space<vmem>>, vector<128x384xf32>
    %cst_336 = arith.constant dense<0.000000e+00> : vector<8x384xf32>
    %844 = tpu.matmul %792, %843, %cst_336 {dimension_numbers = #tpu.dot_dimension_numbers<[1], [0], [0], [1], [0, 0, 1, 1], [], []>} : vector<8x128xf32>, vector<128x384xf32>, vector<8x384xf32> -> vector<8x384xf32>
    %c0_337 = arith.constant 0 : index
    %c0_338 = arith.constant 0 : index
    %845 = vector.load %arg13[%c0_337, %c0_338] : memref<1x384xf32, #tpu.memory_space<vmem>>, vector<1x384xf32>
    %846 = vector.broadcast %845 : vector<1x384xf32> to vector<8x384xf32>
    %847 = arith.addf %844, %846 : vector<8x384xf32>
    %848 = vector.extract_strided_slice %842 {offsets = [0, 0], sizes = [8, 128], strides = [1, 1]} : vector<8x384xf32> to vector<8x128xf32>
    %849 = vector.extract_strided_slice %847 {offsets = [0, 0], sizes = [8, 128], strides = [1, 1]} : vector<8x384xf32> to vector<8x128xf32>
    %850 = arith.addf %848, %849 : vector<8x128xf32>
    %851 = arith.negf %850 : vector<8x128xf32>
    %852 = math.exp %851 : vector<8x128xf32>
    %cst_339 = arith.constant 1.000000e+00 : f32
    %853 = vector.broadcast %cst_339 : f32 to vector<8x128xf32>
    %854 = arith.addf %853, %852 : vector<8x128xf32>
    %855 = arith.divf %853, %854 : vector<8x128xf32>
    %856 = vector.extract_strided_slice %842 {offsets = [0, 128], sizes = [8, 128], strides = [1, 1]} : vector<8x384xf32> to vector<8x128xf32>
    %857 = vector.extract_strided_slice %847 {offsets = [0, 128], sizes = [8, 128], strides = [1, 1]} : vector<8x384xf32> to vector<8x128xf32>
    %858 = arith.addf %856, %857 : vector<8x128xf32>
    %859 = arith.negf %858 : vector<8x128xf32>
    %860 = math.exp %859 : vector<8x128xf32>
    %cst_340 = arith.constant 1.000000e+00 : f32
    %861 = vector.broadcast %cst_340 : f32 to vector<8x128xf32>
    %862 = arith.addf %861, %860 : vector<8x128xf32>
    %863 = arith.divf %861, %862 : vector<8x128xf32>
    %864 = vector.extract_strided_slice %842 {offsets = [0, 256], sizes = [8, 128], strides = [1, 1]} : vector<8x384xf32> to vector<8x128xf32>
    %865 = vector.extract_strided_slice %847 {offsets = [0, 256], sizes = [8, 128], strides = [1, 1]} : vector<8x384xf32> to vector<8x128xf32>
    %866 = arith.mulf %855, %865 : vector<8x128xf32>
    %867 = arith.addf %864, %866 : vector<8x128xf32>
    %868 = math.tanh %867 : vector<8x128xf32>
    %cst_341 = arith.constant 1.000000e+00 : f32
    %869 = vector.broadcast %cst_341 : f32 to vector<8x128xf32>
    %870 = arith.subf %869, %863 : vector<8x128xf32>
    %871 = arith.mulf %870, %868 : vector<8x128xf32>
    %872 = arith.mulf %863, %792 : vector<8x128xf32>
    %873 = arith.addf %871, %872 : vector<8x128xf32>
    %c0_342 = arith.constant 0 : index
    %c0_343 = arith.constant 0 : index
    %874 = vector.load %arg14[%c0_342, %c0_343] : memref<128x384xf32, #tpu.memory_space<vmem>>, vector<128x384xf32>
    %cst_344 = arith.constant dense<0.000000e+00> : vector<8x384xf32>
    %875 = tpu.matmul %873, %874, %cst_344 {dimension_numbers = #tpu.dot_dimension_numbers<[1], [0], [0], [1], [0, 0, 1, 1], [], []>} : vector<8x128xf32>, vector<128x384xf32>, vector<8x384xf32> -> vector<8x384xf32>
    %c0_345 = arith.constant 0 : index
    %c0_346 = arith.constant 0 : index
    %876 = vector.load %arg16[%c0_345, %c0_346] : memref<1x384xf32, #tpu.memory_space<vmem>>, vector<1x384xf32>
    %877 = vector.broadcast %876 : vector<1x384xf32> to vector<8x384xf32>
    %878 = arith.addf %875, %877 : vector<8x384xf32>
    %c0_347 = arith.constant 0 : index
    %c0_348 = arith.constant 0 : index
    %879 = vector.load %arg15[%c0_347, %c0_348] : memref<128x384xf32, #tpu.memory_space<vmem>>, vector<128x384xf32>
    %cst_349 = arith.constant dense<0.000000e+00> : vector<8x384xf32>
    %880 = tpu.matmul %828, %879, %cst_349 {dimension_numbers = #tpu.dot_dimension_numbers<[1], [0], [0], [1], [0, 0, 1, 1], [], []>} : vector<8x128xf32>, vector<128x384xf32>, vector<8x384xf32> -> vector<8x384xf32>
    %c0_350 = arith.constant 0 : index
    %c0_351 = arith.constant 0 : index
    %881 = vector.load %arg17[%c0_350, %c0_351] : memref<1x384xf32, #tpu.memory_space<vmem>>, vector<1x384xf32>
    %882 = vector.broadcast %881 : vector<1x384xf32> to vector<8x384xf32>
    %883 = arith.addf %880, %882 : vector<8x384xf32>
    %884 = vector.extract_strided_slice %878 {offsets = [0, 0], sizes = [8, 128], strides = [1, 1]} : vector<8x384xf32> to vector<8x128xf32>
    %885 = vector.extract_strided_slice %883 {offsets = [0, 0], sizes = [8, 128], strides = [1, 1]} : vector<8x384xf32> to vector<8x128xf32>
    %886 = arith.addf %884, %885 : vector<8x128xf32>
    %887 = arith.negf %886 : vector<8x128xf32>
    %888 = math.exp %887 : vector<8x128xf32>
    %cst_352 = arith.constant 1.000000e+00 : f32
    %889 = vector.broadcast %cst_352 : f32 to vector<8x128xf32>
    %890 = arith.addf %889, %888 : vector<8x128xf32>
    %891 = arith.divf %889, %890 : vector<8x128xf32>
    %892 = vector.extract_strided_slice %878 {offsets = [0, 128], sizes = [8, 128], strides = [1, 1]} : vector<8x384xf32> to vector<8x128xf32>
    %893 = vector.extract_strided_slice %883 {offsets = [0, 128], sizes = [8, 128], strides = [1, 1]} : vector<8x384xf32> to vector<8x128xf32>
    %894 = arith.addf %892, %893 : vector<8x128xf32>
    %895 = arith.negf %894 : vector<8x128xf32>
    %896 = math.exp %895 : vector<8x128xf32>
    %cst_353 = arith.constant 1.000000e+00 : f32
    %897 = vector.broadcast %cst_353 : f32 to vector<8x128xf32>
    %898 = arith.addf %897, %896 : vector<8x128xf32>
    %899 = arith.divf %897, %898 : vector<8x128xf32>
    %900 = vector.extract_strided_slice %878 {offsets = [0, 256], sizes = [8, 128], strides = [1, 1]} : vector<8x384xf32> to vector<8x128xf32>
    %901 = vector.extract_strided_slice %883 {offsets = [0, 256], sizes = [8, 128], strides = [1, 1]} : vector<8x384xf32> to vector<8x128xf32>
    %902 = arith.mulf %891, %901 : vector<8x128xf32>
    %903 = arith.addf %900, %902 : vector<8x128xf32>
    %904 = math.tanh %903 : vector<8x128xf32>
    %cst_354 = arith.constant 1.000000e+00 : f32
    %905 = vector.broadcast %cst_354 : f32 to vector<8x128xf32>
    %906 = arith.subf %905, %899 : vector<8x128xf32>
    %907 = arith.mulf %906, %904 : vector<8x128xf32>
    %908 = arith.mulf %899, %828 : vector<8x128xf32>
    %909 = arith.addf %907, %908 : vector<8x128xf32>
    %c0_355 = arith.constant 0 : index
    %c0_356 = arith.constant 0 : index
    %910 = vector.load %arg18[%c0_355, %c0_356] : memref<128x128xf32, #tpu.memory_space<vmem>>, vector<128x128xf32>
    %cst_357 = arith.constant dense<0.000000e+00> : vector<8x128xf32>
    %911 = tpu.matmul %909, %910, %cst_357 {dimension_numbers = #tpu.dot_dimension_numbers<[1], [0], [0], [1], [0, 0, 1, 1], [], []>} : vector<8x128xf32>, vector<128x128xf32>, vector<8x128xf32> -> vector<8x128xf32>
    %c0_358 = arith.constant 0 : index
    %c0_359 = arith.constant 0 : index
    %912 = vector.load %arg19[%c0_358, %c0_359] : memref<1x128xf32, #tpu.memory_space<vmem>>, vector<1x128xf32>
    %913 = vector.broadcast %912 : vector<1x128xf32> to vector<8x128xf32>
    %914 = arith.addf %911, %913 : vector<8x128xf32>
    %915 = arith.addf %914, %834 : vector<8x128xf32>
    %c3_360 = arith.constant 3 : index
    %c0_361 = arith.constant 0 : index
    %c0_362 = arith.constant 0 : index
    %916 = vector.load %arg20[%c3_360, %c0_361, %c0_362] : memref<5x8x128xf32, #tpu.memory_space<vmem>>, vector<1x8x128xf32>
    %917 = vector.shape_cast %916 : vector<1x8x128xf32> to vector<8x128xf32>
    %918 = vector.shape_cast %915 : vector<8x128xf32> to vector<1x8x128xf32>
    tpu.vector_store %arg20[%c3_360, %c0_361, %c0_362], %918 {strides = array<i32>} : memref<5x8x128xf32, #tpu.memory_space<vmem>>, vector<1x8x128xf32>,
    %c0_363 = arith.constant 0 : index
    %c0_364 = arith.constant 0 : index
    %919 = vector.load %arg10[%c0_363, %c0_364] : memref<128x384xf32, #tpu.memory_space<vmem>>, vector<128x384xf32>
    %cst_365 = arith.constant dense<0.000000e+00> : vector<8x384xf32>
    %920 = tpu.matmul %915, %919, %cst_365 {dimension_numbers = #tpu.dot_dimension_numbers<[1], [0], [0], [1], [0, 0, 1, 1], [], []>} : vector<8x128xf32>, vector<128x384xf32>, vector<8x384xf32> -> vector<8x384xf32>
    %c0_366 = arith.constant 0 : index
    %c0_367 = arith.constant 0 : index
    %921 = vector.load %arg12[%c0_366, %c0_367] : memref<1x384xf32, #tpu.memory_space<vmem>>, vector<1x384xf32>
    %922 = vector.broadcast %921 : vector<1x384xf32> to vector<8x384xf32>
    %923 = arith.addf %920, %922 : vector<8x384xf32>
    %c0_368 = arith.constant 0 : index
    %c0_369 = arith.constant 0 : index
    %924 = vector.load %arg11[%c0_368, %c0_369] : memref<128x384xf32, #tpu.memory_space<vmem>>, vector<128x384xf32>
    %cst_370 = arith.constant dense<0.000000e+00> : vector<8x384xf32>
    %925 = tpu.matmul %873, %924, %cst_370 {dimension_numbers = #tpu.dot_dimension_numbers<[1], [0], [0], [1], [0, 0, 1, 1], [], []>} : vector<8x128xf32>, vector<128x384xf32>, vector<8x384xf32> -> vector<8x384xf32>
    %c0_371 = arith.constant 0 : index
    %c0_372 = arith.constant 0 : index
    %926 = vector.load %arg13[%c0_371, %c0_372] : memref<1x384xf32, #tpu.memory_space<vmem>>, vector<1x384xf32>
    %927 = vector.broadcast %926 : vector<1x384xf32> to vector<8x384xf32>
    %928 = arith.addf %925, %927 : vector<8x384xf32>
    %929 = vector.extract_strided_slice %923 {offsets = [0, 0], sizes = [8, 128], strides = [1, 1]} : vector<8x384xf32> to vector<8x128xf32>
    %930 = vector.extract_strided_slice %928 {offsets = [0, 0], sizes = [8, 128], strides = [1, 1]} : vector<8x384xf32> to vector<8x128xf32>
    %931 = arith.addf %929, %930 : vector<8x128xf32>
    %932 = arith.negf %931 : vector<8x128xf32>
    %933 = math.exp %932 : vector<8x128xf32>
    %cst_373 = arith.constant 1.000000e+00 : f32
    %934 = vector.broadcast %cst_373 : f32 to vector<8x128xf32>
    %935 = arith.addf %934, %933 : vector<8x128xf32>
    %936 = arith.divf %934, %935 : vector<8x128xf32>
    %937 = vector.extract_strided_slice %923 {offsets = [0, 128], sizes = [8, 128], strides = [1, 1]} : vector<8x384xf32> to vector<8x128xf32>
    %938 = vector.extract_strided_slice %928 {offsets = [0, 128], sizes = [8, 128], strides = [1, 1]} : vector<8x384xf32> to vector<8x128xf32>
    %939 = arith.addf %937, %938 : vector<8x128xf32>
    %940 = arith.negf %939 : vector<8x128xf32>
    %941 = math.exp %940 : vector<8x128xf32>
    %cst_374 = arith.constant 1.000000e+00 : f32
    %942 = vector.broadcast %cst_374 : f32 to vector<8x128xf32>
    %943 = arith.addf %942, %941 : vector<8x128xf32>
    %944 = arith.divf %942, %943 : vector<8x128xf32>
    %945 = vector.extract_strided_slice %923 {offsets = [0, 256], sizes = [8, 128], strides = [1, 1]} : vector<8x384xf32> to vector<8x128xf32>
    %946 = vector.extract_strided_slice %928 {offsets = [0, 256], sizes = [8, 128], strides = [1, 1]} : vector<8x384xf32> to vector<8x128xf32>
    %947 = arith.mulf %936, %946 : vector<8x128xf32>
    %948 = arith.addf %945, %947 : vector<8x128xf32>
    %949 = math.tanh %948 : vector<8x128xf32>
    %cst_375 = arith.constant 1.000000e+00 : f32
    %950 = vector.broadcast %cst_375 : f32 to vector<8x128xf32>
    %951 = arith.subf %950, %944 : vector<8x128xf32>
    %952 = arith.mulf %951, %949 : vector<8x128xf32>
    %953 = arith.mulf %944, %873 : vector<8x128xf32>
    %954 = arith.addf %952, %953 : vector<8x128xf32>
    %c0_376 = arith.constant 0 : index
    %c0_377 = arith.constant 0 : index
    %955 = vector.load %arg14[%c0_376, %c0_377] : memref<128x384xf32, #tpu.memory_space<vmem>>, vector<128x384xf32>
    %cst_378 = arith.constant dense<0.000000e+00> : vector<8x384xf32>
    %956 = tpu.matmul %954, %955, %cst_378 {dimension_numbers = #tpu.dot_dimension_numbers<[1], [0], [0], [1], [0, 0, 1, 1], [], []>} : vector<8x128xf32>, vector<128x384xf32>, vector<8x384xf32> -> vector<8x384xf32>
    %c0_379 = arith.constant 0 : index
    %c0_380 = arith.constant 0 : index
    %957 = vector.load %arg16[%c0_379, %c0_380] : memref<1x384xf32, #tpu.memory_space<vmem>>, vector<1x384xf32>
    %958 = vector.broadcast %957 : vector<1x384xf32> to vector<8x384xf32>
    %959 = arith.addf %956, %958 : vector<8x384xf32>
    %c0_381 = arith.constant 0 : index
    %c0_382 = arith.constant 0 : index
    %960 = vector.load %arg15[%c0_381, %c0_382] : memref<128x384xf32, #tpu.memory_space<vmem>>, vector<128x384xf32>
    %cst_383 = arith.constant dense<0.000000e+00> : vector<8x384xf32>
    %961 = tpu.matmul %909, %960, %cst_383 {dimension_numbers = #tpu.dot_dimension_numbers<[1], [0], [0], [1], [0, 0, 1, 1], [], []>} : vector<8x128xf32>, vector<128x384xf32>, vector<8x384xf32> -> vector<8x384xf32>
    %c0_384 = arith.constant 0 : index
    %c0_385 = arith.constant 0 : index
    %962 = vector.load %arg17[%c0_384, %c0_385] : memref<1x384xf32, #tpu.memory_space<vmem>>, vector<1x384xf32>
    %963 = vector.broadcast %962 : vector<1x384xf32> to vector<8x384xf32>
    %964 = arith.addf %961, %963 : vector<8x384xf32>
    %965 = vector.extract_strided_slice %959 {offsets = [0, 0], sizes = [8, 128], strides = [1, 1]} : vector<8x384xf32> to vector<8x128xf32>
    %966 = vector.extract_strided_slice %964 {offsets = [0, 0], sizes = [8, 128], strides = [1, 1]} : vector<8x384xf32> to vector<8x128xf32>
    %967 = arith.addf %965, %966 : vector<8x128xf32>
    %968 = arith.negf %967 : vector<8x128xf32>
    %969 = math.exp %968 : vector<8x128xf32>
    %cst_386 = arith.constant 1.000000e+00 : f32
    %970 = vector.broadcast %cst_386 : f32 to vector<8x128xf32>
    %971 = arith.addf %970, %969 : vector<8x128xf32>
    %972 = arith.divf %970, %971 : vector<8x128xf32>
    %973 = vector.extract_strided_slice %959 {offsets = [0, 128], sizes = [8, 128], strides = [1, 1]} : vector<8x384xf32> to vector<8x128xf32>
    %974 = vector.extract_strided_slice %964 {offsets = [0, 128], sizes = [8, 128], strides = [1, 1]} : vector<8x384xf32> to vector<8x128xf32>
    %975 = arith.addf %973, %974 : vector<8x128xf32>
    %976 = arith.negf %975 : vector<8x128xf32>
    %977 = math.exp %976 : vector<8x128xf32>
    %cst_387 = arith.constant 1.000000e+00 : f32
    %978 = vector.broadcast %cst_387 : f32 to vector<8x128xf32>
    %979 = arith.addf %978, %977 : vector<8x128xf32>
    %980 = arith.divf %978, %979 : vector<8x128xf32>
    %981 = vector.extract_strided_slice %959 {offsets = [0, 256], sizes = [8, 128], strides = [1, 1]} : vector<8x384xf32> to vector<8x128xf32>
    %982 = vector.extract_strided_slice %964 {offsets = [0, 256], sizes = [8, 128], strides = [1, 1]} : vector<8x384xf32> to vector<8x128xf32>
    %983 = arith.mulf %972, %982 : vector<8x128xf32>
    %984 = arith.addf %981, %983 : vector<8x128xf32>
    %985 = math.tanh %984 : vector<8x128xf32>
    %cst_388 = arith.constant 1.000000e+00 : f32
    %986 = vector.broadcast %cst_388 : f32 to vector<8x128xf32>
    %987 = arith.subf %986, %980 : vector<8x128xf32>
    %988 = arith.mulf %987, %985 : vector<8x128xf32>
    %989 = arith.mulf %980, %909 : vector<8x128xf32>
    %990 = arith.addf %988, %989 : vector<8x128xf32>
    %c0_389 = arith.constant 0 : index
    %c0_390 = arith.constant 0 : index
    %991 = vector.load %arg18[%c0_389, %c0_390] : memref<128x128xf32, #tpu.memory_space<vmem>>, vector<128x128xf32>
    %cst_391 = arith.constant dense<0.000000e+00> : vector<8x128xf32>
    %992 = tpu.matmul %990, %991, %cst_391 {dimension_numbers = #tpu.dot_dimension_numbers<[1], [0], [0], [1], [0, 0, 1, 1], [], []>} : vector<8x128xf32>, vector<128x128xf32>, vector<8x128xf32> -> vector<8x128xf32>
    %c0_392 = arith.constant 0 : index
    %c0_393 = arith.constant 0 : index
    %993 = vector.load %arg19[%c0_392, %c0_393] : memref<1x128xf32, #tpu.memory_space<vmem>>, vector<1x128xf32>
    %994 = vector.broadcast %993 : vector<1x128xf32> to vector<8x128xf32>
    %995 = arith.addf %992, %994 : vector<8x128xf32>
    %996 = arith.addf %995, %915 : vector<8x128xf32>
    %c4_394 = arith.constant 4 : index
    %c0_395 = arith.constant 0 : index
    %c0_396 = arith.constant 0 : index
    %997 = vector.load %arg20[%c4_394, %c0_395, %c0_396] : memref<5x8x128xf32, #tpu.memory_space<vmem>>, vector<1x8x128xf32>
    %998 = vector.shape_cast %997 : vector<1x8x128xf32> to vector<8x128xf32>
    %999 = vector.shape_cast %996 : vector<8x128xf32> to vector<1x8x128xf32>
    tpu.vector_store %arg20[%c4_394, %c0_395, %c0_396], %999 {strides = array<i32>} : memref<5x8x128xf32, #tpu.memory_space<vmem>>, vector<1x8x128xf32>,
    return
  }
}

</mosaic_0001>

<bundles_post_ra>
// kernel: seq2seq_forward.1
= control target key start
LH: loop header
LB: loop body
LE: loop exit
PB: predicated region body
PF: predicated region fallthrough
CT: control target
= control target key end

     0   :  { %s18313_s0 = inlined_call_operand.vmem [shape: f32[8,8,4], index: 0, kind: input, shape index: {}]   ;;  %s18314_s1 = inlined_call_operand.vmem [shape: f32[8,128], index: 1, kind: input, shape index: {}]   ;;  %s18315_s2 = inlined_call_operand.vmem [shape: f32[4,384], index: 2, kind: input, shape index: {}]   ;;  %s18316_s3 = inlined_call_operand.hbm [shape: f32[128,384], index: 3, kind: input, shape index: {}]   ;;  %s18317_s4 = inlined_call_operand.vmem [shape: f32[1,384], index: 4, kind: input, shape index: {}]   ;;  %s18318_s5 = inlined_call_operand.vmem [shape: f32[1,384], index: 5, kind: input, shape index: {}]   ;;  %s18319_s6 = inlined_call_operand.hbm [shape: f32[128,384], index: 6, kind: input, shape index: {}]   ;;  %s18320_s7 = inlined_call_operand.hbm [shape: f32[128,384], index: 7, kind: input, shape index: {}]   ;;  %s18321_s8 = inlined_call_operand.vmem [shape: f32[1,384], index: 8, kind: input, shape index: {}]   ;;  %s18322_s9 = inlined_call_operand.vmem [shape: f32[1,384], index: 9, kind: input, shape index: {}]   ;;  %s18323_s10 = inlined_call_operand.hbm [shape: f32[128,384], index: 10, kind: input, shape index: {}]   ;;  %s18324_s11 = inlined_call_operand.hbm [shape: f32[128,384], index: 11, kind: input, shape index: {}]   ;;  %s18325_s12 = inlined_call_operand.vmem [shape: f32[1,384], index: 12, kind: input, shape index: {}]   ;;  %s18326_s13 = inlined_call_operand.vmem [shape: f32[1,384], index: 13, kind: input, shape index: {}]   ;;  %s18327_s14 = inlined_call_operand.hbm [shape: f32[128,384], index: 14, kind: input, shape index: {}]   ;;  %s18328_s15 = inlined_call_operand.hbm [shape: f32[128,384], index: 15, kind: input, shape index: {}]   ;;  %s18329_s16 = inlined_call_operand.vmem [shape: f32[1,384], index: 16, kind: input, shape index: {}]   ;;  %s18330_s17 = inlined_call_operand.vmem [shape: f32[1,384], index: 17, kind: input, shape index: {}]   ;;  %s18331_s18 = inlined_call_operand.vmem [shape: f32[128,128], index: 18, kind: input, shape index: {}]   ;;  %s18332_s19 = inlined_call_operand.vmem [shape: f32[1,128], index: 19, kind: input, shape index: {}]   ;;  %s18333_s20 = inlined_call_operand.vmem [shape: f32[5,8,128], index: 20, kind: output, shape index: {}]  }
   0x1   :  { %18475 = sst [smem:[#allocation82_spill]] %s18313_s0 }
   0x2   :  { %18476 = sst [smem:[#allocation83_spill]] %s18314_s1 }
   0x3   :  { %18477 = sst [smem:[#allocation84_spill]] %s18315_s2 }
   0x4   :  { %18478 = sst [smem:[#allocation85_spill]] %s18316_s3 }
   0x5   :  { %18479 = sst [smem:[#allocation86_spill]] %s18317_s4 }
   0x6   :  { %25 = vsyncpa [#allocation3], 0 }
   0x7   :  { %26 = vsyncpa [#allocation5], 0 }
   0x8   :  { %27 = vsyncpa [#allocation8], 0 }
   0x9   :  { %28 = vsyncpa [#allocation11], 0  ;;  %s15985_s1 = smov [#allocation4]   ;;  %s15986_s23 = smov [#allocation7]  }
   0xa   :  { %s56_s22 = sshll.u32 %s15985_s1, 4  ;;  %s84_s24 = sshll.u32 %s15986_s23, 4  ;;  %s57_s22 = int_to_ptr.vmem [resolvable:$true] %s56_s22  ;;  %s16102_s24 = int_to_ptr.vmem [resolvable:$true] %s84_s24 }
   0xb   :  { %s15823_s3 = scalar_lea.hbm %s18319_s6, 6144 }
   0xc   :  { %p15824_p0 = scmp.ne.s32.totalorder %s18319_s6, %s15823_s3  ;;  %p15827_p1 = scmp.lt.u32.totalorder %s15823_s3, %s18319_s6 }
   0xe   :  { %p15829_p2 = pnand %p15827_p1, %p15824_p0 }
  0x10   :  { %15832 = shalt.err (!%p15829_p2)
}
  0x11   :  { %s15833_s29 = scalar_lea.vmem %s57_s22, 6144  ;;  %p15838_p4 = scmp.lt.s32.totalorder %s57_s22, %s57_s22 }
  0x12   :  { %p15834_p3 = scmp.ne.s32.totalorder %s57_s22, %s15833_s29  ;;  %p15839_p5 = scmp.lt.s32.totalorder %s15833_s29, %s15833_s29 }
  0x14   :  { %p15840_p6 = por %p15839_p5, %p15838_p4 }
  0x16   :  { %p15841_p7 = pnand %p15840_p6, %p15834_p3 }
  0x18   :  { %15844 = shalt.err (!%p15841_p7)
}
  0x19   :  { %s15987_s30 = smov 384   ;;  %s15988_s0 = smov 24  }
  0x1a   :  { %62 = dma.hbm_to_vmem [thread:$0]  %s18319_s6, 6144, %s57_s22, [#allocation5], %s15987_s30, %s15987_s30, %s15988_s0  }
  0x1b   :  { %s15845_s25 = scalar_lea.hbm %s18323_s10, 6144 }
  0x1c   :  { %p15846_p8 = scmp.ne.s32.totalorder %s18323_s10, %s15845_s25  ;;  %p15849_p9 = scmp.lt.u32.totalorder %s15845_s25, %s18323_s10 }
  0x1e   :  { %p15851_p10 = pnand %p15849_p9, %p15846_p8 }
  0x20   :  { %15854 = shalt.err (!%p15851_p10)
}
  0x21   :  { %s15855_s4 = scalar_lea.vmem %s16102_s24, 6144  ;;  %p15860_p12 = scmp.lt.s32.totalorder %s16102_s24, %s16102_s24 }
  0x22   :  { %p15856_p11 = scmp.ne.s32.totalorder %s16102_s24, %s15855_s4  ;;  %p15861_p13 = scmp.lt.s32.totalorder %s15855_s4, %s15855_s4 }
  0x24   :  { %p15862_p0 = por %p15861_p13, %p15860_p12 }
  0x26   :  { %p15863_p1 = pnand %p15862_p0, %p15856_p11 }
  0x28   :  { %15866 = shalt.err (!%p15863_p1)
}
  0x29   :  { %90 = dma.hbm_to_vmem [thread:$0]  %s18323_s10, 6144, %s16102_s24, [#allocation8], %s15987_s30, %s15987_s30, %s15988_s0  }
  0x2a   :  { %s15989_s29 = smov [#allocation10]   ;;  %s15990_s1 = smov [#allocation2]  }
  0x2b   :  { %s112_s21 = sshll.u32 %s15989_s29, 4  ;;  %s40_s23 = sshll.u32 %s15990_s1, 4  ;;  %s113_s21 = int_to_ptr.vmem [resolvable:$true] %s112_s21  ;;  %s16139_s23 = int_to_ptr.vmem [resolvable:$true] %s40_s23 }
  0x2c   :  { %s15867_s3 = scalar_lea.hbm %s18327_s14, 6144 }
  0x2d   :  { %p15868_p2 = scmp.ne.s32.totalorder %s18327_s14, %s15867_s3  ;;  %p15871_p3 = scmp.lt.u32.totalorder %s15867_s3, %s18327_s14 }
  0x2f   :  { %p15873_p4 = pnand %p15871_p3, %p15868_p2 }
  0x31   :  { %15876 = shalt.err (!%p15873_p4)
}
  0x32   :  { %s15877_s10 = scalar_lea.vmem %s113_s21, 6144  ;;  %p15882_p6 = scmp.lt.s32.totalorder %s113_s21, %s113_s21 }
  0x33   :  { %p15878_p5 = scmp.ne.s32.totalorder %s113_s21, %s15877_s10  ;;  %p15883_p7 = scmp.lt.s32.totalorder %s15877_s10, %s15877_s10 }
  0x35   :  { %p15884_p8 = por %p15883_p7, %p15882_p6 }
  0x37   :  { %p15885_p9 = pnand %p15884_p8, %p15878_p5 }
  0x39   :  { %15888 = shalt.err (!%p15885_p9)
}
  0x3a   :  { %118 = dma.hbm_to_vmem [thread:$0]  %s18327_s14, 6144, %s113_s21, [#allocation11], %s15987_s30, %s15987_s30, %s15988_s0  }
  0x3b   :  { %s18480_s1 = sld [smem:[#allocation85_spill]] }
  0x41   :  { %s15889_s2 = scalar_lea.hbm %s18480_s1, 6144 }
  0x42   :  { %p15890_p10 = scmp.ne.s32.totalorder %s18480_s1, %s15889_s2  ;;  %p15893_p11 = scmp.lt.u32.totalorder %s15889_s2, %s18480_s1 }
  0x44   :  { %p15895_p12 = pnand %p15893_p11, %p15890_p10 }
  0x46   :  { %15898 = shalt.err (!%p15895_p12)
}
  0x47   :  { %s15899_s28 = scalar_lea.vmem %s16139_s23, 6144  ;;  %p15904_p0 = scmp.lt.s32.totalorder %s16139_s23, %s16139_s23 }
  0x48   :  { %p15900_p13 = scmp.ne.s32.totalorder %s16139_s23, %s15899_s28  ;;  %p15905_p1 = scmp.lt.s32.totalorder %s15899_s28, %s15899_s28 }
  0x4a   :  { %p15906_p2 = por %p15905_p1, %p15904_p0 }
  0x4c   :  { %p15907_p3 = pnand %p15906_p2, %p15900_p13 }
  0x4e   :  { %15910 = shalt.err (!%p15907_p3)
}
  0x4f   :  { %46 = dma.hbm_to_vmem [thread:$0]  %s18480_s1, 6144, %s16139_s23, [#allocation3], %s15987_s30, %s15987_s30, %s15988_s0  }
  0x50   :  { %s15991_s4 = smov [#allocation6]   ;;  %s15992_s24 = smov [#allocation9]  }
  0x51   :  { %s68_s10 = sshll.u32 %s15991_s4, 4  ;;  %s96_s6 = sshll.u32 %s15992_s24, 4  ;;  %s69_s10 = int_to_ptr.vmem [resolvable:$true] %s68_s10  ;;  %s16176_s6 = int_to_ptr.vmem [resolvable:$true] %s96_s6 }
  0x52   :  { %s15911_s2 = scalar_lea.hbm %s18320_s7, 6144 }
  0x53   :  { %p15912_p4 = scmp.ne.s32.totalorder %s18320_s7, %s15911_s2  ;;  %p15915_p5 = scmp.lt.u32.totalorder %s15911_s2, %s18320_s7 }
  0x55   :  { %p15917_p6 = pnand %p15915_p5, %p15912_p4 }
  0x57   :  { %15920 = shalt.err (!%p15917_p6)
}
  0x58   :  { %s15921_s23 = scalar_lea.vmem %s69_s10, 6144  ;;  %p15926_p8 = scmp.lt.s32.totalorder %s69_s10, %s69_s10 }
  0x59   :  { %p15922_p7 = scmp.ne.s32.totalorder %s69_s10, %s15921_s23  ;;  %p15927_p9 = scmp.lt.s32.totalorder %s15921_s23, %s15921_s23 }
  0x5b   :  { %p15928_p10 = por %p15927_p9, %p15926_p8 }
  0x5d   :  { %p15929_p11 = pnand %p15928_p10, %p15922_p7 }
  0x5f   :  { %15932 = shalt.err (!%p15929_p11)
}
  0x60   :  { %74 = dma.hbm_to_vmem [thread:$0]  %s18320_s7, 6144, %s69_s10, [#allocation5], %s15987_s30, %s15987_s30, %s15988_s0  }
  0x61   :  { %s15933_s4 = scalar_lea.hbm %s18324_s11, 6144 }
  0x62   :  { %p15934_p12 = scmp.ne.s32.totalorder %s18324_s11, %s15933_s4  ;;  %p15937_p13 = scmp.lt.u32.totalorder %s15933_s4, %s18324_s11 }
  0x64   :  { %p15939_p0 = pnand %p15937_p13, %p15934_p12 }
  0x66   :  { %15942 = shalt.err (!%p15939_p0)
}
  0x67   :  { %s15943_s25 = scalar_lea.vmem %s16176_s6, 6144  ;;  %p15948_p2 = scmp.lt.s32.totalorder %s16176_s6, %s16176_s6 }
  0x68   :  { %p15944_p1 = scmp.ne.s32.totalorder %s16176_s6, %s15943_s25  ;;  %p15949_p3 = scmp.lt.s32.totalorder %s15943_s25, %s15943_s25 }
  0x6a   :  { %p15950_p4 = por %p15949_p3, %p15948_p2 }
  0x6c   :  { %p15951_p5 = pnand %p15950_p4, %p15944_p1 }
  0x6e   :  { %15954 = shalt.err (!%p15951_p5)
}
  0x6f   :  { %102 = dma.hbm_to_vmem [thread:$0]  %s18324_s11, 6144, %s16176_s6, [#allocation8], %s15987_s30, %s15987_s30, %s15988_s0  }
  0x70   :  { %s15993_s3 = smov [#allocation12]   ;;  %s15955_s1 = scalar_lea.hbm %s18328_s15, 6144 }
  0x71   :  { %s124_s26 = sshll.u32 %s15993_s3, 4  ;;  %p15956_p6 = scmp.ne.s32.totalorder %s18328_s15, %s15955_s1  ;;  %s125_s26 = int_to_ptr.vmem [resolvable:$true] %s124_s26 }
  0x72   :  { %p15959_p7 = scmp.lt.u32.totalorder %s15955_s1, %s18328_s15 }
  0x74   :  { %p15961_p8 = pnand %p15959_p7, %p15956_p6 }
  0x76   :  { %15964 = shalt.err (!%p15961_p8)
}
  0x77   :  { %s15965_s24 = scalar_lea.vmem %s125_s26, 6144  ;;  %p15970_p10 = scmp.lt.s32.totalorder %s125_s26, %s125_s26 }
  0x78   :  { %p15966_p9 = scmp.ne.s32.totalorder %s125_s26, %s15965_s24  ;;  %p15971_p11 = scmp.lt.s32.totalorder %s15965_s24, %s15965_s24 }
  0x7a   :  { %p15972_p12 = por %p15971_p11, %p15970_p10 }
  0x7c   :  { %p15973_p13 = pnand %p15972_p12, %p15966_p9 }
  0x7e   :  { %15976 = shalt.err (!%p15973_p13)
}
  0x7f   :  { %130 = dma.hbm_to_vmem [thread:$0]  %s18328_s15, 6144, %s125_s26, [#allocation11], %s15987_s30, %s15987_s30, %s15988_s0  }
  0x80   :  { %15977 = dma.done.wait [#allocation3], 6144  }
  0x81   :  { %15978 = vsyncadd [#allocation3], 4294961152 }
  0x82   :  { %15979 = dma.done.wait [#allocation5], 12288  }
  0x83   :  { %15980 = vsyncadd [#allocation5], 4294955008 }
  0x84   :  { %15981 = dma.done.wait [#allocation8], 12288  }
  0x85   :  { %15982 = vsyncadd [#allocation8], 4294955008 }
  0x86   :  { %15983 = dma.done.wait [#allocation11], 12288  }
  0x87   :  { %15984 = vsyncadd [#allocation11], 4294955008  ;;  %v18338_v0 = vmov 0.0   ;;  %vm15995_vm0 = vmmov 0   ;;  %s18481_s15 = sld [smem:[#allocation84_spill]]  ;;  %vm187_vm1 = vcmask 1043456  }
  0x88   :  { %258 = vmatprep.mubr.f32.mxu0 %v18338_v0  ;;  %11047 = vmatprep.subr.mxu1 %v18338_v0  ;;  %v336_v2 = vld [vmem:[#allocation2 + $0x8] sm:$0xff]  ;;  %v339_v3 = vld [vmem:[#allocation2 + $0x20] sm:$0xff]  ;;  %v338_v7 = vld [vmem:[#allocation2 + $0x18] sm:$0xff]  ;;  %s18482_s2 = sld [smem:[#allocation82_spill]]  ;;  %vm183_vm2 = vcmask 31744   ;;  %v18340_v25 = vmov 0.0|0.0  }
  0x89   :  { %11049 = vmatprep.mubr.msk.f32.mxu1 %vm15995_vm0, %v18338_v0  ;;  %v16241_v5 = vpack.c.bf16 %v339_v3, %v336_v2  ;;  %v335_v6 = vld [vmem:[#allocation2] sm:$0xff]  ;;  %v342_v10 = vld [vmem:[#allocation2 + $0x38] sm:$0xff]  ;;  %v345_v11 = vld [vmem:[#allocation2 + $0x50] sm:$0xff]  ;;  %s18526_s23 = sld [smem:[#allocation86_spill]]  ;;  %s18827_s21 = sld [smem:[#allocation83_spill]] }
  0x8a   :  { %v16246_v9 = vpack.c.bf16 %v338_v7, %v335_v6  ;;  %v16250_v12 = vpack.c.bf16 %v345_v11, %v342_v10  ;;  %v341_v13 = vld [vmem:[#allocation2 + $0x30] sm:$0xff]  ;;  %v344_v14 = vld [vmem:[#allocation2 + $0x48] sm:$0xff]  ;;  %v351_v16 = vld [vmem:[#allocation2 + $0x80] sm:$0xff] }
  0x8b   :  { %v348_v15 = vld [vmem:[#allocation2 + $0x68] sm:$0xff]  ;;  %v16257_v17 = vpack.c.bf16 %v344_v14, %v341_v13  ;;  %v347_v19 = vld [vmem:[#allocation2 + $0x60] sm:$0xff]  ;;  %v350_v20 = vld [vmem:[#allocation2 + $0x78] sm:$0xff] }
  0x8c   :  { %v16261_v18 = vpack.c.bf16 %v351_v16, %v348_v15  ;;  %v354_v21 = vld [vmem:[#allocation2 + $0x98] sm:$0xff]  ;;  %v357_v22 = vld [vmem:[#allocation2 + $0xb0] sm:$0xff]  ;;  %v16271_v24 = vpack.c.bf16 %v350_v20, %v347_v19  ;;  %v340_v27 = vld [vmem:[#allocation2 + $0x28] sm:$0xff] }
  0x8d   :  { %v16235_v1 = vld [vmem:[%s18481_s15] sm:$0xff]  ;;  %v16266_v23 = vld [vmem:[%s18481_s15 + $0x8] sm:$0xf]  ;;  %v337_v26 = vld [vmem:[#allocation2 + $0x10] sm:$0xff]  ;;  %v16275_v28 = vpack.c.bf16 %v357_v22, %v354_v21 }
  0x8e   :  { %v16239_v4 = vcombine.high %v16235_v1, %v16235_v1  ;;  %v160_v8 = vld [vmem:[%s18482_s2] sm:$0xff]  ;;  %11048 = vmatpush3.msk.msra.mxu1 %vm187_vm1, %v16266_v23  ;;  %v353_v29 = vld [vmem:[#allocation2 + $0x90] sm:$0xff]  ;;  %v356_v30 = vld [vmem:[#allocation2 + $0xa8] sm:$0xff]  ;;  %v16278_v32 = vpack.c.bf16 %v340_v27, %v337_v26 }
  0x8f   :  { %12834 = vmatprep.subr.bf16.mxu1 %v18340_v25  ;;  %18483 = vst [vmem:[#allocation17_spill] sm:$0xff] %v16275_v28  ;;  %v360_v31 = vld [vmem:[#allocation2 + $0xc8] sm:$0xff]  ;;  %11050 = vmatmul.mubr.msk.f32.vlgmr.msra.gmra.mrb[0].mxu1 %vm183_vm2, %v160_v8  ;;  %v363_v33 = vld [vmem:[#allocation2 + $0xe0] sm:$0xff]  ;;  %v346_v35 = vld [vmem:[#allocation2 + $0x58] sm:$0xff]  ;;  %v16286_v37 = vpack.c.bf16 %v356_v30, %v353_v29 }
  0x90   :  { %10090 = vmatprep.subr.msk.mxu0 %vm187_vm1, %v16239_v4  ;;  %v343_v34 = vld [vmem:[#allocation2 + $0x40] sm:$0xff]  ;;  %11084 = vmatprep.mubr.msk.f32.mxu1 %vm15995_vm0, %v18338_v0  ;;  %v349_v38 = vld [vmem:[#allocation2 + $0x70] sm:$0xff]  ;;  %v352_v39 = vld [vmem:[#allocation2 + $0x88] sm:$0xff]  ;;  %v16290_v40 = vpack.c.bf16 %v363_v33, %v360_v31 }
  0x91   :  { %10091 = vmatpush1.msk.msra.mxu0 %vm187_vm1, %v16235_v1  ;;  %12836 = vmatpush3.bf16.msra.mxu1 %v16278_v32  ;;  %v16283_v36 = vpack.c.bf16 %v346_v35, %v343_v34  ;;  %18485 = vst [vmem:[#allocation19_spill] sm:$0xff] %v16286_v37  ;;  %v359_v41 = vld [vmem:[#allocation2 + $0xc0] sm:$0xff]  ;;  %v362_v42 = vld [vmem:[#allocation2 + $0xd8] sm:$0xff]  ;;  %v369_v44 = vld [vmem:[#allocation2 + $0x110] sm:$0xff]  ;;  %v16293_v45 = vpack.c.bf16 %v352_v39, %v349_v38 }
  0x92   :  { %12803 = vmatprep.subr.bf16.mxu0 %v16241_v5  ;;  %10092 = vmatmul.mubr.msk.f32.vlgmr.msra.gmra.mrb[0].mxu0 %vm183_vm2, %v160_v8  ;;  %18486 = vst [vmem:[#allocation20_spill] sm:$0xff] %v16290_v40  ;;  %v366_v43 = vld [vmem:[#allocation2 + $0xf8] sm:$0xff]  ;;  %v16296_v46 = vpack.c.bf16 %v362_v42, %v359_v41  ;;  %v355_v47 = vld [vmem:[#allocation2 + $0xa0] sm:$0xff]  ;;  %v365_v50 = vld [vmem:[#allocation2 + $0xf0] sm:$0xff] }
  0x93   :  { %12805 = vmatpush1.bf16.msra.mxu0 %v16246_v9  ;;  %464 = vmatprep.mubr.f32.mxu0 %v18338_v0  ;;  %18484 = vst [vmem:[#allocation18_spill] sm:$0xff] %v16283_v36  ;;  %18487 = vst [vmem:[#allocation21_spill] sm:$0xff] %v16293_v45  ;;  %v358_v48 = vld [vmem:[#allocation2 + $0xb8] sm:$0xff]  ;;  %v16300_v49 = vpack.c.bf16 %v369_v44, %v366_v43  ;;  %v368_v51 = vld [vmem:[#allocation2 + $0x108] sm:$0xff] }
  0x94   :  { %12807 = vmatprep.subr.bf16.mxu0 %v16250_v12  ;;  %12837 = vmatprep.subr.bf16.mxu1 %v18340_v25  ;;  %18488 = vst [vmem:[#allocation22_spill] sm:$0xff] %v16296_v46  ;;  %v372_v52 = vld [vmem:[#allocation2 + $0x128] sm:$0xff]  ;;  %v375_v53 = vld [vmem:[#allocation2 + $0x140] sm:$0xff]  ;;  %v16303_v54 = vpack.c.bf16 %v358_v48, %v355_v47  ;;  %v16306_v55 = vpack.c.bf16 %v368_v51, %v365_v50  ;;  %v361_v56 = vld [vmem:[#allocation2 + $0xd0] sm:$0xff] }
  0x95   :  { %12839 = vmatpush3.bf16.msra.mxu1 %v16283_v36  ;;  %18489 = vst [vmem:[#allocation23_spill] sm:$0xff] %v16300_v49  ;;  %v364_v57 = vld [vmem:[#allocation2 + $0xe8] sm:$0xff]  ;;  %v16310_v58 = vpack.c.bf16 %v375_v53, %v372_v52  ;;  %v371_v59 = vld [vmem:[#allocation2 + $0x120] sm:$0xff]  ;;  %v374_v60 = vld [vmem:[#allocation2 + $0x138] sm:$0xff] }
  0x96   :  { %12840 = vmatprep.subr.bf16.mxu1 %v18340_v25  ;;  %18490 = vst [vmem:[#allocation24_spill] sm:$0xff] %v16303_v54  ;;  %18491 = vst [vmem:[#allocation25_spill] sm:$0xff] %v16306_v55  ;;  %v378_v61 = vld [vmem:[#allocation2 + $0x158] sm:$0xff]  ;;  %v381_v62 = vld [vmem:[#allocation2 + $0x170] sm:$0xff]  ;;  %v16313_v63 = vpack.c.bf16 %v364_v57, %v361_v56  ;;  %v16316_v2 = vpack.c.bf16 %v374_v60, %v371_v59 }
  0x97   :  { %12809 = vmatpush1.bf16.msra.mxu0 %v16257_v17  ;;  %18492 = vst [vmem:[#allocation26_spill] sm:$0xff] %v16310_v58  ;;  %v367_v3 = vld [vmem:[#allocation2 + $0x100] sm:$0xff]  ;;  %v370_v6 = vld [vmem:[#allocation2 + $0x118] sm:$0xff]  ;;  %v16320_v7 = vpack.c.bf16 %v381_v62, %v378_v61  ;;  %v377_v8 = vld [vmem:[#allocation2 + $0x150] sm:$0xff] }
  0x98   :  { %12811 = vmatprep.subr.bf16.mxu0 %v16261_v18  ;;  %18493 = vst [vmem:[#allocation27_spill] sm:$0xff] %v16313_v63  ;;  %18494 = vst [vmem:[#allocation28_spill] sm:$0xff] %v16316_v2  ;;  %v380_v10 = vld [vmem:[#allocation2 + $0x168] sm:$0xff]  ;;  %v16323_v11 = vpack.c.bf16 %v370_v6, %v367_v3  ;;  %v373_v14 = vld [vmem:[#allocation2 + $0x130] sm:$0xff] }
  0x99   :  { %12842 = vmatpush3.bf16.msra.mxu1 %v16293_v45  ;;  %18495 = vst [vmem:[#allocation29_spill] sm:$0xff] %v16320_v7  ;;  %v16326_v13 = vpack.c.bf16 %v380_v10, %v377_v8  ;;  %v376_v15 = vld [vmem:[#allocation2 + $0x148] sm:$0xff]  ;;  %v379_v19 = vld [vmem:[#allocation2 + $0x160] sm:$0xff]  ;;  %v382_v20 = vld [vmem:[#allocation2 + $0x178] sm:$0xff] }
  0x9a   :  { %12843 = vmatprep.subr.bf16.mxu1 %v18340_v25  ;;  %18496 = vst [vmem:[#allocation30_spill] sm:$0xff] %v16323_v11  ;;  %v16331_v16 = vpack.c.bf16 %v376_v15, %v373_v14  ;;  %v16337_v21 = vpack.c.bf16 %v382_v20, %v379_v19  ;;  %v563_v22 = vld [vmem:[#allocation4 + $0x8] sm:$0xff]  ;;  %v566_v26 = vld [vmem:[#allocation4 + $0x20] sm:$0xff]  ;;  %v565_v30 = vld [vmem:[#allocation4 + $0x18] sm:$0xff] }
  0x9b   :  { %12813 = vmatpush1.bf16.msra.mxu0 %v16271_v24  ;;  %18497 = vst [vmem:[#allocation31_spill] sm:$0xff] %v16326_v13  ;;  %v16346_v27 = vpack.c.bf16 %v566_v26, %v563_v22  ;;  %v562_v29 = vld [vmem:[#allocation4] sm:$0xff]  ;;  %v564_v31 = vld [vmem:[#allocation4 + $0x10] sm:$0xff]  ;;  %v567_v34 = vld [vmem:[#allocation4 + $0x28] sm:$0xff] }
  0x9c   :  { %12815 = vmatprep.subr.bf16.mxu0 %v16275_v28  ;;  %18498 = vst [vmem:[#allocation32_spill] sm:$0xff] %v16331_v16  ;;  %18499 = vst [vmem:[#allocation33_spill] sm:$0xff] %v16337_v21  ;;  %v16348_v33 = vpack.c.bf16 %v565_v30, %v562_v29  ;;  %v16351_v35 = vpack.c.bf16 %v567_v34, %v564_v31  ;;  %v569_v38 = vld [vmem:[#allocation4 + $0x38] sm:$0xff]  ;;  %v572_v39 = vld [vmem:[#allocation4 + $0x50] sm:$0xff] }
  0x9d   :  { %12845 = vmatpush3.bf16.msra.mxu1 %v16303_v54  ;;  %18500 = vst [vmem:[#allocation34_spill] sm:$0xff] %v16346_v27  ;;  %v16355_v41 = vpack.c.bf16 %v572_v39, %v569_v38  ;;  %v568_v42 = vld [vmem:[#allocation4 + $0x30] sm:$0xff]  ;;  %v571_v43 = vld [vmem:[#allocation4 + $0x48] sm:$0xff]  ;;  %v570_v44 = vld [vmem:[#allocation4 + $0x40] sm:$0xff] }
  0x9e   :  { %12846 = vmatprep.subr.bf16.mxu1 %v18340_v25  ;;  %18501 = vst [vmem:[#allocation35_spill] sm:$0xff] %v16348_v33  ;;  %18502 = vst [vmem:[#allocation36_spill] sm:$0xff] %v16351_v35  ;;  %v16358_v47 = vpack.c.bf16 %v571_v43, %v568_v42  ;;  %v573_v48 = vld [vmem:[#allocation4 + $0x58] sm:$0xff]  ;;  %v575_v51 = vld [vmem:[#allocation4 + $0x68] sm:$0xff] }
  0x9f   :  { %12817 = vmatpush1.bf16.msra.mxu0 %v16286_v37  ;;  %18503 = vst [vmem:[#allocation37_spill] sm:$0xff] %v16355_v41  ;;  %v16361_v50 = vpack.c.bf16 %v573_v48, %v570_v44  ;;  %v578_v52 = vld [vmem:[#allocation4 + $0x80] sm:$0xff]  ;;  %v577_v57 = vld [vmem:[#allocation4 + $0x78] sm:$0xff]  ;;  %v576_v59 = vld [vmem:[#allocation4 + $0x70] sm:$0xff] }
  0xa0   :  { %12819 = vmatprep.subr.bf16.mxu0 %v16290_v40  ;;  %18504 = vst [vmem:[#allocation38_spill] sm:$0xff] %v16358_v47  ;;  %v16365_v53 = vpack.c.bf16 %v578_v52, %v575_v51  ;;  %v574_v56 = vld [vmem:[#allocation4 + $0x60] sm:$0xff]  ;;  %v579_v61 = vld [vmem:[#allocation4 + $0x88] sm:$0xff]  ;;  %v581_v3 = vld [vmem:[#allocation4 + $0x98] sm:$0xff] }
  0xa1   :  { %12848 = vmatpush3.bf16.msra.mxu1 %v16313_v63  ;;  %18505 = vst [vmem:[#allocation39_spill] sm:$0xff] %v16361_v50  ;;  %v16368_v60 = vpack.c.bf16 %v577_v57, %v574_v56  ;;  %v16371_v62 = vpack.c.bf16 %v579_v61, %v576_v59  ;;  %v584_v6 = vld [vmem:[#allocation4 + $0xb0] sm:$0xff]  ;;  %v583_v14 = vld [vmem:[#allocation4 + $0xa8] sm:$0xff]  ;;  %v582_v15 = vld [vmem:[#allocation4 + $0xa0] sm:$0xff] }
  0xa2   :  { %12849 = vmatprep.subr.bf16.mxu1 %v18340_v25  ;;  %18506 = vst [vmem:[#allocation40_spill] sm:$0xff] %v16365_v53  ;;  %v16375_v8 = vpack.c.bf16 %v584_v6, %v581_v3  ;;  %v580_v10 = vld [vmem:[#allocation4 + $0x90] sm:$0xff]  ;;  %v585_v20 = vld [vmem:[#allocation4 + $0xb8] sm:$0xff]  ;;  %v587_v26 = vld [vmem:[#allocation4 + $0xc8] sm:$0xff] }
  0xa3   :  { %12821 = vmatpush1.bf16.msra.mxu0 %v16296_v46  ;;  %18507 = vst [vmem:[#allocation41_spill] sm:$0xff] %v16368_v60  ;;  %18508 = vst [vmem:[#allocation42_spill] sm:$0xff] %v16371_v62  ;;  %v16378_v19 = vpack.c.bf16 %v583_v14, %v580_v10  ;;  %v16381_v22 = vpack.c.bf16 %v585_v20, %v582_v15  ;;  %v590_v29 = vld [vmem:[#allocation4 + $0xe0] sm:$0xff]  ;;  %v589_v34 = vld [vmem:[#allocation4 + $0xd8] sm:$0xff] }
  0xa4   :  { %12823 = vmatprep.subr.bf16.mxu0 %v16300_v49  ;;  %18509 = vst [vmem:[#allocation43_spill] sm:$0xff] %v16375_v8  ;;  %v16385_v30 = vpack.c.bf16 %v590_v29, %v587_v26  ;;  %v586_v31 = vld [vmem:[#allocation4 + $0xc0] sm:$0xff]  ;;  %v588_v38 = vld [vmem:[#allocation4 + $0xd0] sm:$0xff]  ;;  %v591_v42 = vld [vmem:[#allocation4 + $0xe8] sm:$0xff] }
  0xa5   :  { %12851 = vmatpush3.bf16.msra.mxu1 %v16323_v11  ;;  %18510 = vst [vmem:[#allocation44_spill] sm:$0xff] %v16378_v19  ;;  %18511 = vst [vmem:[#allocation45_spill] sm:$0xff] %v16381_v22  ;;  %v16388_v39 = vpack.c.bf16 %v589_v34, %v586_v31  ;;  %v16391_v43 = vpack.c.bf16 %v591_v42, %v588_v38  ;;  %v593_v44 = vld [vmem:[#allocation4 + $0xf8] sm:$0xff]  ;;  %v596_v48 = vld [vmem:[#allocation4 + $0x110] sm:$0xff] }
  0xa6   :  { %12852 = vmatprep.subr.bf16.mxu1 %v18340_v25  ;;  %18512 = vst [vmem:[#allocation46_spill] sm:$0xff] %v16385_v30  ;;  %v16395_v51 = vpack.c.bf16 %v596_v48, %v593_v44  ;;  %v592_v52 = vld [vmem:[#allocation4 + $0xf0] sm:$0xff]  ;;  %v595_v56 = vld [vmem:[#allocation4 + $0x108] sm:$0xff]  ;;  %v594_v57 = vld [vmem:[#allocation4 + $0x100] sm:$0xff] }
  0xa7   :  { %12825 = vmatpush1.bf16.msra.mxu0 %v16306_v55  ;;  %18513 = vst [vmem:[#allocation47_spill] sm:$0xff] %v16388_v39  ;;  %18514 = vst [vmem:[#allocation48_spill] sm:$0xff] %v16391_v43  ;;  %v16398_v59 = vpack.c.bf16 %v595_v56, %v592_v52  ;;  %v597_v61 = vld [vmem:[#allocation4 + $0x118] sm:$0xff]  ;;  %v599_v3 = vld [vmem:[#allocation4 + $0x128] sm:$0xff] }
  0xa8   :  { %12827 = vmatprep.subr.bf16.mxu0 %v16310_v58  ;;  %18515 = vst [vmem:[#allocation49_spill] sm:$0xff] %v16395_v51  ;;  %v602_v6 = vld [vmem:[#allocation4 + $0x140] sm:$0xff]  ;;  %v16401_v10 = vpack.c.bf16 %v597_v61, %v594_v57  ;;  %v601_v20 = vld [vmem:[#allocation4 + $0x138] sm:$0xff]  ;;  %v600_v26 = vld [vmem:[#allocation4 + $0x130] sm:$0xff] }
  0xa9   :  { %12854 = vmatpush3.bf16.msra.mxu1 %v16331_v16  ;;  %18516 = vst [vmem:[#allocation50_spill] sm:$0xff] %v16398_v59  ;;  %v16403_v14 = vpack.c.bf16 %v602_v6, %v599_v3  ;;  %v598_v15 = vld [vmem:[#allocation4 + $0x120] sm:$0xff]  ;;  %v603_v31 = vld [vmem:[#allocation4 + $0x148] sm:$0xff]  ;;  %v605_v34 = vld [vmem:[#allocation4 + $0x158] sm:$0xff] }
  0xaa   :  { %12855 = vmatprep.subr.bf16.mxu1 %v18340_v25  ;;  %18517 = vst [vmem:[#allocation51_spill] sm:$0xff] %v16401_v10  ;;  %v16406_v29 = vpack.c.bf16 %v601_v20, %v598_v15  ;;  %v608_v38 = vld [vmem:[#allocation4 + $0x170] sm:$0xff]  ;;  %v16410_v42 = vpack.c.bf16 %v603_v31, %v600_v26  ;;  %v607_v52 = vld [vmem:[#allocation4 + $0x168] sm:$0xff]  ;;  %v606_v56 = vld [vmem:[#allocation4 + $0x160] sm:$0xff] }
  0xab   :  { %12829 = vmatpush1.bf16.msra.mxu0 %v16316_v2  ;;  %18518 = vst [vmem:[#allocation52_spill] sm:$0xff] %v16403_v14  ;;  %v16412_v44 = vpack.c.bf16 %v608_v38, %v605_v34  ;;  %v604_v48 = vld [vmem:[#allocation4 + $0x150] sm:$0xff]  ;;  %v609_v57 = vld [vmem:[#allocation4 + $0x178] sm:$0xff]  ;;  %v769_v61 = vld [vmem:[#allocation6 + $0x8] sm:$0xff]  ;;  %v165_v34 = vlaneseq }
  0xac   :  { %12831 = vmatprep.subr.bf16.mxu0 %v16320_v7  ;;  %18519 = vst [vmem:[#allocation53_spill] sm:$0xff] %v16406_v29  ;;  %18520 = vst [vmem:[#allocation54_spill] sm:$0xff] %v16410_v42  ;;  %v772_v3 = vld [vmem:[#allocation6 + $0x20] sm:$0xff]  ;;  %v16416_v6 = vpack.c.bf16 %v607_v52, %v604_v48  ;;  %v16420_v15 = vpack.c.bf16 %v609_v57, %v606_v56 }
  0xad   :  { %12857 = vmatpush3.bf16.msra.mxu1 %v16337_v21  ;;  %18521 = vst [vmem:[#allocation55_spill] sm:$0xff] %v16412_v44  ;;  %v16422_v20 = vpack.c.bf16 %v772_v3, %v769_v61  ;;  %v166_v38 = vshrl.u32 %v165_v34, 7  ;;  %v383_v52 = vld [vmem:[%s18318_s5] sm:$0x7] }
  0xae   :  { %12890 = vmatprep.subr.bf16.mxu1 %v18340_v25  ;;  %18522 = vst [vmem:[#allocation56_spill] sm:$0xff] %v16416_v6  ;;  %18523 = vst [vmem:[#allocation57_spill] sm:$0xff] %v16420_v15  ;;  %v163_v56 = vld [vmem:[%s18526_s23] sm:$0x7] }
  0xaf   :  { %12833 = vmatpush1.bf16.msra.mxu0 %v16326_v13  ;;  %18524 = vst [vmem:[#allocation58_spill] sm:$0xff] %v16422_v20  ;;  %v16429_v48 = vsub.s32 0, %v166_v38  ;;  %v16437_v57 = vsub.s32 1, %v166_v38 }
  0xb0   :  { %11085 = vmatmul.mubr.f32.vlgmr.msra.gmra.mrb[2].mxu1 %v18338_v0  ;;  %12859 = vmatprep.subr.bf16.mxu0 %v16346_v27 }
  0xb1   :  { %11119 = vmatprep.mubr.msk.f32.mxu1 %vm15995_vm0, %v18338_v0  ;;  %12892 = vmatpush3.bf16.msra.mxu1 %v16351_v35  ;;  %18525 = vst [vmem:[#allocation59_spill] sm:$0xff] %v16429_v48  ;;  %18527 = vst [vmem:[#allocation60_spill] sm:$0xff] %v16437_v57  ;;  %v168_v61 = vrot.slane %v163_v56, %v16429_v48  ;;  %v388_v3 = vrot.slane %v383_v52, %v16429_v48 }
  0xb2   :  { %465 = vmatmul.mubr.f32.vlgmr.msra.gmra.mrb[0].mxu0 %v18338_v0  ;;  %12893 = vmatprep.subr.bf16.mxu1 %v18340_v25  ;;  %v392_v34 = vrot.slane %v383_v52, %v16437_v57 }
  0xb3   :  { %691 = vmatprep.mubr.f32.mxu0 %v18338_v0  ;;  %12861 = vmatpush1.bf16.msra.mxu0 %v16348_v33  ;;  %v16443_v0 = vadd.f32 %v388_v3, %v168_v61 }
  0xb4   :  { %12863 = vmatprep.subr.bf16.mxu0 %v16355_v41 }
  0xb5   :  { %12895 = vmatpush3.bf16.msra.mxu1 %v16361_v50  ;;  %18528 = vst [vmem:[#allocation61_spill] sm:$0xff] %v16443_v0 }
  0xb6   :  { %12896 = vmatprep.subr.bf16.mxu1 %v18340_v25 }
  0xb7   :  { %12865 = vmatpush1.bf16.msra.mxu0 %v16358_v47 }
  0xb8   :  { %12867 = vmatprep.subr.bf16.mxu0 %v16365_v53 }
  0xb9   :  { %12898 = vmatpush3.bf16.msra.mxu1 %v16371_v62 }
  0xba   :  { %12899 = vmatprep.subr.bf16.mxu1 %v18340_v25 }
  0xbb   :  { %12869 = vmatpush1.bf16.msra.mxu0 %v16368_v60 }
  0xbc   :  { %12871 = vmatprep.subr.bf16.mxu0 %v16375_v8 }
  0xbd   :  { %12901 = vmatpush3.bf16.msra.mxu1 %v16381_v22 }
  0xbe   :  { %12902 = vmatprep.subr.bf16.mxu1 %v18340_v25 }
  0xbf   :  { %12873 = vmatpush1.bf16.msra.mxu0 %v16378_v19 }
  0xc0   :  { %12875 = vmatprep.subr.bf16.mxu0 %v16385_v30 }
  0xc1   :  { %12904 = vmatpush3.bf16.msra.mxu1 %v16391_v43 }
  0xc2   :  { %12905 = vmatprep.subr.bf16.mxu1 %v18340_v25 }
  0xc3   :  { %12877 = vmatpush1.bf16.msra.mxu0 %v16388_v39 }
  0xc4   :  { %12879 = vmatprep.subr.bf16.mxu0 %v16395_v51 }
  0xc5   :  { %12907 = vmatpush3.bf16.msra.mxu1 %v16401_v10 }
  0xc6   :  { %12908 = vmatprep.subr.bf16.mxu1 %v18340_v25 }
  0xc7   :  { %12881 = vmatpush1.bf16.msra.mxu0 %v16398_v59 }
  0xc8   :  { %12883 = vmatprep.subr.bf16.mxu0 %v16403_v14 }
  0xc9   :  { %12910 = vmatpush3.bf16.msra.mxu1 %v16410_v42 }
  0xca   :  { %12911 = vmatprep.subr.bf16.mxu1 %v18340_v25 }
  0xcb   :  { %12885 = vmatpush1.bf16.msra.mxu0 %v16406_v29 }
  0xcc   :  { %12887 = vmatprep.subr.bf16.mxu0 %v16412_v44 }
  0xcd   :  { %12913 = vmatpush3.bf16.msra.mxu1 %v16420_v15 }
  0xce   :  { %12946 = vmatprep.subr.bf16.mxu1 %v18340_v25 }
  0xcf   :  { %12889 = vmatpush1.bf16.msra.mxu0 %v16416_v6 }
  0xd0   :  { %12915 = vmatprep.subr.bf16.mxu0 %v16422_v20 }
 0x162   :  { %v331_v26 = vpop.f32.mrb[0].mxu1 }
 0x163   :  { %v11051_v31 = vpop.f32.mrb[1].mxu1 }
 0x164   :  { %v172_v31 = vrot.slane %v163_v56, %v16437_v57  ;;  %v16449_v57 = vsub.s32 2, %v166_v38  ;;  %v768_v38 = vld [vmem:[#allocation6] sm:$0xff] }
 0x166   :  { %v16445_v15 = vadd.f32 %v392_v34, %v172_v31  ;;  %18530 = vst [vmem:[#allocation63_spill] sm:$0xff] %v16449_v57  ;;  %v16452_v61 = vrot.slane %v383_v52, %v16449_v57  ;;  %v771_v31 = vld [vmem:[#allocation6 + $0x18] sm:$0xff]  ;;  %v770_v52 = vld [vmem:[#allocation6 + $0x10] sm:$0xff]  ;;  %v773_v34 = vld [vmem:[#allocation6 + $0x28] sm:$0xff] }
 0x167   :  { %v16459_v59 = vpack.c.bf16 %v771_v31, %v768_v38  ;;  %v782_v31 = vld [vmem:[#allocation6 + $0x70] sm:$0xff] }
 0x168   :  { %18529 = vst [vmem:[#allocation62_spill] sm:$0xff] %v16445_v15 }
 0x169   :  { %18532 = vst [vmem:[#allocation65_spill] sm:$0xff] %v16459_v59 }
 0x183   :  { %v537_v44 = vpop.f32.mrb[2].mxu1 }
 0x184   :  { %v11086_v43 = vpop.f32.mrb[3].mxu1 }
 0x185   :  { %v466_v25 = vpop.f32.mrb[0].mxu0 }
 0x186   :  { %v15387_v42 = vadd.f32 %v16443_v0, %v466_v25  ;;  %v468_v20 = vpop.f32.mrb[1].mxu0  ;;  %v16455_v25 = vrot.slane %v163_v56, %v16449_v57  ;;  %v775_v0 = vld [vmem:[#allocation6 + $0x38] sm:$0xff]  ;;  %v778_v56 = vld [vmem:[#allocation6 + $0x50] sm:$0xff] }
 0x187   :  { %v15389_v10 = vadd.f32 %v16445_v15, %v468_v20  ;;  %v538_v20 = vadd.f32 %v537_v44, %v16452_v61  ;;  %v16461_v44 = vpack.c.bf16 %v773_v34, %v770_v52  ;;  %v785_v52 = vld [vmem:[#allocation6 + $0x88] sm:$0xff]  ;;  %v787_v34 = vld [vmem:[#allocation6 + $0x98] sm:$0xff] }
 0x188   :  { %v10095_v6 = vmul.f32 -1.442695, %v15387_v42  ;;  %18531 = vst [vmem:[#allocation64_spill] sm:$0xff] %v16455_v25 }
 0x189   :  { %v10096_v29 = vmul.f32 -1.442695, %v15389_v10  ;;  %v332_v10 = vadd.f32 %v331_v26, %v16455_v25  ;;  %18533 = vst [vmem:[#allocation66_spill] sm:$0xff] %v16461_v44  ;;  %v774_v26 = vld [vmem:[#allocation6 + $0x30] sm:$0xff]  ;;  %v784_v25 = vld [vmem:[#allocation6 + $0x80] sm:$0xff] }
 0x18a   :  { %15555 = vpow2.f32 %v10095_v6 }
 0x18b   :  { %15557 = vpow2.f32 %v10096_v29 }
 0x194   :  { %v15556_v48 = vpop.eup %15555 }
 0x195   :  { %v545_v14 = vadd.f32 1.0, %v15556_v48  ;;  %v15558_v3 = vpop.eup %15557 }
 0x196   :  { %v552_v42 = vadd.f32 1.0, %v15558_v3 }
 0x197   :  { %15559 = vrcp.f32 %v545_v14 }
 0x198   :  { %15561 = vrcp.f32 %v552_v42 }
 0x1a1   :  { %v15560_v6 = vpop.eup %15559 }
 0x1a2   :  { %v555_v43 = vmul.f32 %v15560_v6, %v538_v20  ;;  %v15562_v14 = vpop.eup %15561  ;;  %v16465_v20 = vpack.c.bf16 %v778_v56, %v775_v0  ;;  %v777_v6 = vld [vmem:[#allocation6 + $0x48] sm:$0xff]  ;;  %v18537_v0 = vmov 0.0|0.0   ;;  %v790_v56 = vld [vmem:[#allocation6 + $0xb0] sm:$0xff] }
 0x1a3   :  { %v558_v48 = vsub.f32 1.0, %v15562_v14  ;;  %v560_v3 = vmul.f32 0.0, %v15562_v14 }
 0x1a4   :  { %v556_v29 = vadd.f32 %v555_v43, %v332_v10  ;;  %18534 = vst [vmem:[#allocation67_spill] sm:$0xff] %v16465_v20  ;;  %v776_v10 = vld [vmem:[#allocation6 + $0x40] sm:$0xff]  ;;  %v779_v43 = vld [vmem:[#allocation6 + $0x58] sm:$0xff] }
 0x1a5   :  { %v16473_v14 = vpack.c.bf16 %v779_v43, %v776_v10  ;;  %v16490_v10 = vpack.c.bf16 %v790_v56, %v787_v34  ;;  %v789_v43 = vld [vmem:[#allocation6 + $0xa8] sm:$0xff]  ;;  %v795_v34 = vld [vmem:[#allocation6 + $0xd8] sm:$0xff]  ;;  %v794_v56 = vld [vmem:[#allocation6 + $0xd0] sm:$0xff] }
 0x1a6   :  { %15563 = vtanh.f32 %v556_v29  ;;  %v781_v29 = vld [vmem:[#allocation6 + $0x68] sm:$0xff] }
 0x1a7   :  { %18536 = vst [vmem:[#allocation69_spill] sm:$0xff] %v16473_v14  ;;  %v16477_v38 = vpack.c.bf16 %v784_v25, %v781_v29  ;;  %v786_v25 = vld [vmem:[#allocation6 + $0x90] sm:$0xff]  ;;  %18542 = vst [vmem:[#allocation73_spill] sm:$0xff] %v16490_v10  ;;  %v788_v29 = vld [vmem:[#allocation6 + $0xa0] sm:$0xff] }
 0x1a9   :  { %18538 = vst [vmem:[#allocation70_spill] sm:$0xff] %v16477_v38 }
 0x1b0   :  { %v15564_v15 = vpop.eup %15563 }
 0x1b1   :  { %v559_v57 = vmul.f32 %v15564_v15, %v558_v48  ;;  %v16471_v15 = vpack.c.bf16 %v777_v6, %v774_v26  ;;  %v783_v48 = vld [vmem:[#allocation6 + $0x78] sm:$0xff]  ;;  %v16486_v6 = vpack.c.bf16 %v785_v52, %v782_v31  ;;  %v792_v31 = vld [vmem:[#allocation6 + $0xc0] sm:$0xff] }
 0x1b3   :  { %v16463_v42 = vadd.f32 %v560_v3, %v559_v57  ;;  %18535 = vst [vmem:[#allocation68_spill] sm:$0xff] %v16471_v15  ;;  %v780_v57 = vld [vmem:[#allocation6 + $0x60] sm:$0xff]  ;;  %v18539_v3 = vmov 0.0   ;;  %18541 = vst [vmem:[#allocation72_spill] sm:$0xff] %v16486_v6 }
 0x1b4   :  { %v16484_v26 = vpack.c.bf16 %v783_v48, %v780_v57  ;;  %v16494_v57 = vpack.c.bf16 %v789_v43, %v786_v25  ;;  %v16504_v25 = vpack.c.bf16 %v795_v34, %v792_v31  ;;  %v798_v43 = vld [vmem:[#allocation6 + $0xf0] sm:$0xff]  ;;  %v804_v34 = vld [vmem:[#allocation6 + $0x120] sm:$0xff] }
 0x1b5   :  { %692 = vmatmul.mubr.f32.vlgmr.msra.gmra.mrb[2].mxu0 %v16463_v42  ;;  %11120 = vmatmul.mubr.f32.vlgmr.msra.gmra.mrb[4].mxu1 %v16463_v42 }
 0x1b6   :  { %12917 = vmatpush1.bf16.msra.mxu0 %v16459_v59  ;;  %12948 = vmatpush3.bf16.msra.mxu1 %v16461_v44  ;;  %18540 = vst [vmem:[#allocation71_spill] sm:$0xff] %v16484_v26  ;;  %v793_v44 = vld [vmem:[#allocation6 + $0xc8] sm:$0xff]  ;;  %v796_v59 = vld [vmem:[#allocation6 + $0xe0] sm:$0xff]  ;;  %18543 = vst [vmem:[#allocation74_spill] sm:$0xff] %v16494_v57 }
 0x1b7   :  { %12919 = vmatprep.subr.bf16.mxu0 %v16465_v20  ;;  %12949 = vmatprep.subr.bf16.mxu1 %v18537_v0  ;;  %v791_v20 = vld [vmem:[#allocation6 + $0xb8] sm:$0xff]  ;;  %v16500_v52 = vpack.c.bf16 %v796_v59, %v793_v44  ;;  %v801_v44 = vld [vmem:[#allocation6 + $0x108] sm:$0xff] }
 0x1b8   :  { %897 = vmatprep.mubr.f32.mxu0 %v18539_v3  ;;  %11154 = vmatprep.mubr.msk.f32.mxu1 %vm15995_vm0, %v18539_v3  ;;  %v16496_v48 = vpack.c.bf16 %v791_v20, %v788_v29  ;;  %v800_v29 = vld [vmem:[#allocation6 + $0x100] sm:$0xff]  ;;  %v16514_v31 = vpack.c.bf16 %v801_v44, %v798_v43  ;;  %v810_v44 = vld [vmem:[#allocation6 + $0x150] sm:$0xff] }
 0x1b9   :  { %18545 = vst [vmem:[#allocation76_spill] sm:$0xff] %v16500_v52 }
 0x1ba   :  { %12921 = vmatpush1.bf16.msra.mxu0 %v16471_v15  ;;  %12951 = vmatpush3.bf16.msra.mxu1 %v16473_v14  ;;  %18544 = vst [vmem:[#allocation75_spill] sm:$0xff] %v16496_v48  ;;  %v799_v14 = vld [vmem:[#allocation6 + $0xf8] sm:$0xff]  ;;  %v802_v15 = vld [vmem:[#allocation6 + $0x110] sm:$0xff]  ;;  %18547 = vst [vmem:[#allocation78_spill] sm:$0xff] %v16514_v31 }
 0x1bb   :  { %12923 = vmatprep.subr.bf16.mxu0 %v16477_v38  ;;  %12952 = vmatprep.subr.bf16.mxu1 %v18537_v0  ;;  %v797_v38 = vld [vmem:[#allocation6 + $0xe8] sm:$0xff]  ;;  %v16510_v59 = vpack.c.bf16 %v802_v15, %v799_v14  ;;  %v807_v14 = vld [vmem:[#allocation6 + $0x138] sm:$0xff] }
 0x1bc   :  { %v16506_v20 = vpack.c.bf16 %v797_v38, %v794_v56  ;;  %v806_v56 = vld [vmem:[#allocation6 + $0x130] sm:$0xff]  ;;  %v16524_v43 = vpack.c.bf16 %v807_v14, %v804_v34 }
 0x1bd   :  { %18546 = vst [vmem:[#allocation77_spill] sm:$0xff] %v16510_v59  ;;  %v18553_v14 = vld [vmem:[#allocation51_spill] sm:$0xff] }
 0x1be   :  { %12925 = vmatpush1.bf16.msra.mxu0 %v16484_v26  ;;  %12954 = vmatpush3.bf16.msra.mxu1 %v16486_v6  ;;  %v805_v6 = vld [vmem:[#allocation6 + $0x128] sm:$0xff]  ;;  %v808_v26 = vld [vmem:[#allocation6 + $0x140] sm:$0xff] }
 0x1bf   :  { %12927 = vmatprep.subr.bf16.mxu0 %v16490_v10  ;;  %12955 = vmatprep.subr.bf16.mxu1 %v18537_v0  ;;  %v803_v10 = vld [vmem:[#allocation6 + $0x118] sm:$0xff]  ;;  %v16520_v15 = vpack.c.bf16 %v808_v26, %v805_v6  ;;  %v813_v6 = vld [vmem:[#allocation6 + $0x168] sm:$0xff] }
 0x1c0   :  { %v16516_v38 = vpack.c.bf16 %v803_v10, %v800_v29  ;;  %v812_v29 = vld [vmem:[#allocation6 + $0x160] sm:$0xff] }
 0x1c2   :  { %12929 = vmatpush1.bf16.msra.mxu0 %v16494_v57  ;;  %12957 = vmatpush3.bf16.msra.mxu1 %v16496_v48  ;;  %v811_v48 = vld [vmem:[#allocation6 + $0x158] sm:$0xff]  ;;  %v814_v57 = vld [vmem:[#allocation6 + $0x170] sm:$0xff] }
 0x1c3   :  { %12931 = vmatprep.subr.bf16.mxu0 %v16500_v52  ;;  %12958 = vmatprep.subr.bf16.mxu1 %v18537_v0  ;;  %v809_v52 = vld [vmem:[#allocation6 + $0x148] sm:$0xff]  ;;  %v16530_v26 = vpack.c.bf16 %v814_v57, %v811_v48  ;;  %v18550_v48 = vld [vmem:[#allocation48_spill] sm:$0xff] }
 0x1c4   :  { %v16526_v10 = vpack.c.bf16 %v809_v52, %v806_v56  ;;  %v10099_v57 = vld [vmem:[%s18482_s2 + $0x8] sm:$0xff]  ;;  %v18551_v52 = vld [vmem:[#allocation53_spill] sm:$0xff]  ;;  %v18554_v56 = vld [vmem:[#allocation56_spill] sm:$0xff] }
 0x1c6   :  { %12933 = vmatpush1.bf16.msra.mxu0 %v16504_v25  ;;  %12960 = vmatpush3.bf16.msra.mxu1 %v16506_v20 }
 0x1c7   :  { %12935 = vmatprep.subr.bf16.mxu0 %v16510_v59  ;;  %12961 = vmatprep.subr.bf16.mxu1 %v18537_v0  ;;  %v815_v59 = vld [vmem:[#allocation6 + $0x178] sm:$0xff] }
 0x1c8   :  { %v16536_v34 = vpack.c.bf16 %v815_v59, %v812_v29  ;;  %v18552_v59 = vld [vmem:[#allocation55_spill] sm:$0xff]  ;;  %v18557_v29 = vld [vmem:[#allocation57_spill] sm:$0xff] }
 0x1ca   :  { %12937 = vmatpush1.bf16.msra.mxu0 %v16514_v31  ;;  %12963 = vmatpush3.bf16.msra.mxu1 %v16516_v38  ;;  %v16534_v31 = vpack.c.bf16 %v813_v6, %v810_v44  ;;  %v18555_v44 = vld [vmem:[#allocation58_spill] sm:$0xff] }
 0x1cb   :  { %12939 = vmatprep.subr.bf16.mxu0 %v16520_v15  ;;  %12964 = vmatprep.subr.bf16.mxu1 %v18537_v0  ;;  %v18556_v6 = vld [vmem:[#allocation54_spill] sm:$0xff] }
 0x1ce   :  { %12941 = vmatpush1.bf16.msra.mxu0 %v16524_v43  ;;  %12966 = vmatpush3.bf16.msra.mxu1 %v16526_v10 }
 0x1cf   :  { %12943 = vmatprep.subr.bf16.mxu0 %v16530_v26  ;;  %12967 = vmatprep.subr.bf16.mxu1 %v18537_v0 }
 0x1d2   :  { %12945 = vmatpush1.bf16.msra.mxu0 %v16534_v31  ;;  %12969 = vmatpush3.bf16.msra.mxu1 %v16536_v34 }
 0x1d3   :  { %12971 = vmatprep.subr.bf16.mxu0 %v16241_v5  ;;  %10100 = vmatprep.subr.msk.mxu1 %vm187_vm1, %v16239_v4 }
 0x1d5   :  { %898 = vmatmul.mubr.f32.vlgmr.msra.gmra.mrb[2].mxu0 %v18539_v3  ;;  %11155 = vmatmul.mubr.f32.vlgmr.msra.gmra.mrb[6].mxu1 %v18539_v3 }
 0x1d6   :  { %12973 = vmatpush1.bf16.msra.mxu0 %v16246_v9  ;;  %10101 = vmatpush1.msk.msra.mxu1 %vm187_vm1, %v16235_v1  ;;  %v18548_v1 = vld [vmem:[#allocation50_spill] sm:$0xff] }
 0x1d7   :  { %1064 = vmatprep.mubr.f32.mxu1 %v18539_v3  ;;  %12975 = vmatprep.subr.bf16.mxu0 %v16250_v12 }
 0x1d8   :  { %11157 = vmatprep.subr.mxu1 %v18539_v3  ;;  %1205 = vmatprep.mubr.f32.mxu0 %v18539_v3 }
 0x1d9   :  { %10102 = vmatmul.mubr.msk.f32.vlgmr.msra.gmra.mrb[8].mxu1 %vm183_vm2, %v10099_v57 }
 0x1da   :  { %12977 = vmatpush1.bf16.msra.mxu0 %v16257_v17  ;;  %11158 = vmatpush3.msk.msra.mxu1 %vm187_vm1, %v16266_v23  ;;  %v18549_v23 = vld [vmem:[#allocation52_spill] sm:$0xff] }
 0x1db   :  { %11159 = vmatprep.mubr.msk.f32.mxu1 %vm15995_vm0, %v18539_v3  ;;  %13002 = vmatprep.subr.bf16.mxu1 %v18537_v0 }
 0x1dc   :  { %12979 = vmatprep.subr.bf16.mxu0 %v16261_v18 }
 0x1dd   :  { %11160 = vmatmul.mubr.msk.f32.vlgmr.msra.gmra.mrb[10].mxu1 %vm183_vm2, %v10099_v57 }
 0x1de   :  { %13004 = vmatpush3.bf16.msra.mxu1 %v16278_v32  ;;  %12981 = vmatpush1.bf16.msra.mxu0 %v16271_v24 }
 0x1df   :  { %13005 = vmatprep.subr.bf16.mxu1 %v18537_v0  ;;  %12983 = vmatprep.subr.bf16.mxu0 %v16275_v28 }
 0x1e0   :  { %11194 = vmatprep.mubr.msk.f32.mxu1 %vm15995_vm0, %v18539_v3 }
 0x1e2   :  { %13007 = vmatpush3.bf16.msra.mxu1 %v16283_v36  ;;  %12985 = vmatpush1.bf16.msra.mxu0 %v16286_v37 }
 0x1e3   :  { %13008 = vmatprep.subr.bf16.mxu1 %v18537_v0  ;;  %12987 = vmatprep.subr.bf16.mxu0 %v16290_v40 }
 0x1e6   :  { %13010 = vmatpush3.bf16.msra.mxu1 %v16293_v45  ;;  %12989 = vmatpush1.bf16.msra.mxu0 %v16296_v46 }
 0x1e7   :  { %13011 = vmatprep.subr.bf16.mxu1 %v18537_v0  ;;  %12991 = vmatprep.subr.bf16.mxu0 %v16300_v49 }
 0x1ea   :  { %13013 = vmatpush3.bf16.msra.mxu1 %v16303_v54  ;;  %12993 = vmatpush1.bf16.msra.mxu0 %v16306_v55 }
 0x1eb   :  { %13014 = vmatprep.subr.bf16.mxu1 %v18537_v0  ;;  %12995 = vmatprep.subr.bf16.mxu0 %v16310_v58 }
 0x1ee   :  { %13016 = vmatpush3.bf16.msra.mxu1 %v16313_v63  ;;  %12997 = vmatpush1.bf16.msra.mxu0 %v16316_v2 }
 0x1ef   :  { %13017 = vmatprep.subr.bf16.mxu1 %v18537_v0  ;;  %12999 = vmatprep.subr.bf16.mxu0 %v16320_v7 }
 0x1f2   :  { %13019 = vmatpush3.bf16.msra.mxu1 %v16323_v11  ;;  %13001 = vmatpush1.bf16.msra.mxu0 %v16326_v13 }
 0x1f3   :  { %13020 = vmatprep.subr.bf16.mxu1 %v18537_v0  ;;  %13027 = vmatprep.subr.bf16.mxu0 %v16346_v27 }
 0x1f5   :  { %1206 = vmatmul.mubr.f32.vlgmr.msra.gmra.mrb[4].mxu0 %v16463_v42 }
 0x1f6   :  { %13022 = vmatpush3.bf16.msra.mxu1 %v16331_v16  ;;  %13029 = vmatpush1.bf16.msra.mxu0 %v16348_v33 }
 0x1f7   :  { %13023 = vmatprep.subr.bf16.mxu1 %v18537_v0  ;;  %13031 = vmatprep.subr.bf16.mxu0 %v16355_v41 }
 0x1f8   :  { %1367 = vmatprep.mubr.f32.mxu0 %v18539_v3 }
 0x1fa   :  { %13025 = vmatpush3.bf16.msra.mxu1 %v16337_v21  ;;  %13033 = vmatpush1.bf16.msra.mxu0 %v16358_v47 }
 0x1fb   :  { %13058 = vmatprep.subr.bf16.mxu1 %v18537_v0  ;;  %13035 = vmatprep.subr.bf16.mxu0 %v16365_v53 }
 0x1fd   :  { %11195 = vmatmul.mubr.f32.vlgmr.msra.gmra.mrb[12].mxu1 %v16463_v42 }
 0x1fe   :  { %13060 = vmatpush3.bf16.msra.mxu1 %v16351_v35  ;;  %13037 = vmatpush1.bf16.msra.mxu0 %v16368_v60 }
 0x1ff   :  { %13061 = vmatprep.subr.bf16.mxu1 %v18537_v0  ;;  %13039 = vmatprep.subr.bf16.mxu0 %v16375_v8 }
 0x200   :  { %11229 = vmatprep.mubr.msk.f32.mxu1 %vm15995_vm0, %v18539_v3 }
 0x202   :  { %13063 = vmatpush3.bf16.msra.mxu1 %v16361_v50  ;;  %13041 = vmatpush1.bf16.msra.mxu0 %v16378_v19 }
 0x203   :  { %13064 = vmatprep.subr.bf16.mxu1 %v18537_v0  ;;  %13043 = vmatprep.subr.bf16.mxu0 %v16385_v30 }
 0x206   :  { %13066 = vmatpush3.bf16.msra.mxu1 %v16371_v62  ;;  %13045 = vmatpush1.bf16.msra.mxu0 %v16388_v39 }
 0x207   :  { %13067 = vmatprep.subr.bf16.mxu1 %v18537_v0  ;;  %13047 = vmatprep.subr.bf16.mxu0 %v16395_v51 }
 0x20a   :  { %13069 = vmatpush3.bf16.msra.mxu1 %v16381_v22  ;;  %13049 = vmatpush1.bf16.msra.mxu0 %v18548_v1 }
 0x20b   :  { %13070 = vmatprep.subr.bf16.mxu1 %v18537_v0  ;;  %13051 = vmatprep.subr.bf16.mxu0 %v18549_v23 }
 0x20e   :  { %13072 = vmatpush3.bf16.msra.mxu1 %v18550_v48  ;;  %13053 = vmatpush1.bf16.msra.mxu0 %v18551_v52  ;;  %v18559_v48 = vld [vmem:[#allocation60_spill] sm:$0xff] }
 0x20f   :  { %13073 = vmatprep.subr.bf16.mxu1 %v18537_v0  ;;  %13055 = vmatprep.subr.bf16.mxu0 %v18552_v59  ;;  %v18558_v59 = vld [vmem:[#allocation59_spill] sm:$0xff] }
 0x212   :  { %13075 = vmatpush3.bf16.msra.mxu1 %v18553_v14  ;;  %13057 = vmatpush1.bf16.msra.mxu0 %v18554_v56  ;;  %v816_v14 = vld [vmem:[%s18322_s9] sm:$0x7] }
 0x213   :  { %13076 = vmatprep.subr.bf16.mxu1 %v18537_v0  ;;  %13083 = vmatprep.subr.bf16.mxu0 %v18555_v44  ;;  %v610_v56 = vld [vmem:[%s18321_s8] sm:$0x7] }
 0x214   :  { %v615_v44 = vrot.slane %v610_v56, %v18558_v59  ;;  %v619_v23 = vrot.slane %v610_v56, %v18559_v48 }
 0x216   :  { %13078 = vmatpush3.bf16.msra.mxu1 %v18556_v6  ;;  %v821_v6 = vrot.slane %v816_v14, %v18558_v59 }
 0x217   :  { %13079 = vmatprep.subr.bf16.mxu1 %v18537_v0 }
 0x218   :  { %v16643_v1 = vadd.f32 %v821_v6, %v615_v44 }
 0x21a   :  { %13081 = vmatpush3.bf16.msra.mxu1 %v18557_v29  ;;  %v825_v29 = vrot.slane %v816_v14, %v18559_v48  ;;  %18560 = vst [vmem:[#allocation79_spill] sm:$0xff] %v16643_v1 }
 0x21b   :  { %13114 = vmatprep.subr.bf16.mxu1 %v18537_v0 }
 0x288   :  { %v764_v57 = vpop.f32.mrb[4].mxu1 }
 0x289   :  { %v11121_v52 = vpop.f32.mrb[5].mxu1 }
 0x28a   :  { %v16645_v52 = vadd.f32 %v825_v29, %v619_v23  ;;  %v18562_v29 = vld [vmem:[#allocation63_spill] sm:$0xff] }
 0x28b   :  { %v16650_v48 = vrot.slane %v816_v14, %v18562_v29 }
 0x28c   :  { %18561 = vst [vmem:[#allocation80_spill] sm:$0xff] %v16645_v52 }
 0x28d   :  { %18563 = vst [vmem:[#allocation81_spill] sm:$0xff] %v16650_v48 }
 0x2a8   :  { %v899_v22 = vpop.f32.mrb[2].mxu0  ;;  %v970_v51 = vpop.f32.mrb[6].mxu1 }
 0x2a9   :  { %v15391_v39 = vadd.f32 %v16643_v1, %v899_v22  ;;  %v901_v62 = vpop.f32.mrb[3].mxu0  ;;  %v11156_v30 = vpop.f32.mrb[7].mxu1  ;;  %v16653_v22 = vrot.slane %v610_v56, %v18562_v29 }
 0x2aa   :  { %v15393_v50 = vadd.f32 %v16645_v52, %v901_v62  ;;  %v971_v62 = vadd.f32 %v970_v51, %v16650_v48 }
 0x2ab   :  { %v10097_v19 = vmul.f32 -1.442695, %v15391_v39 }
 0x2ac   :  { %v1066_v8 = vpop.f32.mrb[8].mxu1  ;;  %v10098_v60 = vmul.f32 -1.442695, %v15393_v50 }
 0x2ad   :  { %15565 = vpow2.f32 %v10097_v19  ;;  %v1068_v59 = vpop.f32.mrb[9].mxu1  ;;  %v765_v19 = vadd.f32 %v764_v57, %v16653_v22 }
 0x2ae   :  { %15567 = vpow2.f32 %v10098_v60  ;;  %v18564_v60 = vld [vmem:[#allocation61_spill] sm:$0xff] }
 0x2af   :  { %v15395_v52 = vadd.f32 %v18564_v60, %v1066_v8 }
 0x2b0   :  { %v1137_v35 = vpop.f32.mrb[10].mxu1 }
 0x2b1   :  { %v11161_v53 = vpop.f32.mrb[11].mxu1 }
 0x2b7   :  { %v15566_v44 = vpop.eup %15565 }
 0x2b8   :  { %v978_v6 = vadd.f32 1.0, %v15566_v44  ;;  %v15568_v23 = vpop.eup %15567  ;;  %v18565_v44 = vld [vmem:[#allocation62_spill] sm:$0xff] }
 0x2b9   :  { %v985_v30 = vadd.f32 1.0, %v15568_v23 }
 0x2ba   :  { %15569 = vrcp.f32 %v978_v6  ;;  %v15398_v6 = vadd.f32 %v18565_v44, %v1068_v59 }
 0x2bb   :  { %15571 = vrcp.f32 %v985_v30 }
 0x2c4   :  { %v15570_v39 = vpop.eup %15569 }
 0x2c5   :  { %v988_v50 = vmul.f32 %v15570_v39, %v971_v62  ;;  %v15572_v23 = vpop.eup %15571 }
 0x2c6   :  { %v991_v41 = vsub.f32 1.0, %v15572_v23  ;;  %v993_v62 = vmul.f32 0.0, %v15572_v23 }
 0x2c7   :  { %v989_v53 = vadd.f32 %v988_v50, %v765_v19  ;;  %v18566_v50 = vld [vmem:[#allocation64_spill] sm:$0xff] }
 0x2c8   :  { %v1207_v1 = vpop.f32.mrb[4].mxu0 }
 0x2c9   :  { %15573 = vtanh.f32 %v989_v53  ;;  %v15396_v14 = vadd.f32 %v15395_v52, %v1207_v1  ;;  %v1209_v47 = vpop.f32.mrb[5].mxu0  ;;  %v1138_v53 = vadd.f32 %v1137_v35, %v18566_v50  ;;  %v18569_v35 = vld [vmem:[#allocation67_spill] sm:$0xff] }
 0x2ca   :  { %v15399_v21 = vadd.f32 %v15398_v6, %v1209_v47 }
 0x2cb   :  { %v10105_v56 = vmul.f32 -1.442695, %v15396_v14 }
 0x2cc   :  { %v10106_v29 = vmul.f32 -1.442695, %v15399_v21 }
 0x2cd   :  { %15575 = vpow2.f32 %v10105_v56 }
 0x2ce   :  { %15577 = vpow2.f32 %v10106_v29 }
 0x2d0   :  { %v1278_v51 = vpop.f32.mrb[12].mxu1 }
 0x2d1   :  { %v11196_v48 = vpop.f32.mrb[13].mxu1  ;;  %v1279_v47 = vadd.f32 %v1278_v51, %v16452_v61  ;;  %v18567_v51 = vld [vmem:[#allocation65_spill] sm:$0xff] }
 0x2d3   :  { %v15574_v57 = vpop.eup %15573 }
 0x2d4   :  { %v992_v30 = vmul.f32 %v15574_v57, %v991_v41  ;;  %v18568_v57 = vld [vmem:[#allocation66_spill] sm:$0xff] }
 0x2d6   :  { %v16659_v39 = vadd.f32 %v993_v62, %v992_v30  ;;  %v18571_v30 = vld [vmem:[#allocation69_spill] sm:$0xff]  ;;  %v18572_v62 = vld [vmem:[#allocation70_spill] sm:$0xff] }
 0x2d7   :  { %v15576_v8 = vpop.eup %15575 }
 0x2d8   :  { %v1286_v59 = vadd.f32 1.0, %v15576_v8  ;;  %v15578_v19 = vpop.eup %15577  ;;  %v18573_v8 = vld [vmem:[#allocation71_spill] sm:$0xff] }
 0x2d9   :  { %v1293_v1 = vadd.f32 1.0, %v15578_v19  ;;  %v18575_v19 = vld [vmem:[#allocation73_spill] sm:$0xff] }
 0x2da   :  { %15579 = vrcp.f32 %v1286_v59  ;;  %v18574_v59 = vld [vmem:[#allocation72_spill] sm:$0xff] }
 0x2db   :  { %15581 = vrcp.f32 %v1293_v1  ;;  %v18576_v1 = vld [vmem:[#allocation74_spill] sm:$0xff] }
 0x2e4   :  { %v15580_v52 = vpop.eup %15579 }
 0x2e5   :  { %v1296_v21 = vmul.f32 %v15580_v52, %v1279_v47  ;;  %v15582_v6 = vpop.eup %15581  ;;  %v18577_v47 = vld [vmem:[#allocation75_spill] sm:$0xff]  ;;  %v18578_v52 = vld [vmem:[#allocation76_spill] sm:$0xff] }
 0x2e6   :  { %v1299_v29 = vsub.f32 1.0, %v15582_v6  ;;  %v1301_v56 = vmul.f32 %v15582_v6, %v16463_v42  ;;  %v18570_v42 = vld [vmem:[#allocation68_spill] sm:$0xff]  ;;  %v10109_v6 = vld [vmem:[%s18482_s2 + $0x10] sm:$0xff] }
 0x2e7   :  { %v1297_v48 = vadd.f32 %v1296_v21, %v1138_v53  ;;  %v18579_v53 = vld [vmem:[#allocation77_spill] sm:$0xff]  ;;  %v18580_v21 = vld [vmem:[#allocation78_spill] sm:$0xff] }
 0x2e9   :  { %15583 = vtanh.f32 %v1297_v48  ;;  %v16710_v48 = vld [vmem:[%s18481_s15] sm:$0xff] }
 0x2f3   :  { %v15584_v41 = vpop.eup %15583 }
 0x2f4   :  { %v1300_v14 = vmul.f32 %v15584_v41, %v1299_v29  ;;  %v16726_v29 = vld [vmem:[%s18481_s15 + $0x8] sm:$0xf]  ;;  %v18581_v41 = vld [vmem:[#allocation37_spill] sm:$0xff] }
 0x2f6   :  { %v16664_v23 = vadd.f32 %v1301_v56, %v1300_v14  ;;  %v18582_v14 = vld [vmem:[#allocation33_spill] sm:$0xff]  ;;  %v18583_v56 = vld [vmem:[#allocation38_spill] sm:$0xff] }
 0x2f8   :  { %1368 = vmatmul.mubr.f32.vlgmr.msra.gmra.mrb[6].mxu0 %v16664_v23  ;;  %11230 = vmatmul.mubr.f32.vlgmr.msra.gmra.mrb[14].mxu1 %v16664_v23 }
 0x2f9   :  { %13085 = vmatpush1.bf16.msra.mxu0 %v18567_v51  ;;  %13116 = vmatpush3.bf16.msra.mxu1 %v18568_v57 }
 0x2fa   :  { %13087 = vmatprep.subr.bf16.mxu0 %v18569_v35  ;;  %13117 = vmatprep.subr.bf16.mxu1 %v18537_v0 }
 0x2fb   :  { %1508 = vmatprep.mubr.f32.mxu0 %v18539_v3  ;;  %11264 = vmatprep.mubr.msk.f32.mxu1 %vm15995_vm0, %v18539_v3 }
 0x2fd   :  { %13089 = vmatpush1.bf16.msra.mxu0 %v18570_v42  ;;  %13119 = vmatpush3.bf16.msra.mxu1 %v18571_v30 }
 0x2fe   :  { %13091 = vmatprep.subr.bf16.mxu0 %v18572_v62  ;;  %13120 = vmatprep.subr.bf16.mxu1 %v18537_v0 }
 0x301   :  { %13093 = vmatpush1.bf16.msra.mxu0 %v18573_v8  ;;  %13122 = vmatpush3.bf16.msra.mxu1 %v18574_v59 }
 0x302   :  { %13095 = vmatprep.subr.bf16.mxu0 %v18575_v19  ;;  %13123 = vmatprep.subr.bf16.mxu1 %v18537_v0 }
 0x305   :  { %13097 = vmatpush1.bf16.msra.mxu0 %v18576_v1  ;;  %13125 = vmatpush3.bf16.msra.mxu1 %v18577_v47 }
 0x306   :  { %13099 = vmatprep.subr.bf16.mxu0 %v18578_v52  ;;  %13126 = vmatprep.subr.bf16.mxu1 %v18537_v0 }
 0x309   :  { %13101 = vmatpush1.bf16.msra.mxu0 %v16504_v25  ;;  %13128 = vmatpush3.bf16.msra.mxu1 %v16506_v20 }
 0x30a   :  { %13103 = vmatprep.subr.bf16.mxu0 %v18579_v53  ;;  %13129 = vmatprep.subr.bf16.mxu1 %v18537_v0 }
 0x30d   :  { %13105 = vmatpush1.bf16.msra.mxu0 %v18580_v21  ;;  %13131 = vmatpush3.bf16.msra.mxu1 %v16516_v38 }
 0x30e   :  { %13107 = vmatprep.subr.bf16.mxu0 %v16520_v15  ;;  %13132 = vmatprep.subr.bf16.mxu1 %v18537_v0 }
 0x311   :  { %13109 = vmatpush1.bf16.msra.mxu0 %v16524_v43  ;;  %13134 = vmatpush3.bf16.msra.mxu1 %v16526_v10 }
 0x312   :  { %13111 = vmatprep.subr.bf16.mxu0 %v16530_v26  ;;  %13135 = vmatprep.subr.bf16.mxu1 %v18537_v0 }
 0x315   :  { %13113 = vmatpush1.bf16.msra.mxu0 %v16534_v31  ;;  %13137 = vmatpush3.bf16.msra.mxu1 %v16536_v34 }
 0x316   :  { %13139 = vmatprep.subr.bf16.mxu0 %v16241_v5  ;;  %10110 = vmatprep.subr.msk.mxu1 %vm187_vm1, %v16239_v4 }
 0x318   :  { %1509 = vmatmul.mubr.f32.vlgmr.msra.gmra.mrb[6].mxu0 %v16659_v39  ;;  %11265 = vmatmul.mubr.f32.vlgmr.msra.gmra.mrb[16].mxu1 %v16659_v39 }
 0x319   :  { %13141 = vmatpush1.bf16.msra.mxu0 %v16246_v9  ;;  %10111 = vmatpush1.msk.msra.mxu1 %vm187_vm1, %v16710_v48 }
 0x31a   :  { %1675 = vmatprep.mubr.f32.mxu1 %v18539_v3  ;;  %13143 = vmatprep.subr.bf16.mxu0 %v16250_v12 }
 0x31b   :  { %11267 = vmatprep.subr.mxu1 %v18539_v3  ;;  %1816 = vmatprep.mubr.f32.mxu0 %v18539_v3 }
 0x31c   :  { %10112 = vmatmul.mubr.msk.f32.vlgmr.msra.gmra.mrb[18].mxu1 %vm183_vm2, %v10109_v6 }
 0x31d   :  { %13145 = vmatpush1.bf16.msra.mxu0 %v16257_v17  ;;  %11268 = vmatpush3.msk.msra.mxu1 %vm187_vm1, %v16726_v29 }
 0x31e   :  { %11269 = vmatprep.mubr.msk.f32.mxu1 %vm15995_vm0, %v18539_v3  ;;  %13170 = vmatprep.subr.bf16.mxu1 %v18537_v0 }
 0x31f   :  { %13147 = vmatprep.subr.bf16.mxu0 %v16261_v18 }
 0x320   :  { %11270 = vmatmul.mubr.msk.f32.vlgmr.msra.gmra.mrb[20].mxu1 %vm183_vm2, %v10109_v6  ;;  %v18584_v6 = vld [vmem:[#allocation40_spill] sm:$0xff] }
 0x321   :  { %13172 = vmatpush3.bf16.msra.mxu1 %v16278_v32  ;;  %13149 = vmatpush1.bf16.msra.mxu0 %v16271_v24 }
 0x322   :  { %13173 = vmatprep.subr.bf16.mxu1 %v18537_v0  ;;  %13151 = vmatprep.subr.bf16.mxu0 %v16275_v28 }
 0x323   :  { %11304 = vmatprep.mubr.msk.f32.mxu1 %vm15995_vm0, %v18539_v3 }
 0x325   :  { %13175 = vmatpush3.bf16.msra.mxu1 %v16283_v36  ;;  %13153 = vmatpush1.bf16.msra.mxu0 %v16286_v37  ;;  %v18607_v37 = vld [vmem:[#allocation81_spill] sm:$0xff] }
 0x326   :  { %13176 = vmatprep.subr.bf16.mxu1 %v18537_v0  ;;  %13155 = vmatprep.subr.bf16.mxu0 %v16290_v40 }
 0x329   :  { %13178 = vmatpush3.bf16.msra.mxu1 %v16293_v45  ;;  %13157 = vmatpush1.bf16.msra.mxu0 %v16296_v46 }
 0x32a   :  { %13179 = vmatprep.subr.bf16.mxu1 %v18537_v0  ;;  %13159 = vmatprep.subr.bf16.mxu0 %v16300_v49 }
 0x32d   :  { %13181 = vmatpush3.bf16.msra.mxu1 %v16303_v54  ;;  %13161 = vmatpush1.bf16.msra.mxu0 %v16306_v55 }
 0x32e   :  { %13182 = vmatprep.subr.bf16.mxu1 %v18537_v0  ;;  %13163 = vmatprep.subr.bf16.mxu0 %v16310_v58  ;;  %v18606_v58 = vld [vmem:[#allocation80_spill] sm:$0xff] }
 0x331   :  { %13184 = vmatpush3.bf16.msra.mxu1 %v16313_v63  ;;  %13165 = vmatpush1.bf16.msra.mxu0 %v16316_v2 }
 0x332   :  { %13185 = vmatprep.subr.bf16.mxu1 %v18537_v0  ;;  %13167 = vmatprep.subr.bf16.mxu0 %v16320_v7  ;;  %v18605_v7 = vld [vmem:[#allocation79_spill] sm:$0xff] }
 0x335   :  { %13187 = vmatpush3.bf16.msra.mxu1 %v16323_v11  ;;  %13169 = vmatpush1.bf16.msra.mxu0 %v16326_v13  ;;  %v18595_v13 = vld [vmem:[#allocation50_spill] sm:$0xff]  ;;  %v18598_v11 = vld [vmem:[#allocation53_spill] sm:$0xff] }
 0x336   :  { %13188 = vmatprep.subr.bf16.mxu1 %v18537_v0  ;;  %13195 = vmatprep.subr.bf16.mxu0 %v16346_v27  ;;  %v18585_v27 = vld [vmem:[#allocation36_spill] sm:$0xff] }
 0x338   :  { %1817 = vmatmul.mubr.f32.vlgmr.msra.gmra.mrb[8].mxu0 %v16664_v23 }
 0x339   :  { %13190 = vmatpush3.bf16.msra.mxu1 %v16331_v16  ;;  %13197 = vmatpush1.bf16.msra.mxu0 %v16348_v33  ;;  %v18586_v16 = vld [vmem:[#allocation41_spill] sm:$0xff]  ;;  %v18587_v33 = vld [vmem:[#allocation43_spill] sm:$0xff] }
 0x33a   :  { %13191 = vmatprep.subr.bf16.mxu1 %v18537_v0  ;;  %13199 = vmatprep.subr.bf16.mxu0 %v18581_v41  ;;  %v18591_v41 = vld [vmem:[#allocation42_spill] sm:$0xff] }
 0x33b   :  { %1978 = vmatprep.mubr.f32.mxu0 %v18539_v3 }
 0x33d   :  { %13193 = vmatpush3.bf16.msra.mxu1 %v18582_v14  ;;  %13201 = vmatpush1.bf16.msra.mxu0 %v18583_v56  ;;  %v18588_v14 = vld [vmem:[#allocation39_spill] sm:$0xff]  ;;  %v18589_v56 = vld [vmem:[#allocation44_spill] sm:$0xff] }
 0x33e   :  { %13226 = vmatprep.subr.bf16.mxu1 %v18537_v0  ;;  %13203 = vmatprep.subr.bf16.mxu0 %v18584_v6  ;;  %v18590_v6 = vld [vmem:[#allocation46_spill] sm:$0xff] }
 0x340   :  { %11305 = vmatmul.mubr.f32.vlgmr.msra.gmra.mrb[22].mxu1 %v16664_v23 }
 0x341   :  { %13228 = vmatpush3.bf16.msra.mxu1 %v18585_v27  ;;  %13205 = vmatpush1.bf16.msra.mxu0 %v18586_v16  ;;  %v18592_v27 = vld [vmem:[#allocation47_spill] sm:$0xff]  ;;  %v18593_v16 = vld [vmem:[#allocation49_spill] sm:$0xff] }
 0x342   :  { %13229 = vmatprep.subr.bf16.mxu1 %v18537_v0  ;;  %13207 = vmatprep.subr.bf16.mxu0 %v18587_v33  ;;  %v18594_v33 = vld [vmem:[#allocation45_spill] sm:$0xff] }
 0x343   :  { %11339 = vmatprep.mubr.msk.f32.mxu1 %vm15995_vm0, %v18539_v3 }
 0x345   :  { %13231 = vmatpush3.bf16.msra.mxu1 %v18588_v14  ;;  %13209 = vmatpush1.bf16.msra.mxu0 %v18589_v56  ;;  %v18596_v14 = vld [vmem:[#allocation52_spill] sm:$0xff] }
 0x346   :  { %13232 = vmatprep.subr.bf16.mxu1 %v18537_v0  ;;  %13211 = vmatprep.subr.bf16.mxu0 %v18590_v6  ;;  %v18597_v56 = vld [vmem:[#allocation48_spill] sm:$0xff] }
 0x347   :  { %v18601_v6 = vld [vmem:[#allocation56_spill] sm:$0xff] }
 0x349   :  { %13234 = vmatpush3.bf16.msra.mxu1 %v18591_v41  ;;  %13213 = vmatpush1.bf16.msra.mxu0 %v18592_v27  ;;  %v18599_v41 = vld [vmem:[#allocation55_spill] sm:$0xff] }
 0x34a   :  { %13235 = vmatprep.subr.bf16.mxu1 %v18537_v0  ;;  %13215 = vmatprep.subr.bf16.mxu0 %v18593_v16  ;;  %v18600_v27 = vld [vmem:[#allocation51_spill] sm:$0xff] }
 0x34d   :  { %13237 = vmatpush3.bf16.msra.mxu1 %v18594_v33  ;;  %13217 = vmatpush1.bf16.msra.mxu0 %v18595_v13  ;;  %v18602_v33 = vld [vmem:[#allocation58_spill] sm:$0xff] }
 0x34e   :  { %13238 = vmatprep.subr.bf16.mxu1 %v18537_v0  ;;  %13219 = vmatprep.subr.bf16.mxu0 %v18596_v14  ;;  %v18603_v13 = vld [vmem:[#allocation54_spill] sm:$0xff]  ;;  %v18604_v14 = vld [vmem:[#allocation57_spill] sm:$0xff] }
 0x351   :  { %13240 = vmatpush3.bf16.msra.mxu1 %v18597_v56  ;;  %13221 = vmatpush1.bf16.msra.mxu0 %v18598_v11 }
 0x352   :  { %13241 = vmatprep.subr.bf16.mxu1 %v18537_v0  ;;  %13223 = vmatprep.subr.bf16.mxu0 %v18599_v41 }
 0x355   :  { %13243 = vmatpush3.bf16.msra.mxu1 %v18600_v27  ;;  %13225 = vmatpush1.bf16.msra.mxu0 %v18601_v6 }
 0x356   :  { %13244 = vmatprep.subr.bf16.mxu1 %v18537_v0  ;;  %13251 = vmatprep.subr.bf16.mxu0 %v18602_v33 }
 0x359   :  { %13246 = vmatpush3.bf16.msra.mxu1 %v18603_v13 }
 0x35a   :  { %13247 = vmatprep.subr.bf16.mxu1 %v18537_v0 }
 0x35d   :  { %13249 = vmatpush3.bf16.msra.mxu1 %v18604_v14 }
 0x35e   :  { %13282 = vmatprep.subr.bf16.mxu1 %v18537_v0 }
 0x3cb   :  { %v1440_v11 = vpop.f32.mrb[14].mxu1 }
 0x3cc   :  { %v11231_v56 = vpop.f32.mrb[15].mxu1 }
 0x3eb   :  { %v1510_v16 = vpop.f32.mrb[6].mxu0  ;;  %v1581_v41 = vpop.f32.mrb[16].mxu1 }
 0x3ec   :  { %v15401_v27 = vadd.f32 %v18605_v7, %v1510_v16  ;;  %v1512_v2 = vpop.f32.mrb[7].mxu0  ;;  %v11266_v6 = vpop.f32.mrb[17].mxu1  ;;  %v1582_v36 = vadd.f32 %v1581_v41, %v18607_v37 }
 0x3ed   :  { %v15403_v55 = vadd.f32 %v18606_v58, %v1512_v2  ;;  %v1441_v6 = vadd.f32 %v1440_v11, %v16653_v22 }
 0x3ee   :  { %v10107_v63 = vmul.f32 -1.442695, %v15401_v27 }
 0x3ef   :  { %v1677_v33 = vpop.f32.mrb[18].mxu1  ;;  %v10108_v54 = vmul.f32 -1.442695, %v15403_v55 }
 0x3f0   :  { %15585 = vpow2.f32 %v10107_v63  ;;  %v1679_v13 = vpop.f32.mrb[19].mxu1  ;;  %v15405_v63 = vadd.f32 %v18564_v60, %v1677_v33 }
 0x3f1   :  { %15587 = vpow2.f32 %v10108_v54  ;;  %v15408_v55 = vadd.f32 %v18565_v44, %v1679_v13 }
 0x3f3   :  { %v1748_v49 = vpop.f32.mrb[20].mxu1 }
 0x3f4   :  { %v11271_v46 = vpop.f32.mrb[21].mxu1 }
 0x3fa   :  { %v15586_v14 = vpop.eup %15585 }
 0x3fb   :  { %v1589_v45 = vadd.f32 1.0, %v15586_v14  ;;  %v15588_v56 = vpop.eup %15587 }
 0x3fc   :  { %v1596_v40 = vadd.f32 1.0, %v15588_v56 }
 0x3fd   :  { %15589 = vrcp.f32 %v1589_v45 }
 0x3fe   :  { %15591 = vrcp.f32 %v1596_v40 }
 0x407   :  { %v15590_v16 = vpop.eup %15589 }
 0x408   :  { %v1599_v27 = vmul.f32 %v15590_v16, %v1582_v36  ;;  %v15592_v56 = vpop.eup %15591 }
 0x409   :  { %v1602_v28 = vsub.f32 1.0, %v15592_v56  ;;  %v1604_v40 = vmul.f32 %v15592_v56, %v16659_v39  ;;  %v18610_v56 = vld [vmem:[#allocation19_spill] sm:$0xff] }
 0x40a   :  { %v1600_v2 = vadd.f32 %v1599_v27, %v1441_v6 }
 0x40b   :  { %v1818_v58 = vpop.f32.mrb[8].mxu0 }
 0x40c   :  { %15593 = vtanh.f32 %v1600_v2  ;;  %v15406_v46 = vadd.f32 %v15405_v63, %v1818_v58  ;;  %v1820_v54 = vpop.f32.mrb[9].mxu0  ;;  %v1749_v63 = vadd.f32 %v1748_v49, %v18566_v50  ;;  %v10119_v49 = vld [vmem:[%s18482_s2 + $0x18] sm:$0xff] }
 0x40d   :  { %v15409_v14 = vadd.f32 %v15408_v55, %v1820_v54 }
 0x40e   :  { %v10115_v45 = vmul.f32 -1.442695, %v15406_v46 }
 0x40f   :  { %v10116_v7 = vmul.f32 -1.442695, %v15409_v14 }
 0x410   :  { %15595 = vpow2.f32 %v10115_v45  ;;  %v18609_v45 = vld [vmem:[#allocation18_spill] sm:$0xff] }
 0x411   :  { %15597 = vpow2.f32 %v10116_v7 }
 0x413   :  { %v1889_v41 = vpop.f32.mrb[22].mxu1 }
 0x414   :  { %v11306_v37 = vpop.f32.mrb[23].mxu1  ;;  %v1890_v27 = vadd.f32 %v1889_v41, %v16452_v61  ;;  %v18611_v41 = vld [vmem:[#allocation20_spill] sm:$0xff] }
 0x416   :  { %v15594_v11 = vpop.eup %15593 }
 0x417   :  { %v1603_v36 = vmul.f32 %v15594_v11, %v1602_v28  ;;  %v18612_v11 = vld [vmem:[#allocation21_spill] sm:$0xff] }
 0x419   :  { %v16809_v33 = vadd.f32 %v1604_v40, %v1603_v36  ;;  %v18613_v36 = vld [vmem:[#allocation22_spill] sm:$0xff]  ;;  %v18614_v40 = vld [vmem:[#allocation23_spill] sm:$0xff] }
 0x41a   :  { %v15596_v13 = vpop.eup %15595 }
 0x41b   :  { %v1897_v16 = vadd.f32 1.0, %v15596_v13  ;;  %v15598_v58 = vpop.eup %15597  ;;  %v18615_v13 = vld [vmem:[#allocation24_spill] sm:$0xff] }
 0x41c   :  { %v1904_v6 = vadd.f32 1.0, %v15598_v58  ;;  %v18617_v58 = vld [vmem:[#allocation26_spill] sm:$0xff] }
 0x41d   :  { %15599 = vrcp.f32 %v1897_v16  ;;  %v18616_v16 = vld [vmem:[#allocation25_spill] sm:$0xff] }
 0x41e   :  { %15601 = vrcp.f32 %v1904_v6  ;;  %v18618_v6 = vld [vmem:[#allocation27_spill] sm:$0xff] }
 0x427   :  { %v15600_v2 = vpop.eup %15599 }
 0x428   :  { %v1907_v37 = vmul.f32 %v15600_v2, %v1890_v27  ;;  %v15602_v7 = vpop.eup %15601  ;;  %v18619_v27 = vld [vmem:[#allocation28_spill] sm:$0xff]  ;;  %v18620_v2 = vld [vmem:[#allocation29_spill] sm:$0xff] }
 0x429   :  { %v1910_v28 = vsub.f32 1.0, %v15602_v7  ;;  %v1912_v54 = vmul.f32 %v15602_v7, %v16664_v23  ;;  %v18608_v23 = vld [vmem:[#allocation17_spill] sm:$0xff]  ;;  %v18624_v7 = vld [vmem:[#allocation32_spill] sm:$0xff] }
 0x42a   :  { %v1908_v55 = vadd.f32 %v1907_v37, %v1749_v63  ;;  %v18621_v63 = vld [vmem:[#allocation30_spill] sm:$0xff]  ;;  %v18622_v37 = vld [vmem:[#allocation31_spill] sm:$0xff] }
 0x42c   :  { %15603 = vtanh.f32 %v1908_v55  ;;  %v18623_v55 = vld [vmem:[#allocation34_spill] sm:$0xff] }
 0x436   :  { %v15604_v46 = vpop.eup %15603 }
 0x437   :  { %v1911_v39 = vmul.f32 %v15604_v46, %v1910_v28  ;;  %v18625_v28 = vld [vmem:[#allocation35_spill] sm:$0xff]  ;;  %v18626_v46 = vld [vmem:[#allocation37_spill] sm:$0xff] }
 0x439   :  { %v16814_v14 = vadd.f32 %v1912_v54, %v1911_v39  ;;  %v18627_v39 = vld [vmem:[#allocation33_spill] sm:$0xff]  ;;  %v18628_v54 = vld [vmem:[#allocation38_spill] sm:$0xff] }
 0x43b   :  { %1979 = vmatmul.mubr.f32.vlgmr.msra.gmra.mrb[10].mxu0 %v16814_v14  ;;  %11340 = vmatmul.mubr.f32.vlgmr.msra.gmra.mrb[24].mxu1 %v16814_v14 }
 0x43c   :  { %13253 = vmatpush1.bf16.msra.mxu0 %v18567_v51  ;;  %13284 = vmatpush3.bf16.msra.mxu1 %v18568_v57 }
 0x43d   :  { %13255 = vmatprep.subr.bf16.mxu0 %v18569_v35  ;;  %13285 = vmatprep.subr.bf16.mxu1 %v18537_v0 }
 0x43e   :  { %2119 = vmatprep.mubr.f32.mxu0 %v18539_v3  ;;  %11374 = vmatprep.mubr.msk.f32.mxu1 %vm15995_vm0, %v18539_v3 }
 0x440   :  { %13257 = vmatpush1.bf16.msra.mxu0 %v18570_v42  ;;  %13287 = vmatpush3.bf16.msra.mxu1 %v18571_v30 }
 0x441   :  { %13259 = vmatprep.subr.bf16.mxu0 %v18572_v62  ;;  %13288 = vmatprep.subr.bf16.mxu1 %v18537_v0 }
 0x444   :  { %13261 = vmatpush1.bf16.msra.mxu0 %v18573_v8  ;;  %13290 = vmatpush3.bf16.msra.mxu1 %v18574_v59 }
 0x445   :  { %13263 = vmatprep.subr.bf16.mxu0 %v18575_v19  ;;  %13291 = vmatprep.subr.bf16.mxu1 %v18537_v0 }
 0x448   :  { %13265 = vmatpush1.bf16.msra.mxu0 %v18576_v1  ;;  %13293 = vmatpush3.bf16.msra.mxu1 %v18577_v47 }
 0x449   :  { %13267 = vmatprep.subr.bf16.mxu0 %v18578_v52  ;;  %13294 = vmatprep.subr.bf16.mxu1 %v18537_v0 }
 0x44c   :  { %13269 = vmatpush1.bf16.msra.mxu0 %v16504_v25  ;;  %13296 = vmatpush3.bf16.msra.mxu1 %v16506_v20 }
 0x44d   :  { %13271 = vmatprep.subr.bf16.mxu0 %v18579_v53  ;;  %13297 = vmatprep.subr.bf16.mxu1 %v18537_v0 }
 0x450   :  { %13273 = vmatpush1.bf16.msra.mxu0 %v18580_v21  ;;  %13299 = vmatpush3.bf16.msra.mxu1 %v16516_v38 }
 0x451   :  { %13275 = vmatprep.subr.bf16.mxu0 %v16520_v15  ;;  %13300 = vmatprep.subr.bf16.mxu1 %v18537_v0 }
 0x454   :  { %13277 = vmatpush1.bf16.msra.mxu0 %v16524_v43  ;;  %13302 = vmatpush3.bf16.msra.mxu1 %v16526_v10 }
 0x455   :  { %13279 = vmatprep.subr.bf16.mxu0 %v16530_v26  ;;  %13303 = vmatprep.subr.bf16.mxu1 %v18537_v0 }
 0x458   :  { %13281 = vmatpush1.bf16.msra.mxu0 %v16534_v31  ;;  %13305 = vmatpush3.bf16.msra.mxu1 %v16536_v34 }
 0x459   :  { %13307 = vmatprep.subr.bf16.mxu0 %v16241_v5  ;;  %10120 = vmatprep.subr.msk.mxu1 %vm187_vm1, %v16239_v4 }
 0x45b   :  { %2120 = vmatmul.mubr.f32.vlgmr.msra.gmra.mrb[10].mxu0 %v16809_v33  ;;  %11375 = vmatmul.mubr.f32.vlgmr.msra.gmra.mrb[26].mxu1 %v16809_v33 }
 0x45c   :  { %13309 = vmatpush1.bf16.msra.mxu0 %v16246_v9  ;;  %10121 = vmatpush1.msk.msra.mxu1 %vm187_vm1, %v16710_v48 }
 0x45d   :  { %2286 = vmatprep.mubr.f32.mxu1 %v18539_v3  ;;  %13311 = vmatprep.subr.bf16.mxu0 %v16250_v12 }
 0x45e   :  { %11377 = vmatprep.subr.mxu1 %v18539_v3  ;;  %2427 = vmatprep.mubr.f32.mxu0 %v18539_v3 }
 0x45f   :  { %10122 = vmatmul.mubr.msk.f32.vlgmr.msra.gmra.mrb[28].mxu1 %vm183_vm2, %v10119_v49 }
 0x460   :  { %13313 = vmatpush1.bf16.msra.mxu0 %v16257_v17  ;;  %11378 = vmatpush3.msk.msra.mxu1 %vm187_vm1, %v16726_v29 }
 0x461   :  { %11379 = vmatprep.mubr.msk.f32.mxu1 %vm15995_vm0, %v18539_v3  ;;  %13338 = vmatprep.subr.bf16.mxu1 %v18537_v0 }
 0x462   :  { %13315 = vmatprep.subr.bf16.mxu0 %v16261_v18 }
 0x463   :  { %11380 = vmatmul.mubr.msk.f32.vlgmr.msra.gmra.mrb[30].mxu1 %vm183_vm2, %v10119_v49  ;;  %v18629_v49 = vld [vmem:[#allocation40_spill] sm:$0xff] }
 0x464   :  { %13340 = vmatpush3.bf16.msra.mxu1 %v16278_v32  ;;  %13317 = vmatpush1.bf16.msra.mxu0 %v16271_v24 }
 0x465   :  { %13341 = vmatprep.subr.bf16.mxu1 %v18537_v0  ;;  %13319 = vmatprep.subr.bf16.mxu0 %v18608_v23 }
 0x466   :  { %11414 = vmatprep.mubr.msk.f32.mxu1 %vm15995_vm0, %v18539_v3 }
 0x468   :  { %13343 = vmatpush3.bf16.msra.mxu1 %v18609_v45  ;;  %13321 = vmatpush1.bf16.msra.mxu0 %v18610_v56  ;;  %v18652_v56 = vld [vmem:[#allocation81_spill] sm:$0xff] }
 0x469   :  { %13344 = vmatprep.subr.bf16.mxu1 %v18537_v0  ;;  %13323 = vmatprep.subr.bf16.mxu0 %v18611_v41 }
 0x46c   :  { %13346 = vmatpush3.bf16.msra.mxu1 %v18612_v11  ;;  %13325 = vmatpush1.bf16.msra.mxu0 %v18613_v36 }
 0x46d   :  { %13347 = vmatprep.subr.bf16.mxu1 %v18537_v0  ;;  %13327 = vmatprep.subr.bf16.mxu0 %v18614_v40 }
 0x470   :  { %13349 = vmatpush3.bf16.msra.mxu1 %v18615_v13  ;;  %13329 = vmatpush1.bf16.msra.mxu0 %v18616_v16 }
 0x471   :  { %13350 = vmatprep.subr.bf16.mxu1 %v18537_v0  ;;  %13331 = vmatprep.subr.bf16.mxu0 %v18617_v58  ;;  %v18651_v58 = vld [vmem:[#allocation80_spill] sm:$0xff] }
 0x474   :  { %13352 = vmatpush3.bf16.msra.mxu1 %v18618_v6  ;;  %13333 = vmatpush1.bf16.msra.mxu0 %v18619_v27 }
 0x475   :  { %13353 = vmatprep.subr.bf16.mxu1 %v18537_v0  ;;  %13335 = vmatprep.subr.bf16.mxu0 %v18620_v2  ;;  %v18650_v2 = vld [vmem:[#allocation79_spill] sm:$0xff] }
 0x478   :  { %13355 = vmatpush3.bf16.msra.mxu1 %v18621_v63  ;;  %13337 = vmatpush1.bf16.msra.mxu0 %v18622_v37  ;;  %v18640_v37 = vld [vmem:[#allocation50_spill] sm:$0xff]  ;;  %v18643_v63 = vld [vmem:[#allocation53_spill] sm:$0xff] }
 0x479   :  { %13356 = vmatprep.subr.bf16.mxu1 %v18537_v0  ;;  %13363 = vmatprep.subr.bf16.mxu0 %v18623_v55  ;;  %v18630_v55 = vld [vmem:[#allocation36_spill] sm:$0xff] }
 0x47b   :  { %2428 = vmatmul.mubr.f32.vlgmr.msra.gmra.mrb[12].mxu0 %v16814_v14 }
 0x47c   :  { %13358 = vmatpush3.bf16.msra.mxu1 %v18624_v7  ;;  %13365 = vmatpush1.bf16.msra.mxu0 %v18625_v28  ;;  %v18631_v7 = vld [vmem:[#allocation41_spill] sm:$0xff]  ;;  %v18632_v28 = vld [vmem:[#allocation43_spill] sm:$0xff] }
 0x47d   :  { %13359 = vmatprep.subr.bf16.mxu1 %v18537_v0  ;;  %13367 = vmatprep.subr.bf16.mxu0 %v18626_v46  ;;  %v18636_v46 = vld [vmem:[#allocation42_spill] sm:$0xff] }
 0x47e   :  { %2589 = vmatprep.mubr.f32.mxu0 %v18539_v3 }
 0x480   :  { %13361 = vmatpush3.bf16.msra.mxu1 %v18627_v39  ;;  %13369 = vmatpush1.bf16.msra.mxu0 %v18628_v54  ;;  %v18633_v39 = vld [vmem:[#allocation39_spill] sm:$0xff]  ;;  %v18634_v54 = vld [vmem:[#allocation44_spill] sm:$0xff] }
 0x481   :  { %13394 = vmatprep.subr.bf16.mxu1 %v18537_v0  ;;  %13371 = vmatprep.subr.bf16.mxu0 %v18629_v49  ;;  %v18635_v49 = vld [vmem:[#allocation46_spill] sm:$0xff] }
 0x483   :  { %11415 = vmatmul.mubr.f32.vlgmr.msra.gmra.mrb[32].mxu1 %v16814_v14 }
 0x484   :  { %13396 = vmatpush3.bf16.msra.mxu1 %v18630_v55  ;;  %13373 = vmatpush1.bf16.msra.mxu0 %v18631_v7  ;;  %v18637_v55 = vld [vmem:[#allocation47_spill] sm:$0xff]  ;;  %v18638_v7 = vld [vmem:[#allocation49_spill] sm:$0xff] }
 0x485   :  { %13397 = vmatprep.subr.bf16.mxu1 %v18537_v0  ;;  %13375 = vmatprep.subr.bf16.mxu0 %v18632_v28  ;;  %v18639_v28 = vld [vmem:[#allocation45_spill] sm:$0xff] }
 0x486   :  { %11449 = vmatprep.mubr.msk.f32.mxu1 %vm15995_vm0, %v18539_v3 }
 0x488   :  { %13399 = vmatpush3.bf16.msra.mxu1 %v18633_v39  ;;  %13377 = vmatpush1.bf16.msra.mxu0 %v18634_v54  ;;  %v18641_v39 = vld [vmem:[#allocation52_spill] sm:$0xff] }
 0x489   :  { %13400 = vmatprep.subr.bf16.mxu1 %v18537_v0  ;;  %13379 = vmatprep.subr.bf16.mxu0 %v18635_v49  ;;  %v18642_v54 = vld [vmem:[#allocation48_spill] sm:$0xff] }
 0x48a   :  { %v18646_v49 = vld [vmem:[#allocation56_spill] sm:$0xff] }
 0x48c   :  { %13402 = vmatpush3.bf16.msra.mxu1 %v18636_v46  ;;  %13381 = vmatpush1.bf16.msra.mxu0 %v18637_v55  ;;  %v18644_v46 = vld [vmem:[#allocation55_spill] sm:$0xff] }
 0x48d   :  { %13403 = vmatprep.subr.bf16.mxu1 %v18537_v0  ;;  %13383 = vmatprep.subr.bf16.mxu0 %v18638_v7  ;;  %v18645_v55 = vld [vmem:[#allocation51_spill] sm:$0xff] }
 0x490   :  { %13405 = vmatpush3.bf16.msra.mxu1 %v18639_v28  ;;  %13385 = vmatpush1.bf16.msra.mxu0 %v18640_v37  ;;  %v18647_v28 = vld [vmem:[#allocation58_spill] sm:$0xff] }
 0x491   :  { %13406 = vmatprep.subr.bf16.mxu1 %v18537_v0  ;;  %13387 = vmatprep.subr.bf16.mxu0 %v18641_v39  ;;  %v18648_v37 = vld [vmem:[#allocation54_spill] sm:$0xff]  ;;  %v18649_v39 = vld [vmem:[#allocation57_spill] sm:$0xff] }
 0x494   :  { %13408 = vmatpush3.bf16.msra.mxu1 %v18642_v54  ;;  %13389 = vmatpush1.bf16.msra.mxu0 %v18643_v63 }
 0x495   :  { %13409 = vmatprep.subr.bf16.mxu1 %v18537_v0  ;;  %13391 = vmatprep.subr.bf16.mxu0 %v18644_v46 }
 0x498   :  { %13411 = vmatpush3.bf16.msra.mxu1 %v18645_v55  ;;  %13393 = vmatpush1.bf16.msra.mxu0 %v18646_v49 }
 0x499   :  { %13412 = vmatprep.subr.bf16.mxu1 %v18537_v0  ;;  %13419 = vmatprep.subr.bf16.mxu0 %v18647_v28 }
 0x49c   :  { %13414 = vmatpush3.bf16.msra.mxu1 %v18648_v37 }
 0x49d   :  { %13415 = vmatprep.subr.bf16.mxu1 %v18537_v0 }
 0x4a0   :  { %13417 = vmatpush3.bf16.msra.mxu1 %v18649_v39 }
 0x4a1   :  { %13450 = vmatprep.subr.bf16.mxu1 %v18537_v0 }
 0x50e   :  { %v2051_v63 = vpop.f32.mrb[24].mxu1 }
 0x50f   :  { %v11341_v54 = vpop.f32.mrb[25].mxu1 }
 0x52e   :  { %v2121_v7 = vpop.f32.mrb[10].mxu0  ;;  %v2192_v46 = vpop.f32.mrb[26].mxu1 }
 0x52f   :  { %v15411_v55 = vadd.f32 %v18650_v2, %v2121_v7  ;;  %v2123_v27 = vpop.f32.mrb[11].mxu0  ;;  %v11376_v49 = vpop.f32.mrb[27].mxu1  ;;  %v2193_v45 = vadd.f32 %v2192_v46, %v18652_v56 }
 0x530   :  { %v15413_v16 = vadd.f32 %v18651_v58, %v2123_v27  ;;  %v2052_v49 = vadd.f32 %v2051_v63, %v16653_v22 }
 0x531   :  { %v10117_v6 = vmul.f32 -1.442695, %v15411_v55 }
 0x532   :  { %v2288_v28 = vpop.f32.mrb[28].mxu1  ;;  %v10118_v13 = vmul.f32 -1.442695, %v15413_v16 }
 0x533   :  { %15605 = vpow2.f32 %v10117_v6  ;;  %v2290_v37 = vpop.f32.mrb[29].mxu1  ;;  %v15415_v6 = vadd.f32 %v18564_v60, %v2288_v28 }
 0x534   :  { %15607 = vpow2.f32 %v10118_v13  ;;  %v15418_v16 = vadd.f32 %v18565_v44, %v2290_v37 }
 0x536   :  { %v2359_v40 = vpop.f32.mrb[30].mxu1 }
 0x537   :  { %v11381_v36 = vpop.f32.mrb[31].mxu1 }
 0x53d   :  { %v15606_v39 = vpop.eup %15605 }
 0x53e   :  { %v2200_v11 = vadd.f32 1.0, %v15606_v39  ;;  %v15608_v54 = vpop.eup %15607 }
 0x53f   :  { %v2207_v41 = vadd.f32 1.0, %v15608_v54 }
 0x540   :  { %15609 = vrcp.f32 %v2200_v11 }
 0x541   :  { %15611 = vrcp.f32 %v2207_v41 }
 0x54a   :  { %v15610_v7 = vpop.eup %15609 }
 0x54b   :  { %v2210_v55 = vmul.f32 %v15610_v7, %v2193_v45  ;;  %v15612_v54 = vpop.eup %15611 }
 0x54c   :  { %v2213_v23 = vsub.f32 1.0, %v15612_v54  ;;  %v2215_v41 = vmul.f32 %v15612_v54, %v16809_v33  ;;  %v18657_v54 = vld [vmem:[#allocation21_spill] sm:$0xff] }
 0x54d   :  { %v2211_v27 = vadd.f32 %v2210_v55, %v2052_v49 }
 0x54e   :  { %v2429_v58 = vpop.f32.mrb[12].mxu0 }
 0x54f   :  { %15613 = vtanh.f32 %v2211_v27  ;;  %v15416_v36 = vadd.f32 %v15415_v6, %v2429_v58  ;;  %v2431_v13 = vpop.f32.mrb[13].mxu0  ;;  %v2360_v6 = vadd.f32 %v2359_v40, %v18566_v50  ;;  %v18655_v40 = vld [vmem:[#allocation19_spill] sm:$0xff] }
 0x550   :  { %v15419_v39 = vadd.f32 %v15418_v16, %v2431_v13 }
 0x551   :  { %v10125_v11 = vmul.f32 -1.442695, %v15416_v36 }
 0x552   :  { %v10126_v2 = vmul.f32 -1.442695, %v15419_v39 }
 0x553   :  { %15615 = vpow2.f32 %v10125_v11  ;;  %v18656_v11 = vld [vmem:[#allocation20_spill] sm:$0xff] }
 0x554   :  { %15617 = vpow2.f32 %v10126_v2 }
 0x556   :  { %v2500_v46 = vpop.f32.mrb[32].mxu1 }
 0x557   :  { %v11416_v56 = vpop.f32.mrb[33].mxu1  ;;  %v2501_v55 = vadd.f32 %v2500_v46, %v16452_v61  ;;  %v18658_v46 = vld [vmem:[#allocation22_spill] sm:$0xff] }
 0x559   :  { %v15614_v63 = vpop.eup %15613 }
 0x55a   :  { %v2214_v45 = vmul.f32 %v15614_v63, %v2213_v23  ;;  %v18659_v63 = vld [vmem:[#allocation23_spill] sm:$0xff] }
 0x55c   :  { %v16949_v28 = vadd.f32 %v2215_v41, %v2214_v45  ;;  %v18660_v45 = vld [vmem:[#allocation24_spill] sm:$0xff]  ;;  %v18661_v41 = vld [vmem:[#allocation25_spill] sm:$0xff] }
 0x55d   :  { %v15616_v37 = vpop.eup %15615 }
 0x55e   :  { %v2508_v7 = vadd.f32 1.0, %v15616_v37  ;;  %v15618_v58 = vpop.eup %15617  ;;  %v18662_v37 = vld [vmem:[#allocation26_spill] sm:$0xff] }
 0x55f   :  { %v2515_v49 = vadd.f32 1.0, %v15618_v58  ;;  %v18664_v58 = vld [vmem:[#allocation28_spill] sm:$0xff] }
 0x560   :  { %15619 = vrcp.f32 %v2508_v7  ;;  %v18663_v7 = vld [vmem:[#allocation27_spill] sm:$0xff] }
 0x561   :  { %15621 = vrcp.f32 %v2515_v49  ;;  %v18665_v49 = vld [vmem:[#allocation29_spill] sm:$0xff] }
 0x56a   :  { %v15620_v27 = vpop.eup %15619 }
 0x56b   :  { %v2518_v56 = vmul.f32 %v15620_v27, %v2501_v55  ;;  %v15622_v2 = vpop.eup %15621  ;;  %v18666_v55 = vld [vmem:[#allocation30_spill] sm:$0xff]  ;;  %v18667_v27 = vld [vmem:[#allocation31_spill] sm:$0xff] }
 0x56c   :  { %v2521_v23 = vsub.f32 1.0, %v15622_v2  ;;  %v2523_v13 = vmul.f32 %v15622_v2, %v16814_v14  ;;  %v10129_v14 = vld [vmem:[%s18482_s2 + $0x20] sm:$0xff] }
 0x56d   :  { %v2519_v16 = vadd.f32 %v2518_v56, %v2360_v6  ;;  %v18668_v6 = vld [vmem:[#allocation34_spill] sm:$0xff]  ;;  %v18669_v56 = vld [vmem:[#allocation32_spill] sm:$0xff]  ;;  %v18671_v2 = vld [vmem:[#allocation37_spill] sm:$0xff] }
 0x56f   :  { %15623 = vtanh.f32 %v2519_v16  ;;  %v18670_v16 = vld [vmem:[#allocation35_spill] sm:$0xff] }
 0x579   :  { %v15624_v36 = vpop.eup %15623 }
 0x57a   :  { %v2522_v33 = vmul.f32 %v15624_v36, %v2521_v23  ;;  %v18672_v23 = vld [vmem:[#allocation33_spill] sm:$0xff]  ;;  %v18673_v36 = vld [vmem:[#allocation38_spill] sm:$0xff] }
 0x57c   :  { %v16954_v39 = vadd.f32 %v2523_v13, %v2522_v33  ;;  %v18674_v33 = vld [vmem:[#allocation40_spill] sm:$0xff] }
 0x57d   :  { %v18675_v13 = vld [vmem:[#allocation36_spill] sm:$0xff] }
 0x57e   :  { %2590 = vmatmul.mubr.f32.vlgmr.msra.gmra.mrb[14].mxu0 %v16954_v39  ;;  %11450 = vmatmul.mubr.f32.vlgmr.msra.gmra.mrb[34].mxu1 %v16954_v39 }
 0x57f   :  { %13421 = vmatpush1.bf16.msra.mxu0 %v18567_v51  ;;  %13452 = vmatpush3.bf16.msra.mxu1 %v18568_v57 }
 0x580   :  { %13423 = vmatprep.subr.bf16.mxu0 %v18569_v35  ;;  %13453 = vmatprep.subr.bf16.mxu1 %v18537_v0 }
 0x581   :  { %2730 = vmatprep.mubr.f32.mxu0 %v18539_v3  ;;  %11484 = vmatprep.mubr.msk.f32.mxu1 %vm15995_vm0, %v18539_v3 }
 0x583   :  { %13425 = vmatpush1.bf16.msra.mxu0 %v18570_v42  ;;  %13455 = vmatpush3.bf16.msra.mxu1 %v18571_v30 }
 0x584   :  { %13427 = vmatprep.subr.bf16.mxu0 %v18572_v62  ;;  %13456 = vmatprep.subr.bf16.mxu1 %v18537_v0 }
 0x587   :  { %13429 = vmatpush1.bf16.msra.mxu0 %v18573_v8  ;;  %13458 = vmatpush3.bf16.msra.mxu1 %v18574_v59 }
 0x588   :  { %13431 = vmatprep.subr.bf16.mxu0 %v18575_v19  ;;  %13459 = vmatprep.subr.bf16.mxu1 %v18537_v0 }
 0x58b   :  { %13433 = vmatpush1.bf16.msra.mxu0 %v18576_v1  ;;  %13461 = vmatpush3.bf16.msra.mxu1 %v18577_v47 }
 0x58c   :  { %13435 = vmatprep.subr.bf16.mxu0 %v18578_v52  ;;  %13462 = vmatprep.subr.bf16.mxu1 %v18537_v0 }
 0x58f   :  { %13437 = vmatpush1.bf16.msra.mxu0 %v16504_v25  ;;  %13464 = vmatpush3.bf16.msra.mxu1 %v16506_v20 }
 0x590   :  { %13439 = vmatprep.subr.bf16.mxu0 %v18579_v53  ;;  %13465 = vmatprep.subr.bf16.mxu1 %v18537_v0 }
 0x593   :  { %13441 = vmatpush1.bf16.msra.mxu0 %v18580_v21  ;;  %13467 = vmatpush3.bf16.msra.mxu1 %v16516_v38 }
 0x594   :  { %13443 = vmatprep.subr.bf16.mxu0 %v16520_v15  ;;  %13468 = vmatprep.subr.bf16.mxu1 %v18537_v0 }
 0x597   :  { %13445 = vmatpush1.bf16.msra.mxu0 %v16524_v43  ;;  %13470 = vmatpush3.bf16.msra.mxu1 %v16526_v10 }
 0x598   :  { %13447 = vmatprep.subr.bf16.mxu0 %v16530_v26  ;;  %13471 = vmatprep.subr.bf16.mxu1 %v18537_v0 }
 0x59b   :  { %13449 = vmatpush1.bf16.msra.mxu0 %v16534_v31  ;;  %13473 = vmatpush3.bf16.msra.mxu1 %v16536_v34 }
 0x59c   :  { %13475 = vmatprep.subr.bf16.mxu0 %v16241_v5  ;;  %10130 = vmatprep.subr.msk.mxu1 %vm187_vm1, %v16239_v4 }
 0x59e   :  { %2731 = vmatmul.mubr.f32.vlgmr.msra.gmra.mrb[14].mxu0 %v16949_v28  ;;  %11485 = vmatmul.mubr.f32.vlgmr.msra.gmra.mrb[36].mxu1 %v16949_v28 }
 0x59f   :  { %13477 = vmatpush1.bf16.msra.mxu0 %v16246_v9  ;;  %10131 = vmatpush1.msk.msra.mxu1 %vm187_vm1, %v16710_v48  ;;  %v18653_v48 = vld [vmem:[#allocation17_spill] sm:$0xff] }
 0x5a0   :  { %2897 = vmatprep.mubr.f32.mxu1 %v18539_v3  ;;  %13479 = vmatprep.subr.bf16.mxu0 %v16250_v12 }
 0x5a1   :  { %11487 = vmatprep.subr.mxu1 %v18539_v3  ;;  %3038 = vmatprep.mubr.f32.mxu0 %v18539_v3 }
 0x5a2   :  { %10132 = vmatmul.mubr.msk.f32.vlgmr.msra.gmra.mrb[38].mxu1 %vm183_vm2, %v10129_v14 }
 0x5a3   :  { %13481 = vmatpush1.bf16.msra.mxu0 %v16257_v17  ;;  %11488 = vmatpush3.msk.msra.mxu1 %vm187_vm1, %v16726_v29  ;;  %v18654_v29 = vld [vmem:[#allocation18_spill] sm:$0xff] }
 0x5a4   :  { %11489 = vmatprep.mubr.msk.f32.mxu1 %vm15995_vm0, %v18539_v3  ;;  %13506 = vmatprep.subr.bf16.mxu1 %v18537_v0 }
 0x5a5   :  { %13483 = vmatprep.subr.bf16.mxu0 %v16261_v18 }
 0x5a6   :  { %11490 = vmatmul.mubr.msk.f32.vlgmr.msra.gmra.mrb[40].mxu1 %vm183_vm2, %v10129_v14  ;;  %v18676_v14 = vld [vmem:[#allocation41_spill] sm:$0xff] }
 0x5a7   :  { %13508 = vmatpush3.bf16.msra.mxu1 %v16278_v32  ;;  %13485 = vmatpush1.bf16.msra.mxu0 %v16271_v24 }
 0x5a8   :  { %13509 = vmatprep.subr.bf16.mxu1 %v18537_v0  ;;  %13487 = vmatprep.subr.bf16.mxu0 %v18653_v48 }
 0x5a9   :  { %11524 = vmatprep.mubr.msk.f32.mxu1 %vm15995_vm0, %v18539_v3 }
 0x5ab   :  { %13511 = vmatpush3.bf16.msra.mxu1 %v18654_v29  ;;  %13489 = vmatpush1.bf16.msra.mxu0 %v18655_v40 }
 0x5ac   :  { %13512 = vmatprep.subr.bf16.mxu1 %v18537_v0  ;;  %13491 = vmatprep.subr.bf16.mxu0 %v18656_v11 }
 0x5af   :  { %13514 = vmatpush3.bf16.msra.mxu1 %v18657_v54  ;;  %13493 = vmatpush1.bf16.msra.mxu0 %v18658_v46 }
 0x5b0   :  { %13515 = vmatprep.subr.bf16.mxu1 %v18537_v0  ;;  %13495 = vmatprep.subr.bf16.mxu0 %v18659_v63 }
 0x5b3   :  { %13517 = vmatpush3.bf16.msra.mxu1 %v18660_v45  ;;  %13497 = vmatpush1.bf16.msra.mxu0 %v18661_v41  ;;  %v18697_v45 = vld [vmem:[#allocation81_spill] sm:$0xff] }
 0x5b4   :  { %13518 = vmatprep.subr.bf16.mxu1 %v18537_v0  ;;  %13499 = vmatprep.subr.bf16.mxu0 %v18662_v37  ;;  %v18696_v37 = vld [vmem:[#allocation80_spill] sm:$0xff] }
 0x5b7   :  { %13520 = vmatpush3.bf16.msra.mxu1 %v18663_v7  ;;  %13501 = vmatpush1.bf16.msra.mxu0 %v18664_v58 }
 0x5b8   :  { %13521 = vmatprep.subr.bf16.mxu1 %v18537_v0  ;;  %13503 = vmatprep.subr.bf16.mxu0 %v18665_v49  ;;  %v18695_v49 = vld [vmem:[#allocation79_spill] sm:$0xff] }
 0x5bb   :  { %13523 = vmatpush3.bf16.msra.mxu1 %v18666_v55  ;;  %13505 = vmatpush1.bf16.msra.mxu0 %v18667_v27  ;;  %v18688_v27 = vld [vmem:[#allocation53_spill] sm:$0xff] }
 0x5bc   :  { %13524 = vmatprep.subr.bf16.mxu1 %v18537_v0  ;;  %13531 = vmatprep.subr.bf16.mxu0 %v18668_v6  ;;  %v18681_v6 = vld [vmem:[#allocation42_spill] sm:$0xff] }
 0x5be   :  { %3039 = vmatmul.mubr.f32.vlgmr.msra.gmra.mrb[16].mxu0 %v16954_v39 }
 0x5bf   :  { %13526 = vmatpush3.bf16.msra.mxu1 %v18669_v56  ;;  %13533 = vmatpush1.bf16.msra.mxu0 %v18670_v16  ;;  %v18677_v16 = vld [vmem:[#allocation43_spill] sm:$0xff] }
 0x5c0   :  { %13527 = vmatprep.subr.bf16.mxu1 %v18537_v0  ;;  %13535 = vmatprep.subr.bf16.mxu0 %v18671_v2  ;;  %v18678_v2 = vld [vmem:[#allocation39_spill] sm:$0xff] }
 0x5c1   :  { %3200 = vmatprep.mubr.f32.mxu0 %v18539_v3 }
 0x5c3   :  { %13529 = vmatpush3.bf16.msra.mxu1 %v18672_v23  ;;  %13537 = vmatpush1.bf16.msra.mxu0 %v18673_v36  ;;  %v18679_v36 = vld [vmem:[#allocation44_spill] sm:$0xff]  ;;  %v18685_v23 = vld [vmem:[#allocation50_spill] sm:$0xff] }
 0x5c4   :  { %13562 = vmatprep.subr.bf16.mxu1 %v18537_v0  ;;  %13539 = vmatprep.subr.bf16.mxu0 %v18674_v33  ;;  %v18680_v33 = vld [vmem:[#allocation46_spill] sm:$0xff] }
 0x5c6   :  { %11525 = vmatmul.mubr.f32.vlgmr.msra.gmra.mrb[42].mxu1 %v16954_v39 }
 0x5c7   :  { %13564 = vmatpush3.bf16.msra.mxu1 %v18675_v13  ;;  %13541 = vmatpush1.bf16.msra.mxu0 %v18676_v14  ;;  %v18682_v13 = vld [vmem:[#allocation47_spill] sm:$0xff]  ;;  %v18683_v14 = vld [vmem:[#allocation49_spill] sm:$0xff] }
 0x5c8   :  { %13565 = vmatprep.subr.bf16.mxu1 %v18537_v0  ;;  %13543 = vmatprep.subr.bf16.mxu0 %v18677_v16  ;;  %v18684_v16 = vld [vmem:[#allocation45_spill] sm:$0xff] }
 0x5c9   :  { %11559 = vmatprep.mubr.msk.f32.mxu1 %vm15995_vm0, %v18539_v3 }
 0x5cb   :  { %13567 = vmatpush3.bf16.msra.mxu1 %v18678_v2  ;;  %13545 = vmatpush1.bf16.msra.mxu0 %v18679_v36  ;;  %v18686_v2 = vld [vmem:[#allocation52_spill] sm:$0xff] }
 0x5cc   :  { %13568 = vmatprep.subr.bf16.mxu1 %v18537_v0  ;;  %13547 = vmatprep.subr.bf16.mxu0 %v18680_v33  ;;  %v18687_v36 = vld [vmem:[#allocation48_spill] sm:$0xff]  ;;  %v18689_v33 = vld [vmem:[#allocation55_spill] sm:$0xff] }
 0x5cf   :  { %13570 = vmatpush3.bf16.msra.mxu1 %v18681_v6  ;;  %13549 = vmatpush1.bf16.msra.mxu0 %v18682_v13  ;;  %v18690_v13 = vld [vmem:[#allocation51_spill] sm:$0xff]  ;;  %v18691_v6 = vld [vmem:[#allocation56_spill] sm:$0xff] }
 0x5d0   :  { %13571 = vmatprep.subr.bf16.mxu1 %v18537_v0  ;;  %13551 = vmatprep.subr.bf16.mxu0 %v18683_v14  ;;  %v18692_v14 = vld [vmem:[#allocation58_spill] sm:$0xff] }
 0x5d3   :  { %13573 = vmatpush3.bf16.msra.mxu1 %v18684_v16  ;;  %13553 = vmatpush1.bf16.msra.mxu0 %v18685_v23  ;;  %v18693_v23 = vld [vmem:[#allocation54_spill] sm:$0xff] }
 0x5d4   :  { %13574 = vmatprep.subr.bf16.mxu1 %v18537_v0  ;;  %13555 = vmatprep.subr.bf16.mxu0 %v18686_v2  ;;  %v18694_v2 = vld [vmem:[#allocation57_spill] sm:$0xff] }
 0x5d7   :  { %13576 = vmatpush3.bf16.msra.mxu1 %v18687_v36  ;;  %13557 = vmatpush1.bf16.msra.mxu0 %v18688_v27 }
 0x5d8   :  { %13577 = vmatprep.subr.bf16.mxu1 %v18537_v0  ;;  %13559 = vmatprep.subr.bf16.mxu0 %v18689_v33 }
 0x5db   :  { %13579 = vmatpush3.bf16.msra.mxu1 %v18690_v13  ;;  %13561 = vmatpush1.bf16.msra.mxu0 %v18691_v6 }
 0x5dc   :  { %13580 = vmatprep.subr.bf16.mxu1 %v18537_v0  ;;  %13587 = vmatprep.subr.bf16.mxu0 %v18692_v14 }
 0x5df   :  { %13582 = vmatpush3.bf16.msra.mxu1 %v18693_v23 }
 0x5e0   :  { %13583 = vmatprep.subr.bf16.mxu1 %v18537_v0 }
 0x5e3   :  { %13585 = vmatpush3.bf16.msra.mxu1 %v18694_v2 }
 0x5e4   :  { %13618 = vmatprep.subr.bf16.mxu1 %v18537_v0 }
 0x651   :  { %v2662_v27 = vpop.f32.mrb[34].mxu1 }
 0x652   :  { %v11451_v36 = vpop.f32.mrb[35].mxu1 }
 0x671   :  { %v2732_v16 = vpop.f32.mrb[14].mxu0  ;;  %v2803_v33 = vpop.f32.mrb[36].mxu1 }
 0x672   :  { %v15421_v13 = vadd.f32 %v18695_v49, %v2732_v16  ;;  %v2734_v56 = vpop.f32.mrb[15].mxu0  ;;  %v11486_v6 = vpop.f32.mrb[37].mxu1  ;;  %v2804_v40 = vadd.f32 %v2803_v33, %v18697_v45 }
 0x673   :  { %v15423_v55 = vadd.f32 %v18696_v37, %v2734_v56  ;;  %v2663_v6 = vadd.f32 %v2662_v27, %v16653_v22 }
 0x674   :  { %v10127_v58 = vmul.f32 -1.442695, %v15421_v13 }
 0x675   :  { %v2899_v14 = vpop.f32.mrb[38].mxu1  ;;  %v10128_v41 = vmul.f32 -1.442695, %v15423_v55 }
 0x676   :  { %15625 = vpow2.f32 %v10127_v58  ;;  %v2901_v23 = vpop.f32.mrb[39].mxu1  ;;  %v15425_v58 = vadd.f32 %v18564_v60, %v2899_v14 }
 0x677   :  { %15627 = vpow2.f32 %v10128_v41  ;;  %v15428_v55 = vadd.f32 %v18565_v44, %v2901_v23 }
 0x679   :  { %v2970_v63 = vpop.f32.mrb[40].mxu1 }
 0x67a   :  { %v11491_v7 = vpop.f32.mrb[41].mxu1 }
 0x680   :  { %v15626_v2 = vpop.eup %15625 }
 0x681   :  { %v2811_v46 = vadd.f32 1.0, %v15626_v2  ;;  %v15628_v36 = vpop.eup %15627 }
 0x682   :  { %v2818_v11 = vadd.f32 1.0, %v15628_v36 }
 0x683   :  { %15629 = vrcp.f32 %v2811_v46 }
 0x684   :  { %15631 = vrcp.f32 %v2818_v11 }
 0x68d   :  { %v15630_v16 = vpop.eup %15629 }
 0x68e   :  { %v2821_v13 = vmul.f32 %v15630_v16, %v2804_v40  ;;  %v15632_v36 = vpop.eup %15631 }
 0x68f   :  { %v2824_v48 = vsub.f32 1.0, %v15632_v36  ;;  %v2826_v11 = vmul.f32 %v15632_v36, %v16949_v28  ;;  %v18698_v36 = vld [vmem:[#allocation17_spill] sm:$0xff] }
 0x690   :  { %v2822_v56 = vadd.f32 %v2821_v13, %v2663_v6 }
 0x691   :  { %v3040_v37 = vpop.f32.mrb[16].mxu0 }
 0x692   :  { %15633 = vtanh.f32 %v2822_v56  ;;  %v15426_v41 = vadd.f32 %v15425_v58, %v3040_v37  ;;  %v3042_v7 = vpop.f32.mrb[17].mxu0  ;;  %v2971_v58 = vadd.f32 %v2970_v63, %v18566_v50  ;;  %v17146_v63 = vld [vmem:[%s18481_s15 + $0x8] sm:$0xf] }
 0x693   :  { %v15429_v2 = vadd.f32 %v15428_v55, %v3042_v7 }
 0x694   :  { %v10135_v46 = vmul.f32 -1.442695, %v15426_v41 }
 0x695   :  { %v10136_v49 = vmul.f32 -1.442695, %v15429_v2 }
 0x696   :  { %15635 = vpow2.f32 %v10135_v46  ;;  %v10139_v46 = vld [vmem:[%s18482_s2 + $0x28] sm:$0xff] }
 0x697   :  { %15637 = vpow2.f32 %v10136_v49 }
 0x699   :  { %v3111_v33 = vpop.f32.mrb[42].mxu1 }
 0x69a   :  { %v11526_v45 = vpop.f32.mrb[43].mxu1  ;;  %v3112_v13 = vadd.f32 %v3111_v33, %v16452_v61  ;;  %v18699_v33 = vld [vmem:[#allocation19_spill] sm:$0xff] }
 0x69c   :  { %v15634_v27 = vpop.eup %15633 }
 0x69d   :  { %v2825_v40 = vmul.f32 %v15634_v27, %v2824_v48  ;;  %v18700_v27 = vld [vmem:[#allocation24_spill] sm:$0xff] }
 0x69f   :  { %v17089_v14 = vadd.f32 %v2826_v11, %v2825_v40  ;;  %v18701_v40 = vld [vmem:[#allocation20_spill] sm:$0xff]  ;;  %v18702_v11 = vld [vmem:[#allocation22_spill] sm:$0xff] }
 0x6a0   :  { %v15636_v23 = vpop.eup %15635 }
 0x6a1   :  { %v3119_v16 = vadd.f32 1.0, %v15636_v23  ;;  %v15638_v37 = vpop.eup %15637  ;;  %v18703_v23 = vld [vmem:[#allocation27_spill] sm:$0xff] }
 0x6a2   :  { %v3126_v6 = vadd.f32 1.0, %v15638_v37  ;;  %v18705_v37 = vld [vmem:[#allocation25_spill] sm:$0xff] }
 0x6a3   :  { %15639 = vrcp.f32 %v3119_v16  ;;  %v18704_v16 = vld [vmem:[#allocation23_spill] sm:$0xff] }
 0x6a4   :  { %15641 = vrcp.f32 %v3126_v6  ;;  %v18706_v6 = vld [vmem:[#allocation30_spill] sm:$0xff] }
 0x6ad   :  { %v15640_v56 = vpop.eup %15639 }
 0x6ae   :  { %v3129_v45 = vmul.f32 %v15640_v56, %v3112_v13  ;;  %v15642_v49 = vpop.eup %15641  ;;  %v18707_v13 = vld [vmem:[#allocation26_spill] sm:$0xff]  ;;  %v18708_v56 = vld [vmem:[#allocation28_spill] sm:$0xff] }
 0x6af   :  { %v3132_v48 = vsub.f32 1.0, %v15642_v49  ;;  %v3134_v7 = vmul.f32 %v15642_v49, %v16954_v39  ;;  %v17139_v39 = vld [vmem:[%s18481_s15] sm:$0xff] }
 0x6b0   :  { %v3130_v55 = vadd.f32 %v3129_v45, %v2971_v58  ;;  %v18709_v58 = vld [vmem:[#allocation32_spill] sm:$0xff]  ;;  %v18710_v45 = vld [vmem:[#allocation29_spill] sm:$0xff] }
 0x6b1   :  { %v18712_v49 = vld [vmem:[#allocation33_spill] sm:$0xff] }
 0x6b2   :  { %15643 = vtanh.f32 %v3130_v55  ;;  %v18711_v55 = vld [vmem:[#allocation31_spill] sm:$0xff] }
 0x6bc   :  { %v15644_v41 = vpop.eup %15643 }
 0x6bd   :  { %v3133_v28 = vmul.f32 %v15644_v41, %v3132_v48  ;;  %v18713_v48 = vld [vmem:[#allocation34_spill] sm:$0xff]  ;;  %v18714_v41 = vld [vmem:[#allocation35_spill] sm:$0xff] }
 0x6bf   :  { %v17094_v2 = vadd.f32 %v3134_v7, %v3133_v28  ;;  %v18715_v28 = vld [vmem:[#allocation36_spill] sm:$0xff]  ;;  %v18716_v7 = vld [vmem:[#allocation37_spill] sm:$0xff] }
 0x6c1   :  { %3201 = vmatmul.mubr.f32.vlgmr.msra.gmra.mrb[18].mxu0 %v17094_v2  ;;  %11560 = vmatmul.mubr.f32.vlgmr.msra.gmra.mrb[44].mxu1 %v17094_v2 }
 0x6c2   :  { %13589 = vmatpush1.bf16.msra.mxu0 %v18567_v51  ;;  %13620 = vmatpush3.bf16.msra.mxu1 %v18568_v57 }
 0x6c3   :  { %13591 = vmatprep.subr.bf16.mxu0 %v18569_v35  ;;  %13621 = vmatprep.subr.bf16.mxu1 %v18537_v0 }
 0x6c4   :  { %3341 = vmatprep.mubr.f32.mxu0 %v18539_v3  ;;  %11594 = vmatprep.mubr.msk.f32.mxu1 %vm15995_vm0, %v18539_v3 }
 0x6c6   :  { %13593 = vmatpush1.bf16.msra.mxu0 %v18570_v42  ;;  %13623 = vmatpush3.bf16.msra.mxu1 %v18571_v30 }
 0x6c7   :  { %13595 = vmatprep.subr.bf16.mxu0 %v18572_v62  ;;  %13624 = vmatprep.subr.bf16.mxu1 %v18537_v0 }
 0x6ca   :  { %13597 = vmatpush1.bf16.msra.mxu0 %v18573_v8  ;;  %13626 = vmatpush3.bf16.msra.mxu1 %v18574_v59 }
 0x6cb   :  { %13599 = vmatprep.subr.bf16.mxu0 %v18575_v19  ;;  %13627 = vmatprep.subr.bf16.mxu1 %v18537_v0 }
 0x6ce   :  { %13601 = vmatpush1.bf16.msra.mxu0 %v18576_v1  ;;  %13629 = vmatpush3.bf16.msra.mxu1 %v18577_v47 }
 0x6cf   :  { %13603 = vmatprep.subr.bf16.mxu0 %v18578_v52  ;;  %13630 = vmatprep.subr.bf16.mxu1 %v18537_v0 }
 0x6d2   :  { %13605 = vmatpush1.bf16.msra.mxu0 %v16504_v25  ;;  %13632 = vmatpush3.bf16.msra.mxu1 %v16506_v20 }
 0x6d3   :  { %13607 = vmatprep.subr.bf16.mxu0 %v18579_v53  ;;  %13633 = vmatprep.subr.bf16.mxu1 %v18537_v0 }
 0x6d6   :  { %13609 = vmatpush1.bf16.msra.mxu0 %v18580_v21  ;;  %13635 = vmatpush3.bf16.msra.mxu1 %v16516_v38 }
 0x6d7   :  { %13611 = vmatprep.subr.bf16.mxu0 %v16520_v15  ;;  %13636 = vmatprep.subr.bf16.mxu1 %v18537_v0 }
 0x6da   :  { %13613 = vmatpush1.bf16.msra.mxu0 %v16524_v43  ;;  %13638 = vmatpush3.bf16.msra.mxu1 %v16526_v10 }
 0x6db   :  { %13615 = vmatprep.subr.bf16.mxu0 %v16530_v26  ;;  %13639 = vmatprep.subr.bf16.mxu1 %v18537_v0 }
 0x6de   :  { %13617 = vmatpush1.bf16.msra.mxu0 %v16534_v31  ;;  %13641 = vmatpush3.bf16.msra.mxu1 %v16536_v34 }
 0x6df   :  { %10140 = vmatprep.subr.msk.mxu0 %vm187_vm1, %v16239_v4  ;;  %11597 = vmatprep.subr.mxu1 %v18539_v3 }
 0x6e1   :  { %3342 = vmatmul.mubr.f32.vlgmr.msra.gmra.mrb[18].mxu0 %v17089_v14  ;;  %11595 = vmatmul.mubr.f32.vlgmr.msra.gmra.mrb[46].mxu1 %v17089_v14 }
 0x6e2   :  { %10141 = vmatpush1.msk.msra.mxu0 %vm187_vm1, %v17139_v39  ;;  %11598 = vmatpush3.msk.msra.mxu1 %vm187_vm1, %v17146_v63 }
 0x6e3   :  { %3508 = vmatprep.mubr.f32.mxu0 %v18539_v3  ;;  %11599 = vmatprep.mubr.msk.f32.mxu1 %vm15995_vm0, %v18539_v3 }
 0x6e4   :  { %13643 = vmatprep.subr.bf16.mxu0 %v16241_v5  ;;  %13674 = vmatprep.subr.bf16.mxu1 %v18537_v0 }
 0x6e5   :  { %10142 = vmatmul.mubr.msk.f32.vlgmr.msra.gmra.mrb[20].mxu0 %vm183_vm2, %v10139_v46  ;;  %11600 = vmatmul.mubr.msk.f32.vlgmr.msra.gmra.mrb[48].mxu1 %vm183_vm2, %v10139_v46  ;;  %v18717_v46 = vld [vmem:[#allocation38_spill] sm:$0xff] }
 0x6e6   :  { %13645 = vmatpush1.bf16.msra.mxu0 %v16246_v9  ;;  %13676 = vmatpush3.bf16.msra.mxu1 %v16278_v32 }
 0x6e7   :  { %13647 = vmatprep.subr.bf16.mxu0 %v16250_v12  ;;  %13677 = vmatprep.subr.bf16.mxu1 %v18537_v0 }
 0x6e8   :  { %3649 = vmatprep.mubr.f32.mxu0 %v18539_v3  ;;  %11634 = vmatprep.mubr.msk.f32.mxu1 %vm15995_vm0, %v18539_v3 }
 0x6ea   :  { %13649 = vmatpush1.bf16.msra.mxu0 %v16257_v17  ;;  %13679 = vmatpush3.bf16.msra.mxu1 %v18654_v29 }
 0x6eb   :  { %13651 = vmatprep.subr.bf16.mxu0 %v16261_v18  ;;  %13680 = vmatprep.subr.bf16.mxu1 %v18537_v0 }
 0x6ee   :  { %13653 = vmatpush1.bf16.msra.mxu0 %v16271_v24  ;;  %13682 = vmatpush3.bf16.msra.mxu1 %v18657_v54 }
 0x6ef   :  { %13655 = vmatprep.subr.bf16.mxu0 %v18698_v36  ;;  %13683 = vmatprep.subr.bf16.mxu1 %v18537_v0 }
 0x6f2   :  { %13657 = vmatpush1.bf16.msra.mxu0 %v18699_v33  ;;  %13685 = vmatpush3.bf16.msra.mxu1 %v18700_v27 }
 0x6f3   :  { %13659 = vmatprep.subr.bf16.mxu0 %v18701_v40  ;;  %13686 = vmatprep.subr.bf16.mxu1 %v18537_v0 }
 0x6f6   :  { %13661 = vmatpush1.bf16.msra.mxu0 %v18702_v11  ;;  %13688 = vmatpush3.bf16.msra.mxu1 %v18703_v23 }
 0x6f7   :  { %13663 = vmatprep.subr.bf16.mxu0 %v18704_v16  ;;  %13689 = vmatprep.subr.bf16.mxu1 %v18537_v0 }
 0x6fa   :  { %13665 = vmatpush1.bf16.msra.mxu0 %v18705_v37  ;;  %13691 = vmatpush3.bf16.msra.mxu1 %v18706_v6 }
 0x6fb   :  { %13667 = vmatprep.subr.bf16.mxu0 %v18707_v13  ;;  %13692 = vmatprep.subr.bf16.mxu1 %v18537_v0  ;;  %v18738_v13 = vld [vmem:[#allocation79_spill] sm:$0xff] }
 0x6fe   :  { %13669 = vmatpush1.bf16.msra.mxu0 %v18708_v56  ;;  %13694 = vmatpush3.bf16.msra.mxu1 %v18709_v58  ;;  %v18725_v58 = vld [vmem:[#allocation46_spill] sm:$0xff] }
 0x6ff   :  { %13671 = vmatprep.subr.bf16.mxu0 %v18710_v45  ;;  %13695 = vmatprep.subr.bf16.mxu1 %v18537_v0  ;;  %v18724_v45 = vld [vmem:[#allocation45_spill] sm:$0xff] }
 0x702   :  { %13673 = vmatpush1.bf16.msra.mxu0 %v18711_v55  ;;  %13697 = vmatpush3.bf16.msra.mxu1 %v18712_v49  ;;  %v18719_v49 = vld [vmem:[#allocation40_spill] sm:$0xff] }
 0x703   :  { %13699 = vmatprep.subr.bf16.mxu0 %v18713_v48  ;;  %13730 = vmatprep.subr.bf16.mxu1 %v18537_v0  ;;  %v18718_v48 = vld [vmem:[#allocation39_spill] sm:$0xff]  ;;  %v18723_v55 = vld [vmem:[#allocation44_spill] sm:$0xff] }
 0x705   :  { %3650 = vmatmul.mubr.f32.vlgmr.msra.gmra.mrb[20].mxu0 %v17094_v2  ;;  %11635 = vmatmul.mubr.f32.vlgmr.msra.gmra.mrb[50].mxu1 %v17094_v2 }
 0x706   :  { %13701 = vmatpush1.bf16.msra.mxu0 %v18714_v41  ;;  %13732 = vmatpush3.bf16.msra.mxu1 %v18715_v28  ;;  %v18720_v41 = vld [vmem:[#allocation41_spill] sm:$0xff]  ;;  %v18721_v28 = vld [vmem:[#allocation42_spill] sm:$0xff] }
 0x707   :  { %13703 = vmatprep.subr.bf16.mxu0 %v18716_v7  ;;  %13733 = vmatprep.subr.bf16.mxu1 %v18537_v0  ;;  %v18722_v7 = vld [vmem:[#allocation43_spill] sm:$0xff] }
 0x708   :  { %3811 = vmatprep.mubr.f32.mxu0 %v18539_v3  ;;  %11669 = vmatprep.mubr.msk.f32.mxu1 %vm15995_vm0, %v18539_v3 }
 0x70a   :  { %13705 = vmatpush1.bf16.msra.mxu0 %v18717_v46  ;;  %13735 = vmatpush3.bf16.msra.mxu1 %v18718_v48  ;;  %v18726_v48 = vld [vmem:[#allocation47_spill] sm:$0xff]  ;;  %v18728_v46 = vld [vmem:[#allocation49_spill] sm:$0xff] }
 0x70b   :  { %13707 = vmatprep.subr.bf16.mxu0 %v18719_v49  ;;  %13736 = vmatprep.subr.bf16.mxu1 %v18537_v0  ;;  %v18727_v49 = vld [vmem:[#allocation48_spill] sm:$0xff] }
 0x70e   :  { %13709 = vmatpush1.bf16.msra.mxu0 %v18720_v41  ;;  %13738 = vmatpush3.bf16.msra.mxu1 %v18721_v28  ;;  %v18729_v28 = vld [vmem:[#allocation50_spill] sm:$0xff]  ;;  %v18731_v41 = vld [vmem:[#allocation52_spill] sm:$0xff] }
 0x70f   :  { %13711 = vmatprep.subr.bf16.mxu0 %v18722_v7  ;;  %13739 = vmatprep.subr.bf16.mxu1 %v18537_v0  ;;  %v18730_v7 = vld [vmem:[#allocation51_spill] sm:$0xff] }
 0x712   :  { %13713 = vmatpush1.bf16.msra.mxu0 %v18723_v55  ;;  %13741 = vmatpush3.bf16.msra.mxu1 %v18724_v45  ;;  %v18732_v45 = vld [vmem:[#allocation53_spill] sm:$0xff]  ;;  %v18734_v55 = vld [vmem:[#allocation55_spill] sm:$0xff] }
 0x713   :  { %13715 = vmatprep.subr.bf16.mxu0 %v18725_v58  ;;  %13742 = vmatprep.subr.bf16.mxu1 %v18537_v0  ;;  %v18733_v58 = vld [vmem:[#allocation54_spill] sm:$0xff] }
 0x716   :  { %13717 = vmatpush1.bf16.msra.mxu0 %v18726_v48  ;;  %13744 = vmatpush3.bf16.msra.mxu1 %v18727_v49  ;;  %v18735_v49 = vld [vmem:[#allocation56_spill] sm:$0xff]  ;;  %v18737_v48 = vld [vmem:[#allocation58_spill] sm:$0xff] }
 0x717   :  { %13719 = vmatprep.subr.bf16.mxu0 %v18728_v46  ;;  %13745 = vmatprep.subr.bf16.mxu1 %v18537_v0  ;;  %v18736_v46 = vld [vmem:[#allocation57_spill] sm:$0xff] }
 0x71a   :  { %13721 = vmatpush1.bf16.msra.mxu0 %v18729_v28  ;;  %13747 = vmatpush3.bf16.msra.mxu1 %v18730_v7 }
 0x71b   :  { %13723 = vmatprep.subr.bf16.mxu0 %v18731_v41  ;;  %13748 = vmatprep.subr.bf16.mxu1 %v18537_v0 }
 0x71e   :  { %13725 = vmatpush1.bf16.msra.mxu0 %v18732_v45  ;;  %13750 = vmatpush3.bf16.msra.mxu1 %v18733_v58 }
 0x71f   :  { %13727 = vmatprep.subr.bf16.mxu0 %v18734_v55  ;;  %13751 = vmatprep.subr.bf16.mxu1 %v18537_v0  ;;  %v18739_v55 = vld [vmem:[#allocation80_spill] sm:$0xff] }
 0x722   :  { %13729 = vmatpush1.bf16.msra.mxu0 %v18735_v49  ;;  %13753 = vmatpush3.bf16.msra.mxu1 %v18736_v46 }
 0x723   :  { %13755 = vmatprep.subr.bf16.mxu0 %v18737_v48  ;;  %13786 = vmatprep.subr.bf16.mxu1 %v18537_v0 }
 0x794   :  { %v3273_v7 = vpop.f32.mrb[44].mxu1 }
 0x795   :  { %v11561_v41 = vpop.f32.mrb[45].mxu1 }
 0x796   :  { %v18740_v41 = vld [vmem:[#allocation81_spill] sm:$0xff] }
 0x7b4   :  { %v3343_v28 = vpop.f32.mrb[18].mxu0  ;;  %v3414_v56 = vpop.f32.mrb[46].mxu1 }
 0x7b5   :  { %v15431_v45 = vadd.f32 %v18738_v13, %v3343_v28  ;;  %v3345_v6 = vpop.f32.mrb[19].mxu0  ;;  %v11596_v58 = vpop.f32.mrb[47].mxu1  ;;  %v3415_v33 = vadd.f32 %v3414_v56, %v18740_v41  ;;  %v3274_v28 = vadd.f32 %v3273_v7, %v16653_v22 }
 0x7b6   :  { %v15433_v16 = vadd.f32 %v18739_v55, %v3345_v6 }
 0x7b7   :  { %v10137_v37 = vmul.f32 -1.442695, %v15431_v45 }
 0x7b8   :  { %v3581_v23 = vpop.f32.mrb[48].mxu1  ;;  %v10138_v11 = vmul.f32 -1.442695, %v15433_v16 }
 0x7b9   :  { %15645 = vpow2.f32 %v10137_v37  ;;  %v11601_v49 = vpop.f32.mrb[49].mxu1 }
 0x7ba   :  { %15647 = vpow2.f32 %v10138_v11 }
 0x7c3   :  { %v15646_v46 = vpop.eup %15645 }
 0x7c4   :  { %v3422_v48 = vadd.f32 1.0, %v15646_v46  ;;  %v15648_v40 = vpop.eup %15647 }
 0x7c5   :  { %v3429_v27 = vadd.f32 1.0, %v15648_v40 }
 0x7c6   :  { %15649 = vrcp.f32 %v3422_v48 }
 0x7c7   :  { %15651 = vrcp.f32 %v3429_v27 }
 0x7d0   :  { %v15650_v36 = vpop.eup %15649 }
 0x7d1   :  { %v3432_v13 = vmul.f32 %v15650_v36, %v3415_v33  ;;  %v15652_v49 = vpop.eup %15651 }
 0x7d2   :  { %v3435_v40 = vsub.f32 1.0, %v15652_v49  ;;  %v3437_v36 = vmul.f32 %v15652_v49, %v17089_v14 }
 0x7d3   :  { %v3433_v58 = vadd.f32 %v3432_v13, %v3274_v28 }
 0x7d5   :  { %15653 = vtanh.f32 %v3433_v58 }
 0x7d8   :  { %v3651_v6 = vpop.f32.mrb[20].mxu0  ;;  %v3722_v45 = vpop.f32.mrb[50].mxu1 }
 0x7d9   :  { %v15435_v37 = vadd.f32 %v18564_v60, %v3651_v6  ;;  %v3653_v16 = vpop.f32.mrb[21].mxu0  ;;  %v11636_v11 = vpop.f32.mrb[51].mxu1  ;;  %v3723_v58 = vadd.f32 %v3722_v45, %v16452_v61  ;;  %v18742_v45 = vld [vmem:[#allocation19_spill] sm:$0xff] }
 0x7da   :  { %v15437_v48 = vadd.f32 %v18565_v44, %v3653_v16 }
 0x7db   :  { %v10145_v46 = vmul.f32 -1.442695, %v15435_v37  ;;  %v3582_v37 = vadd.f32 %v3581_v23, %v18566_v50  ;;  %v18741_v23 = vld [vmem:[#allocation17_spill] sm:$0xff] }
 0x7dc   :  { %v10146_v41 = vmul.f32 -1.442695, %v15437_v48 }
 0x7dd   :  { %15655 = vpow2.f32 %v10145_v46 }
 0x7de   :  { %15657 = vpow2.f32 %v10146_v41 }
 0x7df   :  { %v15654_v56 = vpop.eup %15653 }
 0x7e0   :  { %v3436_v55 = vmul.f32 %v15654_v56, %v3435_v40  ;;  %v18743_v40 = vld [vmem:[#allocation24_spill] sm:$0xff] }
 0x7e1   :  { %v18744_v56 = vld [vmem:[#allocation20_spill] sm:$0xff] }
 0x7e2   :  { %v17239_v33 = vadd.f32 %v3437_v36, %v3436_v55  ;;  %v18745_v36 = vld [vmem:[#allocation22_spill] sm:$0xff] }
 0x7e7   :  { %v15656_v27 = vpop.eup %15655 }
 0x7e8   :  { %v3730_v13 = vadd.f32 1.0, %v15656_v27  ;;  %v15658_v7 = vpop.eup %15657  ;;  %v18746_v27 = vld [vmem:[#allocation27_spill] sm:$0xff] }
 0x7e9   :  { %v3737_v28 = vadd.f32 1.0, %v15658_v7  ;;  %v18748_v7 = vld [vmem:[#allocation25_spill] sm:$0xff] }
 0x7ea   :  { %15659 = vrcp.f32 %v3730_v13  ;;  %v18747_v13 = vld [vmem:[#allocation23_spill] sm:$0xff] }
 0x7eb   :  { %15661 = vrcp.f32 %v3737_v28  ;;  %v18749_v28 = vld [vmem:[#allocation30_spill] sm:$0xff] }
 0x7f4   :  { %v15660_v6 = vpop.eup %15659 }
 0x7f5   :  { %v3740_v16 = vmul.f32 %v15660_v6, %v3723_v58  ;;  %v15662_v46 = vpop.eup %15661  ;;  %v18750_v58 = vld [vmem:[#allocation26_spill] sm:$0xff]  ;;  %v18751_v6 = vld [vmem:[#allocation28_spill] sm:$0xff] }
 0x7f6   :  { %v3743_v48 = vsub.f32 1.0, %v15662_v46  ;;  %v3745_v41 = vmul.f32 %v15662_v46, %v17094_v2  ;;  %v10149_v2 = vld [vmem:[%s18482_s2 + $0x30] sm:$0xff]  ;;  %v18755_v46 = vld [vmem:[#allocation33_spill] sm:$0xff] }
 0x7f7   :  { %v3741_v11 = vadd.f32 %v3740_v16, %v3582_v37  ;;  %v18752_v37 = vld [vmem:[#allocation32_spill] sm:$0xff]  ;;  %v18753_v16 = vld [vmem:[#allocation29_spill] sm:$0xff] }
 0x7f9   :  { %15663 = vtanh.f32 %v3741_v11  ;;  %v18754_v11 = vld [vmem:[#allocation31_spill] sm:$0xff] }
 0x803   :  { %v15664_v14 = vpop.eup %15663 }
 0x804   :  { %v3744_v55 = vmul.f32 %v15664_v14, %v3743_v48  ;;  %v18756_v48 = vld [vmem:[#allocation34_spill] sm:$0xff]  ;;  %v18757_v14 = vld [vmem:[#allocation35_spill] sm:$0xff] }
 0x806   :  { %v17244_v49 = vadd.f32 %v3745_v41, %v3744_v55  ;;  %v18758_v55 = vld [vmem:[#allocation36_spill] sm:$0xff]  ;;  %v18759_v41 = vld [vmem:[#allocation37_spill] sm:$0xff] }
 0x808   :  { %3812 = vmatmul.mubr.f32.vlgmr.msra.gmra.mrb[22].mxu0 %v17244_v49  ;;  %11670 = vmatmul.mubr.f32.vlgmr.msra.gmra.mrb[52].mxu1 %v17244_v49 }
 0x809   :  { %13757 = vmatpush1.bf16.msra.mxu0 %v18567_v51  ;;  %13788 = vmatpush3.bf16.msra.mxu1 %v18568_v57 }
 0x80a   :  { %13759 = vmatprep.subr.bf16.mxu0 %v18569_v35  ;;  %13789 = vmatprep.subr.bf16.mxu1 %v18537_v0 }
 0x80b   :  { %3952 = vmatprep.mubr.f32.mxu0 %v18539_v3  ;;  %11704 = vmatprep.mubr.msk.f32.mxu1 %vm15995_vm0, %v18539_v3 }
 0x80d   :  { %13761 = vmatpush1.bf16.msra.mxu0 %v18570_v42  ;;  %13791 = vmatpush3.bf16.msra.mxu1 %v18571_v30 }
 0x80e   :  { %13763 = vmatprep.subr.bf16.mxu0 %v18572_v62  ;;  %13792 = vmatprep.subr.bf16.mxu1 %v18537_v0 }
 0x811   :  { %13765 = vmatpush1.bf16.msra.mxu0 %v18573_v8  ;;  %13794 = vmatpush3.bf16.msra.mxu1 %v18574_v59 }
 0x812   :  { %13767 = vmatprep.subr.bf16.mxu0 %v18575_v19  ;;  %13795 = vmatprep.subr.bf16.mxu1 %v18537_v0 }
 0x815   :  { %13769 = vmatpush1.bf16.msra.mxu0 %v18576_v1  ;;  %13797 = vmatpush3.bf16.msra.mxu1 %v18577_v47 }
 0x816   :  { %13771 = vmatprep.subr.bf16.mxu0 %v18578_v52  ;;  %13798 = vmatprep.subr.bf16.mxu1 %v18537_v0 }
 0x819   :  { %13773 = vmatpush1.bf16.msra.mxu0 %v16504_v25  ;;  %13800 = vmatpush3.bf16.msra.mxu1 %v16506_v20 }
 0x81a   :  { %13775 = vmatprep.subr.bf16.mxu0 %v18579_v53  ;;  %13801 = vmatprep.subr.bf16.mxu1 %v18537_v0 }
 0x81d   :  { %13777 = vmatpush1.bf16.msra.mxu0 %v18580_v21  ;;  %13803 = vmatpush3.bf16.msra.mxu1 %v16516_v38 }
 0x81e   :  { %13779 = vmatprep.subr.bf16.mxu0 %v16520_v15  ;;  %13804 = vmatprep.subr.bf16.mxu1 %v18537_v0 }
 0x821   :  { %13781 = vmatpush1.bf16.msra.mxu0 %v16524_v43  ;;  %13806 = vmatpush3.bf16.msra.mxu1 %v16526_v10 }
 0x822   :  { %13783 = vmatprep.subr.bf16.mxu0 %v16530_v26  ;;  %13807 = vmatprep.subr.bf16.mxu1 %v18537_v0 }
 0x825   :  { %13785 = vmatpush1.bf16.msra.mxu0 %v16534_v31  ;;  %13809 = vmatpush3.bf16.msra.mxu1 %v16536_v34 }
 0x826   :  { %10150 = vmatprep.subr.msk.mxu0 %vm187_vm1, %v16239_v4  ;;  %11707 = vmatprep.subr.mxu1 %v18539_v3 }
 0x828   :  { %3953 = vmatmul.mubr.f32.vlgmr.msra.gmra.mrb[22].mxu0 %v17239_v33  ;;  %11705 = vmatmul.mubr.f32.vlgmr.msra.gmra.mrb[54].mxu1 %v17239_v33 }
 0x829   :  { %10151 = vmatpush1.msk.msra.mxu0 %vm187_vm1, %v17139_v39  ;;  %11708 = vmatpush3.msk.msra.mxu1 %vm187_vm1, %v17146_v63 }
 0x82a   :  { %4119 = vmatprep.mubr.f32.mxu0 %v18539_v3  ;;  %11709 = vmatprep.mubr.msk.f32.mxu1 %vm15995_vm0, %v18539_v3 }
 0x82b   :  { %13811 = vmatprep.subr.bf16.mxu0 %v16241_v5  ;;  %13842 = vmatprep.subr.bf16.mxu1 %v18537_v0 }
 0x82c   :  { %10152 = vmatmul.mubr.msk.f32.vlgmr.msra.gmra.mrb[24].mxu0 %vm183_vm2, %v10149_v2  ;;  %11710 = vmatmul.mubr.msk.f32.vlgmr.msra.gmra.mrb[56].mxu1 %vm183_vm2, %v10149_v2  ;;  %v18760_v2 = vld [vmem:[#allocation38_spill] sm:$0xff] }
 0x82d   :  { %13813 = vmatpush1.bf16.msra.mxu0 %v16246_v9  ;;  %13844 = vmatpush3.bf16.msra.mxu1 %v16278_v32 }
 0x82e   :  { %13815 = vmatprep.subr.bf16.mxu0 %v16250_v12  ;;  %13845 = vmatprep.subr.bf16.mxu1 %v18537_v0 }
 0x82f   :  { %4260 = vmatprep.mubr.f32.mxu0 %v18539_v3  ;;  %11744 = vmatprep.mubr.msk.f32.mxu1 %vm15995_vm0, %v18539_v3 }
 0x831   :  { %13817 = vmatpush1.bf16.msra.mxu0 %v16257_v17  ;;  %13847 = vmatpush3.bf16.msra.mxu1 %v18654_v29 }
 0x832   :  { %13819 = vmatprep.subr.bf16.mxu0 %v16261_v18  ;;  %13848 = vmatprep.subr.bf16.mxu1 %v18537_v0 }
 0x835   :  { %13821 = vmatpush1.bf16.msra.mxu0 %v16271_v24  ;;  %13850 = vmatpush3.bf16.msra.mxu1 %v18657_v54 }
 0x836   :  { %13823 = vmatprep.subr.bf16.mxu0 %v18741_v23  ;;  %13851 = vmatprep.subr.bf16.mxu1 %v18537_v0 }
 0x839   :  { %13825 = vmatpush1.bf16.msra.mxu0 %v18742_v45  ;;  %13853 = vmatpush3.bf16.msra.mxu1 %v18743_v40 }
 0x83a   :  { %13827 = vmatprep.subr.bf16.mxu0 %v18744_v56  ;;  %13854 = vmatprep.subr.bf16.mxu1 %v18537_v0 }
 0x83d   :  { %13829 = vmatpush1.bf16.msra.mxu0 %v18745_v36  ;;  %13856 = vmatpush3.bf16.msra.mxu1 %v18746_v27 }
 0x83e   :  { %13831 = vmatprep.subr.bf16.mxu0 %v18747_v13  ;;  %13857 = vmatprep.subr.bf16.mxu1 %v18537_v0 }
 0x841   :  { %13833 = vmatpush1.bf16.msra.mxu0 %v18748_v7  ;;  %13859 = vmatpush3.bf16.msra.mxu1 %v18749_v28 }
 0x842   :  { %13835 = vmatprep.subr.bf16.mxu0 %v18750_v58  ;;  %13860 = vmatprep.subr.bf16.mxu1 %v18537_v0  ;;  %v18781_v58 = vld [vmem:[#allocation79_spill] sm:$0xff] }
 0x845   :  { %13837 = vmatpush1.bf16.msra.mxu0 %v18751_v6  ;;  %13862 = vmatpush3.bf16.msra.mxu1 %v18752_v37  ;;  %v18768_v37 = vld [vmem:[#allocation46_spill] sm:$0xff] }
 0x846   :  { %13839 = vmatprep.subr.bf16.mxu0 %v18753_v16  ;;  %13863 = vmatprep.subr.bf16.mxu1 %v18537_v0  ;;  %v18767_v16 = vld [vmem:[#allocation45_spill] sm:$0xff] }
 0x849   :  { %13841 = vmatpush1.bf16.msra.mxu0 %v18754_v11  ;;  %13865 = vmatpush3.bf16.msra.mxu1 %v18755_v46  ;;  %v18762_v46 = vld [vmem:[#allocation40_spill] sm:$0xff] }
 0x84a   :  { %13867 = vmatprep.subr.bf16.mxu0 %v18756_v48  ;;  %13898 = vmatprep.subr.bf16.mxu1 %v18537_v0  ;;  %v18761_v48 = vld [vmem:[#allocation39_spill] sm:$0xff]  ;;  %v18766_v11 = vld [vmem:[#allocation44_spill] sm:$0xff] }
 0x84c   :  { %4261 = vmatmul.mubr.f32.vlgmr.msra.gmra.mrb[24].mxu0 %v17244_v49  ;;  %11745 = vmatmul.mubr.f32.vlgmr.msra.gmra.mrb[58].mxu1 %v17244_v49 }
 0x84d   :  { %13869 = vmatpush1.bf16.msra.mxu0 %v18757_v14  ;;  %13900 = vmatpush3.bf16.msra.mxu1 %v18758_v55  ;;  %v18763_v14 = vld [vmem:[#allocation41_spill] sm:$0xff]  ;;  %v18764_v55 = vld [vmem:[#allocation42_spill] sm:$0xff] }
 0x84e   :  { %13871 = vmatprep.subr.bf16.mxu0 %v18759_v41  ;;  %13901 = vmatprep.subr.bf16.mxu1 %v18537_v0  ;;  %v18765_v41 = vld [vmem:[#allocation43_spill] sm:$0xff] }
 0x84f   :  { %4422 = vmatprep.mubr.f32.mxu0 %v18539_v3  ;;  %11779 = vmatprep.mubr.msk.f32.mxu1 %vm15995_vm0, %v18539_v3 }
 0x851   :  { %13873 = vmatpush1.bf16.msra.mxu0 %v18760_v2  ;;  %13903 = vmatpush3.bf16.msra.mxu1 %v18761_v48  ;;  %v18769_v48 = vld [vmem:[#allocation47_spill] sm:$0xff]  ;;  %v18771_v2 = vld [vmem:[#allocation49_spill] sm:$0xff] }
 0x852   :  { %13875 = vmatprep.subr.bf16.mxu0 %v18762_v46  ;;  %13904 = vmatprep.subr.bf16.mxu1 %v18537_v0  ;;  %v18770_v46 = vld [vmem:[#allocation48_spill] sm:$0xff] }
 0x855   :  { %13877 = vmatpush1.bf16.msra.mxu0 %v18763_v14  ;;  %13906 = vmatpush3.bf16.msra.mxu1 %v18764_v55  ;;  %v18772_v55 = vld [vmem:[#allocation50_spill] sm:$0xff]  ;;  %v18774_v14 = vld [vmem:[#allocation52_spill] sm:$0xff] }
 0x856   :  { %13879 = vmatprep.subr.bf16.mxu0 %v18765_v41  ;;  %13907 = vmatprep.subr.bf16.mxu1 %v18537_v0  ;;  %v18773_v41 = vld [vmem:[#allocation51_spill] sm:$0xff] }
 0x859   :  { %13881 = vmatpush1.bf16.msra.mxu0 %v18766_v11  ;;  %13909 = vmatpush3.bf16.msra.mxu1 %v18767_v16  ;;  %v18775_v16 = vld [vmem:[#allocation53_spill] sm:$0xff]  ;;  %v18777_v11 = vld [vmem:[#allocation55_spill] sm:$0xff] }
 0x85a   :  { %13883 = vmatprep.subr.bf16.mxu0 %v18768_v37  ;;  %13910 = vmatprep.subr.bf16.mxu1 %v18537_v0  ;;  %v18776_v37 = vld [vmem:[#allocation54_spill] sm:$0xff] }
 0x85d   :  { %13885 = vmatpush1.bf16.msra.mxu0 %v18769_v48  ;;  %13912 = vmatpush3.bf16.msra.mxu1 %v18770_v46  ;;  %v18778_v46 = vld [vmem:[#allocation56_spill] sm:$0xff]  ;;  %v18780_v48 = vld [vmem:[#allocation58_spill] sm:$0xff] }
 0x85e   :  { %13887 = vmatprep.subr.bf16.mxu0 %v18771_v2  ;;  %13913 = vmatprep.subr.bf16.mxu1 %v18537_v0  ;;  %v18779_v2 = vld [vmem:[#allocation57_spill] sm:$0xff] }
 0x861   :  { %13889 = vmatpush1.bf16.msra.mxu0 %v18772_v55  ;;  %13915 = vmatpush3.bf16.msra.mxu1 %v18773_v41 }
 0x862   :  { %13891 = vmatprep.subr.bf16.mxu0 %v18774_v14  ;;  %13916 = vmatprep.subr.bf16.mxu1 %v18537_v0 }
 0x865   :  { %13893 = vmatpush1.bf16.msra.mxu0 %v18775_v16  ;;  %13918 = vmatpush3.bf16.msra.mxu1 %v18776_v37 }
 0x866   :  { %13895 = vmatprep.subr.bf16.mxu0 %v18777_v11  ;;  %13919 = vmatprep.subr.bf16.mxu1 %v18537_v0  ;;  %v18782_v11 = vld [vmem:[#allocation80_spill] sm:$0xff] }
 0x869   :  { %13897 = vmatpush1.bf16.msra.mxu0 %v18778_v46  ;;  %13921 = vmatpush3.bf16.msra.mxu1 %v18779_v2 }
 0x86a   :  { %13923 = vmatprep.subr.bf16.mxu0 %v18780_v48  ;;  %13954 = vmatprep.subr.bf16.mxu1 %v18537_v0 }
 0x8db   :  { %v3884_v41 = vpop.f32.mrb[52].mxu1 }
 0x8dc   :  { %v11671_v14 = vpop.f32.mrb[53].mxu1 }
 0x8dd   :  { %v18783_v14 = vld [vmem:[#allocation81_spill] sm:$0xff] }
 0x8fb   :  { %v3954_v55 = vpop.f32.mrb[22].mxu0  ;;  %v4025_v6 = vpop.f32.mrb[54].mxu1 }
 0x8fc   :  { %v15439_v16 = vadd.f32 %v18781_v58, %v3954_v55  ;;  %v3956_v28 = vpop.f32.mrb[23].mxu0  ;;  %v11706_v37 = vpop.f32.mrb[55].mxu1  ;;  %v4026_v45 = vadd.f32 %v4025_v6, %v18783_v14  ;;  %v3885_v55 = vadd.f32 %v3884_v41, %v16653_v22 }
 0x8fd   :  { %v15441_v13 = vadd.f32 %v18782_v11, %v3956_v28 }
 0x8fe   :  { %v10147_v7 = vmul.f32 -1.442695, %v15439_v16 }
 0x8ff   :  { %v4192_v27 = vpop.f32.mrb[56].mxu1  ;;  %v10148_v36 = vmul.f32 -1.442695, %v15441_v13 }
 0x900   :  { %15665 = vpow2.f32 %v10147_v7  ;;  %v11711_v46 = vpop.f32.mrb[57].mxu1 }
 0x901   :  { %15667 = vpow2.f32 %v10148_v36 }
 0x90a   :  { %v15666_v2 = vpop.eup %15665 }
 0x90b   :  { %v4033_v48 = vadd.f32 1.0, %v15666_v2  ;;  %v15668_v56 = vpop.eup %15667 }
 0x90c   :  { %v4040_v40 = vadd.f32 1.0, %v15668_v56 }
 0x90d   :  { %15669 = vrcp.f32 %v4033_v48 }
 0x90e   :  { %15671 = vrcp.f32 %v4040_v40 }
 0x917   :  { %v15670_v23 = vpop.eup %15669 }
 0x918   :  { %v4043_v58 = vmul.f32 %v15670_v23, %v4026_v45  ;;  %v15672_v46 = vpop.eup %15671 }
 0x919   :  { %v4046_v56 = vsub.f32 1.0, %v15672_v46  ;;  %v4048_v23 = vmul.f32 %v15672_v46, %v17239_v33 }
 0x91a   :  { %v4044_v37 = vadd.f32 %v4043_v58, %v3885_v55 }
 0x91c   :  { %15673 = vtanh.f32 %v4044_v37 }
 0x91f   :  { %v4262_v28 = vpop.f32.mrb[24].mxu0  ;;  %v4333_v16 = vpop.f32.mrb[58].mxu1 }
 0x920   :  { %v15443_v7 = vadd.f32 %v18564_v60, %v4262_v28  ;;  %v4264_v13 = vpop.f32.mrb[25].mxu0  ;;  %v11746_v36 = vpop.f32.mrb[59].mxu1  ;;  %v4334_v37 = vadd.f32 %v4333_v16, %v16452_v61  ;;  %v18797_v16 = vld [vmem:[#allocation31_spill] sm:$0xff] }
 0x921   :  { %v15445_v48 = vadd.f32 %v18565_v44, %v4264_v13 }
 0x922   :  { %v10155_v2 = vmul.f32 -1.442695, %v15443_v7  ;;  %v4193_v7 = vadd.f32 %v4192_v27, %v18566_v50  ;;  %v18796_v27 = vld [vmem:[#allocation29_spill] sm:$0xff] }
 0x923   :  { %v10156_v14 = vmul.f32 -1.442695, %v15445_v48 }
 0x924   :  { %15675 = vpow2.f32 %v10155_v2 }
 0x925   :  { %15677 = vpow2.f32 %v10156_v14 }
 0x926   :  { %v15674_v6 = vpop.eup %15673 }
 0x927   :  { %v4047_v11 = vmul.f32 %v15674_v6, %v4046_v56  ;;  %v18798_v56 = vld [vmem:[#allocation33_spill] sm:$0xff]  ;;  %v18799_v6 = vld [vmem:[#allocation34_spill] sm:$0xff] }
 0x929   :  { %v17379_v45 = vadd.f32 %v4048_v23, %v4047_v11  ;;  %v18800_v23 = vld [vmem:[#allocation35_spill] sm:$0xff] }
 0x92e   :  { %v15676_v40 = vpop.eup %15675 }
 0x92f   :  { %v4341_v58 = vadd.f32 1.0, %v15676_v40  ;;  %v15678_v41 = vpop.eup %15677  ;;  %v18801_v40 = vld [vmem:[#allocation36_spill] sm:$0xff] }
 0x930   :  { %v4348_v55 = vadd.f32 1.0, %v15678_v41  ;;  %v18803_v41 = vld [vmem:[#allocation38_spill] sm:$0xff] }
 0x931   :  { %15679 = vrcp.f32 %v4341_v58  ;;  %v18802_v58 = vld [vmem:[#allocation37_spill] sm:$0xff] }
 0x932   :  { %15681 = vrcp.f32 %v4348_v55  ;;  %v18804_v55 = vld [vmem:[#allocation39_spill] sm:$0xff] }
 0x93b   :  { %v15680_v28 = vpop.eup %15679 }
 0x93c   :  { %v4351_v13 = vmul.f32 %v15680_v28, %v4334_v37  ;;  %v15682_v2 = vpop.eup %15681  ;;  %v18805_v37 = vld [vmem:[#allocation40_spill] sm:$0xff]  ;;  %v18806_v28 = vld [vmem:[#allocation41_spill] sm:$0xff] }
 0x93d   :  { %v4354_v48 = vsub.f32 1.0, %v15682_v2  ;;  %v4356_v14 = vmul.f32 %v15682_v2, %v17244_v49  ;;  %v10159_v49 = vld [vmem:[%s18482_s2 + $0x38] sm:$0xff]  ;;  %v18810_v2 = vld [vmem:[#allocation45_spill] sm:$0xff] }
 0x93e   :  { %v4352_v36 = vadd.f32 %v4351_v13, %v4193_v7  ;;  %v18807_v7 = vld [vmem:[#allocation42_spill] sm:$0xff]  ;;  %v18808_v13 = vld [vmem:[#allocation43_spill] sm:$0xff] }
 0x940   :  { %15683 = vtanh.f32 %v4352_v36  ;;  %v18809_v36 = vld [vmem:[#allocation44_spill] sm:$0xff] }
 0x94a   :  { %v15684_v33 = vpop.eup %15683 }
 0x94b   :  { %v4355_v11 = vmul.f32 %v15684_v33, %v4354_v48  ;;  %v18811_v48 = vld [vmem:[#allocation46_spill] sm:$0xff]  ;;  %v18812_v33 = vld [vmem:[#allocation47_spill] sm:$0xff] }
 0x94d   :  { %v17384_v46 = vadd.f32 %v4356_v14, %v4355_v11  ;;  %v18813_v11 = vld [vmem:[#allocation48_spill] sm:$0xff]  ;;  %v18814_v14 = vld [vmem:[#allocation49_spill] sm:$0xff] }
 0x94f   :  { %4423 = vmatmul.mubr.f32.vlgmr.msra.gmra.mrb[26].mxu0 %v17384_v46  ;;  %11780 = vmatmul.mubr.f32.vlgmr.msra.gmra.mrb[60].mxu1 %v17384_v46 }
 0x950   :  { %13925 = vmatpush1.bf16.msra.mxu0 %v18567_v51  ;;  %13956 = vmatpush3.bf16.msra.mxu1 %v18568_v57 }
 0x951   :  { %13927 = vmatprep.subr.bf16.mxu0 %v18569_v35  ;;  %13957 = vmatprep.subr.bf16.mxu1 %v18537_v0 }
 0x952   :  { %4563 = vmatprep.mubr.f32.mxu0 %v18539_v3  ;;  %11814 = vmatprep.mubr.msk.f32.mxu1 %vm15995_vm0, %v18539_v3 }
 0x954   :  { %13929 = vmatpush1.bf16.msra.mxu0 %v18570_v42  ;;  %13959 = vmatpush3.bf16.msra.mxu1 %v18571_v30 }
 0x955   :  { %13931 = vmatprep.subr.bf16.mxu0 %v18572_v62  ;;  %13960 = vmatprep.subr.bf16.mxu1 %v18537_v0 }
 0x958   :  { %13933 = vmatpush1.bf16.msra.mxu0 %v18573_v8  ;;  %13962 = vmatpush3.bf16.msra.mxu1 %v18574_v59 }
 0x959   :  { %13935 = vmatprep.subr.bf16.mxu0 %v18575_v19  ;;  %13963 = vmatprep.subr.bf16.mxu1 %v18537_v0 }
 0x95c   :  { %13937 = vmatpush1.bf16.msra.mxu0 %v18576_v1  ;;  %13965 = vmatpush3.bf16.msra.mxu1 %v18577_v47 }
 0x95d   :  { %13939 = vmatprep.subr.bf16.mxu0 %v18578_v52  ;;  %13966 = vmatprep.subr.bf16.mxu1 %v18537_v0 }
 0x960   :  { %13941 = vmatpush1.bf16.msra.mxu0 %v16504_v25  ;;  %13968 = vmatpush3.bf16.msra.mxu1 %v16506_v20 }
 0x961   :  { %13943 = vmatprep.subr.bf16.mxu0 %v18579_v53  ;;  %13969 = vmatprep.subr.bf16.mxu1 %v18537_v0 }
 0x964   :  { %13945 = vmatpush1.bf16.msra.mxu0 %v18580_v21  ;;  %13971 = vmatpush3.bf16.msra.mxu1 %v16516_v38 }
 0x965   :  { %13947 = vmatprep.subr.bf16.mxu0 %v16520_v15  ;;  %13972 = vmatprep.subr.bf16.mxu1 %v18537_v0 }
 0x968   :  { %13949 = vmatpush1.bf16.msra.mxu0 %v16524_v43  ;;  %13974 = vmatpush3.bf16.msra.mxu1 %v16526_v10 }
 0x969   :  { %13951 = vmatprep.subr.bf16.mxu0 %v16530_v26  ;;  %13975 = vmatprep.subr.bf16.mxu1 %v18537_v0 }
 0x96c   :  { %13953 = vmatpush1.bf16.msra.mxu0 %v16534_v31  ;;  %13977 = vmatpush3.bf16.msra.mxu1 %v16536_v34 }
 0x96d   :  { %10160 = vmatprep.subr.msk.mxu0 %vm187_vm1, %v16239_v4  ;;  %11817 = vmatprep.subr.mxu1 %v18539_v3  ;;  %v18784_v4 = vld [vmem:[#allocation17_spill] sm:$0xff] }
 0x96f   :  { %4564 = vmatmul.mubr.f32.vlgmr.msra.gmra.mrb[26].mxu0 %v17379_v45  ;;  %11815 = vmatmul.mubr.f32.vlgmr.msra.gmra.mrb[62].mxu1 %v17379_v45 }
 0x970   :  { %10161 = vmatpush1.msk.msra.mxu0 %vm187_vm1, %v17139_v39  ;;  %11818 = vmatpush3.msk.msra.mxu1 %vm187_vm1, %v17146_v63  ;;  %v18794_v39 = vld [vmem:[#allocation28_spill] sm:$0xff] }
 0x971   :  { %4730 = vmatprep.mubr.f32.mxu0 %v18539_v3  ;;  %11819 = vmatprep.mubr.msk.f32.mxu1 %vm15995_vm0, %v18539_v3  ;;  %v18795_v63 = vld [vmem:[#allocation32_spill] sm:$0xff] }
 0x972   :  { %13979 = vmatprep.subr.bf16.mxu0 %v16241_v5  ;;  %14010 = vmatprep.subr.bf16.mxu1 %v18537_v0  ;;  %v18785_v5 = vld [vmem:[#allocation19_spill] sm:$0xff] }
 0x973   :  { %10162 = vmatmul.mubr.msk.f32.vlgmr.msra.gmra.mrb[28].mxu0 %vm183_vm2, %v10159_v49  ;;  %11820 = vmatmul.mubr.msk.f32.vlgmr.msra.gmra.mrb[64].mxu1 %vm183_vm2, %v10159_v49  ;;  %v18815_v49 = vld [vmem:[#allocation50_spill] sm:$0xff] }
 0x974   :  { %13981 = vmatpush1.bf16.msra.mxu0 %v16246_v9  ;;  %14012 = vmatpush3.bf16.msra.mxu1 %v16278_v32  ;;  %v18786_v9 = vld [vmem:[#allocation24_spill] sm:$0xff]  ;;  %v18790_v32 = vld [vmem:[#allocation23_spill] sm:$0xff] }
 0x975   :  { %13983 = vmatprep.subr.bf16.mxu0 %v16250_v12  ;;  %14013 = vmatprep.subr.bf16.mxu1 %v18537_v0  ;;  %v18787_v12 = vld [vmem:[#allocation20_spill] sm:$0xff] }
 0x976   :  { %4871 = vmatprep.mubr.f32.mxu0 %v18539_v3  ;;  %11854 = vmatprep.mubr.msk.f32.mxu1 %vm15995_vm0, %v18539_v3 }
 0x978   :  { %13985 = vmatpush1.bf16.msra.mxu0 %v16257_v17  ;;  %14015 = vmatpush3.bf16.msra.mxu1 %v18654_v29  ;;  %v18788_v17 = vld [vmem:[#allocation22_spill] sm:$0xff] }
 0x979   :  { %13987 = vmatprep.subr.bf16.mxu0 %v16261_v18  ;;  %14016 = vmatprep.subr.bf16.mxu1 %v18537_v0  ;;  %v18789_v18 = vld [vmem:[#allocation27_spill] sm:$0xff]  ;;  %v18792_v29 = vld [vmem:[#allocation30_spill] sm:$0xff] }
 0x97c   :  { %13989 = vmatpush1.bf16.msra.mxu0 %v16271_v24  ;;  %14018 = vmatpush3.bf16.msra.mxu1 %v18657_v54  ;;  %v18791_v24 = vld [vmem:[#allocation25_spill] sm:$0xff]  ;;  %v18793_v54 = vld [vmem:[#allocation26_spill] sm:$0xff] }
 0x97d   :  { %13991 = vmatprep.subr.bf16.mxu0 %v18784_v4  ;;  %14019 = vmatprep.subr.bf16.mxu1 %v18537_v0  ;;  %v18816_v4 = vld [vmem:[#allocation51_spill] sm:$0xff] }
 0x980   :  { %13993 = vmatpush1.bf16.msra.mxu0 %v18785_v5  ;;  %14021 = vmatpush3.bf16.msra.mxu1 %v18786_v9  ;;  %v18817_v5 = vld [vmem:[#allocation52_spill] sm:$0xff]  ;;  %v18818_v9 = vld [vmem:[#allocation53_spill] sm:$0xff] }
 0x981   :  { %13995 = vmatprep.subr.bf16.mxu0 %v18787_v12  ;;  %14022 = vmatprep.subr.bf16.mxu1 %v18537_v0  ;;  %v18819_v12 = vld [vmem:[#allocation54_spill] sm:$0xff] }
 0x984   :  { %13997 = vmatpush1.bf16.msra.mxu0 %v18788_v17  ;;  %14024 = vmatpush3.bf16.msra.mxu1 %v18789_v18  ;;  %v18820_v17 = vld [vmem:[#allocation55_spill] sm:$0xff]  ;;  %v18821_v18 = vld [vmem:[#allocation56_spill] sm:$0xff] }
 0x985   :  { %13999 = vmatprep.subr.bf16.mxu0 %v18790_v32  ;;  %14025 = vmatprep.subr.bf16.mxu1 %v18537_v0  ;;  %v18822_v32 = vld [vmem:[#allocation57_spill] sm:$0xff] }
 0x988   :  { %14001 = vmatpush1.bf16.msra.mxu0 %v18791_v24  ;;  %14027 = vmatpush3.bf16.msra.mxu1 %v18792_v29  ;;  %v18823_v24 = vld [vmem:[#allocation58_spill] sm:$0xff] }
 0x989   :  { %14003 = vmatprep.subr.bf16.mxu0 %v18793_v54  ;;  %14028 = vmatprep.subr.bf16.mxu1 %v18537_v0 }
 0x98c   :  { %14005 = vmatpush1.bf16.msra.mxu0 %v18794_v39  ;;  %14030 = vmatpush3.bf16.msra.mxu1 %v18795_v63 }
 0x98d   :  { %14007 = vmatprep.subr.bf16.mxu0 %v18796_v27  ;;  %14031 = vmatprep.subr.bf16.mxu1 %v18537_v0  ;;  %v18824_v27 = vld [vmem:[#allocation79_spill] sm:$0xff] }
 0x990   :  { %14009 = vmatpush1.bf16.msra.mxu0 %v18797_v16  ;;  %14033 = vmatpush3.bf16.msra.mxu1 %v18798_v56 }
 0x991   :  { %14035 = vmatprep.subr.bf16.mxu0 %v18799_v6  ;;  %14066 = vmatprep.subr.bf16.mxu1 %v18537_v0 }
 0x993   :  { %4872 = vmatmul.mubr.f32.vlgmr.msra.gmra.mrb[28].mxu0 %v17384_v46  ;;  %11855 = vmatmul.mubr.f32.vlgmr.msra.gmra.mrb[66].mxu1 %v17384_v46 }
 0x994   :  { %14037 = vmatpush1.bf16.msra.mxu0 %v18800_v23  ;;  %14068 = vmatpush3.bf16.msra.mxu1 %v18801_v40  ;;  %v18825_v40 = vld [vmem:[#allocation80_spill] sm:$0xff] }
 0x995   :  { %14039 = vmatprep.subr.bf16.mxu0 %v18802_v58  ;;  %14069 = vmatprep.subr.bf16.mxu1 %v18537_v0 }
 0x996   :  { %5033 = vmatprep.mubr.f32.mxu0 %v18539_v3  ;;  %11889 = vmatprep.mubr.msk.f32.mxu1 %vm15995_vm0, %v18539_v3 }
 0x998   :  { %14041 = vmatpush1.bf16.msra.mxu0 %v18803_v41  ;;  %14071 = vmatpush3.bf16.msra.mxu1 %v18804_v55 }
 0x999   :  { %14043 = vmatprep.subr.bf16.mxu0 %v18805_v37  ;;  %14072 = vmatprep.subr.bf16.mxu1 %v18537_v0 }
 0x99c   :  { %14045 = vmatpush1.bf16.msra.mxu0 %v18806_v28  ;;  %14074 = vmatpush3.bf16.msra.mxu1 %v18807_v7 }
 0x99d   :  { %14047 = vmatprep.subr.bf16.mxu0 %v18808_v13  ;;  %14075 = vmatprep.subr.bf16.mxu1 %v18537_v0 }
 0x9a0   :  { %14049 = vmatpush1.bf16.msra.mxu0 %v18809_v36  ;;  %14077 = vmatpush3.bf16.msra.mxu1 %v18810_v2  ;;  %v18826_v2 = vld [vmem:[#allocation81_spill] sm:$0xff] }
 0x9a1   :  { %14051 = vmatprep.subr.bf16.mxu0 %v18811_v48  ;;  %14078 = vmatprep.subr.bf16.mxu1 %v18537_v0 }
 0x9a4   :  { %14053 = vmatpush1.bf16.msra.mxu0 %v18812_v33  ;;  %14080 = vmatpush3.bf16.msra.mxu1 %v18813_v11 }
 0x9a5   :  { %14055 = vmatprep.subr.bf16.mxu0 %v18814_v14  ;;  %14081 = vmatprep.subr.bf16.mxu1 %v18537_v0 }
 0x9a8   :  { %14057 = vmatpush1.bf16.msra.mxu0 %v18815_v49  ;;  %14083 = vmatpush3.bf16.msra.mxu1 %v18816_v4 }
 0x9a9   :  { %14059 = vmatprep.subr.bf16.mxu0 %v18817_v5  ;;  %14084 = vmatprep.subr.bf16.mxu1 %v18537_v0 }
 0x9ac   :  { %14061 = vmatpush1.bf16.msra.mxu0 %v18818_v9  ;;  %14086 = vmatpush3.bf16.msra.mxu1 %v18819_v12 }
 0x9ad   :  { %14063 = vmatprep.subr.bf16.mxu0 %v18820_v17  ;;  %14087 = vmatprep.subr.bf16.mxu1 %v18537_v0 }
 0x9b0   :  { %14065 = vmatpush1.bf16.msra.mxu0 %v18821_v18  ;;  %14089 = vmatpush3.bf16.msra.mxu1 %v18822_v32 }
 0x9b1   :  { %14091 = vmatprep.subr.bf16.mxu0 %v18823_v24  ;;  %14122 = vmatprep.subr.bf16.mxu1 %v18537_v0 }
 0xa22   :  { %v4495_v29 = vpop.f32.mrb[60].mxu1 }
 0xa23   :  { %v11781_v54 = vpop.f32.mrb[61].mxu1  ;;  %v4496_v11 = vadd.f32 %v4495_v29, %v16653_v22 }
 0xa42   :  { %v4565_v39 = vpop.f32.mrb[26].mxu0  ;;  %v4636_v63 = vpop.f32.mrb[62].mxu1 }
 0xa43   :  { %v15447_v16 = vadd.f32 %v18824_v27, %v4565_v39  ;;  %v4567_v56 = vpop.f32.mrb[27].mxu0  ;;  %v11816_v6 = vpop.f32.mrb[63].mxu1  ;;  %v4637_v48 = vadd.f32 %v4636_v63, %v18826_v2 }
 0xa44   :  { %v15449_v58 = vadd.f32 %v18825_v40, %v4567_v56 }
 0xa45   :  { %v10157_v23 = vmul.f32 -1.442695, %v15447_v16 }
 0xa46   :  { %v4803_v41 = vpop.f32.mrb[64].mxu1  ;;  %v10158_v37 = vmul.f32 -1.442695, %v15449_v58 }
 0xa47   :  { %15685 = vpow2.f32 %v10157_v23  ;;  %v11821_v55 = vpop.f32.mrb[65].mxu1 }
 0xa48   :  { %15687 = vpow2.f32 %v10158_v37 }
 0xa51   :  { %v15686_v28 = vpop.eup %15685 }
 0xa52   :  { %v4644_v7 = vadd.f32 1.0, %v15686_v28  ;;  %v15688_v13 = vpop.eup %15687 }
 0xa53   :  { %v4651_v36 = vadd.f32 1.0, %v15688_v13 }
 0xa54   :  { %15689 = vrcp.f32 %v4644_v7 }
 0xa55   :  { %15691 = vrcp.f32 %v4651_v36 }
 0xa5e   :  { %v15690_v33 = vpop.eup %15689 }
 0xa5f   :  { %v4654_v14 = vmul.f32 %v15690_v33, %v4637_v48  ;;  %v15692_v18 = vpop.eup %15691 }
 0xa60   :  { %v4657_v54 = vsub.f32 1.0, %v15692_v18  ;;  %v4659_v29 = vmul.f32 %v15692_v18, %v17379_v45  ;;  %v5298_v18 = vld [vmem:[#allocation7 + $0xc8] sm:$0xff] }
 0xa61   :  { %v4655_v49 = vadd.f32 %v4654_v14, %v4496_v11 }
 0xa63   :  { %15693 = vtanh.f32 %v4655_v49 }
 0xa66   :  { %v4873_v4 = vpop.f32.mrb[28].mxu0  ;;  %v4944_v5 = vpop.f32.mrb[66].mxu1 }
 0xa67   :  { %v15451_v9 = vadd.f32 %v18564_v60, %v4873_v4  ;;  %v4875_v12 = vpop.f32.mrb[29].mxu0  ;;  %v11856_v17 = vpop.f32.mrb[67].mxu1  ;;  %v4945_v55 = vadd.f32 %v4944_v5, %v16452_v61  ;;  %v5274_v61 = vld [vmem:[#allocation7 + $0x8] sm:$0xff]  ;;  %v5291_v4 = vld [vmem:[#allocation7 + $0x90] sm:$0xff] }
 0xa68   :  { %v15453_v24 = vadd.f32 %v18565_v44, %v4875_v12  ;;  %v4804_v44 = vadd.f32 %v4803_v41, %v18566_v50  ;;  %v5277_v50 = vld [vmem:[#allocation7 + $0x20] sm:$0xff]  ;;  %v5295_v41 = vld [vmem:[#allocation7 + $0xb0] sm:$0xff]  ;;  %v5296_v17 = vld [vmem:[#allocation7 + $0xb8] sm:$0xff] }
 0xa69   :  { %v10165_v32 = vmul.f32 -1.442695, %v15451_v9  ;;  %v5294_v9 = vld [vmem:[#allocation7 + $0xa8] sm:$0xff]  ;;  %v5293_v12 = vld [vmem:[#allocation7 + $0xa0] sm:$0xff] }
 0xa6a   :  { %v10166_v63 = vmul.f32 -1.442695, %v15453_v24  ;;  %v14160_v24 = vpack.c.bf16 %v5294_v9, %v5291_v4  ;;  %v5487_v9 = vld [vmem:[#allocation9 + $0x40] sm:$0xff] }
 0xa6b   :  { %15695 = vpow2.f32 %v10165_v32  ;;  %v5301_v32 = vld [vmem:[#allocation7 + $0xe0] sm:$0xff] }
 0xa6c   :  { %15697 = vpow2.f32 %v10166_v63  ;;  %v14162_v63 = vpack.c.bf16 %v5301_v32, %v5298_v18  ;;  %v5495_v18 = vld [vmem:[#allocation9 + $0x80] sm:$0xff] }
 0xa6d   :  { %v15694_v39 = vpop.eup %15693 }
 0xa6e   :  { %v4658_v16 = vmul.f32 %v15694_v39, %v4657_v54  ;;  %v14188_v54 = vpack.c.bf16 %v5296_v17, %v5293_v12  ;;  %v5297_v39 = vld [vmem:[#allocation7 + $0xc0] sm:$0xff]  ;;  %v5490_v12 = vld [vmem:[#allocation9 + $0x58] sm:$0xff]  ;;  %v5492_v17 = vld [vmem:[#allocation9 + $0x68] sm:$0xff] }
 0xa70   :  { %v17519_v56 = vadd.f32 %v4659_v29, %v4658_v16  ;;  %v5300_v16 = vld [vmem:[#allocation7 + $0xd8] sm:$0xff]  ;;  %v5299_v29 = vld [vmem:[#allocation7 + $0xd0] sm:$0xff] }
 0xa75   :  { %v15696_v6 = vpop.eup %15695 }
 0xa76   :  { %v4952_v23 = vadd.f32 1.0, %v15696_v6  ;;  %v15698_v60 = vpop.eup %15697  ;;  %v5302_v6 = vld [vmem:[#allocation7 + $0xe8] sm:$0xff] }
 0xa77   :  { %v4959_v58 = vadd.f32 1.0, %v15698_v60  ;;  %v5307_v60 = vld [vmem:[#allocation7 + $0x110] sm:$0xff] }
 0xa78   :  { %15699 = vrcp.f32 %v4952_v23  ;;  %v5304_v23 = vld [vmem:[#allocation7 + $0xf8] sm:$0xff] }
 0xa79   :  { %15701 = vrcp.f32 %v4959_v58  ;;  %v14164_v58 = vpack.c.bf16 %v5300_v16, %v5297_v39  ;;  %v14210_v39 = vpack.c.bf16 %v5495_v18, %v5492_v17  ;;  %v5493_v16 = vld [vmem:[#allocation9 + $0x70] sm:$0xff]  ;;  %v5707_v17 = vld [vmem:[#allocation10 + $0x8] sm:$0xff]  ;;  %v5710_v18 = vld [vmem:[#allocation10 + $0x20] sm:$0xff] }
 0xa82   :  { %v15700_v37 = vpop.eup %15699 }
 0xa83   :  { %v4962_v28 = vmul.f32 %v15700_v37, %v4945_v55  ;;  %v15702_v13 = vpop.eup %15701  ;;  %v14191_v55 = vpack.c.bf16 %v5302_v6, %v5299_v29  ;;  %v5303_v37 = vld [vmem:[#allocation7 + $0xf0] sm:$0xff]  ;;  %v5496_v29 = vld [vmem:[#allocation9 + $0x88] sm:$0xff]  ;;  %v5498_v6 = vld [vmem:[#allocation9 + $0x98] sm:$0xff] }
 0xa84   :  { %v4965_v36 = vsub.f32 1.0, %v15702_v13  ;;  %v4967_v33 = vmul.f32 %v15702_v13, %v17384_v46  ;;  %v5292_v46 = vld [vmem:[#allocation7 + $0x98] sm:$0xff] }
 0xa85   :  { %v4963_v7 = vadd.f32 %v4962_v28, %v4804_v44  ;;  %v14158_v5 = vpack.c.bf16 %v5295_v41, %v5292_v46  ;;  %v14166_v44 = vpack.c.bf16 %v5307_v60, %v5304_v23  ;;  %v5306_v28 = vld [vmem:[#allocation7 + $0x108] sm:$0xff]  ;;  %v5308_v13 = vld [vmem:[#allocation7 + $0x118] sm:$0xff]  ;;  %v5272_v46 = vld [vmem:[%s18827_s21] sm:$0xff] }
 0xa86   :  { %v5501_v23 = vld [vmem:[#allocation9 + $0xb0] sm:$0xff] }
 0xa87   :  { %15703 = vtanh.f32 %v4963_v7  ;;  %v5305_v7 = vld [vmem:[#allocation7 + $0x100] sm:$0xff] }
 0xa91   :  { %v15704_v45 = vpop.eup %15703 }
 0xa92   :  { %v4966_v48 = vmul.f32 %v15704_v45, %v4965_v36  ;;  %v5310_v36 = vld [vmem:[#allocation7 + $0x128] sm:$0xff]  ;;  %v5313_v45 = vld [vmem:[#allocation7 + $0x140] sm:$0xff] }
 0xa94   :  { %v17524_v11 = vadd.f32 %v4967_v33, %v4966_v48  ;;  %v14168_v48 = vpack.c.bf16 %v5306_v28, %v5303_v37  ;;  %v14194_v33 = vpack.c.bf16 %v5308_v13, %v5305_v7  ;;  %v14214_v37 = vpack.c.bf16 %v5501_v23, %v5498_v6  ;;  %v5499_v28 = vld [vmem:[#allocation9 + $0xa0] sm:$0xff]  ;;  %v5502_v7 = vld [vmem:[#allocation9 + $0xb8] sm:$0xff]  ;;  %v5504_v13 = vld [vmem:[#allocation9 + $0xc8] sm:$0xff] }
 0xa95   :  { %v5713_v6 = vld [vmem:[#allocation10 + $0x38] sm:$0xff]  ;;  %v5716_v23 = vld [vmem:[#allocation10 + $0x50] sm:$0xff] }
 0xa96   :  { %5034 = vmatmul.mubr.f32.vlgmr.msra.gmra.mrb[30].mxu0 %v17524_v11  ;;  %11890 = vmatmul.mubr.f32.vlgmr.msra.gmra.mrb[68].mxu1 %v17524_v11 }
 0xa97   :  { %14093 = vmatpush1.bf16.msra.mxu0 %v18567_v51  ;;  %14124 = vmatpush3.bf16.msra.mxu1 %v18568_v57  ;;  %v5276_v51 = vld [vmem:[#allocation7 + $0x18] sm:$0xff]  ;;  %v5275_v57 = vld [vmem:[#allocation7 + $0x10] sm:$0xff] }
 0xa98   :  { %14095 = vmatprep.subr.bf16.mxu0 %v18569_v35  ;;  %14125 = vmatprep.subr.bf16.mxu1 %v18537_v0  ;;  %v5278_v35 = vld [vmem:[#allocation7 + $0x28] sm:$0xff] }
 0xa99   :  { %5174 = vmatprep.mubr.f32.mxu0 %v18539_v3  ;;  %11924 = vmatprep.mubr.msk.f32.mxu1 %vm15995_vm0, %v18539_v3 }
 0xa9b   :  { %14097 = vmatpush1.bf16.msra.mxu0 %v18570_v42  ;;  %14127 = vmatpush3.bf16.msra.mxu1 %v18571_v30  ;;  %v5283_v42 = vld [vmem:[#allocation7 + $0x50] sm:$0xff]  ;;  %v14179_v30 = vpack.c.bf16 %v5278_v35, %v5275_v57  ;;  %v5316_v57 = vld [vmem:[#allocation7 + $0x158] sm:$0xff] }
 0xa9c   :  { %14099 = vmatprep.subr.bf16.mxu0 %v18572_v62  ;;  %14128 = vmatprep.subr.bf16.mxu1 %v18537_v0  ;;  %v5281_v62 = vld [vmem:[#allocation7 + $0x40] sm:$0xff]  ;;  %v5319_v35 = vld [vmem:[#allocation7 + $0x170] sm:$0xff] }
 0xa9f   :  { %14101 = vmatpush1.bf16.msra.mxu0 %v18573_v8  ;;  %14130 = vmatpush3.bf16.msra.mxu1 %v18574_v59  ;;  %v5284_v8 = vld [vmem:[#allocation7 + $0x58] sm:$0xff]  ;;  %v5286_v59 = vld [vmem:[#allocation7 + $0x68] sm:$0xff] }
 0xaa0   :  { %14103 = vmatprep.subr.bf16.mxu0 %v18575_v19  ;;  %14131 = vmatprep.subr.bf16.mxu1 %v18537_v0  ;;  %v5289_v19 = vld [vmem:[#allocation7 + $0x80] sm:$0xff] }
 0xaa3   :  { %14105 = vmatpush1.bf16.msra.mxu0 %v18576_v1  ;;  %14133 = vmatpush3.bf16.msra.mxu1 %v18577_v47  ;;  %v5285_v1 = vld [vmem:[#allocation7 + $0x60] sm:$0xff]  ;;  %v14154_v47 = vpack.c.bf16 %v5289_v19, %v5286_v59 }
 0xaa4   :  { %14107 = vmatprep.subr.bf16.mxu0 %v18578_v52  ;;  %14134 = vmatprep.subr.bf16.mxu1 %v18537_v0  ;;  %v5288_v52 = vld [vmem:[#allocation7 + $0x78] sm:$0xff] }
 0xaa5   :  { %v14156_v14 = vpack.c.bf16 %v5288_v52, %v5285_v1  ;;  %v5482_v1 = vld [vmem:[#allocation9 + $0x18] sm:$0xff]  ;;  %v5484_v52 = vld [vmem:[#allocation9 + $0x28] sm:$0xff] }
 0xaa7   :  { %14109 = vmatpush1.bf16.msra.mxu0 %v16504_v25  ;;  %14136 = vmatpush3.bf16.msra.mxu1 %v16506_v20  ;;  %v5273_v25 = vld [vmem:[#allocation7] sm:$0xff]  ;;  %v14146_v20 = vpack.c.bf16 %v5277_v50, %v5274_v61  ;;  %v14170_v50 = vpack.c.bf16 %v5313_v45, %v5310_v36 }
 0xaa8   :  { %14111 = vmatprep.subr.bf16.mxu0 %v18579_v53  ;;  %14137 = vmatprep.subr.bf16.mxu1 %v18537_v0  ;;  %v5287_v53 = vld [vmem:[#allocation7 + $0x70] sm:$0xff]  ;;  %v5309_v61 = vld [vmem:[#allocation7 + $0x120] sm:$0xff] }
 0xaa9   :  { %v5507_v36 = vld [vmem:[#allocation9 + $0xe0] sm:$0xff] }
 0xaab   :  { %14113 = vmatpush1.bf16.msra.mxu0 %v18580_v21  ;;  %14139 = vmatpush3.bf16.msra.mxu1 %v16516_v38  ;;  %v5280_v38 = vld [vmem:[#allocation7 + $0x38] sm:$0xff]  ;;  %v5290_v21 = vld [vmem:[#allocation7 + $0x88] sm:$0xff] }
 0xaac   :  { %14115 = vmatprep.subr.bf16.mxu0 %v16520_v15  ;;  %14140 = vmatprep.subr.bf16.mxu1 %v18537_v0  ;;  %v14148_v15 = vpack.c.bf16 %v5276_v51, %v5273_v25  ;;  %v14185_v49 = vpack.c.bf16 %v5290_v21, %v5287_v53  ;;  %v5312_v25 = vld [vmem:[#allocation7 + $0x138] sm:$0xff]  ;;  %v5314_v51 = vld [vmem:[#allocation7 + $0x148] sm:$0xff]  ;;  %v5489_v21 = vld [vmem:[#allocation9 + $0x50] sm:$0xff] }
 0xaad   :  { %v5486_v53 = vld [vmem:[#allocation9 + $0x38] sm:$0xff] }
 0xaae   :  { %v14206_v4 = vpack.c.bf16 %v5489_v21, %v5486_v53  ;;  %v5525_v53 = vld [vmem:[#allocation9 + $0x170] sm:$0xff] }
 0xaaf   :  { %14117 = vmatpush1.bf16.msra.mxu0 %v16524_v43  ;;  %14142 = vmatpush3.bf16.msra.mxu1 %v16526_v10  ;;  %v5279_v43 = vld [vmem:[#allocation7 + $0x30] sm:$0xff]  ;;  %v14150_v10 = vpack.c.bf16 %v5283_v42, %v5280_v38  ;;  %v14172_v38 = vpack.c.bf16 %v5312_v25, %v5309_v61  ;;  %v14218_v61 = vpack.c.bf16 %v5507_v36, %v5504_v13  ;;  %v5719_v13 = vld [vmem:[#allocation10 + $0x68] sm:$0xff]  ;;  %v5722_v36 = vld [vmem:[#allocation10 + $0x80] sm:$0xff] }
 0xab0   :  { %14119 = vmatprep.subr.bf16.mxu0 %v16530_v26  ;;  %14143 = vmatprep.subr.bf16.mxu1 %v18537_v0  ;;  %v5282_v26 = vld [vmem:[#allocation7 + $0x48] sm:$0xff]  ;;  %v5505_v25 = vld [vmem:[#allocation9 + $0xd0] sm:$0xff] }
 0xab3   :  { %14121 = vmatpush1.bf16.msra.mxu0 %v16534_v31  ;;  %14145 = vmatpush3.bf16.msra.mxu1 %v16536_v34  ;;  %v14152_v31 = vpack.c.bf16 %v5282_v26, %v5279_v43  ;;  %v14182_v34 = vpack.c.bf16 %v5284_v8, %v5281_v62  ;;  %v5318_v43 = vld [vmem:[#allocation7 + $0x168] sm:$0xff]  ;;  %v5320_v26 = vld [vmem:[#allocation7 + $0x178] sm:$0xff]  ;;  %v5483_v8 = vld [vmem:[#allocation9 + $0x20] sm:$0xff] }
 0xab4   :  { %14147 = vmatprep.subr.bf16.mxu0 %v14146_v20  ;;  %14178 = vmatprep.subr.bf16.mxu1 %v18537_v0  ;;  %v5311_v20 = vld [vmem:[#allocation7 + $0x130] sm:$0xff]  ;;  %v5480_v62 = vld [vmem:[#allocation9 + $0x8] sm:$0xff] }
 0xab5   :  { %v14197_v42 = vpack.c.bf16 %v5314_v51, %v5311_v20  ;;  %v5508_v20 = vld [vmem:[#allocation9 + $0xe8] sm:$0xff]  ;;  %v5510_v51 = vld [vmem:[#allocation9 + $0xf8] sm:$0xff] }
 0xab6   :  { %5175 = vmatmul.mubr.f32.vlgmr.msra.gmra.mrb[30].mxu0 %v17519_v56  ;;  %11925 = vmatmul.mubr.f32.vlgmr.msra.gmra.mrb[70].mxu1 %v17519_v56 }
 0xab7   :  { %14149 = vmatpush1.bf16.msra.mxu0 %v14148_v15  ;;  %14180 = vmatpush3.bf16.msra.mxu1 %v14179_v30  ;;  %v5315_v15 = vld [vmem:[#allocation7 + $0x150] sm:$0xff]  ;;  %v14174_v30 = vpack.c.bf16 %v5319_v35, %v5316_v57 }
 0xab8   :  { %14151 = vmatprep.subr.bf16.mxu0 %v14150_v10  ;;  %14181 = vmatprep.subr.bf16.mxu1 %v18537_v0  ;;  %v5317_v10 = vld [vmem:[#allocation7 + $0x160] sm:$0xff]  ;;  %v14176_v59 = vpack.c.bf16 %v5318_v43, %v5315_v15  ;;  %v5513_v57 = vld [vmem:[#allocation9 + $0x110] sm:$0xff] }
 0xab9   :  { %5402 = vmatprep.mubr.f32.mxu0 %v18539_v3  ;;  %11959 = vmatprep.mubr.msk.f32.mxu1 %vm15995_vm0, %v18539_v3  ;;  %v14200_v19 = vpack.c.bf16 %v5320_v26, %v5317_v10  ;;  %v14222_v15 = vpack.c.bf16 %v5513_v57, %v5510_v51  ;;  %v5511_v43 = vld [vmem:[#allocation9 + $0x100] sm:$0xff]  ;;  %v5514_v10 = vld [vmem:[#allocation9 + $0x118] sm:$0xff]  ;;  %v5516_v26 = vld [vmem:[#allocation9 + $0x128] sm:$0xff] }
 0xaba   :  { %v5725_v51 = vld [vmem:[#allocation10 + $0x98] sm:$0xff]  ;;  %v5728_v57 = vld [vmem:[#allocation10 + $0xb0] sm:$0xff] }
 0xabb   :  { %14153 = vmatpush1.bf16.msra.mxu0 %v14152_v31  ;;  %14183 = vmatpush3.bf16.msra.mxu1 %v14182_v34  ;;  %v5479_v31 = vld [vmem:[#allocation9] sm:$0xff]  ;;  %v14202_v34 = vpack.c.bf16 %v5483_v8, %v5480_v62 }
 0xabc   :  { %14155 = vmatprep.subr.bf16.mxu0 %v14154_v47  ;;  %14184 = vmatprep.subr.bf16.mxu1 %v18537_v0  ;;  %v5481_v47 = vld [vmem:[#allocation9 + $0x10] sm:$0xff]  ;;  %v14204_v41 = vpack.c.bf16 %v5482_v1, %v5479_v31  ;;  %v5519_v62 = vld [vmem:[#allocation9 + $0x140] sm:$0xff] }
 0xabd   :  { %v14226_v31 = vpack.c.bf16 %v5519_v62, %v5516_v26  ;;  %v5517_v1 = vld [vmem:[#allocation9 + $0x130] sm:$0xff]  ;;  %v5731_v26 = vld [vmem:[#allocation10 + $0xc8] sm:$0xff]  ;;  %v5734_v62 = vld [vmem:[#allocation10 + $0xe0] sm:$0xff] }
 0xabf   :  { %14157 = vmatpush1.bf16.msra.mxu0 %v14156_v14  ;;  %14186 = vmatpush3.bf16.msra.mxu1 %v14185_v49  ;;  %v14235_v14 = vpack.c.bf16 %v5484_v52, %v5481_v47  ;;  %v5485_v49 = vld [vmem:[#allocation9 + $0x30] sm:$0xff]  ;;  %v5520_v47 = vld [vmem:[#allocation9 + $0x148] sm:$0xff]  ;;  %v5522_v52 = vld [vmem:[#allocation9 + $0x158] sm:$0xff] }
 0xac0   :  { %14159 = vmatprep.subr.bf16.mxu0 %v14158_v5  ;;  %14187 = vmatprep.subr.bf16.mxu1 %v18537_v0  ;;  %v5488_v5 = vld [vmem:[#allocation9 + $0x48] sm:$0xff] }
 0xac1   :  { %v14208_v32 = vpack.c.bf16 %v5488_v5, %v5485_v49  ;;  %v5524_v49 = vld [vmem:[#allocation9 + $0x168] sm:$0xff]  ;;  %v5526_v5 = vld [vmem:[#allocation9 + $0x178] sm:$0xff] }
 0xac3   :  { %14161 = vmatpush1.bf16.msra.mxu0 %v14160_v24  ;;  %14189 = vmatpush3.bf16.msra.mxu1 %v14188_v54  ;;  %v14238_v24 = vpack.c.bf16 %v5490_v12, %v5487_v9  ;;  %v5491_v54 = vld [vmem:[#allocation9 + $0x60] sm:$0xff] }
 0xac4   :  { %14163 = vmatprep.subr.bf16.mxu0 %v14162_v63  ;;  %14190 = vmatprep.subr.bf16.mxu1 %v18537_v0  ;;  %v5494_v63 = vld [vmem:[#allocation9 + $0x78] sm:$0xff] }
 0xac5   :  { %v14212_v60 = vpack.c.bf16 %v5494_v63, %v5491_v54  ;;  %v5709_v54 = vld [vmem:[#allocation10 + $0x18] sm:$0xff] }
 0xac7   :  { %14165 = vmatpush1.bf16.msra.mxu0 %v14164_v58  ;;  %14192 = vmatpush3.bf16.msra.mxu1 %v14191_v55  ;;  %v14241_v58 = vpack.c.bf16 %v5496_v29, %v5493_v16  ;;  %v5497_v55 = vld [vmem:[#allocation9 + $0x90] sm:$0xff]  ;;  %v5711_v16 = vld [vmem:[#allocation10 + $0x28] sm:$0xff] }
 0xac8   :  { %14167 = vmatprep.subr.bf16.mxu0 %v14166_v44  ;;  %14193 = vmatprep.subr.bf16.mxu1 %v18537_v0  ;;  %v5500_v44 = vld [vmem:[#allocation9 + $0xa8] sm:$0xff] }
 0xac9   :  { %v14216_v45 = vpack.c.bf16 %v5500_v44, %v5497_v55  ;;  %v5715_v55 = vld [vmem:[#allocation10 + $0x48] sm:$0xff] }
 0xacb   :  { %14169 = vmatpush1.bf16.msra.mxu0 %v14168_v48  ;;  %14195 = vmatpush3.bf16.msra.mxu1 %v14194_v33  ;;  %v14244_v48 = vpack.c.bf16 %v5502_v7, %v5499_v28  ;;  %v5503_v33 = vld [vmem:[#allocation9 + $0xc0] sm:$0xff]  ;;  %v5717_v28 = vld [vmem:[#allocation10 + $0x58] sm:$0xff] }
 0xacc   :  { %14171 = vmatprep.subr.bf16.mxu0 %v14170_v50  ;;  %14196 = vmatprep.subr.bf16.mxu1 %v18537_v0  ;;  %v5506_v50 = vld [vmem:[#allocation9 + $0xd8] sm:$0xff] }
 0xacd   :  { %v14220_v35 = vpack.c.bf16 %v5506_v50, %v5503_v33  ;;  %v5721_v33 = vld [vmem:[#allocation10 + $0x78] sm:$0xff] }
 0xacf   :  { %14173 = vmatpush1.bf16.msra.mxu0 %v14172_v38  ;;  %14198 = vmatpush3.bf16.msra.mxu1 %v14197_v42  ;;  %v14247_v38 = vpack.c.bf16 %v5508_v20, %v5505_v25  ;;  %v5509_v42 = vld [vmem:[#allocation9 + $0xf0] sm:$0xff]  ;;  %v5723_v25 = vld [vmem:[#allocation10 + $0x88] sm:$0xff] }
 0xad0   :  { %14175 = vmatprep.subr.bf16.mxu0 %v14174_v30  ;;  %14199 = vmatprep.subr.bf16.mxu1 %v18537_v0  ;;  %v5512_v30 = vld [vmem:[#allocation9 + $0x108] sm:$0xff] }
 0xad1   :  { %v14224_v8 = vpack.c.bf16 %v5512_v30, %v5509_v42  ;;  %v5727_v42 = vld [vmem:[#allocation10 + $0xa8] sm:$0xff] }
 0xad3   :  { %14177 = vmatpush1.bf16.msra.mxu0 %v14176_v59  ;;  %14201 = vmatpush3.bf16.msra.mxu1 %v14200_v19  ;;  %v14250_v59 = vpack.c.bf16 %v5514_v10, %v5511_v43  ;;  %v5515_v19 = vld [vmem:[#allocation9 + $0x120] sm:$0xff]  ;;  %v5729_v43 = vld [vmem:[#allocation10 + $0xb8] sm:$0xff] }
 0xad4   :  { %14203 = vmatprep.subr.bf16.mxu0 %v14202_v34  ;;  %14234 = vmatprep.subr.bf16.mxu1 %v18537_v0  ;;  %v5518_v34 = vld [vmem:[#allocation9 + $0x138] sm:$0xff] }
 0xad5   :  { %v14228_v21 = vpack.c.bf16 %v5518_v34, %v5515_v19  ;;  %v5733_v19 = vld [vmem:[#allocation10 + $0xd8] sm:$0xff] }
 0xad6   :  { %5403 = vmatmul.mubr.f32.vlgmr.msra.gmra.mrb[32].mxu0 %v5272_v46  ;;  %11960 = vmatmul.mubr.f32.vlgmr.msra.gmra.mrb[72].mxu1 %v5272_v46  ;;  %v14253_v46 = vpack.c.bf16 %v5520_v47, %v5517_v1  ;;  %v5735_v1 = vld [vmem:[#allocation10 + $0xe8] sm:$0xff] }
 0xad7   :  { %14205 = vmatpush1.bf16.msra.mxu0 %v14204_v41  ;;  %14236 = vmatpush3.bf16.msra.mxu1 %v14235_v14  ;;  %v5521_v41 = vld [vmem:[#allocation9 + $0x150] sm:$0xff]  ;;  %v14230_v14 = vpack.c.bf16 %v5525_v53, %v5522_v52  ;;  %v5737_v53 = vld [vmem:[#allocation10 + $0xf8] sm:$0xff] }
 0xad8   :  { %14207 = vmatprep.subr.bf16.mxu0 %v14206_v4  ;;  %14237 = vmatprep.subr.bf16.mxu1 %v18537_v0  ;;  %v5523_v4 = vld [vmem:[#allocation9 + $0x160] sm:$0xff]  ;;  %v14232_v9 = vpack.c.bf16 %v5524_v49, %v5521_v41  ;;  %v5739_v49 = vld [vmem:[#allocation10 + $0x108] sm:$0xff] }
 0xad9   :  { %5608 = vmatprep.mubr.f32.mxu0 %v18539_v3  ;;  %11994 = vmatprep.mubr.msk.f32.mxu1 %vm15995_vm0, %v18539_v3  ;;  %v14256_v12 = vpack.c.bf16 %v5526_v5, %v5523_v4  ;;  %v5738_v4 = vld [vmem:[#allocation10 + $0x100] sm:$0xff] }
 0xadb   :  { %14209 = vmatpush1.bf16.msra.mxu0 %v14208_v32  ;;  %14239 = vmatpush3.bf16.msra.mxu1 %v14238_v24  ;;  %v14258_v32 = vpack.c.bf16 %v5710_v18, %v5707_v17  ;;  %v5706_v24 = vld [vmem:[#allocation10] sm:$0xff] }
 0xadc   :  { %14211 = vmatprep.subr.bf16.mxu0 %v14210_v39  ;;  %14240 = vmatprep.subr.bf16.mxu1 %v18537_v0  ;;  %v5708_v39 = vld [vmem:[#allocation10 + $0x10] sm:$0xff]  ;;  %v14260_v63 = vpack.c.bf16 %v5709_v54, %v5706_v24  ;;  %v5746_v17 = vld [vmem:[#allocation10 + $0x140] sm:$0xff]  ;;  %v5745_v54 = vld [vmem:[#allocation10 + $0x138] sm:$0xff] }
 0xadd   :  { %v14291_v29 = vpack.c.bf16 %v5711_v16, %v5708_v39  ;;  %v5742_v24 = vld [vmem:[#allocation10 + $0x120] sm:$0xff]  ;;  %v5744_v39 = vld [vmem:[#allocation10 + $0x130] sm:$0xff]  ;;  %v5747_v16 = vld [vmem:[#allocation10 + $0x148] sm:$0xff] }
 0xadf   :  { %14213 = vmatpush1.bf16.msra.mxu0 %v14212_v60  ;;  %14242 = vmatpush3.bf16.msra.mxu1 %v14241_v58  ;;  %v14262_v60 = vpack.c.bf16 %v5716_v23, %v5713_v6  ;;  %v5712_v58 = vld [vmem:[#allocation10 + $0x30] sm:$0xff]  ;;  %v14309_v23 = vpack.c.bf16 %v5747_v16, %v5744_v39 }
 0xae0   :  { %14215 = vmatprep.subr.bf16.mxu0 %v14214_v37  ;;  %14243 = vmatprep.subr.bf16.mxu1 %v18537_v0  ;;  %v5714_v37 = vld [vmem:[#allocation10 + $0x40] sm:$0xff]  ;;  %v14264_v44 = vpack.c.bf16 %v5715_v55, %v5712_v58  ;;  %v5752_v6 = vld [vmem:[#allocation10 + $0x170] sm:$0xff]  ;;  %v5751_v55 = vld [vmem:[#allocation10 + $0x168] sm:$0xff] }
 0xae1   :  { %v14294_v7 = vpack.c.bf16 %v5717_v28, %v5714_v37  ;;  %v5748_v58 = vld [vmem:[#allocation10 + $0x150] sm:$0xff]  ;;  %v5750_v37 = vld [vmem:[#allocation10 + $0x160] sm:$0xff]  ;;  %v5913_v28 = vld [vmem:[#allocation12 + $0x8] sm:$0xff] }
 0xae3   :  { %14217 = vmatpush1.bf16.msra.mxu0 %v14216_v45  ;;  %14245 = vmatpush3.bf16.msra.mxu1 %v14244_v48  ;;  %v14266_v45 = vpack.c.bf16 %v5722_v36, %v5719_v13  ;;  %v5718_v48 = vld [vmem:[#allocation10 + $0x60] sm:$0xff]  ;;  %v14288_v13 = vpack.c.bf16 %v5751_v55, %v5748_v58 }
 0xae4   :  { %14219 = vmatprep.subr.bf16.mxu0 %v14218_v61  ;;  %14246 = vmatprep.subr.bf16.mxu1 %v18537_v0  ;;  %v5720_v61 = vld [vmem:[#allocation10 + $0x70] sm:$0xff]  ;;  %v14268_v50 = vpack.c.bf16 %v5721_v33, %v5718_v48 }
 0xae5   :  { %v14297_v20 = vpack.c.bf16 %v5723_v25, %v5720_v61 }
 0xae7   :  { %14221 = vmatpush1.bf16.msra.mxu0 %v14220_v35  ;;  %14248 = vmatpush3.bf16.msra.mxu1 %v14247_v38  ;;  %v14270_v35 = vpack.c.bf16 %v5728_v57, %v5725_v51  ;;  %v5724_v38 = vld [vmem:[#allocation10 + $0x90] sm:$0xff] }
 0xae8   :  { %14223 = vmatprep.subr.bf16.mxu0 %v14222_v15  ;;  %14249 = vmatprep.subr.bf16.mxu1 %v18537_v0  ;;  %v5726_v15 = vld [vmem:[#allocation10 + $0xa0] sm:$0xff]  ;;  %v14272_v30 = vpack.c.bf16 %v5727_v42, %v5724_v38 }
 0xae9   :  { %v14300_v10 = vpack.c.bf16 %v5729_v43, %v5726_v15 }
 0xaeb   :  { %14225 = vmatpush1.bf16.msra.mxu0 %v14224_v8  ;;  %14251 = vmatpush3.bf16.msra.mxu1 %v14250_v59  ;;  %v14274_v8 = vpack.c.bf16 %v5734_v62, %v5731_v26  ;;  %v5730_v59 = vld [vmem:[#allocation10 + $0xc0] sm:$0xff] }
 0xaec   :  { %14227 = vmatprep.subr.bf16.mxu0 %v14226_v31  ;;  %14252 = vmatprep.subr.bf16.mxu1 %v18537_v0  ;;  %v5732_v31 = vld [vmem:[#allocation10 + $0xd0] sm:$0xff]  ;;  %v14276_v34 = vpack.c.bf16 %v5733_v19, %v5730_v59 }
 0xaed   :  { %v14303_v47 = vpack.c.bf16 %v5735_v1, %v5732_v31 }
 0xaef   :  { %14229 = vmatpush1.bf16.msra.mxu0 %v14228_v21  ;;  %14254 = vmatpush3.bf16.msra.mxu1 %v14253_v46  ;;  %v5740_v21 = vld [vmem:[#allocation10 + $0x110] sm:$0xff] }
 0xaf0   :  { %14231 = vmatprep.subr.bf16.mxu0 %v14230_v14  ;;  %14255 = vmatprep.subr.bf16.mxu1 %v18537_v0  ;;  %v14278_v41 = vpack.c.bf16 %v5740_v21, %v5737_v53  ;;  %v5736_v14 = vld [vmem:[#allocation10 + $0xf0] sm:$0xff]  ;;  %v18829_v21 = vld [vmem:[#allocation60_spill] sm:$0xff] }
 0xaf1   :  { %v14280_v5 = vpack.c.bf16 %v5739_v49, %v5736_v14 }
 0xaf3   :  { %14233 = vmatpush1.bf16.msra.mxu0 %v14232_v9  ;;  %14257 = vmatpush3.bf16.msra.mxu1 %v14256_v12  ;;  %v5741_v9 = vld [vmem:[#allocation10 + $0x118] sm:$0xff]  ;;  %v5743_v12 = vld [vmem:[#allocation10 + $0x128] sm:$0xff] }
 0xaf4   :  { %14290 = vmatprep.subr.bf16.mxu1 %v18537_v0  ;;  %14259 = vmatprep.subr.bf16.mxu0 %v14258_v32  ;;  %v14306_v18 = vpack.c.bf16 %v5741_v9, %v5738_v4  ;;  %v14282_v32 = vpack.c.bf16 %v5746_v17, %v5743_v12 }
 0xaf6   :  { %5609 = vmatmul.mubr.f32.vlgmr.msra.gmra.mrb[32].mxu0 %v17524_v11  ;;  %11995 = vmatmul.mubr.f32.vlgmr.msra.gmra.mrb[74].mxu1 %v17524_v11 }
 0xaf7   :  { %5835 = vmatprep.mubr.f32.mxu0 %v18539_v3  ;;  %12029 = vmatprep.mubr.msk.f32.mxu1 %vm15995_vm0, %v18539_v3 }
 0xaf8   :  { %14261 = vmatpush1.bf16.msra.mxu0 %v14260_v63  ;;  %14292 = vmatpush3.bf16.msra.mxu1 %v14291_v29  ;;  %v14284_v63 = vpack.c.bf16 %v5745_v54, %v5742_v24  ;;  %v5749_v29 = vld [vmem:[#allocation10 + $0x158] sm:$0xff] }
 0xaf9   :  { %14293 = vmatprep.subr.bf16.mxu1 %v18537_v0  ;;  %14263 = vmatprep.subr.bf16.mxu0 %v14262_v60  ;;  %v14286_v60 = vpack.c.bf16 %v5752_v6, %v5749_v29 }
 0xafc   :  { %14265 = vmatpush1.bf16.msra.mxu0 %v14264_v44  ;;  %14295 = vmatpush3.bf16.msra.mxu1 %v14294_v7  ;;  %v5753_v44 = vld [vmem:[#allocation10 + $0x178] sm:$0xff]  ;;  %v5916_v7 = vld [vmem:[#allocation12 + $0x20] sm:$0xff] }
 0xafd   :  { %14296 = vmatprep.subr.bf16.mxu1 %v18537_v0  ;;  %14267 = vmatprep.subr.bf16.mxu0 %v14266_v45  ;;  %v14312_v36 = vpack.c.bf16 %v5753_v44, %v5750_v37  ;;  %v14314_v45 = vpack.c.bf16 %v5916_v7, %v5913_v28  ;;  %v5912_v28 = vld [vmem:[#allocation12] sm:$0xff] }
 0xb00   :  { %14269 = vmatpush1.bf16.msra.mxu0 %v14268_v50  ;;  %14298 = vmatpush3.bf16.msra.mxu1 %v14297_v20 }
 0xb01   :  { %14299 = vmatprep.subr.bf16.mxu1 %v18537_v0  ;;  %14271 = vmatprep.subr.bf16.mxu0 %v14270_v35 }
 0xb04   :  { %14273 = vmatpush1.bf16.msra.mxu0 %v14272_v30  ;;  %14301 = vmatpush3.bf16.msra.mxu1 %v14300_v10 }
 0xb05   :  { %14302 = vmatprep.subr.bf16.mxu1 %v18537_v0  ;;  %14275 = vmatprep.subr.bf16.mxu0 %v14274_v8 }
 0xb08   :  { %14277 = vmatpush1.bf16.msra.mxu0 %v14276_v34  ;;  %14304 = vmatpush3.bf16.msra.mxu1 %v14303_v47  ;;  %v18828_v47 = vld [vmem:[#allocation59_spill] sm:$0xff] }
 0xb09   :  { %14305 = vmatprep.subr.bf16.mxu1 %v18537_v0  ;;  %14279 = vmatprep.subr.bf16.mxu0 %v14278_v41 }
 0xb0c   :  { %14281 = vmatpush1.bf16.msra.mxu0 %v14280_v5  ;;  %14307 = vmatpush3.bf16.msra.mxu1 %v14306_v18 }
 0xb0d   :  { %14283 = vmatprep.subr.bf16.mxu0 %v14282_v32  ;;  %14308 = vmatprep.subr.bf16.mxu1 %v18537_v0 }
 0xb10   :  { %14285 = vmatpush1.bf16.msra.mxu0 %v14284_v63  ;;  %14310 = vmatpush3.bf16.msra.mxu1 %v14309_v23  ;;  %v18830_v63 = vld [vmem:[#allocation63_spill] sm:$0xff] }
 0xb11   :  { %14287 = vmatprep.subr.bf16.mxu0 %v14286_v60  ;;  %14311 = vmatprep.subr.bf16.mxu1 %v18537_v0 }
 0xb14   :  { %14289 = vmatpush1.bf16.msra.mxu0 %v14288_v13  ;;  %14313 = vmatpush3.bf16.msra.mxu1 %v14312_v36  ;;  %v5915_v13 = vld [vmem:[#allocation12 + $0x18] sm:$0xff]  ;;  %v5914_v36 = vld [vmem:[#allocation12 + $0x10] sm:$0xff] }
 0xb15   :  { %14315 = vmatprep.subr.bf16.mxu0 %v14314_v45  ;;  %14346 = vmatprep.subr.bf16.mxu1 %v18537_v0  ;;  %v5917_v45 = vld [vmem:[#allocation12 + $0x28] sm:$0xff] }
 0xb69   :  { %v17598_v52 = vpop.f32.mrb[68].mxu1 }
 0xb6a   :  { %v11891_v46 = vpop.f32.mrb[69].mxu1  ;;  %v5107_v10 = vadd.f32 %v17598_v52, %v16653_v22  ;;  %v5321_v22 = vld [vmem:[%s18325_s12] sm:$0x7] }
 0xb6b   :  { %v5326_v52 = vrot.slane %v5321_v22, %v18828_v47  ;;  %v5330_v46 = vrot.slane %v5321_v22, %v18829_v21  ;;  %v5334_v29 = vrot.slane %v5321_v22, %v18830_v63  ;;  %v5930_v22 = vld [vmem:[#allocation12 + $0x90] sm:$0xff] }
 0xb89   :  { %v5176_v48 = vpop.f32.mrb[30].mxu0  ;;  %v5247_v33 = vpop.f32.mrb[70].mxu1 }
 0xb8a   :  { %v15455_v61 = vadd.f32 %v18824_v27, %v5176_v48  ;;  %v5178_v50 = vpop.f32.mrb[31].mxu0  ;;  %v11926_v25 = vpop.f32.mrb[71].mxu1  ;;  %v5248_v30 = vadd.f32 %v5247_v33, %v18826_v2  ;;  %v5527_v2 = vld [vmem:[%s18326_s13] sm:$0x7]  ;;  %v5919_v33 = vld [vmem:[#allocation12 + $0x38] sm:$0xff] }
 0xb8b   :  { %v15457_v51 = vadd.f32 %v18825_v40, %v5178_v50  ;;  %v5532_v53 = vrot.slane %v5527_v2, %v18828_v47  ;;  %v5536_v41 = vrot.slane %v5527_v2, %v18829_v21  ;;  %v5540_v16 = vrot.slane %v5527_v2, %v18830_v63 }
 0xb8c   :  { %v10167_v20 = vmul.f32 -1.442695, %v15455_v61  ;;  %v5922_v61 = vld [vmem:[#allocation12 + $0x50] sm:$0xff] }
 0xb8d   :  { %v10168_v57 = vmul.f32 -1.442695, %v15457_v51  ;;  %v15458_v14 = vadd.f32 %v5532_v53, %v5326_v52  ;;  %v15460_v4 = vadd.f32 %v5536_v41, %v5330_v46  ;;  %v14347_v51 = vpack.c.bf16 %v5917_v45, %v5914_v36  ;;  %v5933_v53 = vld [vmem:[#allocation12 + $0xa8] sm:$0xff]  ;;  %v5932_v46 = vld [vmem:[#allocation12 + $0xa0] sm:$0xff]  ;;  %v5935_v41 = vld [vmem:[#allocation12 + $0xb8] sm:$0xff] }
 0xb8e   :  { %15705 = vpow2.f32 %v10167_v20  ;;  %v14316_v20 = vpack.c.bf16 %v5915_v13, %v5912_v28  ;;  %v5948_v28 = vld [vmem:[#allocation12 + $0x120] sm:$0xff]  ;;  %v5951_v13 = vld [vmem:[#allocation12 + $0x138] sm:$0xff]  ;;  %v5950_v36 = vld [vmem:[#allocation12 + $0x130] sm:$0xff] }
 0xb8f   :  { %15707 = vpow2.f32 %v10168_v57  ;;  %v5918_v57 = vld [vmem:[#allocation12 + $0x30] sm:$0xff]  ;;  %v5953_v45 = vld [vmem:[#allocation12 + $0x148] sm:$0xff] }
 0xb98   :  { %v15706_v35 = vpop.eup %15705 }
 0xb99   :  { %v5255_v38 = vadd.f32 1.0, %v15706_v35  ;;  %v15708_v42 = vpop.eup %15707 }
 0xb9a   :  { %v5262_v15 = vadd.f32 1.0, %v15708_v42  ;;  %v5921_v42 = vld [vmem:[#allocation12 + $0x48] sm:$0xff] }
 0xb9b   :  { %15709 = vrcp.f32 %v5255_v38  ;;  %v14318_v38 = vpack.c.bf16 %v5922_v61, %v5919_v33  ;;  %v5958_v33 = vld [vmem:[#allocation12 + $0x170] sm:$0xff]  ;;  %v14340_v61 = vpack.c.bf16 %v5951_v13, %v5948_v28 }
 0xb9c   :  { %15711 = vrcp.f32 %v5262_v15  ;;  %v5920_v15 = vld [vmem:[#allocation12 + $0x40] sm:$0xff]  ;;  %v6256_v13 = vld [vmem:[#allocation7 + $0xb0] sm:$0xff] }
 0xba5   :  { %v15710_v43 = vpop.eup %15709 }
 0xba6   :  { %v5265_v27 = vmul.f32 %v15710_v43, %v5248_v30  ;;  %v15712_v8 = vpop.eup %15711  ;;  %v5923_v30 = vld [vmem:[#allocation12 + $0x58] sm:$0xff]  ;;  %v5925_v43 = vld [vmem:[#allocation12 + $0x68] sm:$0xff] }
 0xba7   :  { %v5268_v59 = vsub.f32 1.0, %v15712_v8  ;;  %v5270_v34 = vmul.f32 %v15712_v8, %v17519_v56  ;;  %v5926_v8 = vld [vmem:[#allocation12 + $0x70] sm:$0xff] }
 0xba8   :  { %v5266_v26 = vadd.f32 %v5265_v27, %v5107_v10  ;;  %v5928_v10 = vld [vmem:[#allocation12 + $0x80] sm:$0xff]  ;;  %v14320_v27 = vpack.c.bf16 %v5921_v42, %v5918_v57 }
 0xba9   :  { %v5475_v62 = vpop.f32.mrb[72].mxu1  ;;  %v5956_v57 = vld [vmem:[#allocation12 + $0x160] sm:$0xff] }
 0xbaa   :  { %15713 = vtanh.f32 %v5266_v26  ;;  %v11961_v40 = vpop.f32.mrb[73].mxu1  ;;  %v5476_v58 = vadd.f32 %v5475_v62, %v5334_v29  ;;  %v14350_v26 = vpack.c.bf16 %v5923_v30, %v5920_v15  ;;  %v14322_v62 = vpack.c.bf16 %v5928_v10, %v5925_v43  ;;  %v6139_v30 = vld [vmem:[%s18331_s18] sm:$0xff]  ;;  %v6140_v43 = vld [vmem:[%s18331_s18 + $0x8] sm:$0xff] }
 0xbab   :  { %v5927_v40 = vld [vmem:[#allocation12 + $0x78] sm:$0xff]  ;;  %v14371_v10 = vpack.c.bf16 %v6140_v43, %v6139_v30  ;;  %v6264_v30 = vld [vmem:[#allocation7 + $0xf0] sm:$0xff]  ;;  %v6267_v43 = vld [vmem:[#allocation7 + $0x108] sm:$0xff] }
 0xbb4   :  { %v15714_v19 = vpop.eup %15713 }
 0xbb5   :  { %v5269_v31 = vmul.f32 %v15714_v19, %v5268_v59  ;;  %v5929_v59 = vld [vmem:[#allocation12 + $0x88] sm:$0xff]  ;;  %v5931_v19 = vld [vmem:[#allocation12 + $0x98] sm:$0xff] }
 0xbb6   :  { %v14353_v2 = vpack.c.bf16 %v5929_v59, %v5926_v8  ;;  %v6145_v59 = vld [vmem:[%s18331_s18 + $0x30] sm:$0xff] }
 0xbb7   :  { %v17610_v1 = vadd.f32 %v5270_v34, %v5269_v31  ;;  %v5934_v31 = vld [vmem:[#allocation12 + $0xb0] sm:$0xff] }
 0xbb8   :  { %v14326_v52 = vpack.c.bf16 %v5934_v31, %v5931_v19  ;;  %v6146_v19 = vld [vmem:[%s18331_s18 + $0x38] sm:$0xff] }
 0xbb9   :  { %v14380_v31 = vpack.c.bf16 %v6146_v19, %v6145_v59 }
 0xbc9   :  { %v5610_v56 = vpop.f32.mrb[32].mxu0  ;;  %v5681_v49 = vpop.f32.mrb[74].mxu1 }
 0xbca   :  { %v15459_v5 = vadd.f32 %v15458_v14, %v5610_v56  ;;  %v5612_v9 = vpop.f32.mrb[33].mxu0  ;;  %v11996_v12 = vpop.f32.mrb[75].mxu1  ;;  %v5682_v23 = vadd.f32 %v5681_v49, %v5540_v16  ;;  %v5937_v14 = vld [vmem:[#allocation12 + $0xc8] sm:$0xff]  ;;  %v5940_v56 = vld [vmem:[#allocation12 + $0xe0] sm:$0xff]  ;;  %v14328_v49 = vpack.c.bf16 %v5933_v53, %v5930_v22  ;;  %v5942_v16 = vld [vmem:[#allocation12 + $0xf0] sm:$0xff] }
 0xbcb   :  { %v15461_v18 = vadd.f32 %v15460_v4, %v5612_v9  ;;  %v14356_v4 = vpack.c.bf16 %v5935_v41, %v5932_v46  ;;  %v14330_v9 = vpack.c.bf16 %v5940_v56, %v5937_v14  ;;  %v5939_v12 = vld [vmem:[#allocation12 + $0xd8] sm:$0xff]  ;;  %v6151_v41 = vld [vmem:[%s18331_s18 + $0x60] sm:$0xff]  ;;  %v6152_v14 = vld [vmem:[%s18331_s18 + $0x68] sm:$0xff] }
 0xbcc   :  { %v10169_v17 = vmul.f32 -1.442695, %v15459_v5  ;;  %v5936_v5 = vld [vmem:[#allocation12 + $0xc0] sm:$0xff]  ;;  %v6150_v53 = vld [vmem:[%s18331_s18 + $0x58] sm:$0xff]  ;;  %v14389_v56 = vpack.c.bf16 %v6152_v14, %v6151_v41 }
 0xbcd   :  { %v10170_v32 = vmul.f32 -1.442695, %v15461_v18  ;;  %v5941_v18 = vld [vmem:[#allocation12 + $0xe8] sm:$0xff] }
 0xbce   :  { %15715 = vpow2.f32 %v10169_v17  ;;  %v5938_v17 = vld [vmem:[#allocation12 + $0xd0] sm:$0xff] }
 0xbcf   :  { %15717 = vpow2.f32 %v10170_v32  ;;  %v5943_v32 = vld [vmem:[#allocation12 + $0xf8] sm:$0xff] }
 0xbd8   :  { %v15716_v24 = vpop.eup %15715 }
 0xbd9   :  { %v5689_v54 = vadd.f32 1.0, %v15716_v24  ;;  %v15718_v39 = vpop.eup %15717  ;;  %v5946_v24 = vld [vmem:[#allocation12 + $0x110] sm:$0xff] }
 0xbda   :  { %v5696_v6 = vadd.f32 1.0, %v15718_v39  ;;  %v14359_v39 = vpack.c.bf16 %v5941_v18, %v5938_v17  ;;  %v14334_v29 = vpack.c.bf16 %v5946_v24, %v5943_v32  ;;  %v6234_v17 = vld [vmem:[#allocation7] sm:$0xff]  ;;  %v6237_v32 = vld [vmem:[#allocation7 + $0x18] sm:$0xff] }
 0xbdb   :  { %15719 = vrcp.f32 %v5689_v54  ;;  %v14332_v54 = vpack.c.bf16 %v5939_v12, %v5936_v5  ;;  %v6238_v12 = vld [vmem:[#allocation7 + $0x20] sm:$0xff]  ;;  %v14396_v24 = vpack.c.bf16 %v6237_v32, %v6234_v17 }
 0xbdc   :  { %15721 = vrcp.f32 %v5696_v6  ;;  %v5945_v6 = vld [vmem:[#allocation12 + $0x108] sm:$0xff] }
 0xbe5   :  { %v15720_v60 = vpop.eup %15719 }
 0xbe6   :  { %v5699_v55 = vmul.f32 %v15720_v60, %v5682_v23  ;;  %v15722_v44 = vpop.eup %15721  ;;  %v5944_v23 = vld [vmem:[#allocation12 + $0x100] sm:$0xff]  ;;  %v5947_v60 = vld [vmem:[#allocation12 + $0x118] sm:$0xff] }
 0xbe7   :  { %v5702_v7 = vsub.f32 1.0, %v15722_v44  ;;  %v5704_v25 = vmul.f32 %v15722_v44, %v17524_v11  ;;  %v5924_v11 = vld [vmem:[#allocation12 + $0x60] sm:$0xff]  ;;  %v14362_v44 = vpack.c.bf16 %v5947_v60, %v5944_v23  ;;  %v6247_v60 = vld [vmem:[#allocation7 + $0x68] sm:$0xff] }
 0xbe8   :  { %v5700_v37 = vadd.f32 %v5699_v55, %v5476_v58  ;;  %v14324_v34 = vpack.c.bf16 %v5927_v40, %v5924_v11  ;;  %v5949_v58 = vld [vmem:[#allocation12 + $0x128] sm:$0xff]  ;;  %v5952_v55 = vld [vmem:[#allocation12 + $0x140] sm:$0xff] }
 0xbe9   :  { %v6144_v40 = vld [vmem:[%s18331_s18 + $0x28] sm:$0xff] }
 0xbea   :  { %15723 = vtanh.f32 %v5700_v37  ;;  %v14336_v37 = vpack.c.bf16 %v5945_v6, %v5942_v16  ;;  %v6240_v16 = vld [vmem:[#allocation7 + $0x30] sm:$0xff]  ;;  %v6243_v6 = vld [vmem:[#allocation7 + $0x48] sm:$0xff] }
 0xbeb   :  { %v14400_v23 = vpack.c.bf16 %v6243_v6, %v6240_v16 }
 0xbf4   :  { %v15724_v48 = vpop.eup %15723 }
 0xbf5   :  { %v5703_v50 = vmul.f32 %v15724_v48, %v5702_v7  ;;  %v14338_v7 = vpack.c.bf16 %v5952_v55, %v5949_v58  ;;  %v5955_v48 = vld [vmem:[#allocation12 + $0x158] sm:$0xff]  ;;  %v6250_v58 = vld [vmem:[#allocation7 + $0x80] sm:$0xff] }
 0xbf6   :  { %v14402_v55 = vpack.c.bf16 %v6250_v58, %v6247_v60 }
 0xbf7   :  { %v17625_v35 = vadd.f32 %v5704_v25, %v5703_v50  ;;  %v14365_v50 = vpack.c.bf16 %v5953_v45, %v5950_v36  ;;  %v5954_v25 = vld [vmem:[#allocation12 + $0x150] sm:$0xff] }
 0xbf8   :  { %v6252_v45 = vld [vmem:[#allocation7 + $0x90] sm:$0xff] }
 0xbf9   :  { %5836 = vmatmul.mubr.f32.vlgmr.msra.gmra.mrb[34].mxu0 %v17625_v35  ;;  %12030 = vmatmul.mubr.f32.vlgmr.msra.gmra.mrb[76].mxu1 %v17625_v35 }
 0xbfa   :  { %14317 = vmatpush1.bf16.msra.mxu0 %v14316_v20  ;;  %14348 = vmatpush3.bf16.msra.mxu1 %v14347_v51  ;;  %v14342_v20 = vpack.c.bf16 %v5958_v33, %v5955_v48  ;;  %v5957_v51 = vld [vmem:[#allocation12 + $0x168] sm:$0xff] }
 0xbfb   :  { %14319 = vmatprep.subr.bf16.mxu0 %v14318_v38  ;;  %14349 = vmatprep.subr.bf16.mxu1 %v18537_v0  ;;  %v5959_v38 = vld [vmem:[#allocation12 + $0x178] sm:$0xff]  ;;  %v14344_v42 = vpack.c.bf16 %v5957_v51, %v5954_v25  ;;  %v6255_v48 = vld [vmem:[#allocation7 + $0xa8] sm:$0xff] }
 0xbfc   :  { %6041 = vmatprep.mubr.f32.mxu0 %v18539_v3  ;;  %12064 = vmatprep.mubr.msk.f32.mxu1 %vm15995_vm0, %v18539_v3  ;;  %v14368_v15 = vpack.c.bf16 %v5959_v38, %v5956_v57  ;;  %v14408_v33 = vpack.c.bf16 %v6255_v48, %v6252_v45  ;;  %v6261_v51 = vld [vmem:[#allocation7 + $0xd8] sm:$0xff] }
 0xbfd   :  { %v6265_v38 = vld [vmem:[#allocation7 + $0xf8] sm:$0xff] }
 0xbfe   :  { %14321 = vmatpush1.bf16.msra.mxu0 %v14320_v27  ;;  %14351 = vmatpush3.bf16.msra.mxu1 %v14350_v26  ;;  %v6141_v27 = vld [vmem:[%s18331_s18 + $0x10] sm:$0xff]  ;;  %v6142_v26 = vld [vmem:[%s18331_s18 + $0x18] sm:$0xff] }
 0xbff   :  { %14323 = vmatprep.subr.bf16.mxu0 %v14322_v62  ;;  %14352 = vmatprep.subr.bf16.mxu1 %v18537_v0  ;;  %v14374_v11 = vpack.c.bf16 %v6142_v26, %v6141_v27  ;;  %v6143_v62 = vld [vmem:[%s18331_s18 + $0x20] sm:$0xff]  ;;  %v6271_v27 = vld [vmem:[#allocation7 + $0x128] sm:$0xff] }
 0xc00   :  { %v14377_v8 = vpack.c.bf16 %v6144_v40, %v6143_v62  ;;  %v6274_v26 = vld [vmem:[#allocation7 + $0x140] sm:$0xff]  ;;  %v6273_v40 = vld [vmem:[#allocation7 + $0x138] sm:$0xff] }
 0xc01   :  { %v6270_v62 = vld [vmem:[#allocation7 + $0x120] sm:$0xff] }
 0xc02   :  { %14325 = vmatpush1.bf16.msra.mxu0 %v14324_v34  ;;  %14354 = vmatpush3.bf16.msra.mxu1 %v14353_v2  ;;  %v6147_v34 = vld [vmem:[%s18331_s18 + $0x40] sm:$0xff]  ;;  %v6148_v2 = vld [vmem:[%s18331_s18 + $0x48] sm:$0xff] }
 0xc03   :  { %14327 = vmatprep.subr.bf16.mxu0 %v14326_v52  ;;  %14355 = vmatprep.subr.bf16.mxu1 %v18537_v0  ;;  %v14383_v22 = vpack.c.bf16 %v6148_v2, %v6147_v34  ;;  %v6149_v52 = vld [vmem:[%s18331_s18 + $0x50] sm:$0xff]  ;;  %v5754_v34 = vld [vmem:[%s18329_s16] sm:$0x7] }
 0xc04   :  { %v14386_v46 = vpack.c.bf16 %v6150_v53, %v6149_v52  ;;  %v5759_v2 = vrot.slane %v5754_v34, %v18828_v47  ;;  %v5763_v52 = vrot.slane %v5754_v34, %v18829_v21 }
 0xc06   :  { %14329 = vmatpush1.bf16.msra.mxu0 %v14328_v49  ;;  %14357 = vmatpush3.bf16.msra.mxu1 %v14356_v4  ;;  %v6153_v49 = vld [vmem:[%s18331_s18 + $0x70] sm:$0xff]  ;;  %v6154_v4 = vld [vmem:[%s18331_s18 + $0x78] sm:$0xff] }
 0xc07   :  { %14331 = vmatprep.subr.bf16.mxu0 %v14330_v9  ;;  %14358 = vmatprep.subr.bf16.mxu1 %v18537_v0  ;;  %v14392_v5 = vpack.c.bf16 %v6154_v4, %v6153_v49  ;;  %v6235_v9 = vld [vmem:[#allocation7 + $0x8] sm:$0xff] }
 0xc08   :  { %v14394_v18 = vpack.c.bf16 %v6238_v12, %v6235_v9 }
 0xc0a   :  { %14333 = vmatpush1.bf16.msra.mxu0 %v14332_v54  ;;  %14360 = vmatpush3.bf16.msra.mxu1 %v14359_v39  ;;  %v6241_v54 = vld [vmem:[#allocation7 + $0x38] sm:$0xff]  ;;  %v6244_v39 = vld [vmem:[#allocation7 + $0x50] sm:$0xff] }
 0xc0b   :  { %14335 = vmatprep.subr.bf16.mxu0 %v14334_v29  ;;  %14361 = vmatprep.subr.bf16.mxu1 %v18537_v0  ;;  %v14398_v29 = vpack.c.bf16 %v6244_v39, %v6241_v54  ;;  %v5767_v39 = vrot.slane %v5754_v34, %v18830_v63  ;;  %v6278_v34 = vld [vmem:[#allocation7 + $0x160] sm:$0xff] }
 0xc0e   :  { %14337 = vmatpush1.bf16.msra.mxu0 %v14336_v37  ;;  %14363 = vmatpush3.bf16.msra.mxu1 %v14362_v44  ;;  %v6246_v37 = vld [vmem:[#allocation7 + $0x60] sm:$0xff]  ;;  %v6249_v44 = vld [vmem:[#allocation7 + $0x78] sm:$0xff] }
 0xc0f   :  { %14339 = vmatprep.subr.bf16.mxu0 %v14338_v7  ;;  %14364 = vmatprep.subr.bf16.mxu1 %v18537_v0  ;;  %v14404_v28 = vpack.c.bf16 %v6249_v44, %v6246_v37  ;;  %v6253_v7 = vld [vmem:[#allocation7 + $0x98] sm:$0xff]  ;;  %v6236_v44 = vld [vmem:[#allocation7 + $0x10] sm:$0xff] }
 0xc10   :  { %v14406_v36 = vpack.c.bf16 %v6256_v13, %v6253_v7 }
 0xc12   :  { %14341 = vmatpush1.bf16.msra.mxu0 %v14340_v61  ;;  %14366 = vmatpush3.bf16.msra.mxu1 %v14365_v50  ;;  %v6259_v61 = vld [vmem:[#allocation7 + $0xc8] sm:$0xff]  ;;  %v6262_v50 = vld [vmem:[#allocation7 + $0xe0] sm:$0xff] }
 0xc13   :  { %14343 = vmatprep.subr.bf16.mxu0 %v14342_v20  ;;  %14367 = vmatprep.subr.bf16.mxu1 %v18537_v0  ;;  %v14410_v25 = vpack.c.bf16 %v6262_v50, %v6259_v61  ;;  %v6258_v20 = vld [vmem:[#allocation7 + $0xc0] sm:$0xff]  ;;  %v6245_v61 = vld [vmem:[#allocation7 + $0x58] sm:$0xff] }
 0xc14   :  { %v14412_v57 = vpack.c.bf16 %v6261_v51, %v6258_v20  ;;  %v6251_v20 = vld [vmem:[#allocation7 + $0x88] sm:$0xff] }
 0xc16   :  { %14345 = vmatpush1.bf16.msra.mxu0 %v14344_v42  ;;  %14369 = vmatpush3.bf16.msra.mxu1 %v14368_v15  ;;  %v6268_v42 = vld [vmem:[#allocation7 + $0x110] sm:$0xff] }
 0xc17   :  { %14370 = vmatprep.subr.bf16.mxu0 %v18537_v0  ;;  %14395 = vmatprep.subr.bf16.mxu1 %v14394_v18  ;;  %v14414_v15 = vpack.c.bf16 %v6268_v42, %v6265_v38  ;;  %v6260_v42 = vld [vmem:[#allocation7 + $0xd0] sm:$0xff] }
 0xc19   :  { %6042 = vmatmul.mubr.f32.vlgmr.msra.gmra.mrb[34].mxu0 %v17610_v1  ;;  %12065 = vmatmul.mubr.f32.vlgmr.msra.gmra.mrb[78].mxu1 %v17610_v1 }
 0xc1a   :  { %12099 = vmatprep.mubr.msk.f32.mxu0 %vm15995_vm0, %v18539_v3  ;;  %6363 = vmatprep.mubr.f32.mxu1 %v18539_v3 }
 0xc1b   :  { %14372 = vmatpush3.bf16.msra.mxu0 %v14371_v10  ;;  %14397 = vmatpush1.bf16.msra.mxu1 %v14396_v24  ;;  %v14416_v10 = vpack.c.bf16 %v6267_v43, %v6264_v30  ;;  %v6266_v43 = vld [vmem:[#allocation7 + $0x100] sm:$0xff] }
 0xc1c   :  { %14373 = vmatprep.subr.bf16.mxu0 %v18537_v0  ;;  %14399 = vmatprep.subr.bf16.mxu1 %v14398_v29 }
 0xc1f   :  { %14375 = vmatpush3.bf16.msra.mxu0 %v14374_v11  ;;  %14401 = vmatpush1.bf16.msra.mxu1 %v14400_v23  ;;  %v14418_v11 = vpack.c.bf16 %v6274_v26, %v6271_v27  ;;  %v6272_v26 = vld [vmem:[#allocation7 + $0x130] sm:$0xff] }
 0xc20   :  { %14376 = vmatprep.subr.bf16.mxu0 %v18537_v0  ;;  %14403 = vmatprep.subr.bf16.mxu1 %v14402_v55 }
 0xc23   :  { %14378 = vmatpush3.bf16.msra.mxu0 %v14377_v8  ;;  %14405 = vmatpush1.bf16.msra.mxu1 %v14404_v28  ;;  %v14420_v8 = vpack.c.bf16 %v6273_v40, %v6270_v62  ;;  %v6239_v28 = vld [vmem:[#allocation7 + $0x28] sm:$0xff]  ;;  %v6277_v40 = vld [vmem:[#allocation7 + $0x158] sm:$0xff] }
 0xc24   :  { %14379 = vmatprep.subr.bf16.mxu0 %v18537_v0  ;;  %14407 = vmatprep.subr.bf16.mxu1 %v14406_v36  ;;  %v14427_v45 = vpack.c.bf16 %v6239_v28, %v6236_v44 }
 0xc27   :  { %14381 = vmatpush3.bf16.msra.mxu0 %v14380_v31  ;;  %14409 = vmatpush1.bf16.msra.mxu1 %v14408_v33  ;;  %v5960_v31 = vld [vmem:[%s18330_s17] sm:$0x7] }
 0xc28   :  { %14382 = vmatprep.subr.bf16.mxu0 %v18537_v0  ;;  %14411 = vmatprep.subr.bf16.mxu1 %v14410_v25  ;;  %v5969_v53 = vrot.slane %v5960_v31, %v18829_v21  ;;  %v5973_v54 = vrot.slane %v5960_v31, %v18830_v63  ;;  %v6242_v33 = vld [vmem:[#allocation7 + $0x40] sm:$0xff]  ;;  %v6248_v25 = vld [vmem:[#allocation7 + $0x70] sm:$0xff] }
 0xc29   :  { %v14430_v50 = vpack.c.bf16 %v6245_v61, %v6242_v33  ;;  %v14433_v51 = vpack.c.bf16 %v6251_v20, %v6248_v25  ;;  %v6457_v33 = vld [vmem:[#allocation9 + $0x88] sm:$0xff]  ;;  %v6459_v61 = vld [vmem:[#allocation9 + $0x98] sm:$0xff] }
 0xc2b   :  { %14384 = vmatpush3.bf16.msra.mxu0 %v14383_v22  ;;  %14413 = vmatpush1.bf16.msra.mxu1 %v14412_v57  ;;  %v5965_v22 = vrot.slane %v5960_v31, %v18828_v47  ;;  %v6257_v57 = vld [vmem:[#allocation7 + $0xb8] sm:$0xff]  ;;  %v6279_v31 = vld [vmem:[#allocation7 + $0x168] sm:$0xff] }
 0xc2c   :  { %14385 = vmatprep.subr.bf16.mxu0 %v18537_v0  ;;  %14415 = vmatprep.subr.bf16.mxu1 %v14414_v15  ;;  %v6263_v15 = vld [vmem:[#allocation7 + $0xe8] sm:$0xff] }
 0xc2d   :  { %v14439_v30 = vpack.c.bf16 %v6263_v15, %v6260_v42  ;;  %v6463_v42 = vld [vmem:[#allocation9 + $0xb8] sm:$0xff]  ;;  %v6465_v15 = vld [vmem:[#allocation9 + $0xc8] sm:$0xff] }
 0xc2f   :  { %14387 = vmatpush3.bf16.msra.mxu0 %v14386_v46  ;;  %14417 = vmatpush1.bf16.msra.mxu1 %v14416_v10  ;;  %v15462_v46 = vadd.f32 %v5965_v22, %v5759_v2  ;;  %v6269_v10 = vld [vmem:[#allocation7 + $0x118] sm:$0xff] }
 0xc30   :  { %14388 = vmatprep.subr.bf16.mxu0 %v18537_v0  ;;  %14419 = vmatprep.subr.bf16.mxu1 %v14418_v11  ;;  %v14442_v27 = vpack.c.bf16 %v6269_v10, %v6266_v43  ;;  %v6275_v11 = vld [vmem:[#allocation7 + $0x148] sm:$0xff]  ;;  %v6281_v22 = vld [vmem:[#allocation7 + $0x178] sm:$0xff] }
 0xc31   :  { %v14445_v62 = vpack.c.bf16 %v6275_v11, %v6272_v26  ;;  %v6467_v11 = vld [vmem:[#allocation9 + $0xd8] sm:$0xff] }
 0xc33   :  { %14390 = vmatpush3.bf16.msra.mxu0 %v14389_v56  ;;  %14421 = vmatpush1.bf16.msra.mxu1 %v14420_v8  ;;  %v15464_v56 = vadd.f32 %v5969_v53, %v5763_v52  ;;  %v6280_v8 = vld [vmem:[#allocation7 + $0x170] sm:$0xff]  ;;  %v14448_v52 = vpack.c.bf16 %v6281_v22, %v6278_v34  ;;  %v6441_v53 = vld [vmem:[#allocation9 + $0x8] sm:$0xff] }
 0xc34   :  { %14391 = vmatprep.subr.bf16.mxu0 %v18537_v0  ;;  %v6470_v34 = vld [vmem:[#allocation9 + $0xf0] sm:$0xff]  ;;  %v6473_v22 = vld [vmem:[#allocation9 + $0x108] sm:$0xff] }
 0xc37   :  { %14393 = vmatpush3.bf16.msra.mxu0 %v14392_v5 }
 0xc38   :  { %14426 = vmatprep.subr.bf16.mxu0 %v18537_v0 }
 0xccc   :  { %v5908_v59 = vpop.f32.mrb[76].mxu1 }
 0xccd   :  { %v12031_v19 = vpop.f32.mrb[77].mxu1  ;;  %v5909_v23 = vadd.f32 %v5908_v59, %v5767_v39  ;;  %v14422_v59 = vpack.c.bf16 %v6280_v8, %v6277_v40  ;;  %v6446_v39 = vld [vmem:[#allocation9 + $0x30] sm:$0xff]  ;;  %v6469_v40 = vld [vmem:[#allocation9 + $0xe8] sm:$0xff]  ;;  %v6471_v8 = vld [vmem:[#allocation9 + $0xf8] sm:$0xff] }
 0xcce   :  { %v6276_v19 = vld [vmem:[#allocation7 + $0x150] sm:$0xff] }
 0xccf   :  { %v14424_v2 = vpack.c.bf16 %v6279_v31, %v6276_v19  ;;  %14423 = vmatprep.subr.bf16.mxu1 %v14422_v59  ;;  %v6474_v59 = vld [vmem:[#allocation9 + $0x110] sm:$0xff] }
 0xcd1   :  { %14425 = vmatpush1.bf16.msra.mxu1 %v14424_v2  ;;  %v14470_v2 = vpack.c.bf16 %v6474_v59, %v6471_v8  ;;  %v6689_v8 = vld [vmem:[#allocation10 + $0xb0] sm:$0xff] }
 0xcec   :  { %v6043_v41 = vpop.f32.mrb[34].mxu0  ;;  %v6114_v14 = vpop.f32.mrb[78].mxu1 }
 0xced   :  { %v15463_v49 = vadd.f32 %v15462_v46, %v6043_v41  ;;  %v6045_v4 = vpop.f32.mrb[35].mxu0  ;;  %v12066_v5 = vpop.f32.mrb[79].mxu1  ;;  %v6115_v29 = vadd.f32 %v6114_v14, %v5973_v54  ;;  %v6444_v46 = vld [vmem:[#allocation9 + $0x20] sm:$0xff] }
 0xcee   :  { %v15465_v12 = vadd.f32 %v15464_v56, %v6045_v4  ;;  %v14450_v41 = vpack.c.bf16 %v6444_v46, %v6441_v53  ;;  %v10173_v14 = vld [vmem:[%s18332_s19] ss:$0 sm:$0xff]  ;;  %v6442_v4 = vld [vmem:[#allocation9 + $0x10] sm:$0xff]  ;;  %v6445_v5 = vld [vmem:[#allocation9 + $0x28] sm:$0xff] }
 0xcef   :  { %v10171_v9 = vmul.f32 -1.442695, %v15463_v49  ;;  %v6440_v56 = vld [vmem:[#allocation9] sm:$0xff]  ;;  %v6443_v49 = vld [vmem:[#allocation9 + $0x18] sm:$0xff]  ;;  %v14483_v54 = vpack.c.bf16 %v6445_v5, %v6442_v4  ;;  %v6477_v46 = vld [vmem:[#allocation9 + $0x128] sm:$0xff] }
 0xcf0   :  { %v10172_v17 = vmul.f32 -1.442695, %v15465_v12  ;;  %14451 = vmatprep.subr.bf16.mxu1 %v14450_v41  ;;  %v6447_v12 = vld [vmem:[#allocation9 + $0x38] sm:$0xff]  ;;  %v6480_v41 = vld [vmem:[#allocation9 + $0x140] sm:$0xff] }
 0xcf1   :  { %15725 = vpow2.f32 %v10171_v9  ;;  %v6475_v53 = vld [vmem:[#allocation9 + $0x118] sm:$0xff]  ;;  %v14474_v4 = vpack.c.bf16 %v6480_v41, %v6477_v46  ;;  %v6695_v46 = vld [vmem:[#allocation10 + $0xe0] sm:$0xff] }
 0xcf2   :  { %15727 = vpow2.f32 %v10172_v17  ;;  %v6450_v17 = vld [vmem:[#allocation9 + $0x50] sm:$0xff]  ;;  %v6479_v5 = vld [vmem:[#allocation9 + $0x138] sm:$0xff] }
 0xcfb   :  { %v15726_v18 = vpop.eup %15725 }
 0xcfc   :  { %v6122_v32 = vadd.f32 1.0, %v15726_v18  ;;  %v15728_v24 = vpop.eup %15727 }
 0xcfd   :  { %v6129_v16 = vadd.f32 1.0, %v15728_v24  ;;  %v14452_v24 = vpack.c.bf16 %v6443_v49, %v6440_v56  ;;  %v6476_v49 = vld [vmem:[#allocation9 + $0x120] sm:$0xff] }
 0xcfe   :  { %15729 = vrcp.f32 %v6122_v32 }
 0xcff   :  { %15731 = vrcp.f32 %v6129_v16  ;;  %v15819_v16 = vld [vmem:[%s18827_s21] sm:$0xff] }
 0xd08   :  { %v15730_v6 = vpop.eup %15729 }
 0xd09   :  { %v6132_v60 = vmul.f32 %v15730_v6, %v6115_v29  ;;  %v15732_v55 = vpop.eup %15731  ;;  %v14454_v6 = vpack.c.bf16 %v6450_v17, %v6447_v12  ;;  %v6481_v12 = vld [vmem:[#allocation9 + $0x148] sm:$0xff]  ;;  %v6483_v17 = vld [vmem:[#allocation9 + $0x158] sm:$0xff] }
 0xd0a   :  { %v6135_v37 = vsub.f32 1.0, %v15732_v55  ;;  %v6137_v36 = vmul.f32 %v15732_v55, %v17610_v1  ;;  %v6254_v1 = vld [vmem:[#allocation7 + $0xa0] sm:$0xff]  ;;  %v6453_v55 = vld [vmem:[#allocation9 + $0x68] sm:$0xff] }
 0xd0b   :  { %v6133_v58 = vadd.f32 %v6132_v60, %v5909_v23  ;;  %v14436_v38 = vpack.c.bf16 %v6257_v57, %v6254_v1  ;;  %v6449_v23 = vld [vmem:[#allocation9 + $0x48] sm:$0xff]  ;;  %v6448_v60 = vld [vmem:[#allocation9 + $0x40] sm:$0xff] }
 0xd0c   :  { %v14456_v44 = vpack.c.bf16 %v6449_v23, %v6446_v39  ;;  %v6461_v57 = vld [vmem:[#allocation9 + $0xa8] sm:$0xff] }
 0xd0d   :  { %15733 = vtanh.f32 %v6133_v58  ;;  %v6451_v58 = vld [vmem:[#allocation9 + $0x58] sm:$0xff] }
 0xd0e   :  { %v14486_v28 = vpack.c.bf16 %v6451_v58, %v6448_v60  ;;  %v6668_v58 = vld [vmem:[#allocation10 + $0x8] sm:$0xff] }
 0xd17   :  { %v15734_v7 = vpop.eup %15733 }
 0xd18   :  { %v6136_v13 = vmul.f32 %v15734_v7, %v6135_v37  ;;  %v6456_v37 = vld [vmem:[#allocation9 + $0x80] sm:$0xff] }
 0xd19   :  { %v6452_v7 = vld [vmem:[#allocation9 + $0x60] sm:$0xff] }
 0xd1a   :  { %v17714_v48 = vadd.f32 %v6137_v36, %v6136_v13  ;;  %v14458_v13 = vpack.c.bf16 %v6456_v37, %v6453_v55  ;;  %v6455_v36 = vld [vmem:[#allocation9 + $0x78] sm:$0xff]  ;;  %v6671_v55 = vld [vmem:[#allocation10 + $0x20] sm:$0xff] }
 0xd1b   :  { %v14460_v25 = vpack.c.bf16 %v6455_v36, %v6452_v7  ;;  %v14506_v37 = vpack.c.bf16 %v6671_v55, %v6668_v58  ;;  %v6669_v7 = vld [vmem:[#allocation10 + $0x10] sm:$0xff]  ;;  %v6672_v36 = vld [vmem:[#allocation10 + $0x28] sm:$0xff]  ;;  %v6703_v58 = vld [vmem:[#allocation10 + $0x120] sm:$0xff] }
 0xd1c   :  { %12100 = vmatmul.mubr.f32.vlgmr.msra.gmra.mrb[36].mxu0 %v17714_v48  ;;  %v6706_v55 = vld [vmem:[#allocation10 + $0x138] sm:$0xff] }
 0xd1d   :  { %14428 = vmatpush3.bf16.msra.mxu0 %v14427_v45  ;;  %12134 = vmatprep.mubr.msk.f32.mxu0 %vm15995_vm0, %v18539_v3  ;;  %v6454_v45 = vld [vmem:[#allocation9 + $0x70] sm:$0xff] }
 0xd1e   :  { %14429 = vmatprep.subr.bf16.mxu0 %v18537_v0  ;;  %v14489_v20 = vpack.c.bf16 %v6457_v33, %v6454_v45  ;;  %v14539_v45 = vpack.c.bf16 %v6672_v36, %v6669_v7  ;;  %v6674_v33 = vld [vmem:[#allocation10 + $0x38] sm:$0xff] }
 0xd1f   :  { %v6710_v7 = vld [vmem:[#allocation10 + $0x158] sm:$0xff] }
 0xd21   :  { %14431 = vmatpush3.bf16.msra.mxu0 %v14430_v50  ;;  %v6462_v50 = vld [vmem:[#allocation9 + $0xb0] sm:$0xff] }
 0xd22   :  { %14432 = vmatprep.subr.bf16.mxu0 %v18537_v0  ;;  %v14462_v1 = vpack.c.bf16 %v6462_v50, %v6459_v61  ;;  %v6677_v61 = vld [vmem:[#allocation10 + $0x50] sm:$0xff] }
 0xd23   :  { %v14510_v50 = vpack.c.bf16 %v6677_v61, %v6674_v33  ;;  %v6709_v33 = vld [vmem:[#allocation10 + $0x150] sm:$0xff]  ;;  %v6712_v61 = vld [vmem:[#allocation10 + $0x168] sm:$0xff] }
 0xd25   :  { %14434 = vmatpush3.bf16.msra.mxu0 %v14433_v51  ;;  %v6458_v51 = vld [vmem:[#allocation9 + $0x90] sm:$0xff] }
 0xd26   :  { %14435 = vmatprep.subr.bf16.mxu0 %v18537_v0  ;;  %v14464_v43 = vpack.c.bf16 %v6461_v57, %v6458_v51  ;;  %v6675_v51 = vld [vmem:[#allocation10 + $0x40] sm:$0xff]  ;;  %v6678_v57 = vld [vmem:[#allocation10 + $0x58] sm:$0xff] }
 0xd29   :  { %14437 = vmatpush3.bf16.msra.mxu0 %v14436_v38  ;;  %v6460_v38 = vld [vmem:[#allocation9 + $0xa0] sm:$0xff] }
 0xd2a   :  { %14438 = vmatprep.subr.bf16.mxu0 %v18537_v0  ;;  %v14492_v10 = vpack.c.bf16 %v6463_v42, %v6460_v38  ;;  %v14542_v38 = vpack.c.bf16 %v6678_v57, %v6675_v51  ;;  %v6680_v42 = vld [vmem:[#allocation10 + $0x68] sm:$0xff]  ;;  %v6877_v51 = vld [vmem:[#allocation12 + $0x20] sm:$0xff] }
 0xd2d   :  { %14440 = vmatpush3.bf16.msra.mxu0 %v14439_v30  ;;  %v6468_v30 = vld [vmem:[#allocation9 + $0xe0] sm:$0xff] }
 0xd2e   :  { %14441 = vmatprep.subr.bf16.mxu0 %v18537_v0  ;;  %v14466_v26 = vpack.c.bf16 %v6468_v30, %v6465_v15  ;;  %v6683_v15 = vld [vmem:[#allocation10 + $0x80] sm:$0xff] }
 0xd2f   :  { %v14514_v30 = vpack.c.bf16 %v6683_v15, %v6680_v42 }
 0xd31   :  { %14443 = vmatpush3.bf16.msra.mxu0 %v14442_v27  ;;  %v6464_v27 = vld [vmem:[#allocation9 + $0xc0] sm:$0xff] }
 0xd32   :  { %14444 = vmatprep.subr.bf16.mxu0 %v18537_v0  ;;  %v14468_v19 = vpack.c.bf16 %v6467_v11, %v6464_v27  ;;  %v6681_v27 = vld [vmem:[#allocation10 + $0x70] sm:$0xff]  ;;  %v6684_v11 = vld [vmem:[#allocation10 + $0x88] sm:$0xff] }
 0xd35   :  { %14446 = vmatpush3.bf16.msra.mxu0 %v14445_v62  ;;  %v6466_v62 = vld [vmem:[#allocation9 + $0xd0] sm:$0xff] }
 0xd36   :  { %14447 = vmatprep.subr.bf16.mxu0 %v18537_v0  ;;  %v14495_v31 = vpack.c.bf16 %v6469_v40, %v6466_v62  ;;  %v14545_v62 = vpack.c.bf16 %v6684_v11, %v6681_v27  ;;  %v6686_v40 = vld [vmem:[#allocation10 + $0x98] sm:$0xff] }
 0xd37   :  { %v14518_v59 = vpack.c.bf16 %v6689_v8, %v6686_v40 }
 0xd39   :  { %14449 = vmatpush3.bf16.msra.mxu0 %v14448_v52  ;;  %v6472_v52 = vld [vmem:[#allocation9 + $0x100] sm:$0xff] }
 0xd3a   :  { %14482 = vmatprep.subr.bf16.mxu0 %v18537_v0  ;;  %v14498_v56 = vpack.c.bf16 %v6475_v53, %v6472_v52  ;;  %v6692_v53 = vld [vmem:[#allocation10 + $0xc8] sm:$0xff] }
 0xd3b   :  { %v14522_v41 = vpack.c.bf16 %v6695_v46, %v6692_v53 }
 0xdef   :  { %v6228_v9 = vpop.f32.mrb[36].mxu0 }
 0xdf0   :  { %v6229_v18 = vadd.f32 %v10173_v14, %v6228_v9  ;;  %v12101_v32 = vpop.f32.mrb[37].mxu0  ;;  %v14472_v14 = vpack.c.bf16 %v6473_v22, %v6470_v34  ;;  %v6478_v9 = vld [vmem:[#allocation9 + $0x130] sm:$0xff]  ;;  %v6687_v34 = vld [vmem:[#allocation10 + $0xa0] sm:$0xff]  ;;  %v6690_v22 = vld [vmem:[#allocation10 + $0xb8] sm:$0xff] }
 0xdf1   :  { %v14476_v32 = vpack.c.bf16 %v6479_v5, %v6476_v49  ;;  %v14548_v52 = vpack.c.bf16 %v6690_v22, %v6687_v34  ;;  %v6693_v49 = vld [vmem:[#allocation10 + $0xd0] sm:$0xff]  ;;  %v6696_v5 = vld [vmem:[#allocation10 + $0xe8] sm:$0xff] }
 0xdf2   :  { %v6232_v29 = vadd.f32 %v15819_v16, %v6229_v18  ;;  %v6486_v18 = vld [vmem:[#allocation9 + $0x170] sm:$0xff]  ;;  %v6485_v16 = vld [vmem:[#allocation9 + $0x168] sm:$0xff] }
 0xdf3   :  { %v14478_v39 = vpack.c.bf16 %v6486_v18, %v6483_v17  ;;  %v6701_v17 = vld [vmem:[#allocation10 + $0x110] sm:$0xff] }
 0xdf4   :  { %6233 = vst [vmem:[%s18333_s20] sm:$0xff] %v6232_v29  ;;  %6364 = vmatmul.mubr.f32.vlgmr.msra.gmra.mrb[80].mxu1 %v6232_v29  ;;  %12135 = vmatmul.mubr.f32.vlgmr.msra.gmra.mrb[38].mxu0 %v6232_v29  ;;  %v6484_v29 = vld [vmem:[#allocation9 + $0x160] sm:$0xff] }
 0xdf5   :  { %14453 = vmatpush1.bf16.msra.mxu1 %v14452_v24  ;;  %14484 = vmatpush3.bf16.msra.mxu0 %v14483_v54  ;;  %v14501_v24 = vpack.c.bf16 %v6481_v12, %v6478_v9  ;;  %v6482_v54 = vld [vmem:[#allocation9 + $0x150] sm:$0xff]  ;;  %v14551_v9 = vpack.c.bf16 %v6696_v5, %v6693_v49  ;;  %v6698_v12 = vld [vmem:[#allocation10 + $0xf8] sm:$0xff] }
 0xdf6   :  { %14455 = vmatprep.subr.bf16.mxu1 %v14454_v6  ;;  %14485 = vmatprep.subr.bf16.mxu0 %v18537_v0  ;;  %v6487_v6 = vld [vmem:[#allocation9 + $0x178] sm:$0xff]  ;;  %v14480_v23 = vpack.c.bf16 %v6485_v16, %v6482_v54  ;;  %v14526_v18 = vpack.c.bf16 %v6701_v17, %v6698_v12  ;;  %v6699_v54 = vld [vmem:[#allocation10 + $0x100] sm:$0xff] }
 0xdf7   :  { %6569 = vmatprep.mubr.f32.mxu1 %v18539_v3  ;;  %12169 = vmatprep.mubr.msk.f32.mxu0 %vm15995_vm0, %v18539_v3  ;;  %v14504_v60 = vpack.c.bf16 %v6487_v6, %v6484_v29  ;;  %v6702_v16 = vld [vmem:[#allocation10 + $0x118] sm:$0xff]  ;;  %v6704_v29 = vld [vmem:[#allocation10 + $0x128] sm:$0xff]  ;;  %v6707_v6 = vld [vmem:[#allocation10 + $0x140] sm:$0xff] }
 0xdf9   :  { %14457 = vmatpush1.bf16.msra.mxu1 %v14456_v44  ;;  %14487 = vmatpush3.bf16.msra.mxu0 %v14486_v28  ;;  %v6667_v44 = vld [vmem:[#allocation10] sm:$0xff]  ;;  %v6670_v28 = vld [vmem:[#allocation10 + $0x18] sm:$0xff] }
 0xdfa   :  { %14459 = vmatprep.subr.bf16.mxu1 %v14458_v13  ;;  %14488 = vmatprep.subr.bf16.mxu0 %v18537_v0  ;;  %v14508_v13 = vpack.c.bf16 %v6670_v28, %v6667_v44  ;;  %v14532_v44 = vpack.c.bf16 %v6706_v55, %v6703_v58  ;;  %v6708_v28 = vld [vmem:[#allocation10 + $0x148] sm:$0xff] }
 0xdfd   :  { %14461 = vmatpush1.bf16.msra.mxu1 %v14460_v25  ;;  %14490 = vmatpush3.bf16.msra.mxu0 %v14489_v20  ;;  %v6673_v25 = vld [vmem:[#allocation10 + $0x30] sm:$0xff]  ;;  %v6676_v20 = vld [vmem:[#allocation10 + $0x48] sm:$0xff] }
 0xdfe   :  { %14463 = vmatprep.subr.bf16.mxu1 %v14462_v1  ;;  %14491 = vmatprep.subr.bf16.mxu0 %v18537_v0  ;;  %v14512_v1 = vpack.c.bf16 %v6676_v20, %v6673_v25  ;;  %v6714_v25 = vld [vmem:[#allocation10 + $0x178] sm:$0xff]  ;;  %v6874_v20 = vld [vmem:[#allocation12 + $0x8] sm:$0xff] }
 0xe01   :  { %14465 = vmatpush1.bf16.msra.mxu1 %v14464_v43  ;;  %14493 = vmatpush3.bf16.msra.mxu0 %v14492_v10  ;;  %v6679_v43 = vld [vmem:[#allocation10 + $0x60] sm:$0xff]  ;;  %v6682_v10 = vld [vmem:[#allocation10 + $0x78] sm:$0xff] }
 0xe02   :  { %14467 = vmatprep.subr.bf16.mxu1 %v14466_v26  ;;  %14494 = vmatprep.subr.bf16.mxu0 %v18537_v0  ;;  %v14516_v26 = vpack.c.bf16 %v6682_v10, %v6679_v43  ;;  %v6282_v43 = vld [vmem:[%s18325_s12] sm:$0x7] }
 0xe03   :  { %v6287_v10 = vrot.slane %v6282_v43, %v18828_v47 }
 0xe05   :  { %14469 = vmatpush1.bf16.msra.mxu1 %v14468_v19  ;;  %14496 = vmatpush3.bf16.msra.mxu0 %v14495_v31  ;;  %v6685_v19 = vld [vmem:[#allocation10 + $0x90] sm:$0xff]  ;;  %v6688_v31 = vld [vmem:[#allocation10 + $0xa8] sm:$0xff] }
 0xe06   :  { %14471 = vmatprep.subr.bf16.mxu1 %v14470_v2  ;;  %14497 = vmatprep.subr.bf16.mxu0 %v18537_v0  ;;  %v14520_v2 = vpack.c.bf16 %v6688_v31, %v6685_v19 }
 0xe09   :  { %14473 = vmatpush1.bf16.msra.mxu1 %v14472_v14  ;;  %14499 = vmatpush3.bf16.msra.mxu0 %v14498_v56  ;;  %v6691_v14 = vld [vmem:[#allocation10 + $0xc0] sm:$0xff]  ;;  %v6694_v56 = vld [vmem:[#allocation10 + $0xd8] sm:$0xff] }
 0xe0a   :  { %14475 = vmatprep.subr.bf16.mxu1 %v14474_v4  ;;  %14500 = vmatprep.subr.bf16.mxu0 %v18537_v0  ;;  %v14524_v4 = vpack.c.bf16 %v6694_v56, %v6691_v14  ;;  %v6295_v56 = vrot.slane %v6282_v43, %v18830_v63 }
 0xe0d   :  { %14477 = vmatpush1.bf16.msra.mxu1 %v14476_v32  ;;  %14502 = vmatpush3.bf16.msra.mxu0 %v14501_v24  ;;  %v6697_v32 = vld [vmem:[#allocation10 + $0xf0] sm:$0xff]  ;;  %v6700_v24 = vld [vmem:[#allocation10 + $0x108] sm:$0xff] }
 0xe0e   :  { %14479 = vmatprep.subr.bf16.mxu1 %v14478_v39  ;;  %14503 = vmatprep.subr.bf16.mxu0 %v18537_v0  ;;  %v14528_v39 = vpack.c.bf16 %v6700_v24, %v6697_v32  ;;  %v6873_v32 = vld [vmem:[#allocation12] sm:$0xff] }
 0xe11   :  { %14481 = vmatpush1.bf16.msra.mxu1 %v14480_v23  ;;  %14505 = vmatpush3.bf16.msra.mxu0 %v14504_v60  ;;  %v14554_v23 = vpack.c.bf16 %v6702_v16, %v6699_v54  ;;  %v14530_v60 = vpack.c.bf16 %v6707_v6, %v6704_v29  ;;  %v6876_v54 = vld [vmem:[#allocation12 + $0x18] sm:$0xff]  ;;  %v6878_v16 = vld [vmem:[#allocation12 + $0x28] sm:$0xff] }
 0xe12   :  { %14538 = vmatprep.subr.bf16.mxu0 %v18537_v0  ;;  %14507 = vmatprep.subr.bf16.mxu1 %v14506_v37  ;;  %v6705_v37 = vld [vmem:[#allocation10 + $0x130] sm:$0xff]  ;;  %v6880_v6 = vld [vmem:[#allocation12 + $0x38] sm:$0xff]  ;;  %v14564_v55 = vpack.c.bf16 %v6876_v54, %v6873_v32  ;;  %v6909_v32 = vld [vmem:[#allocation12 + $0x120] sm:$0xff] }
 0xe13   :  { %v14557_v36 = vpack.c.bf16 %v6708_v28, %v6705_v37  ;;  %v6912_v54 = vld [vmem:[#allocation12 + $0x138] sm:$0xff] }
 0xe14   :  { %6570 = vmatmul.mubr.f32.vlgmr.msra.gmra.mrb[80].mxu1 %v17625_v35  ;;  %12170 = vmatmul.mubr.f32.vlgmr.msra.gmra.mrb[40].mxu0 %v17625_v35 }
 0xe15   :  { %6796 = vmatprep.mubr.f32.mxu1 %v18539_v3  ;;  %12204 = vmatprep.mubr.msk.f32.mxu0 %vm15995_vm0, %v18539_v3 }
 0xe16   :  { %14509 = vmatpush1.bf16.msra.mxu1 %v14508_v13  ;;  %14540 = vmatpush3.bf16.msra.mxu0 %v14539_v45  ;;  %v6713_v13 = vld [vmem:[#allocation10 + $0x170] sm:$0xff] }
 0xe17   :  { %14541 = vmatprep.subr.bf16.mxu0 %v18537_v0  ;;  %14511 = vmatprep.subr.bf16.mxu1 %v14510_v50  ;;  %v14534_v45 = vpack.c.bf16 %v6713_v13, %v6710_v7  ;;  %v6711_v50 = vld [vmem:[#allocation10 + $0x160] sm:$0xff]  ;;  %v6882_v13 = vld [vmem:[#allocation12 + $0x48] sm:$0xff] }
 0xe18   :  { %v14560_v57 = vpack.c.bf16 %v6714_v25, %v6711_v50 }
 0xe1a   :  { %14513 = vmatpush1.bf16.msra.mxu1 %v14512_v1  ;;  %14543 = vmatpush3.bf16.msra.mxu0 %v14542_v38  ;;  %v14536_v1 = vpack.c.bf16 %v6712_v61, %v6709_v33  ;;  %v14562_v38 = vpack.c.bf16 %v6877_v51, %v6874_v20  ;;  %v6886_v33 = vld [vmem:[#allocation12 + $0x68] sm:$0xff]  ;;  %v6889_v61 = vld [vmem:[#allocation12 + $0x80] sm:$0xff]  ;;  %v6888_v51 = vld [vmem:[#allocation12 + $0x78] sm:$0xff] }
 0xe1b   :  { %14544 = vmatprep.subr.bf16.mxu0 %v18537_v0  ;;  %14515 = vmatprep.subr.bf16.mxu1 %v14514_v30  ;;  %v6488_v30 = vld [vmem:[%s18326_s13] sm:$0x7]  ;;  %v14570_v20 = vpack.c.bf16 %v6889_v61, %v6886_v33  ;;  %v7101_v33 = vld [vmem:[%s18331_s18 + $0x8] sm:$0xff] }
 0xe1c   :  { %v6493_v27 = vrot.slane %v6488_v30, %v18828_v47  ;;  %v6497_v11 = vrot.slane %v6488_v30, %v18829_v21  ;;  %v6501_v14 = vrot.slane %v6488_v30, %v18830_v63 }
 0xe1e   :  { %14517 = vmatpush1.bf16.msra.mxu1 %v14516_v26  ;;  %14546 = vmatpush3.bf16.msra.mxu0 %v14545_v62  ;;  %v6291_v26 = vrot.slane %v6282_v43, %v18829_v21  ;;  %v15466_v62 = vadd.f32 %v6493_v27, %v6287_v10  ;;  %v6891_v43 = vld [vmem:[#allocation12 + $0x90] sm:$0xff]  ;;  %v6894_v27 = vld [vmem:[#allocation12 + $0xa8] sm:$0xff] }
 0xe1f   :  { %14547 = vmatprep.subr.bf16.mxu0 %v18537_v0  ;;  %14519 = vmatprep.subr.bf16.mxu1 %v14518_v59 }
 0xe20   :  { %v15468_v59 = vadd.f32 %v6497_v11, %v6291_v26  ;;  %v6893_v26 = vld [vmem:[#allocation12 + $0xa0] sm:$0xff]  ;;  %v6896_v11 = vld [vmem:[#allocation12 + $0xb8] sm:$0xff] }
 0xe22   :  { %14521 = vmatpush1.bf16.msra.mxu1 %v14520_v2  ;;  %14549 = vmatpush3.bf16.msra.mxu0 %v14548_v52 }
 0xe23   :  { %14550 = vmatprep.subr.bf16.mxu0 %v18537_v0  ;;  %14523 = vmatprep.subr.bf16.mxu1 %v14522_v41 }
 0xe26   :  { %14525 = vmatpush1.bf16.msra.mxu1 %v14524_v4  ;;  %14552 = vmatpush3.bf16.msra.mxu0 %v14551_v9 }
 0xe27   :  { %14553 = vmatprep.subr.bf16.mxu0 %v18537_v0  ;;  %14527 = vmatprep.subr.bf16.mxu1 %v14526_v18 }
 0xe2a   :  { %14529 = vmatpush1.bf16.msra.mxu1 %v14528_v39  ;;  %14555 = vmatpush3.bf16.msra.mxu0 %v14554_v23  ;;  %v6875_v39 = vld [vmem:[#allocation12 + $0x10] sm:$0xff] }
 0xe2b   :  { %14531 = vmatprep.subr.bf16.mxu1 %v14530_v60  ;;  %14556 = vmatprep.subr.bf16.mxu0 %v18537_v0  ;;  %v6883_v23 = vld [vmem:[#allocation12 + $0x50] sm:$0xff]  ;;  %v14595_v37 = vpack.c.bf16 %v6878_v16, %v6875_v39  ;;  %v6914_v16 = vld [vmem:[#allocation12 + $0x148] sm:$0xff] }
 0xe2c   :  { %v14566_v7 = vpack.c.bf16 %v6883_v23, %v6880_v6  ;;  %v6911_v39 = vld [vmem:[#allocation12 + $0x130] sm:$0xff]  ;;  %v14588_v23 = vpack.c.bf16 %v6912_v54, %v6909_v32 }
 0xe2d   :  { %v6919_v6 = vld [vmem:[#allocation12 + $0x170] sm:$0xff] }
 0xe2e   :  { %14533 = vmatpush1.bf16.msra.mxu1 %v14532_v44  ;;  %14558 = vmatpush3.bf16.msra.mxu0 %v14557_v36  ;;  %v6879_v44 = vld [vmem:[#allocation12 + $0x30] sm:$0xff]  ;;  %v6881_v36 = vld [vmem:[#allocation12 + $0x40] sm:$0xff] }
 0xe2f   :  { %14535 = vmatprep.subr.bf16.mxu1 %v14534_v45  ;;  %14559 = vmatprep.subr.bf16.mxu0 %v18537_v0  ;;  %v6884_v45 = vld [vmem:[#allocation12 + $0x58] sm:$0xff]  ;;  %v14568_v50 = vpack.c.bf16 %v6882_v13, %v6879_v44  ;;  %v6917_v44 = vld [vmem:[#allocation12 + $0x160] sm:$0xff]  ;;  %v7218_v54 = vld [vmem:[#allocation7 + $0xb0] sm:$0xff] }
 0xe30   :  { %v14598_v25 = vpack.c.bf16 %v6884_v45, %v6881_v36  ;;  %v7100_v45 = vld [vmem:[%s18331_s18] sm:$0xff] }
 0xe31   :  { %v14619_v61 = vpack.c.bf16 %v7101_v33, %v7100_v45  ;;  %v7226_v45 = vld [vmem:[#allocation7 + $0xf0] sm:$0xff]  ;;  %v7229_v33 = vld [vmem:[#allocation7 + $0x108] sm:$0xff] }
 0xe32   :  { %14537 = vmatpush1.bf16.msra.mxu1 %v14536_v1  ;;  %14561 = vmatpush3.bf16.msra.mxu0 %v14560_v57  ;;  %v6887_v1 = vld [vmem:[#allocation12 + $0x70] sm:$0xff]  ;;  %v6890_v57 = vld [vmem:[#allocation12 + $0x88] sm:$0xff] }
 0xe33   :  { %14563 = vmatprep.subr.bf16.mxu1 %v14562_v38  ;;  %14594 = vmatprep.subr.bf16.mxu0 %v18537_v0  ;;  %v6892_v38 = vld [vmem:[#allocation12 + $0x98] sm:$0xff]  ;;  %v14601_v30 = vpack.c.bf16 %v6890_v57, %v6887_v1  ;;  %v7106_v57 = vld [vmem:[%s18331_s18 + $0x30] sm:$0xff] }
 0xec7   :  { %v6436_v42 = vpop.f32.mrb[38].mxu0 }
 0xec8   :  { %v12136_v15 = vpop.f32.mrb[39].mxu0  ;;  %v6437_v9 = vadd.f32 %v6436_v42, %v6295_v56  ;;  %v6895_v42 = vld [vmem:[#allocation12 + $0xb0] sm:$0xff] }
 0xec9   :  { %v14574_v10 = vpack.c.bf16 %v6895_v42, %v6892_v38  ;;  %v7107_v38 = vld [vmem:[%s18331_s18 + $0x38] sm:$0xff] }
 0xeca   :  { %v14628_v42 = vpack.c.bf16 %v7107_v38, %v7106_v57 }
 0xee7   :  { %v6571_v40 = vpop.f32.mrb[80].mxu1  ;;  %v6642_v8 = vpop.f32.mrb[40].mxu0 }
 0xee8   :  { %v15467_v19 = vadd.f32 %v15466_v62, %v6571_v40  ;;  %v6573_v31 = vpop.f32.mrb[81].mxu1  ;;  %v12171_v34 = vpop.f32.mrb[41].mxu0  ;;  %v6643_v4 = vadd.f32 %v6642_v8, %v6501_v14  ;;  %v6898_v62 = vld [vmem:[#allocation12 + $0xc8] sm:$0xff]  ;;  %v6901_v40 = vld [vmem:[#allocation12 + $0xe0] sm:$0xff]  ;;  %v14576_v8 = vpack.c.bf16 %v6894_v27, %v6891_v43  ;;  %v6903_v14 = vld [vmem:[#allocation12 + $0xf0] sm:$0xff] }
 0xee9   :  { %v15469_v22 = vadd.f32 %v15468_v59, %v6573_v31  ;;  %v14604_v59 = vpack.c.bf16 %v6896_v11, %v6893_v26  ;;  %v14578_v31 = vpack.c.bf16 %v6901_v40, %v6898_v62  ;;  %v6900_v34 = vld [vmem:[#allocation12 + $0xd8] sm:$0xff]  ;;  %v7112_v11 = vld [vmem:[%s18331_s18 + $0x60] sm:$0xff]  ;;  %v7113_v62 = vld [vmem:[%s18331_s18 + $0x68] sm:$0xff] }
 0xeea   :  { %v10174_v2 = vmul.f32 -1.442695, %v15467_v19  ;;  %v6897_v19 = vld [vmem:[#allocation12 + $0xc0] sm:$0xff]  ;;  %v7111_v27 = vld [vmem:[%s18331_s18 + $0x58] sm:$0xff]  ;;  %v14637_v40 = vpack.c.bf16 %v7113_v62, %v7112_v11 }
 0xeeb   :  { %v10175_v52 = vmul.f32 -1.442695, %v15469_v22  ;;  %v6902_v22 = vld [vmem:[#allocation12 + $0xe8] sm:$0xff] }
 0xeec   :  { %15735 = vpow2.f32 %v10174_v2  ;;  %v6899_v2 = vld [vmem:[#allocation12 + $0xd0] sm:$0xff] }
 0xeed   :  { %15737 = vpow2.f32 %v10175_v52  ;;  %v6904_v52 = vld [vmem:[#allocation12 + $0xf8] sm:$0xff] }
 0xef6   :  { %v15736_v53 = vpop.eup %15735 }
 0xef7   :  { %v6650_v46 = vadd.f32 1.0, %v15736_v53  ;;  %v15738_v41 = vpop.eup %15737  ;;  %v6907_v53 = vld [vmem:[#allocation12 + $0x110] sm:$0xff] }
 0xef8   :  { %v6657_v49 = vadd.f32 1.0, %v15738_v41  ;;  %v14607_v41 = vpack.c.bf16 %v6902_v22, %v6899_v2  ;;  %v14582_v56 = vpack.c.bf16 %v6907_v53, %v6904_v52  ;;  %v7196_v2 = vld [vmem:[#allocation7] sm:$0xff]  ;;  %v7199_v52 = vld [vmem:[#allocation7 + $0x18] sm:$0xff] }
 0xef9   :  { %15739 = vrcp.f32 %v6650_v46  ;;  %v14580_v46 = vpack.c.bf16 %v6900_v34, %v6897_v19  ;;  %v7200_v34 = vld [vmem:[#allocation7 + $0x20] sm:$0xff]  ;;  %v14644_v53 = vpack.c.bf16 %v7199_v52, %v7196_v2 }
 0xefa   :  { %15741 = vrcp.f32 %v6657_v49  ;;  %v6906_v49 = vld [vmem:[#allocation12 + $0x108] sm:$0xff] }
 0xf03   :  { %v15740_v5 = vpop.eup %15739 }
 0xf04   :  { %v6660_v12 = vmul.f32 %v15740_v5, %v6643_v4  ;;  %v15742_v18 = vpop.eup %15741  ;;  %v6905_v4 = vld [vmem:[#allocation12 + $0x100] sm:$0xff]  ;;  %v6908_v5 = vld [vmem:[#allocation12 + $0x118] sm:$0xff] }
 0xf05   :  { %v6663_v24 = vsub.f32 1.0, %v15742_v18  ;;  %v6665_v58 = vmul.f32 %v15742_v18, %v17625_v35  ;;  %v6885_v35 = vld [vmem:[#allocation12 + $0x60] sm:$0xff]  ;;  %v14610_v18 = vpack.c.bf16 %v6908_v5, %v6905_v4  ;;  %v7209_v5 = vld [vmem:[#allocation7 + $0x68] sm:$0xff] }
 0xf06   :  { %v6661_v17 = vadd.f32 %v6660_v12, %v6437_v9  ;;  %v14572_v15 = vpack.c.bf16 %v6888_v51, %v6885_v35  ;;  %v6910_v9 = vld [vmem:[#allocation12 + $0x128] sm:$0xff]  ;;  %v6913_v12 = vld [vmem:[#allocation12 + $0x140] sm:$0xff] }
 0xf07   :  { %v7105_v51 = vld [vmem:[%s18331_s18 + $0x28] sm:$0xff] }
 0xf08   :  { %15743 = vtanh.f32 %v6661_v17  ;;  %v14584_v17 = vpack.c.bf16 %v6906_v49, %v6903_v14  ;;  %v7202_v14 = vld [vmem:[#allocation7 + $0x30] sm:$0xff]  ;;  %v7205_v49 = vld [vmem:[#allocation7 + $0x48] sm:$0xff] }
 0xf09   :  { %v14648_v4 = vpack.c.bf16 %v7205_v49, %v7202_v14 }
 0xf12   :  { %v15744_v29 = vpop.eup %15743 }
 0xf13   :  { %v6664_v60 = vmul.f32 %v15744_v29, %v6663_v24  ;;  %v14586_v24 = vpack.c.bf16 %v6913_v12, %v6910_v9  ;;  %v6916_v29 = vld [vmem:[#allocation12 + $0x158] sm:$0xff]  ;;  %v7212_v9 = vld [vmem:[#allocation7 + $0x80] sm:$0xff] }
 0xf14   :  { %v14650_v12 = vpack.c.bf16 %v7212_v9, %v7209_v5 }
 0xf15   :  { %v17773_v28 = vadd.f32 %v6665_v58, %v6664_v60  ;;  %v14613_v60 = vpack.c.bf16 %v6914_v16, %v6911_v39  ;;  %v6915_v58 = vld [vmem:[#allocation12 + $0x150] sm:$0xff] }
 0xf16   :  { %v7214_v16 = vld [vmem:[#allocation7 + $0x90] sm:$0xff] }
 0xf17   :  { %6797 = vmatmul.mubr.f32.vlgmr.msra.gmra.mrb[82].mxu1 %v17773_v28  ;;  %12205 = vmatmul.mubr.f32.vlgmr.msra.gmra.mrb[42].mxu0 %v17773_v28 }
 0xf18   :  { %14565 = vmatpush1.bf16.msra.mxu1 %v14564_v55  ;;  %14596 = vmatpush3.bf16.msra.mxu0 %v14595_v37  ;;  %v14590_v55 = vpack.c.bf16 %v6919_v6, %v6916_v29  ;;  %v6918_v37 = vld [vmem:[#allocation12 + $0x168] sm:$0xff] }
 0xf19   :  { %14567 = vmatprep.subr.bf16.mxu1 %v14566_v7  ;;  %14597 = vmatprep.subr.bf16.mxu0 %v18537_v0  ;;  %v6920_v7 = vld [vmem:[#allocation12 + $0x178] sm:$0xff]  ;;  %v14592_v13 = vpack.c.bf16 %v6918_v37, %v6915_v58  ;;  %v7217_v29 = vld [vmem:[#allocation7 + $0xa8] sm:$0xff] }
 0xf1a   :  { %7002 = vmatprep.mubr.f32.mxu1 %v18539_v3  ;;  %12239 = vmatprep.mubr.msk.f32.mxu0 %vm15995_vm0, %v18539_v3  ;;  %v14616_v36 = vpack.c.bf16 %v6920_v7, %v6917_v44  ;;  %v14656_v6 = vpack.c.bf16 %v7217_v29, %v7214_v16  ;;  %v7223_v37 = vld [vmem:[#allocation7 + $0xd8] sm:$0xff] }
 0xf1b   :  { %v7227_v7 = vld [vmem:[#allocation7 + $0xf8] sm:$0xff] }
 0xf1c   :  { %14569 = vmatpush1.bf16.msra.mxu1 %v14568_v50  ;;  %14599 = vmatpush3.bf16.msra.mxu0 %v14598_v25  ;;  %v7102_v50 = vld [vmem:[%s18331_s18 + $0x10] sm:$0xff]  ;;  %v7103_v25 = vld [vmem:[%s18331_s18 + $0x18] sm:$0xff] }
 0xf1d   :  { %14571 = vmatprep.subr.bf16.mxu1 %v14570_v20  ;;  %14600 = vmatprep.subr.bf16.mxu0 %v18537_v0  ;;  %v14622_v35 = vpack.c.bf16 %v7103_v25, %v7102_v50  ;;  %v7104_v20 = vld [vmem:[%s18331_s18 + $0x20] sm:$0xff]  ;;  %v7233_v50 = vld [vmem:[#allocation7 + $0x128] sm:$0xff] }
 0xf1e   :  { %v14625_v1 = vpack.c.bf16 %v7105_v51, %v7104_v20  ;;  %v7236_v25 = vld [vmem:[#allocation7 + $0x140] sm:$0xff]  ;;  %v7235_v51 = vld [vmem:[#allocation7 + $0x138] sm:$0xff] }
 0xf1f   :  { %v7232_v20 = vld [vmem:[#allocation7 + $0x120] sm:$0xff] }
 0xf20   :  { %14573 = vmatpush1.bf16.msra.mxu1 %v14572_v15  ;;  %14602 = vmatpush3.bf16.msra.mxu0 %v14601_v30  ;;  %v7108_v15 = vld [vmem:[%s18331_s18 + $0x40] sm:$0xff]  ;;  %v7109_v30 = vld [vmem:[%s18331_s18 + $0x48] sm:$0xff] }
 0xf21   :  { %14575 = vmatprep.subr.bf16.mxu1 %v14574_v10  ;;  %14603 = vmatprep.subr.bf16.mxu0 %v18537_v0  ;;  %v14631_v43 = vpack.c.bf16 %v7109_v30, %v7108_v15  ;;  %v7110_v10 = vld [vmem:[%s18331_s18 + $0x50] sm:$0xff]  ;;  %v6715_v15 = vld [vmem:[%s18329_s16] sm:$0x7] }
 0xf22   :  { %v14634_v26 = vpack.c.bf16 %v7111_v27, %v7110_v10  ;;  %v6720_v30 = vrot.slane %v6715_v15, %v18828_v47  ;;  %v6724_v10 = vrot.slane %v6715_v15, %v18829_v21 }
 0xf24   :  { %14577 = vmatpush1.bf16.msra.mxu1 %v14576_v8  ;;  %14605 = vmatpush3.bf16.msra.mxu0 %v14604_v59  ;;  %v7114_v8 = vld [vmem:[%s18331_s18 + $0x70] sm:$0xff]  ;;  %v7115_v59 = vld [vmem:[%s18331_s18 + $0x78] sm:$0xff] }
 0xf25   :  { %14579 = vmatprep.subr.bf16.mxu1 %v14578_v31  ;;  %14606 = vmatprep.subr.bf16.mxu0 %v18537_v0  ;;  %v14640_v19 = vpack.c.bf16 %v7115_v59, %v7114_v8  ;;  %v7197_v31 = vld [vmem:[#allocation7 + $0x8] sm:$0xff] }
 0xf26   :  { %v14642_v22 = vpack.c.bf16 %v7200_v34, %v7197_v31 }
 0xf28   :  { %14581 = vmatpush1.bf16.msra.mxu1 %v14580_v46  ;;  %14608 = vmatpush3.bf16.msra.mxu0 %v14607_v41  ;;  %v7203_v46 = vld [vmem:[#allocation7 + $0x38] sm:$0xff]  ;;  %v7206_v41 = vld [vmem:[#allocation7 + $0x50] sm:$0xff] }
 0xf29   :  { %14583 = vmatprep.subr.bf16.mxu1 %v14582_v56  ;;  %14609 = vmatprep.subr.bf16.mxu0 %v18537_v0  ;;  %v14646_v56 = vpack.c.bf16 %v7206_v41, %v7203_v46  ;;  %v6728_v41 = vrot.slane %v6715_v15, %v18830_v63  ;;  %v7240_v15 = vld [vmem:[#allocation7 + $0x160] sm:$0xff] }
 0xf2c   :  { %14585 = vmatpush1.bf16.msra.mxu1 %v14584_v17  ;;  %14611 = vmatpush3.bf16.msra.mxu0 %v14610_v18  ;;  %v7208_v17 = vld [vmem:[#allocation7 + $0x60] sm:$0xff]  ;;  %v7211_v18 = vld [vmem:[#allocation7 + $0x78] sm:$0xff] }
 0xf2d   :  { %14587 = vmatprep.subr.bf16.mxu1 %v14586_v24  ;;  %14612 = vmatprep.subr.bf16.mxu0 %v18537_v0  ;;  %v14652_v32 = vpack.c.bf16 %v7211_v18, %v7208_v17  ;;  %v7215_v24 = vld [vmem:[#allocation7 + $0x98] sm:$0xff]  ;;  %v7198_v18 = vld [vmem:[#allocation7 + $0x10] sm:$0xff] }
 0xf2e   :  { %v14654_v39 = vpack.c.bf16 %v7218_v54, %v7215_v24 }
 0xf30   :  { %14589 = vmatpush1.bf16.msra.mxu1 %v14588_v23  ;;  %14614 = vmatpush3.bf16.msra.mxu0 %v14613_v60  ;;  %v7221_v23 = vld [vmem:[#allocation7 + $0xc8] sm:$0xff]  ;;  %v7224_v60 = vld [vmem:[#allocation7 + $0xe0] sm:$0xff] }
 0xf31   :  { %14591 = vmatprep.subr.bf16.mxu1 %v14590_v55  ;;  %14615 = vmatprep.subr.bf16.mxu0 %v18537_v0  ;;  %v14658_v58 = vpack.c.bf16 %v7224_v60, %v7221_v23  ;;  %v7220_v55 = vld [vmem:[#allocation7 + $0xc0] sm:$0xff]  ;;  %v7207_v23 = vld [vmem:[#allocation7 + $0x58] sm:$0xff] }
 0xf32   :  { %v14660_v44 = vpack.c.bf16 %v7223_v37, %v7220_v55  ;;  %v7213_v55 = vld [vmem:[#allocation7 + $0x88] sm:$0xff] }
 0xf34   :  { %14593 = vmatpush1.bf16.msra.mxu1 %v14592_v13  ;;  %14617 = vmatpush3.bf16.msra.mxu0 %v14616_v36  ;;  %v7230_v13 = vld [vmem:[#allocation7 + $0x110] sm:$0xff] }
 0xf35   :  { %14618 = vmatprep.subr.bf16.mxu1 %v18537_v0  ;;  %14643 = vmatprep.subr.bf16.mxu0 %v14642_v22  ;;  %v14662_v36 = vpack.c.bf16 %v7230_v13, %v7227_v7  ;;  %v7222_v13 = vld [vmem:[#allocation7 + $0xd0] sm:$0xff] }
 0xf37   :  { %7003 = vmatmul.mubr.f32.vlgmr.msra.gmra.mrb[82].mxu1 %v17714_v48  ;;  %12240 = vmatmul.mubr.f32.vlgmr.msra.gmra.mrb[44].mxu0 %v17714_v48 }
 0xf38   :  { %12274 = vmatprep.mubr.msk.f32.mxu1 %vm15995_vm0, %v18539_v3  ;;  %7325 = vmatprep.mubr.f32.mxu0 %v18539_v3 }
 0xf39   :  { %14620 = vmatpush3.bf16.msra.mxu1 %v14619_v61  ;;  %14645 = vmatpush1.bf16.msra.mxu0 %v14644_v53  ;;  %v14664_v61 = vpack.c.bf16 %v7229_v33, %v7226_v45  ;;  %v7228_v33 = vld [vmem:[#allocation7 + $0x100] sm:$0xff] }
 0xf3a   :  { %14621 = vmatprep.subr.bf16.mxu1 %v18537_v0  ;;  %14647 = vmatprep.subr.bf16.mxu0 %v14646_v56 }
 0xf3d   :  { %14623 = vmatpush3.bf16.msra.mxu1 %v14622_v35  ;;  %14649 = vmatpush1.bf16.msra.mxu0 %v14648_v4  ;;  %v14666_v35 = vpack.c.bf16 %v7236_v25, %v7233_v50  ;;  %v7234_v25 = vld [vmem:[#allocation7 + $0x130] sm:$0xff] }
 0xf3e   :  { %14624 = vmatprep.subr.bf16.mxu1 %v18537_v0  ;;  %14651 = vmatprep.subr.bf16.mxu0 %v14650_v12 }
 0xf41   :  { %14626 = vmatpush3.bf16.msra.mxu1 %v14625_v1  ;;  %14653 = vmatpush1.bf16.msra.mxu0 %v14652_v32  ;;  %v14668_v1 = vpack.c.bf16 %v7235_v51, %v7232_v20  ;;  %v7201_v32 = vld [vmem:[#allocation7 + $0x28] sm:$0xff]  ;;  %v7239_v51 = vld [vmem:[#allocation7 + $0x158] sm:$0xff] }
 0xf42   :  { %14627 = vmatprep.subr.bf16.mxu1 %v18537_v0  ;;  %14655 = vmatprep.subr.bf16.mxu0 %v14654_v39  ;;  %v14675_v16 = vpack.c.bf16 %v7201_v32, %v7198_v18 }
 0xf45   :  { %14629 = vmatpush3.bf16.msra.mxu1 %v14628_v42  ;;  %14657 = vmatpush1.bf16.msra.mxu0 %v14656_v6  ;;  %v6921_v42 = vld [vmem:[%s18330_s17] sm:$0x7] }
 0xf46   :  { %14630 = vmatprep.subr.bf16.mxu1 %v18537_v0  ;;  %14659 = vmatprep.subr.bf16.mxu0 %v14658_v58  ;;  %v6930_v27 = vrot.slane %v6921_v42, %v18829_v21  ;;  %v6934_v46 = vrot.slane %v6921_v42, %v18830_v63  ;;  %v7204_v6 = vld [vmem:[#allocation7 + $0x40] sm:$0xff]  ;;  %v7210_v58 = vld [vmem:[#allocation7 + $0x70] sm:$0xff] }
 0xf47   :  { %v14678_v60 = vpack.c.bf16 %v7207_v23, %v7204_v6  ;;  %v14681_v37 = vpack.c.bf16 %v7213_v55, %v7210_v58  ;;  %v7419_v6 = vld [vmem:[#allocation9 + $0x88] sm:$0xff]  ;;  %v7421_v23 = vld [vmem:[#allocation9 + $0x98] sm:$0xff] }
 0xf49   :  { %14632 = vmatpush3.bf16.msra.mxu1 %v14631_v43  ;;  %14661 = vmatpush1.bf16.msra.mxu0 %v14660_v44  ;;  %v6926_v43 = vrot.slane %v6921_v42, %v18828_v47  ;;  %v7219_v44 = vld [vmem:[#allocation7 + $0xb8] sm:$0xff]  ;;  %v7241_v42 = vld [vmem:[#allocation7 + $0x168] sm:$0xff] }
 0xf4a   :  { %14633 = vmatprep.subr.bf16.mxu1 %v18537_v0  ;;  %14663 = vmatprep.subr.bf16.mxu0 %v14662_v36  ;;  %v7225_v36 = vld [vmem:[#allocation7 + $0xe8] sm:$0xff] }
 0xf4b   :  { %v14687_v45 = vpack.c.bf16 %v7225_v36, %v7222_v13  ;;  %v7425_v13 = vld [vmem:[#allocation9 + $0xb8] sm:$0xff]  ;;  %v7427_v36 = vld [vmem:[#allocation9 + $0xc8] sm:$0xff] }
 0xf4d   :  { %14635 = vmatpush3.bf16.msra.mxu1 %v14634_v26  ;;  %14665 = vmatpush1.bf16.msra.mxu0 %v14664_v61  ;;  %v15470_v26 = vadd.f32 %v6926_v43, %v6720_v30  ;;  %v7231_v61 = vld [vmem:[#allocation7 + $0x118] sm:$0xff] }
 0xf4e   :  { %14636 = vmatprep.subr.bf16.mxu1 %v18537_v0  ;;  %14667 = vmatprep.subr.bf16.mxu0 %v14666_v35  ;;  %v14690_v50 = vpack.c.bf16 %v7231_v61, %v7228_v33  ;;  %v7237_v35 = vld [vmem:[#allocation7 + $0x148] sm:$0xff]  ;;  %v7243_v43 = vld [vmem:[#allocation7 + $0x178] sm:$0xff] }
 0xf4f   :  { %v14693_v20 = vpack.c.bf16 %v7237_v35, %v7234_v25  ;;  %v7429_v35 = vld [vmem:[#allocation9 + $0xd8] sm:$0xff] }
 0xf51   :  { %14638 = vmatpush3.bf16.msra.mxu1 %v14637_v40  ;;  %14669 = vmatpush1.bf16.msra.mxu0 %v14668_v1  ;;  %v15472_v40 = vadd.f32 %v6930_v27, %v6724_v10  ;;  %v7242_v1 = vld [vmem:[#allocation7 + $0x170] sm:$0xff]  ;;  %v14696_v10 = vpack.c.bf16 %v7243_v43, %v7240_v15  ;;  %v7403_v27 = vld [vmem:[#allocation9 + $0x8] sm:$0xff] }
 0xf52   :  { %14639 = vmatprep.subr.bf16.mxu1 %v18537_v0  ;;  %v7432_v15 = vld [vmem:[#allocation9 + $0xf0] sm:$0xff]  ;;  %v7435_v43 = vld [vmem:[#allocation9 + $0x108] sm:$0xff] }
 0xf55   :  { %14641 = vmatpush3.bf16.msra.mxu1 %v14640_v19 }
 0xf56   :  { %14674 = vmatprep.subr.bf16.mxu1 %v18537_v0 }
 0xfea   :  { %v6869_v57 = vpop.f32.mrb[42].mxu0 }
 0xfeb   :  { %v12206_v38 = vpop.f32.mrb[43].mxu0  ;;  %v6870_v4 = vadd.f32 %v6869_v57, %v6728_v41  ;;  %v14670_v57 = vpack.c.bf16 %v7242_v1, %v7239_v51  ;;  %v7408_v41 = vld [vmem:[#allocation9 + $0x30] sm:$0xff]  ;;  %v7431_v51 = vld [vmem:[#allocation9 + $0xe8] sm:$0xff]  ;;  %v7433_v1 = vld [vmem:[#allocation9 + $0xf8] sm:$0xff] }
 0xfec   :  { %v7238_v38 = vld [vmem:[#allocation7 + $0x150] sm:$0xff] }
 0xfed   :  { %v14672_v30 = vpack.c.bf16 %v7241_v42, %v7238_v38  ;;  %14671 = vmatprep.subr.bf16.mxu0 %v14670_v57  ;;  %v7436_v57 = vld [vmem:[#allocation9 + $0x110] sm:$0xff] }
 0xfef   :  { %14673 = vmatpush1.bf16.msra.mxu0 %v14672_v30  ;;  %v14718_v30 = vpack.c.bf16 %v7436_v57, %v7433_v1  ;;  %v7651_v1 = vld [vmem:[#allocation10 + $0xb0] sm:$0xff] }
0x100a   :  { %v7004_v11 = vpop.f32.mrb[82].mxu1  ;;  %v7075_v62 = vpop.f32.mrb[44].mxu0 }
0x100b   :  { %v15471_v8 = vadd.f32 %v15470_v26, %v7004_v11  ;;  %v7006_v59 = vpop.f32.mrb[83].mxu1  ;;  %v12241_v19 = vpop.f32.mrb[45].mxu0  ;;  %v7076_v56 = vadd.f32 %v7075_v62, %v6934_v46  ;;  %v7406_v26 = vld [vmem:[#allocation9 + $0x20] sm:$0xff] }
0x100c   :  { %v15473_v34 = vadd.f32 %v15472_v40, %v7006_v59  ;;  %v14698_v11 = vpack.c.bf16 %v7406_v26, %v7403_v27  ;;  %v10178_v62 = vld [vmem:[%s18332_s19] ss:$0 sm:$0xff]  ;;  %v7404_v59 = vld [vmem:[#allocation9 + $0x10] sm:$0xff]  ;;  %v7407_v19 = vld [vmem:[#allocation9 + $0x28] sm:$0xff] }
0x100d   :  { %v10176_v31 = vmul.f32 -1.442695, %v15471_v8  ;;  %v7402_v40 = vld [vmem:[#allocation9] sm:$0xff]  ;;  %v7405_v8 = vld [vmem:[#allocation9 + $0x18] sm:$0xff]  ;;  %v14731_v46 = vpack.c.bf16 %v7407_v19, %v7404_v59  ;;  %v7439_v26 = vld [vmem:[#allocation9 + $0x128] sm:$0xff] }
0x100e   :  { %v10177_v2 = vmul.f32 -1.442695, %v15473_v34  ;;  %14699 = vmatprep.subr.bf16.mxu0 %v14698_v11  ;;  %v7409_v34 = vld [vmem:[#allocation9 + $0x38] sm:$0xff]  ;;  %v7442_v11 = vld [vmem:[#allocation9 + $0x140] sm:$0xff] }
0x100f   :  { %15745 = vpow2.f32 %v10176_v31  ;;  %v7437_v27 = vld [vmem:[#allocation9 + $0x118] sm:$0xff]  ;;  %v14722_v59 = vpack.c.bf16 %v7442_v11, %v7439_v26  ;;  %v7657_v26 = vld [vmem:[#allocation10 + $0xe0] sm:$0xff] }
0x1010   :  { %15747 = vpow2.f32 %v10177_v2  ;;  %v7412_v2 = vld [vmem:[#allocation9 + $0x50] sm:$0xff]  ;;  %v7441_v19 = vld [vmem:[#allocation9 + $0x138] sm:$0xff] }
0x1019   :  { %v15746_v22 = vpop.eup %15745 }
0x101a   :  { %v7083_v52 = vadd.f32 1.0, %v15746_v22  ;;  %v15748_v53 = vpop.eup %15747 }
0x101b   :  { %v7090_v14 = vadd.f32 1.0, %v15748_v53  ;;  %v14700_v53 = vpack.c.bf16 %v7405_v8, %v7402_v40  ;;  %v7438_v8 = vld [vmem:[#allocation9 + $0x120] sm:$0xff] }
0x101c   :  { %15749 = vrcp.f32 %v7083_v52 }
0x101d   :  { %15751 = vrcp.f32 %v7090_v14  ;;  %v15820_v14 = vld [vmem:[%s18333_s20] sm:$0xff] }
0x1026   :  { %v15750_v49 = vpop.eup %15749 }
0x1027   :  { %v7093_v5 = vmul.f32 %v15750_v49, %v7076_v56  ;;  %v15752_v12 = vpop.eup %15751  ;;  %v14702_v49 = vpack.c.bf16 %v7412_v2, %v7409_v34  ;;  %v7443_v34 = vld [vmem:[#allocation9 + $0x148] sm:$0xff]  ;;  %v7445_v2 = vld [vmem:[#allocation9 + $0x158] sm:$0xff] }
0x1028   :  { %v7096_v17 = vsub.f32 1.0, %v15752_v12  ;;  %v7098_v39 = vmul.f32 %v15752_v12, %v17714_v48  ;;  %v7216_v48 = vld [vmem:[#allocation7 + $0xa0] sm:$0xff]  ;;  %v7415_v12 = vld [vmem:[#allocation9 + $0x68] sm:$0xff] }
0x1029   :  { %v7094_v9 = vadd.f32 %v7093_v5, %v6870_v4  ;;  %v14684_v7 = vpack.c.bf16 %v7219_v44, %v7216_v48  ;;  %v7411_v4 = vld [vmem:[#allocation9 + $0x48] sm:$0xff]  ;;  %v7410_v5 = vld [vmem:[#allocation9 + $0x40] sm:$0xff] }
0x102a   :  { %v14704_v18 = vpack.c.bf16 %v7411_v4, %v7408_v41  ;;  %v7423_v44 = vld [vmem:[#allocation9 + $0xa8] sm:$0xff] }
0x102b   :  { %15753 = vtanh.f32 %v7094_v9  ;;  %v7413_v9 = vld [vmem:[#allocation9 + $0x58] sm:$0xff] }
0x102c   :  { %v14734_v32 = vpack.c.bf16 %v7413_v9, %v7410_v5  ;;  %v7630_v9 = vld [vmem:[#allocation10 + $0x8] sm:$0xff] }
0x1035   :  { %v15754_v24 = vpop.eup %15753 }
0x1036   :  { %v7097_v54 = vmul.f32 %v15754_v24, %v7096_v17  ;;  %v7418_v17 = vld [vmem:[#allocation9 + $0x80] sm:$0xff] }
0x1037   :  { %v7414_v24 = vld [vmem:[#allocation9 + $0x60] sm:$0xff] }
0x1038   :  { %v17862_v29 = vadd.f32 %v7098_v39, %v7097_v54  ;;  %v14706_v54 = vpack.c.bf16 %v7418_v17, %v7415_v12  ;;  %v7417_v39 = vld [vmem:[#allocation9 + $0x78] sm:$0xff]  ;;  %v7633_v12 = vld [vmem:[#allocation10 + $0x20] sm:$0xff] }
0x1039   :  { %v14708_v58 = vpack.c.bf16 %v7417_v39, %v7414_v24  ;;  %v14754_v17 = vpack.c.bf16 %v7633_v12, %v7630_v9  ;;  %v7631_v24 = vld [vmem:[#allocation10 + $0x10] sm:$0xff]  ;;  %v7634_v39 = vld [vmem:[#allocation10 + $0x28] sm:$0xff]  ;;  %v7665_v9 = vld [vmem:[#allocation10 + $0x120] sm:$0xff] }
0x103a   :  { %12275 = vmatmul.mubr.f32.vlgmr.msra.gmra.mrb[84].mxu1 %v17862_v29  ;;  %v7668_v12 = vld [vmem:[#allocation10 + $0x138] sm:$0xff] }
0x103b   :  { %14676 = vmatpush3.bf16.msra.mxu1 %v14675_v16  ;;  %12309 = vmatprep.mubr.msk.f32.mxu1 %vm15995_vm0, %v18539_v3  ;;  %v7416_v16 = vld [vmem:[#allocation9 + $0x70] sm:$0xff] }
0x103c   :  { %14677 = vmatprep.subr.bf16.mxu1 %v18537_v0  ;;  %v14737_v55 = vpack.c.bf16 %v7419_v6, %v7416_v16  ;;  %v14787_v16 = vpack.c.bf16 %v7634_v39, %v7631_v24  ;;  %v7636_v6 = vld [vmem:[#allocation10 + $0x38] sm:$0xff] }
0x103d   :  { %v7672_v24 = vld [vmem:[#allocation10 + $0x158] sm:$0xff] }
0x103f   :  { %14679 = vmatpush3.bf16.msra.mxu1 %v14678_v60  ;;  %v7424_v60 = vld [vmem:[#allocation9 + $0xb0] sm:$0xff] }
0x1040   :  { %14680 = vmatprep.subr.bf16.mxu1 %v18537_v0  ;;  %v14710_v48 = vpack.c.bf16 %v7424_v60, %v7421_v23  ;;  %v7639_v23 = vld [vmem:[#allocation10 + $0x50] sm:$0xff] }
0x1041   :  { %v14758_v60 = vpack.c.bf16 %v7639_v23, %v7636_v6  ;;  %v7671_v6 = vld [vmem:[#allocation10 + $0x150] sm:$0xff]  ;;  %v7674_v23 = vld [vmem:[#allocation10 + $0x168] sm:$0xff] }
0x1043   :  { %14682 = vmatpush3.bf16.msra.mxu1 %v14681_v37  ;;  %v7420_v37 = vld [vmem:[#allocation9 + $0x90] sm:$0xff] }
0x1044   :  { %14683 = vmatprep.subr.bf16.mxu1 %v18537_v0  ;;  %v14712_v33 = vpack.c.bf16 %v7423_v44, %v7420_v37  ;;  %v7637_v37 = vld [vmem:[#allocation10 + $0x40] sm:$0xff]  ;;  %v7640_v44 = vld [vmem:[#allocation10 + $0x58] sm:$0xff] }
0x1047   :  { %14685 = vmatpush3.bf16.msra.mxu1 %v14684_v7  ;;  %v7422_v7 = vld [vmem:[#allocation9 + $0xa0] sm:$0xff] }
0x1048   :  { %14686 = vmatprep.subr.bf16.mxu1 %v18537_v0  ;;  %v14740_v61 = vpack.c.bf16 %v7425_v13, %v7422_v7  ;;  %v14790_v7 = vpack.c.bf16 %v7640_v44, %v7637_v37  ;;  %v7642_v13 = vld [vmem:[#allocation10 + $0x68] sm:$0xff]  ;;  %v7839_v37 = vld [vmem:[#allocation12 + $0x20] sm:$0xff] }
0x104b   :  { %14688 = vmatpush3.bf16.msra.mxu1 %v14687_v45  ;;  %v7430_v45 = vld [vmem:[#allocation9 + $0xe0] sm:$0xff] }
0x104c   :  { %14689 = vmatprep.subr.bf16.mxu1 %v18537_v0  ;;  %v14714_v25 = vpack.c.bf16 %v7430_v45, %v7427_v36  ;;  %v7645_v36 = vld [vmem:[#allocation10 + $0x80] sm:$0xff] }
0x104d   :  { %v14762_v45 = vpack.c.bf16 %v7645_v36, %v7642_v13 }
0x104f   :  { %14691 = vmatpush3.bf16.msra.mxu1 %v14690_v50  ;;  %v7426_v50 = vld [vmem:[#allocation9 + $0xc0] sm:$0xff] }
0x1050   :  { %14692 = vmatprep.subr.bf16.mxu1 %v18537_v0  ;;  %v14716_v38 = vpack.c.bf16 %v7429_v35, %v7426_v50  ;;  %v7643_v50 = vld [vmem:[#allocation10 + $0x70] sm:$0xff]  ;;  %v7646_v35 = vld [vmem:[#allocation10 + $0x88] sm:$0xff] }
0x1053   :  { %14694 = vmatpush3.bf16.msra.mxu1 %v14693_v20  ;;  %v7428_v20 = vld [vmem:[#allocation9 + $0xd0] sm:$0xff] }
0x1054   :  { %14695 = vmatprep.subr.bf16.mxu1 %v18537_v0  ;;  %v14743_v42 = vpack.c.bf16 %v7431_v51, %v7428_v20  ;;  %v14793_v20 = vpack.c.bf16 %v7646_v35, %v7643_v50  ;;  %v7648_v51 = vld [vmem:[#allocation10 + $0x98] sm:$0xff] }
0x1055   :  { %v14766_v57 = vpack.c.bf16 %v7651_v1, %v7648_v51 }
0x1057   :  { %14697 = vmatpush3.bf16.msra.mxu1 %v14696_v10  ;;  %v7434_v10 = vld [vmem:[#allocation9 + $0x100] sm:$0xff] }
0x1058   :  { %14730 = vmatprep.subr.bf16.mxu1 %v18537_v0  ;;  %v14746_v40 = vpack.c.bf16 %v7437_v27, %v7434_v10  ;;  %v7654_v27 = vld [vmem:[#allocation10 + $0xc8] sm:$0xff] }
0x1059   :  { %v14770_v11 = vpack.c.bf16 %v7657_v26, %v7654_v27 }
0x110d   :  { %v7189_v31 = vpop.f32.mrb[84].mxu1 }
0x110e   :  { %v7190_v22 = vadd.f32 %v10178_v62, %v7189_v31  ;;  %v12276_v52 = vpop.f32.mrb[85].mxu1  ;;  %v14720_v62 = vpack.c.bf16 %v7435_v43, %v7432_v15  ;;  %v7440_v31 = vld [vmem:[#allocation9 + $0x130] sm:$0xff]  ;;  %v7649_v15 = vld [vmem:[#allocation10 + $0xa0] sm:$0xff]  ;;  %v7652_v43 = vld [vmem:[#allocation10 + $0xb8] sm:$0xff] }
0x110f   :  { %v14724_v52 = vpack.c.bf16 %v7441_v19, %v7438_v8  ;;  %v14796_v10 = vpack.c.bf16 %v7652_v43, %v7649_v15  ;;  %v7655_v8 = vld [vmem:[#allocation10 + $0xd0] sm:$0xff]  ;;  %v7658_v19 = vld [vmem:[#allocation10 + $0xe8] sm:$0xff] }
0x1110   :  { %v7193_v56 = vadd.f32 %v15820_v14, %v7190_v22  ;;  %v7448_v22 = vld [vmem:[#allocation9 + $0x170] sm:$0xff]  ;;  %v7447_v14 = vld [vmem:[#allocation9 + $0x168] sm:$0xff] }
0x1111   :  { %v14726_v41 = vpack.c.bf16 %v7448_v22, %v7445_v2  ;;  %v7663_v2 = vld [vmem:[#allocation10 + $0x110] sm:$0xff] }
0x1112   :  { %10179 = vst [vmem:[%s18333_s20 + $0x8] sm:$0xff] %v7193_v56  ;;  %7326 = vmatmul.mubr.f32.vlgmr.msra.gmra.mrb[46].mxu0 %v7193_v56  ;;  %12310 = vmatmul.mubr.f32.vlgmr.msra.gmra.mrb[86].mxu1 %v7193_v56  ;;  %v7446_v56 = vld [vmem:[#allocation9 + $0x160] sm:$0xff] }
0x1113   :  { %14701 = vmatpush1.bf16.msra.mxu0 %v14700_v53  ;;  %14732 = vmatpush3.bf16.msra.mxu1 %v14731_v46  ;;  %v14749_v53 = vpack.c.bf16 %v7443_v34, %v7440_v31  ;;  %v7444_v46 = vld [vmem:[#allocation9 + $0x150] sm:$0xff]  ;;  %v14799_v31 = vpack.c.bf16 %v7658_v19, %v7655_v8  ;;  %v7660_v34 = vld [vmem:[#allocation10 + $0xf8] sm:$0xff] }
0x1114   :  { %14703 = vmatprep.subr.bf16.mxu0 %v14702_v49  ;;  %14733 = vmatprep.subr.bf16.mxu1 %v18537_v0  ;;  %v7449_v49 = vld [vmem:[#allocation9 + $0x178] sm:$0xff]  ;;  %v14728_v4 = vpack.c.bf16 %v7447_v14, %v7444_v46  ;;  %v14774_v22 = vpack.c.bf16 %v7663_v2, %v7660_v34  ;;  %v7661_v46 = vld [vmem:[#allocation10 + $0x100] sm:$0xff] }
0x1115   :  { %7531 = vmatprep.mubr.f32.mxu0 %v18539_v3  ;;  %12344 = vmatprep.mubr.msk.f32.mxu1 %vm15995_vm0, %v18539_v3  ;;  %v14752_v5 = vpack.c.bf16 %v7449_v49, %v7446_v56  ;;  %v7664_v14 = vld [vmem:[#allocation10 + $0x118] sm:$0xff]  ;;  %v7666_v56 = vld [vmem:[#allocation10 + $0x128] sm:$0xff]  ;;  %v7669_v49 = vld [vmem:[#allocation10 + $0x140] sm:$0xff] }
0x1117   :  { %14705 = vmatpush1.bf16.msra.mxu0 %v14704_v18  ;;  %14735 = vmatpush3.bf16.msra.mxu1 %v14734_v32  ;;  %v7629_v18 = vld [vmem:[#allocation10] sm:$0xff]  ;;  %v7632_v32 = vld [vmem:[#allocation10 + $0x18] sm:$0xff] }
0x1118   :  { %14707 = vmatprep.subr.bf16.mxu0 %v14706_v54  ;;  %14736 = vmatprep.subr.bf16.mxu1 %v18537_v0  ;;  %v14756_v54 = vpack.c.bf16 %v7632_v32, %v7629_v18  ;;  %v14780_v18 = vpack.c.bf16 %v7668_v12, %v7665_v9  ;;  %v7670_v32 = vld [vmem:[#allocation10 + $0x148] sm:$0xff] }
0x111b   :  { %14709 = vmatpush1.bf16.msra.mxu0 %v14708_v58  ;;  %14738 = vmatpush3.bf16.msra.mxu1 %v14737_v55  ;;  %v7635_v58 = vld [vmem:[#allocation10 + $0x30] sm:$0xff]  ;;  %v7638_v55 = vld [vmem:[#allocation10 + $0x48] sm:$0xff] }
0x111c   :  { %14711 = vmatprep.subr.bf16.mxu0 %v14710_v48  ;;  %14739 = vmatprep.subr.bf16.mxu1 %v18537_v0  ;;  %v14760_v48 = vpack.c.bf16 %v7638_v55, %v7635_v58  ;;  %v7676_v58 = vld [vmem:[#allocation10 + $0x178] sm:$0xff]  ;;  %v7836_v55 = vld [vmem:[#allocation12 + $0x8] sm:$0xff] }
0x111f   :  { %14713 = vmatpush1.bf16.msra.mxu0 %v14712_v33  ;;  %14741 = vmatpush3.bf16.msra.mxu1 %v14740_v61  ;;  %v7641_v33 = vld [vmem:[#allocation10 + $0x60] sm:$0xff]  ;;  %v7644_v61 = vld [vmem:[#allocation10 + $0x78] sm:$0xff] }
0x1120   :  { %14715 = vmatprep.subr.bf16.mxu0 %v14714_v25  ;;  %14742 = vmatprep.subr.bf16.mxu1 %v18537_v0  ;;  %v14764_v25 = vpack.c.bf16 %v7644_v61, %v7641_v33  ;;  %v7244_v33 = vld [vmem:[%s18325_s12] sm:$0x7] }
0x1121   :  { %v7249_v61 = vrot.slane %v7244_v33, %v18828_v47 }
0x1123   :  { %14717 = vmatpush1.bf16.msra.mxu0 %v14716_v38  ;;  %14744 = vmatpush3.bf16.msra.mxu1 %v14743_v42  ;;  %v7647_v38 = vld [vmem:[#allocation10 + $0x90] sm:$0xff]  ;;  %v7650_v42 = vld [vmem:[#allocation10 + $0xa8] sm:$0xff] }
0x1124   :  { %14719 = vmatprep.subr.bf16.mxu0 %v14718_v30  ;;  %14745 = vmatprep.subr.bf16.mxu1 %v18537_v0  ;;  %v14768_v30 = vpack.c.bf16 %v7650_v42, %v7647_v38 }
0x1127   :  { %14721 = vmatpush1.bf16.msra.mxu0 %v14720_v62  ;;  %14747 = vmatpush3.bf16.msra.mxu1 %v14746_v40  ;;  %v7653_v62 = vld [vmem:[#allocation10 + $0xc0] sm:$0xff]  ;;  %v7656_v40 = vld [vmem:[#allocation10 + $0xd8] sm:$0xff] }
0x1128   :  { %14723 = vmatprep.subr.bf16.mxu0 %v14722_v59  ;;  %14748 = vmatprep.subr.bf16.mxu1 %v18537_v0  ;;  %v14772_v59 = vpack.c.bf16 %v7656_v40, %v7653_v62  ;;  %v7257_v40 = vrot.slane %v7244_v33, %v18830_v63 }
0x112b   :  { %14725 = vmatpush1.bf16.msra.mxu0 %v14724_v52  ;;  %14750 = vmatpush3.bf16.msra.mxu1 %v14749_v53  ;;  %v7659_v52 = vld [vmem:[#allocation10 + $0xf0] sm:$0xff]  ;;  %v7662_v53 = vld [vmem:[#allocation10 + $0x108] sm:$0xff] }
0x112c   :  { %14727 = vmatprep.subr.bf16.mxu0 %v14726_v41  ;;  %14751 = vmatprep.subr.bf16.mxu1 %v18537_v0  ;;  %v14776_v41 = vpack.c.bf16 %v7662_v53, %v7659_v52  ;;  %v7835_v52 = vld [vmem:[#allocation12] sm:$0xff] }
0x112f   :  { %14729 = vmatpush1.bf16.msra.mxu0 %v14728_v4  ;;  %14753 = vmatpush3.bf16.msra.mxu1 %v14752_v5  ;;  %v14802_v4 = vpack.c.bf16 %v7664_v14, %v7661_v46  ;;  %v14778_v5 = vpack.c.bf16 %v7669_v49, %v7666_v56  ;;  %v7838_v46 = vld [vmem:[#allocation12 + $0x18] sm:$0xff]  ;;  %v7840_v14 = vld [vmem:[#allocation12 + $0x28] sm:$0xff] }
0x1130   :  { %14786 = vmatprep.subr.bf16.mxu1 %v18537_v0  ;;  %14755 = vmatprep.subr.bf16.mxu0 %v14754_v17  ;;  %v7667_v17 = vld [vmem:[#allocation10 + $0x130] sm:$0xff]  ;;  %v7842_v49 = vld [vmem:[#allocation12 + $0x38] sm:$0xff]  ;;  %v14812_v12 = vpack.c.bf16 %v7838_v46, %v7835_v52  ;;  %v7871_v52 = vld [vmem:[#allocation12 + $0x120] sm:$0xff] }
0x1131   :  { %v14805_v39 = vpack.c.bf16 %v7670_v32, %v7667_v17  ;;  %v7874_v46 = vld [vmem:[#allocation12 + $0x138] sm:$0xff] }
0x1132   :  { %7532 = vmatmul.mubr.f32.vlgmr.msra.gmra.mrb[46].mxu0 %v17773_v28  ;;  %12345 = vmatmul.mubr.f32.vlgmr.msra.gmra.mrb[88].mxu1 %v17773_v28 }
0x1133   :  { %7758 = vmatprep.mubr.f32.mxu0 %v18539_v3  ;;  %12379 = vmatprep.mubr.msk.f32.mxu1 %vm15995_vm0, %v18539_v3 }
0x1134   :  { %14757 = vmatpush1.bf16.msra.mxu0 %v14756_v54  ;;  %14788 = vmatpush3.bf16.msra.mxu1 %v14787_v16  ;;  %v7675_v54 = vld [vmem:[#allocation10 + $0x170] sm:$0xff] }
0x1135   :  { %14789 = vmatprep.subr.bf16.mxu1 %v18537_v0  ;;  %14759 = vmatprep.subr.bf16.mxu0 %v14758_v60  ;;  %v14782_v16 = vpack.c.bf16 %v7675_v54, %v7672_v24  ;;  %v7673_v60 = vld [vmem:[#allocation10 + $0x160] sm:$0xff]  ;;  %v7844_v54 = vld [vmem:[#allocation12 + $0x48] sm:$0xff] }
0x1136   :  { %v14808_v44 = vpack.c.bf16 %v7676_v58, %v7673_v60 }
0x1138   :  { %14761 = vmatpush1.bf16.msra.mxu0 %v14760_v48  ;;  %14791 = vmatpush3.bf16.msra.mxu1 %v14790_v7  ;;  %v14784_v48 = vpack.c.bf16 %v7674_v23, %v7671_v6  ;;  %v14810_v7 = vpack.c.bf16 %v7839_v37, %v7836_v55  ;;  %v7848_v6 = vld [vmem:[#allocation12 + $0x68] sm:$0xff]  ;;  %v7851_v23 = vld [vmem:[#allocation12 + $0x80] sm:$0xff]  ;;  %v7850_v37 = vld [vmem:[#allocation12 + $0x78] sm:$0xff] }
0x1139   :  { %14792 = vmatprep.subr.bf16.mxu1 %v18537_v0  ;;  %14763 = vmatprep.subr.bf16.mxu0 %v14762_v45  ;;  %v7450_v45 = vld [vmem:[%s18326_s13] sm:$0x7]  ;;  %v14818_v55 = vpack.c.bf16 %v7851_v23, %v7848_v6  ;;  %v8063_v6 = vld [vmem:[%s18331_s18 + $0x8] sm:$0xff] }
0x113a   :  { %v7455_v50 = vrot.slane %v7450_v45, %v18828_v47  ;;  %v7459_v35 = vrot.slane %v7450_v45, %v18829_v21  ;;  %v7463_v62 = vrot.slane %v7450_v45, %v18830_v63 }
0x113c   :  { %14765 = vmatpush1.bf16.msra.mxu0 %v14764_v25  ;;  %14794 = vmatpush3.bf16.msra.mxu1 %v14793_v20  ;;  %v7253_v25 = vrot.slane %v7244_v33, %v18829_v21  ;;  %v15474_v20 = vadd.f32 %v7455_v50, %v7249_v61  ;;  %v7853_v33 = vld [vmem:[#allocation12 + $0x90] sm:$0xff]  ;;  %v7856_v50 = vld [vmem:[#allocation12 + $0xa8] sm:$0xff] }
0x113d   :  { %14795 = vmatprep.subr.bf16.mxu1 %v18537_v0  ;;  %14767 = vmatprep.subr.bf16.mxu0 %v14766_v57 }
0x113e   :  { %v15476_v57 = vadd.f32 %v7459_v35, %v7253_v25  ;;  %v7855_v25 = vld [vmem:[#allocation12 + $0xa0] sm:$0xff]  ;;  %v7858_v35 = vld [vmem:[#allocation12 + $0xb8] sm:$0xff] }
0x1140   :  { %14769 = vmatpush1.bf16.msra.mxu0 %v14768_v30  ;;  %14797 = vmatpush3.bf16.msra.mxu1 %v14796_v10 }
0x1141   :  { %14798 = vmatprep.subr.bf16.mxu1 %v18537_v0  ;;  %14771 = vmatprep.subr.bf16.mxu0 %v14770_v11 }
0x1144   :  { %14773 = vmatpush1.bf16.msra.mxu0 %v14772_v59  ;;  %14800 = vmatpush3.bf16.msra.mxu1 %v14799_v31 }
0x1145   :  { %14801 = vmatprep.subr.bf16.mxu1 %v18537_v0  ;;  %14775 = vmatprep.subr.bf16.mxu0 %v14774_v22 }
0x1148   :  { %14777 = vmatpush1.bf16.msra.mxu0 %v14776_v41  ;;  %14803 = vmatpush3.bf16.msra.mxu1 %v14802_v4  ;;  %v7837_v41 = vld [vmem:[#allocation12 + $0x10] sm:$0xff] }
0x1149   :  { %14779 = vmatprep.subr.bf16.mxu0 %v14778_v5  ;;  %14804 = vmatprep.subr.bf16.mxu1 %v18537_v0  ;;  %v7845_v4 = vld [vmem:[#allocation12 + $0x50] sm:$0xff]  ;;  %v14843_v17 = vpack.c.bf16 %v7840_v14, %v7837_v41  ;;  %v7876_v14 = vld [vmem:[#allocation12 + $0x148] sm:$0xff] }
0x114a   :  { %v14814_v24 = vpack.c.bf16 %v7845_v4, %v7842_v49  ;;  %v7873_v41 = vld [vmem:[#allocation12 + $0x130] sm:$0xff]  ;;  %v14836_v4 = vpack.c.bf16 %v7874_v46, %v7871_v52 }
0x114b   :  { %v7881_v49 = vld [vmem:[#allocation12 + $0x170] sm:$0xff] }
0x114c   :  { %14781 = vmatpush1.bf16.msra.mxu0 %v14780_v18  ;;  %14806 = vmatpush3.bf16.msra.mxu1 %v14805_v39  ;;  %v7841_v18 = vld [vmem:[#allocation12 + $0x30] sm:$0xff]  ;;  %v7843_v39 = vld [vmem:[#allocation12 + $0x40] sm:$0xff] }
0x114d   :  { %14783 = vmatprep.subr.bf16.mxu0 %v14782_v16  ;;  %14807 = vmatprep.subr.bf16.mxu1 %v18537_v0  ;;  %v7846_v16 = vld [vmem:[#allocation12 + $0x58] sm:$0xff]  ;;  %v14816_v60 = vpack.c.bf16 %v7844_v54, %v7841_v18  ;;  %v7879_v18 = vld [vmem:[#allocation12 + $0x160] sm:$0xff]  ;;  %v8180_v46 = vld [vmem:[#allocation7 + $0xb0] sm:$0xff] }
0x114e   :  { %v14846_v58 = vpack.c.bf16 %v7846_v16, %v7843_v39  ;;  %v8062_v16 = vld [vmem:[%s18331_s18] sm:$0xff] }
0x114f   :  { %v14867_v23 = vpack.c.bf16 %v8063_v6, %v8062_v16  ;;  %v8188_v16 = vld [vmem:[#allocation7 + $0xf0] sm:$0xff]  ;;  %v8191_v6 = vld [vmem:[#allocation7 + $0x108] sm:$0xff] }
0x1150   :  { %14785 = vmatpush1.bf16.msra.mxu0 %v14784_v48  ;;  %14809 = vmatpush3.bf16.msra.mxu1 %v14808_v44  ;;  %v7849_v48 = vld [vmem:[#allocation12 + $0x70] sm:$0xff]  ;;  %v7852_v44 = vld [vmem:[#allocation12 + $0x88] sm:$0xff] }
0x1151   :  { %14811 = vmatprep.subr.bf16.mxu0 %v14810_v7  ;;  %14842 = vmatprep.subr.bf16.mxu1 %v18537_v0  ;;  %v7854_v7 = vld [vmem:[#allocation12 + $0x98] sm:$0xff]  ;;  %v14849_v45 = vpack.c.bf16 %v7852_v44, %v7849_v48  ;;  %v8068_v44 = vld [vmem:[%s18331_s18 + $0x30] sm:$0xff] }
0x11e5   :  { %v7398_v13 = vpop.f32.mrb[86].mxu1 }
0x11e6   :  { %v12311_v36 = vpop.f32.mrb[87].mxu1  ;;  %v7399_v31 = vadd.f32 %v7398_v13, %v7257_v40  ;;  %v7857_v13 = vld [vmem:[#allocation12 + $0xb0] sm:$0xff] }
0x11e7   :  { %v14822_v61 = vpack.c.bf16 %v7857_v13, %v7854_v7  ;;  %v8069_v7 = vld [vmem:[%s18331_s18 + $0x38] sm:$0xff] }
0x11e8   :  { %v14876_v13 = vpack.c.bf16 %v8069_v7, %v8068_v44 }
0x1205   :  { %v7533_v51 = vpop.f32.mrb[46].mxu0  ;;  %v7604_v1 = vpop.f32.mrb[88].mxu1 }
0x1206   :  { %v15475_v38 = vadd.f32 %v15474_v20, %v7533_v51  ;;  %v7535_v42 = vpop.f32.mrb[47].mxu0  ;;  %v12346_v15 = vpop.f32.mrb[89].mxu1  ;;  %v7605_v59 = vadd.f32 %v7604_v1, %v7463_v62  ;;  %v7860_v20 = vld [vmem:[#allocation12 + $0xc8] sm:$0xff]  ;;  %v7863_v51 = vld [vmem:[#allocation12 + $0xe0] sm:$0xff]  ;;  %v14824_v1 = vpack.c.bf16 %v7856_v50, %v7853_v33  ;;  %v7865_v62 = vld [vmem:[#allocation12 + $0xf0] sm:$0xff] }
0x1207   :  { %v15477_v43 = vadd.f32 %v15476_v57, %v7535_v42  ;;  %v14852_v57 = vpack.c.bf16 %v7858_v35, %v7855_v25  ;;  %v14826_v42 = vpack.c.bf16 %v7863_v51, %v7860_v20  ;;  %v7862_v15 = vld [vmem:[#allocation12 + $0xd8] sm:$0xff]  ;;  %v8074_v35 = vld [vmem:[%s18331_s18 + $0x60] sm:$0xff]  ;;  %v8075_v20 = vld [vmem:[%s18331_s18 + $0x68] sm:$0xff] }
0x1208   :  { %v10180_v30 = vmul.f32 -1.442695, %v15475_v38  ;;  %v7859_v38 = vld [vmem:[#allocation12 + $0xc0] sm:$0xff]  ;;  %v8073_v50 = vld [vmem:[%s18331_s18 + $0x58] sm:$0xff]  ;;  %v14885_v51 = vpack.c.bf16 %v8075_v20, %v8074_v35 }
0x1209   :  { %v10181_v10 = vmul.f32 -1.442695, %v15477_v43  ;;  %v7864_v43 = vld [vmem:[#allocation12 + $0xe8] sm:$0xff] }
0x120a   :  { %15755 = vpow2.f32 %v10180_v30  ;;  %v7861_v30 = vld [vmem:[#allocation12 + $0xd0] sm:$0xff] }
0x120b   :  { %15757 = vpow2.f32 %v10181_v10  ;;  %v7866_v10 = vld [vmem:[#allocation12 + $0xf8] sm:$0xff] }
0x1214   :  { %v15756_v27 = vpop.eup %15755 }
0x1215   :  { %v7612_v26 = vadd.f32 1.0, %v15756_v27  ;;  %v15758_v11 = vpop.eup %15757  ;;  %v7869_v27 = vld [vmem:[#allocation12 + $0x110] sm:$0xff] }
0x1216   :  { %v7619_v8 = vadd.f32 1.0, %v15758_v11  ;;  %v14855_v11 = vpack.c.bf16 %v7864_v43, %v7861_v30  ;;  %v14830_v40 = vpack.c.bf16 %v7869_v27, %v7866_v10  ;;  %v8158_v30 = vld [vmem:[#allocation7] sm:$0xff]  ;;  %v8161_v10 = vld [vmem:[#allocation7 + $0x18] sm:$0xff] }
0x1217   :  { %15759 = vrcp.f32 %v7612_v26  ;;  %v14828_v26 = vpack.c.bf16 %v7862_v15, %v7859_v38  ;;  %v8162_v15 = vld [vmem:[#allocation7 + $0x20] sm:$0xff]  ;;  %v14892_v27 = vpack.c.bf16 %v8161_v10, %v8158_v30 }
0x1218   :  { %15761 = vrcp.f32 %v7619_v8  ;;  %v7868_v8 = vld [vmem:[#allocation12 + $0x108] sm:$0xff] }
0x1221   :  { %v15760_v19 = vpop.eup %15759 }
0x1222   :  { %v7622_v34 = vmul.f32 %v15760_v19, %v7605_v59  ;;  %v15762_v22 = vpop.eup %15761  ;;  %v7867_v59 = vld [vmem:[#allocation12 + $0x100] sm:$0xff]  ;;  %v7870_v19 = vld [vmem:[#allocation12 + $0x118] sm:$0xff] }
0x1223   :  { %v7625_v53 = vsub.f32 1.0, %v15762_v22  ;;  %v7627_v9 = vmul.f32 %v15762_v22, %v17773_v28  ;;  %v7847_v28 = vld [vmem:[#allocation12 + $0x60] sm:$0xff]  ;;  %v14858_v22 = vpack.c.bf16 %v7870_v19, %v7867_v59  ;;  %v8171_v19 = vld [vmem:[#allocation7 + $0x68] sm:$0xff] }
0x1224   :  { %v7623_v2 = vadd.f32 %v7622_v34, %v7399_v31  ;;  %v14820_v36 = vpack.c.bf16 %v7850_v37, %v7847_v28  ;;  %v7872_v31 = vld [vmem:[#allocation12 + $0x128] sm:$0xff]  ;;  %v7875_v34 = vld [vmem:[#allocation12 + $0x140] sm:$0xff] }
0x1225   :  { %v8067_v37 = vld [vmem:[%s18331_s18 + $0x28] sm:$0xff] }
0x1226   :  { %15763 = vtanh.f32 %v7623_v2  ;;  %v14832_v2 = vpack.c.bf16 %v7868_v8, %v7865_v62  ;;  %v8164_v62 = vld [vmem:[#allocation7 + $0x30] sm:$0xff]  ;;  %v8167_v8 = vld [vmem:[#allocation7 + $0x48] sm:$0xff] }
0x1227   :  { %v14896_v59 = vpack.c.bf16 %v8167_v8, %v8164_v62 }
0x1230   :  { %v15764_v56 = vpop.eup %15763 }
0x1231   :  { %v7626_v5 = vmul.f32 %v15764_v56, %v7625_v53  ;;  %v14834_v53 = vpack.c.bf16 %v7875_v34, %v7872_v31  ;;  %v7878_v56 = vld [vmem:[#allocation12 + $0x158] sm:$0xff]  ;;  %v8174_v31 = vld [vmem:[#allocation7 + $0x80] sm:$0xff] }
0x1232   :  { %v14898_v34 = vpack.c.bf16 %v8174_v31, %v8171_v19 }
0x1233   :  { %v17921_v32 = vadd.f32 %v7627_v9, %v7626_v5  ;;  %v14861_v5 = vpack.c.bf16 %v7876_v14, %v7873_v41  ;;  %v7877_v9 = vld [vmem:[#allocation12 + $0x150] sm:$0xff] }
0x1234   :  { %v8176_v14 = vld [vmem:[#allocation7 + $0x90] sm:$0xff] }
0x1235   :  { %7759 = vmatmul.mubr.f32.vlgmr.msra.gmra.mrb[48].mxu0 %v17921_v32  ;;  %12380 = vmatmul.mubr.f32.vlgmr.msra.gmra.mrb[90].mxu1 %v17921_v32 }
0x1236   :  { %14813 = vmatpush1.bf16.msra.mxu0 %v14812_v12  ;;  %14844 = vmatpush3.bf16.msra.mxu1 %v14843_v17  ;;  %v14838_v12 = vpack.c.bf16 %v7881_v49, %v7878_v56  ;;  %v7880_v17 = vld [vmem:[#allocation12 + $0x168] sm:$0xff] }
0x1237   :  { %14815 = vmatprep.subr.bf16.mxu0 %v14814_v24  ;;  %14845 = vmatprep.subr.bf16.mxu1 %v18537_v0  ;;  %v7882_v24 = vld [vmem:[#allocation12 + $0x178] sm:$0xff]  ;;  %v14840_v54 = vpack.c.bf16 %v7880_v17, %v7877_v9  ;;  %v8179_v56 = vld [vmem:[#allocation7 + $0xa8] sm:$0xff] }
0x1238   :  { %7964 = vmatprep.mubr.f32.mxu0 %v18539_v3  ;;  %12414 = vmatprep.mubr.msk.f32.mxu1 %vm15995_vm0, %v18539_v3  ;;  %v14864_v39 = vpack.c.bf16 %v7882_v24, %v7879_v18  ;;  %v14904_v49 = vpack.c.bf16 %v8179_v56, %v8176_v14  ;;  %v8185_v17 = vld [vmem:[#allocation7 + $0xd8] sm:$0xff] }
0x1239   :  { %v8189_v24 = vld [vmem:[#allocation7 + $0xf8] sm:$0xff] }
0x123a   :  { %14817 = vmatpush1.bf16.msra.mxu0 %v14816_v60  ;;  %14847 = vmatpush3.bf16.msra.mxu1 %v14846_v58  ;;  %v8064_v60 = vld [vmem:[%s18331_s18 + $0x10] sm:$0xff]  ;;  %v8065_v58 = vld [vmem:[%s18331_s18 + $0x18] sm:$0xff] }
0x123b   :  { %14819 = vmatprep.subr.bf16.mxu0 %v14818_v55  ;;  %14848 = vmatprep.subr.bf16.mxu1 %v18537_v0  ;;  %v14870_v28 = vpack.c.bf16 %v8065_v58, %v8064_v60  ;;  %v8066_v55 = vld [vmem:[%s18331_s18 + $0x20] sm:$0xff]  ;;  %v8195_v60 = vld [vmem:[#allocation7 + $0x128] sm:$0xff] }
0x123c   :  { %v14873_v48 = vpack.c.bf16 %v8067_v37, %v8066_v55  ;;  %v8198_v58 = vld [vmem:[#allocation7 + $0x140] sm:$0xff]  ;;  %v8197_v37 = vld [vmem:[#allocation7 + $0x138] sm:$0xff] }
0x123d   :  { %v8194_v55 = vld [vmem:[#allocation7 + $0x120] sm:$0xff] }
0x123e   :  { %14821 = vmatpush1.bf16.msra.mxu0 %v14820_v36  ;;  %14850 = vmatpush3.bf16.msra.mxu1 %v14849_v45  ;;  %v8070_v36 = vld [vmem:[%s18331_s18 + $0x40] sm:$0xff]  ;;  %v8071_v45 = vld [vmem:[%s18331_s18 + $0x48] sm:$0xff] }
0x123f   :  { %14823 = vmatprep.subr.bf16.mxu0 %v14822_v61  ;;  %14851 = vmatprep.subr.bf16.mxu1 %v18537_v0  ;;  %v14879_v33 = vpack.c.bf16 %v8071_v45, %v8070_v36  ;;  %v8072_v61 = vld [vmem:[%s18331_s18 + $0x50] sm:$0xff]  ;;  %v7677_v36 = vld [vmem:[%s18329_s16] sm:$0x7] }
0x1240   :  { %v14882_v25 = vpack.c.bf16 %v8073_v50, %v8072_v61  ;;  %v7682_v45 = vrot.slane %v7677_v36, %v18828_v47  ;;  %v7686_v61 = vrot.slane %v7677_v36, %v18829_v21 }
0x1242   :  { %14825 = vmatpush1.bf16.msra.mxu0 %v14824_v1  ;;  %14853 = vmatpush3.bf16.msra.mxu1 %v14852_v57  ;;  %v8076_v1 = vld [vmem:[%s18331_s18 + $0x70] sm:$0xff]  ;;  %v8077_v57 = vld [vmem:[%s18331_s18 + $0x78] sm:$0xff] }
0x1243   :  { %14827 = vmatprep.subr.bf16.mxu0 %v14826_v42  ;;  %14854 = vmatprep.subr.bf16.mxu1 %v18537_v0  ;;  %v14888_v38 = vpack.c.bf16 %v8077_v57, %v8076_v1  ;;  %v8159_v42 = vld [vmem:[#allocation7 + $0x8] sm:$0xff] }
0x1244   :  { %v14890_v43 = vpack.c.bf16 %v8162_v15, %v8159_v42 }
0x1246   :  { %14829 = vmatpush1.bf16.msra.mxu0 %v14828_v26  ;;  %14856 = vmatpush3.bf16.msra.mxu1 %v14855_v11  ;;  %v8165_v26 = vld [vmem:[#allocation7 + $0x38] sm:$0xff]  ;;  %v8168_v11 = vld [vmem:[#allocation7 + $0x50] sm:$0xff] }
0x1247   :  { %14831 = vmatprep.subr.bf16.mxu0 %v14830_v40  ;;  %14857 = vmatprep.subr.bf16.mxu1 %v18537_v0  ;;  %v14894_v40 = vpack.c.bf16 %v8168_v11, %v8165_v26  ;;  %v7690_v11 = vrot.slane %v7677_v36, %v18830_v63  ;;  %v8202_v36 = vld [vmem:[#allocation7 + $0x160] sm:$0xff] }
0x124a   :  { %14833 = vmatpush1.bf16.msra.mxu0 %v14832_v2  ;;  %14859 = vmatpush3.bf16.msra.mxu1 %v14858_v22  ;;  %v8170_v2 = vld [vmem:[#allocation7 + $0x60] sm:$0xff]  ;;  %v8173_v22 = vld [vmem:[#allocation7 + $0x78] sm:$0xff] }
0x124b   :  { %14835 = vmatprep.subr.bf16.mxu0 %v14834_v53  ;;  %14860 = vmatprep.subr.bf16.mxu1 %v18537_v0  ;;  %v14900_v52 = vpack.c.bf16 %v8173_v22, %v8170_v2  ;;  %v8177_v53 = vld [vmem:[#allocation7 + $0x98] sm:$0xff]  ;;  %v8160_v22 = vld [vmem:[#allocation7 + $0x10] sm:$0xff] }
0x124c   :  { %v14902_v41 = vpack.c.bf16 %v8180_v46, %v8177_v53 }
0x124e   :  { %14837 = vmatpush1.bf16.msra.mxu0 %v14836_v4  ;;  %14862 = vmatpush3.bf16.msra.mxu1 %v14861_v5  ;;  %v8183_v4 = vld [vmem:[#allocation7 + $0xc8] sm:$0xff]  ;;  %v8186_v5 = vld [vmem:[#allocation7 + $0xe0] sm:$0xff] }
0x124f   :  { %14839 = vmatprep.subr.bf16.mxu0 %v14838_v12  ;;  %14863 = vmatprep.subr.bf16.mxu1 %v18537_v0  ;;  %v14906_v9 = vpack.c.bf16 %v8186_v5, %v8183_v4  ;;  %v8182_v12 = vld [vmem:[#allocation7 + $0xc0] sm:$0xff]  ;;  %v8169_v4 = vld [vmem:[#allocation7 + $0x58] sm:$0xff] }
0x1250   :  { %v14908_v18 = vpack.c.bf16 %v8185_v17, %v8182_v12  ;;  %v8175_v12 = vld [vmem:[#allocation7 + $0x88] sm:$0xff] }
0x1252   :  { %14841 = vmatpush1.bf16.msra.mxu0 %v14840_v54  ;;  %14865 = vmatpush3.bf16.msra.mxu1 %v14864_v39  ;;  %v8192_v54 = vld [vmem:[#allocation7 + $0x110] sm:$0xff] }
0x1253   :  { %14866 = vmatprep.subr.bf16.mxu0 %v18537_v0  ;;  %14891 = vmatprep.subr.bf16.mxu1 %v14890_v43  ;;  %v14910_v39 = vpack.c.bf16 %v8192_v54, %v8189_v24  ;;  %v8184_v54 = vld [vmem:[#allocation7 + $0xd0] sm:$0xff] }
0x1255   :  { %7965 = vmatmul.mubr.f32.vlgmr.msra.gmra.mrb[48].mxu0 %v17862_v29  ;;  %12415 = vmatmul.mubr.f32.vlgmr.msra.gmra.mrb[92].mxu1 %v17862_v29 }
0x1256   :  { %12449 = vmatprep.mubr.msk.f32.mxu0 %vm15995_vm0, %v18539_v3  ;;  %8287 = vmatprep.mubr.f32.mxu1 %v18539_v3 }
0x1257   :  { %14868 = vmatpush3.bf16.msra.mxu0 %v14867_v23  ;;  %14893 = vmatpush1.bf16.msra.mxu1 %v14892_v27  ;;  %v14912_v23 = vpack.c.bf16 %v8191_v6, %v8188_v16  ;;  %v8190_v6 = vld [vmem:[#allocation7 + $0x100] sm:$0xff] }
0x1258   :  { %14869 = vmatprep.subr.bf16.mxu0 %v18537_v0  ;;  %14895 = vmatprep.subr.bf16.mxu1 %v14894_v40 }
0x125b   :  { %14871 = vmatpush3.bf16.msra.mxu0 %v14870_v28  ;;  %14897 = vmatpush1.bf16.msra.mxu1 %v14896_v59  ;;  %v14914_v28 = vpack.c.bf16 %v8198_v58, %v8195_v60  ;;  %v8196_v58 = vld [vmem:[#allocation7 + $0x130] sm:$0xff] }
0x125c   :  { %14872 = vmatprep.subr.bf16.mxu0 %v18537_v0  ;;  %14899 = vmatprep.subr.bf16.mxu1 %v14898_v34 }
0x125f   :  { %14874 = vmatpush3.bf16.msra.mxu0 %v14873_v48  ;;  %14901 = vmatpush1.bf16.msra.mxu1 %v14900_v52  ;;  %v14916_v48 = vpack.c.bf16 %v8197_v37, %v8194_v55  ;;  %v8163_v52 = vld [vmem:[#allocation7 + $0x28] sm:$0xff]  ;;  %v8201_v37 = vld [vmem:[#allocation7 + $0x158] sm:$0xff] }
0x1260   :  { %14875 = vmatprep.subr.bf16.mxu0 %v18537_v0  ;;  %14903 = vmatprep.subr.bf16.mxu1 %v14902_v41  ;;  %v14923_v14 = vpack.c.bf16 %v8163_v52, %v8160_v22 }
0x1263   :  { %14877 = vmatpush3.bf16.msra.mxu0 %v14876_v13  ;;  %14905 = vmatpush1.bf16.msra.mxu1 %v14904_v49  ;;  %v7883_v13 = vld [vmem:[%s18330_s17] sm:$0x7] }
0x1264   :  { %14878 = vmatprep.subr.bf16.mxu0 %v18537_v0  ;;  %14907 = vmatprep.subr.bf16.mxu1 %v14906_v9  ;;  %v7892_v50 = vrot.slane %v7883_v13, %v18829_v21  ;;  %v7896_v26 = vrot.slane %v7883_v13, %v18830_v63  ;;  %v8166_v49 = vld [vmem:[#allocation7 + $0x40] sm:$0xff]  ;;  %v8172_v9 = vld [vmem:[#allocation7 + $0x70] sm:$0xff] }
0x1265   :  { %v14926_v5 = vpack.c.bf16 %v8169_v4, %v8166_v49  ;;  %v14929_v17 = vpack.c.bf16 %v8175_v12, %v8172_v9  ;;  %v8381_v49 = vld [vmem:[#allocation9 + $0x88] sm:$0xff]  ;;  %v8383_v4 = vld [vmem:[#allocation9 + $0x98] sm:$0xff] }
0x1267   :  { %14880 = vmatpush3.bf16.msra.mxu0 %v14879_v33  ;;  %14909 = vmatpush1.bf16.msra.mxu1 %v14908_v18  ;;  %v7888_v33 = vrot.slane %v7883_v13, %v18828_v47  ;;  %v8181_v18 = vld [vmem:[#allocation7 + $0xb8] sm:$0xff]  ;;  %v8203_v13 = vld [vmem:[#allocation7 + $0x168] sm:$0xff] }
0x1268   :  { %14881 = vmatprep.subr.bf16.mxu0 %v18537_v0  ;;  %14911 = vmatprep.subr.bf16.mxu1 %v14910_v39  ;;  %v8187_v39 = vld [vmem:[#allocation7 + $0xe8] sm:$0xff] }
0x1269   :  { %v14935_v16 = vpack.c.bf16 %v8187_v39, %v8184_v54  ;;  %v8387_v54 = vld [vmem:[#allocation9 + $0xb8] sm:$0xff]  ;;  %v8389_v39 = vld [vmem:[#allocation9 + $0xc8] sm:$0xff] }
0x126b   :  { %14883 = vmatpush3.bf16.msra.mxu0 %v14882_v25  ;;  %14913 = vmatpush1.bf16.msra.mxu1 %v14912_v23  ;;  %v15478_v25 = vadd.f32 %v7888_v33, %v7682_v45  ;;  %v8193_v23 = vld [vmem:[#allocation7 + $0x118] sm:$0xff] }
0x126c   :  { %14884 = vmatprep.subr.bf16.mxu0 %v18537_v0  ;;  %14915 = vmatprep.subr.bf16.mxu1 %v14914_v28  ;;  %v14938_v60 = vpack.c.bf16 %v8193_v23, %v8190_v6  ;;  %v8199_v28 = vld [vmem:[#allocation7 + $0x148] sm:$0xff]  ;;  %v8205_v33 = vld [vmem:[#allocation7 + $0x178] sm:$0xff] }
0x126d   :  { %v14941_v55 = vpack.c.bf16 %v8199_v28, %v8196_v58  ;;  %v8391_v28 = vld [vmem:[#allocation9 + $0xd8] sm:$0xff] }
0x126f   :  { %14886 = vmatpush3.bf16.msra.mxu0 %v14885_v51  ;;  %14917 = vmatpush1.bf16.msra.mxu1 %v14916_v48  ;;  %v15480_v51 = vadd.f32 %v7892_v50, %v7686_v61  ;;  %v8204_v48 = vld [vmem:[#allocation7 + $0x170] sm:$0xff]  ;;  %v14944_v61 = vpack.c.bf16 %v8205_v33, %v8202_v36  ;;  %v8365_v50 = vld [vmem:[#allocation9 + $0x8] sm:$0xff] }
0x1270   :  { %14887 = vmatprep.subr.bf16.mxu0 %v18537_v0  ;;  %v8394_v36 = vld [vmem:[#allocation9 + $0xf0] sm:$0xff]  ;;  %v8397_v33 = vld [vmem:[#allocation9 + $0x108] sm:$0xff] }
0x1273   :  { %14889 = vmatpush3.bf16.msra.mxu0 %v14888_v38 }
0x1274   :  { %14922 = vmatprep.subr.bf16.mxu0 %v18537_v0 }
0x1308   :  { %v7831_v44 = vpop.f32.mrb[90].mxu1 }
0x1309   :  { %v12381_v7 = vpop.f32.mrb[91].mxu1  ;;  %v7832_v59 = vadd.f32 %v7831_v44, %v7690_v11  ;;  %v14918_v44 = vpack.c.bf16 %v8204_v48, %v8201_v37  ;;  %v8370_v11 = vld [vmem:[#allocation9 + $0x30] sm:$0xff]  ;;  %v8393_v37 = vld [vmem:[#allocation9 + $0xe8] sm:$0xff]  ;;  %v8395_v48 = vld [vmem:[#allocation9 + $0xf8] sm:$0xff] }
0x130a   :  { %v8200_v7 = vld [vmem:[#allocation7 + $0x150] sm:$0xff] }
0x130b   :  { %v14920_v45 = vpack.c.bf16 %v8203_v13, %v8200_v7  ;;  %14919 = vmatprep.subr.bf16.mxu1 %v14918_v44  ;;  %v8398_v44 = vld [vmem:[#allocation9 + $0x110] sm:$0xff] }
0x130d   :  { %14921 = vmatpush1.bf16.msra.mxu1 %v14920_v45  ;;  %v14966_v45 = vpack.c.bf16 %v8398_v44, %v8395_v48  ;;  %v8613_v48 = vld [vmem:[#allocation10 + $0xb0] sm:$0xff] }
0x1328   :  { %v7966_v35 = vpop.f32.mrb[48].mxu0  ;;  %v8037_v20 = vpop.f32.mrb[92].mxu1 }
0x1329   :  { %v15479_v1 = vadd.f32 %v15478_v25, %v7966_v35  ;;  %v7968_v57 = vpop.f32.mrb[49].mxu0  ;;  %v12416_v38 = vpop.f32.mrb[93].mxu1  ;;  %v8038_v40 = vadd.f32 %v8037_v20, %v7896_v26  ;;  %v8368_v25 = vld [vmem:[#allocation9 + $0x20] sm:$0xff] }
0x132a   :  { %v15481_v15 = vadd.f32 %v15480_v51, %v7968_v57  ;;  %v14946_v35 = vpack.c.bf16 %v8368_v25, %v8365_v50  ;;  %v10184_v20 = vld [vmem:[%s18332_s19] ss:$0 sm:$0xff]  ;;  %v8366_v57 = vld [vmem:[#allocation9 + $0x10] sm:$0xff]  ;;  %v8369_v38 = vld [vmem:[#allocation9 + $0x28] sm:$0xff] }
0x132b   :  { %v10182_v42 = vmul.f32 -1.442695, %v15479_v1  ;;  %v8364_v51 = vld [vmem:[#allocation9] sm:$0xff]  ;;  %v8367_v1 = vld [vmem:[#allocation9 + $0x18] sm:$0xff]  ;;  %v14979_v26 = vpack.c.bf16 %v8369_v38, %v8366_v57  ;;  %v8401_v25 = vld [vmem:[#allocation9 + $0x128] sm:$0xff] }
0x132c   :  { %v10183_v30 = vmul.f32 -1.442695, %v15481_v15  ;;  %14947 = vmatprep.subr.bf16.mxu1 %v14946_v35  ;;  %v8371_v15 = vld [vmem:[#allocation9 + $0x38] sm:$0xff]  ;;  %v8404_v35 = vld [vmem:[#allocation9 + $0x140] sm:$0xff] }
0x132d   :  { %15765 = vpow2.f32 %v10182_v42  ;;  %v8399_v50 = vld [vmem:[#allocation9 + $0x118] sm:$0xff]  ;;  %v14970_v57 = vpack.c.bf16 %v8404_v35, %v8401_v25  ;;  %v8619_v25 = vld [vmem:[#allocation10 + $0xe0] sm:$0xff] }
0x132e   :  { %15767 = vpow2.f32 %v10183_v30  ;;  %v8374_v30 = vld [vmem:[#allocation9 + $0x50] sm:$0xff]  ;;  %v8403_v38 = vld [vmem:[#allocation9 + $0x138] sm:$0xff] }
0x1337   :  { %v15766_v43 = vpop.eup %15765 }
0x1338   :  { %v8045_v10 = vadd.f32 1.0, %v15766_v43  ;;  %v15768_v27 = vpop.eup %15767 }
0x1339   :  { %v8052_v62 = vadd.f32 1.0, %v15768_v27  ;;  %v14948_v27 = vpack.c.bf16 %v8367_v1, %v8364_v51  ;;  %v8400_v1 = vld [vmem:[#allocation9 + $0x120] sm:$0xff] }
0x133a   :  { %15769 = vrcp.f32 %v8045_v10 }
0x133b   :  { %15771 = vrcp.f32 %v8052_v62  ;;  %v15821_v62 = vld [vmem:[%s18333_s20 + $0x8] sm:$0xff] }
0x1344   :  { %v15770_v8 = vpop.eup %15769 }
0x1345   :  { %v8055_v19 = vmul.f32 %v15770_v8, %v8038_v40  ;;  %v15772_v34 = vpop.eup %15771  ;;  %v14950_v8 = vpack.c.bf16 %v8374_v30, %v8371_v15  ;;  %v8405_v15 = vld [vmem:[#allocation9 + $0x148] sm:$0xff]  ;;  %v8407_v30 = vld [vmem:[#allocation9 + $0x158] sm:$0xff] }
0x1346   :  { %v8058_v2 = vsub.f32 1.0, %v15772_v34  ;;  %v8060_v41 = vmul.f32 %v15772_v34, %v17862_v29  ;;  %v8178_v29 = vld [vmem:[#allocation7 + $0xa0] sm:$0xff]  ;;  %v8377_v34 = vld [vmem:[#allocation9 + $0x68] sm:$0xff] }
0x1347   :  { %v8056_v31 = vadd.f32 %v8055_v19, %v7832_v59  ;;  %v14932_v24 = vpack.c.bf16 %v8181_v18, %v8178_v29  ;;  %v8373_v59 = vld [vmem:[#allocation9 + $0x48] sm:$0xff]  ;;  %v8372_v19 = vld [vmem:[#allocation9 + $0x40] sm:$0xff] }
0x1348   :  { %v14952_v22 = vpack.c.bf16 %v8373_v59, %v8370_v11  ;;  %v8385_v18 = vld [vmem:[#allocation9 + $0xa8] sm:$0xff] }
0x1349   :  { %15773 = vtanh.f32 %v8056_v31  ;;  %v8375_v31 = vld [vmem:[#allocation9 + $0x58] sm:$0xff] }
0x134a   :  { %v14982_v52 = vpack.c.bf16 %v8375_v31, %v8372_v19  ;;  %v8592_v31 = vld [vmem:[#allocation10 + $0x8] sm:$0xff] }
0x1353   :  { %v15774_v53 = vpop.eup %15773 }
0x1354   :  { %v8059_v46 = vmul.f32 %v15774_v53, %v8058_v2  ;;  %v8380_v2 = vld [vmem:[#allocation9 + $0x80] sm:$0xff] }
0x1355   :  { %v8376_v53 = vld [vmem:[#allocation9 + $0x60] sm:$0xff] }
0x1356   :  { %v18010_v56 = vadd.f32 %v8060_v41, %v8059_v46  ;;  %v14954_v46 = vpack.c.bf16 %v8380_v2, %v8377_v34  ;;  %v8379_v41 = vld [vmem:[#allocation9 + $0x78] sm:$0xff]  ;;  %v8595_v34 = vld [vmem:[#allocation10 + $0x20] sm:$0xff] }
0x1357   :  { %v14956_v9 = vpack.c.bf16 %v8379_v41, %v8376_v53  ;;  %v15002_v2 = vpack.c.bf16 %v8595_v34, %v8592_v31  ;;  %v8593_v53 = vld [vmem:[#allocation10 + $0x10] sm:$0xff]  ;;  %v8596_v41 = vld [vmem:[#allocation10 + $0x28] sm:$0xff]  ;;  %v8627_v31 = vld [vmem:[#allocation10 + $0x120] sm:$0xff] }
0x1358   :  { %12450 = vmatmul.mubr.f32.vlgmr.msra.gmra.mrb[50].mxu0 %v18010_v56  ;;  %v8630_v34 = vld [vmem:[#allocation10 + $0x138] sm:$0xff] }
0x1359   :  { %14924 = vmatpush3.bf16.msra.mxu0 %v14923_v14  ;;  %12484 = vmatprep.mubr.msk.f32.mxu0 %vm15995_vm0, %v18539_v3  ;;  %v8378_v14 = vld [vmem:[#allocation9 + $0x70] sm:$0xff] }
0x135a   :  { %14925 = vmatprep.subr.bf16.mxu0 %v18537_v0  ;;  %v14985_v12 = vpack.c.bf16 %v8381_v49, %v8378_v14  ;;  %v15035_v14 = vpack.c.bf16 %v8596_v41, %v8593_v53  ;;  %v8598_v49 = vld [vmem:[#allocation10 + $0x38] sm:$0xff] }
0x135b   :  { %v8634_v53 = vld [vmem:[#allocation10 + $0x158] sm:$0xff] }
0x135d   :  { %14927 = vmatpush3.bf16.msra.mxu0 %v14926_v5  ;;  %v8386_v5 = vld [vmem:[#allocation9 + $0xb0] sm:$0xff] }
0x135e   :  { %14928 = vmatprep.subr.bf16.mxu0 %v18537_v0  ;;  %v14958_v29 = vpack.c.bf16 %v8386_v5, %v8383_v4  ;;  %v8601_v4 = vld [vmem:[#allocation10 + $0x50] sm:$0xff] }
0x135f   :  { %v15006_v5 = vpack.c.bf16 %v8601_v4, %v8598_v49  ;;  %v8633_v49 = vld [vmem:[#allocation10 + $0x150] sm:$0xff]  ;;  %v8636_v4 = vld [vmem:[#allocation10 + $0x168] sm:$0xff] }
0x1361   :  { %14930 = vmatpush3.bf16.msra.mxu0 %v14929_v17  ;;  %v8382_v17 = vld [vmem:[#allocation9 + $0x90] sm:$0xff] }
0x1362   :  { %14931 = vmatprep.subr.bf16.mxu0 %v18537_v0  ;;  %v14960_v6 = vpack.c.bf16 %v8385_v18, %v8382_v17  ;;  %v8599_v17 = vld [vmem:[#allocation10 + $0x40] sm:$0xff]  ;;  %v8602_v18 = vld [vmem:[#allocation10 + $0x58] sm:$0xff] }
0x1365   :  { %14933 = vmatpush3.bf16.msra.mxu0 %v14932_v24  ;;  %v8384_v24 = vld [vmem:[#allocation9 + $0xa0] sm:$0xff] }
0x1366   :  { %14934 = vmatprep.subr.bf16.mxu0 %v18537_v0  ;;  %v14988_v23 = vpack.c.bf16 %v8387_v54, %v8384_v24  ;;  %v15038_v24 = vpack.c.bf16 %v8602_v18, %v8599_v17  ;;  %v8604_v54 = vld [vmem:[#allocation10 + $0x68] sm:$0xff]  ;;  %v8801_v17 = vld [vmem:[#allocation12 + $0x20] sm:$0xff] }
0x1369   :  { %14936 = vmatpush3.bf16.msra.mxu0 %v14935_v16  ;;  %v8392_v16 = vld [vmem:[#allocation9 + $0xe0] sm:$0xff] }
0x136a   :  { %14937 = vmatprep.subr.bf16.mxu0 %v18537_v0  ;;  %v14962_v58 = vpack.c.bf16 %v8392_v16, %v8389_v39  ;;  %v8607_v39 = vld [vmem:[#allocation10 + $0x80] sm:$0xff] }
0x136b   :  { %v15010_v16 = vpack.c.bf16 %v8607_v39, %v8604_v54 }
0x136d   :  { %14939 = vmatpush3.bf16.msra.mxu0 %v14938_v60  ;;  %v8388_v60 = vld [vmem:[#allocation9 + $0xc0] sm:$0xff] }
0x136e   :  { %14940 = vmatprep.subr.bf16.mxu0 %v18537_v0  ;;  %v14964_v7 = vpack.c.bf16 %v8391_v28, %v8388_v60  ;;  %v8605_v60 = vld [vmem:[#allocation10 + $0x70] sm:$0xff]  ;;  %v8608_v28 = vld [vmem:[#allocation10 + $0x88] sm:$0xff] }
0x1371   :  { %14942 = vmatpush3.bf16.msra.mxu0 %v14941_v55  ;;  %v8390_v55 = vld [vmem:[#allocation9 + $0xd0] sm:$0xff] }
0x1372   :  { %14943 = vmatprep.subr.bf16.mxu0 %v18537_v0  ;;  %v14991_v13 = vpack.c.bf16 %v8393_v37, %v8390_v55  ;;  %v15041_v55 = vpack.c.bf16 %v8608_v28, %v8605_v60  ;;  %v8610_v37 = vld [vmem:[#allocation10 + $0x98] sm:$0xff] }
0x1373   :  { %v15014_v44 = vpack.c.bf16 %v8613_v48, %v8610_v37 }
0x1375   :  { %14945 = vmatpush3.bf16.msra.mxu0 %v14944_v61  ;;  %v8396_v61 = vld [vmem:[#allocation9 + $0x100] sm:$0xff] }
0x1376   :  { %14978 = vmatprep.subr.bf16.mxu0 %v18537_v0  ;;  %v14994_v51 = vpack.c.bf16 %v8399_v50, %v8396_v61  ;;  %v8616_v50 = vld [vmem:[#allocation10 + $0xc8] sm:$0xff] }
0x1377   :  { %v15018_v35 = vpack.c.bf16 %v8619_v25, %v8616_v50 }
0x142b   :  { %v8151_v42 = vpop.f32.mrb[50].mxu0 }
0x142c   :  { %v8152_v43 = vadd.f32 %v10184_v20, %v8151_v42  ;;  %v12451_v10 = vpop.f32.mrb[51].mxu0  ;;  %v14968_v20 = vpack.c.bf16 %v8397_v33, %v8394_v36  ;;  %v8402_v42 = vld [vmem:[#allocation9 + $0x130] sm:$0xff]  ;;  %v8611_v36 = vld [vmem:[#allocation10 + $0xa0] sm:$0xff]  ;;  %v8614_v33 = vld [vmem:[#allocation10 + $0xb8] sm:$0xff] }
0x142d   :  { %v14972_v10 = vpack.c.bf16 %v8403_v38, %v8400_v1  ;;  %v15044_v61 = vpack.c.bf16 %v8614_v33, %v8611_v36  ;;  %v8617_v1 = vld [vmem:[#allocation10 + $0xd0] sm:$0xff]  ;;  %v8620_v38 = vld [vmem:[#allocation10 + $0xe8] sm:$0xff] }
0x142e   :  { %v8155_v40 = vadd.f32 %v15821_v62, %v8152_v43  ;;  %v8410_v43 = vld [vmem:[#allocation9 + $0x170] sm:$0xff]  ;;  %v8409_v62 = vld [vmem:[#allocation9 + $0x168] sm:$0xff] }
0x142f   :  { %v14974_v11 = vpack.c.bf16 %v8410_v43, %v8407_v30  ;;  %v8625_v30 = vld [vmem:[#allocation10 + $0x110] sm:$0xff] }
0x1430   :  { %10185 = vst [vmem:[%s18333_s20 + $0x10] sm:$0xff] %v8155_v40  ;;  %8288 = vmatmul.mubr.f32.vlgmr.msra.gmra.mrb[94].mxu1 %v8155_v40  ;;  %12485 = vmatmul.mubr.f32.vlgmr.msra.gmra.mrb[52].mxu0 %v8155_v40  ;;  %v8408_v40 = vld [vmem:[#allocation9 + $0x160] sm:$0xff] }
0x1431   :  { %14949 = vmatpush1.bf16.msra.mxu1 %v14948_v27  ;;  %14980 = vmatpush3.bf16.msra.mxu0 %v14979_v26  ;;  %v14997_v27 = vpack.c.bf16 %v8405_v15, %v8402_v42  ;;  %v8406_v26 = vld [vmem:[#allocation9 + $0x150] sm:$0xff]  ;;  %v15047_v42 = vpack.c.bf16 %v8620_v38, %v8617_v1  ;;  %v8622_v15 = vld [vmem:[#allocation10 + $0xf8] sm:$0xff] }
0x1432   :  { %14951 = vmatprep.subr.bf16.mxu1 %v14950_v8  ;;  %14981 = vmatprep.subr.bf16.mxu0 %v18537_v0  ;;  %v8411_v8 = vld [vmem:[#allocation9 + $0x178] sm:$0xff]  ;;  %v14976_v59 = vpack.c.bf16 %v8409_v62, %v8406_v26  ;;  %v15022_v43 = vpack.c.bf16 %v8625_v30, %v8622_v15  ;;  %v8623_v26 = vld [vmem:[#allocation10 + $0x100] sm:$0xff] }
0x1433   :  { %8493 = vmatprep.mubr.f32.mxu1 %v18539_v3  ;;  %12519 = vmatprep.mubr.msk.f32.mxu0 %vm15995_vm0, %v18539_v3  ;;  %v15000_v19 = vpack.c.bf16 %v8411_v8, %v8408_v40  ;;  %v8626_v62 = vld [vmem:[#allocation10 + $0x118] sm:$0xff]  ;;  %v8628_v40 = vld [vmem:[#allocation10 + $0x128] sm:$0xff]  ;;  %v8631_v8 = vld [vmem:[#allocation10 + $0x140] sm:$0xff] }
0x1435   :  { %14953 = vmatpush1.bf16.msra.mxu1 %v14952_v22  ;;  %14983 = vmatpush3.bf16.msra.mxu0 %v14982_v52  ;;  %v8591_v22 = vld [vmem:[#allocation10] sm:$0xff]  ;;  %v8594_v52 = vld [vmem:[#allocation10 + $0x18] sm:$0xff] }
0x1436   :  { %14955 = vmatprep.subr.bf16.mxu1 %v14954_v46  ;;  %14984 = vmatprep.subr.bf16.mxu0 %v18537_v0  ;;  %v15004_v46 = vpack.c.bf16 %v8594_v52, %v8591_v22  ;;  %v15028_v22 = vpack.c.bf16 %v8630_v34, %v8627_v31  ;;  %v8632_v52 = vld [vmem:[#allocation10 + $0x148] sm:$0xff] }
0x1439   :  { %14957 = vmatpush1.bf16.msra.mxu1 %v14956_v9  ;;  %14986 = vmatpush3.bf16.msra.mxu0 %v14985_v12  ;;  %v8597_v9 = vld [vmem:[#allocation10 + $0x30] sm:$0xff]  ;;  %v8600_v12 = vld [vmem:[#allocation10 + $0x48] sm:$0xff] }
0x143a   :  { %14959 = vmatprep.subr.bf16.mxu1 %v14958_v29  ;;  %14987 = vmatprep.subr.bf16.mxu0 %v18537_v0  ;;  %v15008_v29 = vpack.c.bf16 %v8600_v12, %v8597_v9  ;;  %v8638_v9 = vld [vmem:[#allocation10 + $0x178] sm:$0xff]  ;;  %v8798_v12 = vld [vmem:[#allocation12 + $0x8] sm:$0xff] }
0x143d   :  { %14961 = vmatpush1.bf16.msra.mxu1 %v14960_v6  ;;  %14989 = vmatpush3.bf16.msra.mxu0 %v14988_v23  ;;  %v8603_v6 = vld [vmem:[#allocation10 + $0x60] sm:$0xff]  ;;  %v8606_v23 = vld [vmem:[#allocation10 + $0x78] sm:$0xff] }
0x143e   :  { %14963 = vmatprep.subr.bf16.mxu1 %v14962_v58  ;;  %14990 = vmatprep.subr.bf16.mxu0 %v18537_v0  ;;  %v15012_v58 = vpack.c.bf16 %v8606_v23, %v8603_v6  ;;  %v8206_v6 = vld [vmem:[%s18325_s12] sm:$0x7] }
0x143f   :  { %v8211_v23 = vrot.slane %v8206_v6, %v18828_v47 }
0x1441   :  { %14965 = vmatpush1.bf16.msra.mxu1 %v14964_v7  ;;  %14992 = vmatpush3.bf16.msra.mxu0 %v14991_v13  ;;  %v8609_v7 = vld [vmem:[#allocation10 + $0x90] sm:$0xff]  ;;  %v8612_v13 = vld [vmem:[#allocation10 + $0xa8] sm:$0xff] }
0x1442   :  { %14967 = vmatprep.subr.bf16.mxu1 %v14966_v45  ;;  %14993 = vmatprep.subr.bf16.mxu0 %v18537_v0  ;;  %v15016_v45 = vpack.c.bf16 %v8612_v13, %v8609_v7 }
0x1445   :  { %14969 = vmatpush1.bf16.msra.mxu1 %v14968_v20  ;;  %14995 = vmatpush3.bf16.msra.mxu0 %v14994_v51  ;;  %v8615_v20 = vld [vmem:[#allocation10 + $0xc0] sm:$0xff]  ;;  %v8618_v51 = vld [vmem:[#allocation10 + $0xd8] sm:$0xff] }
0x1446   :  { %14971 = vmatprep.subr.bf16.mxu1 %v14970_v57  ;;  %14996 = vmatprep.subr.bf16.mxu0 %v18537_v0  ;;  %v15020_v57 = vpack.c.bf16 %v8618_v51, %v8615_v20  ;;  %v8219_v51 = vrot.slane %v8206_v6, %v18830_v63 }
0x1449   :  { %14973 = vmatpush1.bf16.msra.mxu1 %v14972_v10  ;;  %14998 = vmatpush3.bf16.msra.mxu0 %v14997_v27  ;;  %v8621_v10 = vld [vmem:[#allocation10 + $0xf0] sm:$0xff]  ;;  %v8624_v27 = vld [vmem:[#allocation10 + $0x108] sm:$0xff] }
0x144a   :  { %14975 = vmatprep.subr.bf16.mxu1 %v14974_v11  ;;  %14999 = vmatprep.subr.bf16.mxu0 %v18537_v0  ;;  %v15024_v11 = vpack.c.bf16 %v8624_v27, %v8621_v10  ;;  %v8797_v10 = vld [vmem:[#allocation12] sm:$0xff] }
0x144d   :  { %14977 = vmatpush1.bf16.msra.mxu1 %v14976_v59  ;;  %15001 = vmatpush3.bf16.msra.mxu0 %v15000_v19  ;;  %v15050_v59 = vpack.c.bf16 %v8626_v62, %v8623_v26  ;;  %v15026_v19 = vpack.c.bf16 %v8631_v8, %v8628_v40  ;;  %v8800_v26 = vld [vmem:[#allocation12 + $0x18] sm:$0xff]  ;;  %v8802_v62 = vld [vmem:[#allocation12 + $0x28] sm:$0xff] }
0x144e   :  { %15034 = vmatprep.subr.bf16.mxu0 %v18537_v0  ;;  %15003 = vmatprep.subr.bf16.mxu1 %v15002_v2  ;;  %v8629_v2 = vld [vmem:[#allocation10 + $0x130] sm:$0xff]  ;;  %v8804_v8 = vld [vmem:[#allocation12 + $0x38] sm:$0xff]  ;;  %v15060_v34 = vpack.c.bf16 %v8800_v26, %v8797_v10  ;;  %v8833_v10 = vld [vmem:[#allocation12 + $0x120] sm:$0xff] }
0x144f   :  { %v15053_v41 = vpack.c.bf16 %v8632_v52, %v8629_v2  ;;  %v8836_v26 = vld [vmem:[#allocation12 + $0x138] sm:$0xff] }
0x1450   :  { %8494 = vmatmul.mubr.f32.vlgmr.msra.gmra.mrb[94].mxu1 %v17921_v32  ;;  %12520 = vmatmul.mubr.f32.vlgmr.msra.gmra.mrb[54].mxu0 %v17921_v32 }
0x1451   :  { %8720 = vmatprep.mubr.f32.mxu1 %v18539_v3  ;;  %12554 = vmatprep.mubr.msk.f32.mxu0 %vm15995_vm0, %v18539_v3 }
0x1452   :  { %15005 = vmatpush1.bf16.msra.mxu1 %v15004_v46  ;;  %15036 = vmatpush3.bf16.msra.mxu0 %v15035_v14  ;;  %v8637_v46 = vld [vmem:[#allocation10 + $0x170] sm:$0xff] }
0x1453   :  { %15037 = vmatprep.subr.bf16.mxu0 %v18537_v0  ;;  %15007 = vmatprep.subr.bf16.mxu1 %v15006_v5  ;;  %v15030_v14 = vpack.c.bf16 %v8637_v46, %v8634_v53  ;;  %v8635_v5 = vld [vmem:[#allocation10 + $0x160] sm:$0xff]  ;;  %v8806_v46 = vld [vmem:[#allocation12 + $0x48] sm:$0xff] }
0x1454   :  { %v15056_v18 = vpack.c.bf16 %v8638_v9, %v8635_v5 }
0x1456   :  { %15009 = vmatpush1.bf16.msra.mxu1 %v15008_v29  ;;  %15039 = vmatpush3.bf16.msra.mxu0 %v15038_v24  ;;  %v15032_v29 = vpack.c.bf16 %v8636_v4, %v8633_v49  ;;  %v15058_v24 = vpack.c.bf16 %v8801_v17, %v8798_v12  ;;  %v8810_v49 = vld [vmem:[#allocation12 + $0x68] sm:$0xff]  ;;  %v8813_v4 = vld [vmem:[#allocation12 + $0x80] sm:$0xff]  ;;  %v8812_v17 = vld [vmem:[#allocation12 + $0x78] sm:$0xff] }
0x1457   :  { %15040 = vmatprep.subr.bf16.mxu0 %v18537_v0  ;;  %15011 = vmatprep.subr.bf16.mxu1 %v15010_v16  ;;  %v8412_v16 = vld [vmem:[%s18326_s13] sm:$0x7]  ;;  %v15066_v12 = vpack.c.bf16 %v8813_v4, %v8810_v49  ;;  %v9025_v49 = vld [vmem:[%s18331_s18 + $0x8] sm:$0xff] }
0x1458   :  { %v8417_v60 = vrot.slane %v8412_v16, %v18828_v47  ;;  %v8421_v28 = vrot.slane %v8412_v16, %v18829_v21  ;;  %v8425_v20 = vrot.slane %v8412_v16, %v18830_v63 }
0x145a   :  { %15013 = vmatpush1.bf16.msra.mxu1 %v15012_v58  ;;  %15042 = vmatpush3.bf16.msra.mxu0 %v15041_v55  ;;  %v8215_v58 = vrot.slane %v8206_v6, %v18829_v21  ;;  %v15482_v55 = vadd.f32 %v8417_v60, %v8211_v23  ;;  %v8815_v6 = vld [vmem:[#allocation12 + $0x90] sm:$0xff]  ;;  %v8818_v60 = vld [vmem:[#allocation12 + $0xa8] sm:$0xff] }
0x145b   :  { %15043 = vmatprep.subr.bf16.mxu0 %v18537_v0  ;;  %15015 = vmatprep.subr.bf16.mxu1 %v15014_v44 }
0x145c   :  { %v15484_v44 = vadd.f32 %v8421_v28, %v8215_v58  ;;  %v8817_v58 = vld [vmem:[#allocation12 + $0xa0] sm:$0xff]  ;;  %v8820_v28 = vld [vmem:[#allocation12 + $0xb8] sm:$0xff] }
0x145e   :  { %15017 = vmatpush1.bf16.msra.mxu1 %v15016_v45  ;;  %15045 = vmatpush3.bf16.msra.mxu0 %v15044_v61 }
0x145f   :  { %15046 = vmatprep.subr.bf16.mxu0 %v18537_v0  ;;  %15019 = vmatprep.subr.bf16.mxu1 %v15018_v35 }
0x1462   :  { %15021 = vmatpush1.bf16.msra.mxu1 %v15020_v57  ;;  %15048 = vmatpush3.bf16.msra.mxu0 %v15047_v42 }
0x1463   :  { %15049 = vmatprep.subr.bf16.mxu0 %v18537_v0  ;;  %15023 = vmatprep.subr.bf16.mxu1 %v15022_v43 }
0x1466   :  { %15025 = vmatpush1.bf16.msra.mxu1 %v15024_v11  ;;  %15051 = vmatpush3.bf16.msra.mxu0 %v15050_v59  ;;  %v8799_v11 = vld [vmem:[#allocation12 + $0x10] sm:$0xff] }
0x1467   :  { %15027 = vmatprep.subr.bf16.mxu1 %v15026_v19  ;;  %15052 = vmatprep.subr.bf16.mxu0 %v18537_v0  ;;  %v8807_v59 = vld [vmem:[#allocation12 + $0x50] sm:$0xff]  ;;  %v15091_v2 = vpack.c.bf16 %v8802_v62, %v8799_v11  ;;  %v8838_v62 = vld [vmem:[#allocation12 + $0x148] sm:$0xff] }
0x1468   :  { %v15062_v53 = vpack.c.bf16 %v8807_v59, %v8804_v8  ;;  %v8835_v11 = vld [vmem:[#allocation12 + $0x130] sm:$0xff]  ;;  %v15084_v59 = vpack.c.bf16 %v8836_v26, %v8833_v10 }
0x1469   :  { %v8843_v8 = vld [vmem:[#allocation12 + $0x170] sm:$0xff] }
0x146a   :  { %15029 = vmatpush1.bf16.msra.mxu1 %v15028_v22  ;;  %15054 = vmatpush3.bf16.msra.mxu0 %v15053_v41  ;;  %v8803_v22 = vld [vmem:[#allocation12 + $0x30] sm:$0xff]  ;;  %v8805_v41 = vld [vmem:[#allocation12 + $0x40] sm:$0xff] }
0x146b   :  { %15031 = vmatprep.subr.bf16.mxu1 %v15030_v14  ;;  %15055 = vmatprep.subr.bf16.mxu0 %v18537_v0  ;;  %v8808_v14 = vld [vmem:[#allocation12 + $0x58] sm:$0xff]  ;;  %v15064_v5 = vpack.c.bf16 %v8806_v46, %v8803_v22  ;;  %v8841_v22 = vld [vmem:[#allocation12 + $0x160] sm:$0xff]  ;;  %v9142_v26 = vld [vmem:[#allocation7 + $0xb0] sm:$0xff] }
0x146c   :  { %v15094_v9 = vpack.c.bf16 %v8808_v14, %v8805_v41  ;;  %v9024_v14 = vld [vmem:[%s18331_s18] sm:$0xff] }
0x146d   :  { %v15115_v4 = vpack.c.bf16 %v9025_v49, %v9024_v14  ;;  %v9150_v14 = vld [vmem:[#allocation7 + $0xf0] sm:$0xff]  ;;  %v9153_v49 = vld [vmem:[#allocation7 + $0x108] sm:$0xff] }
0x146e   :  { %15033 = vmatpush1.bf16.msra.mxu1 %v15032_v29  ;;  %15057 = vmatpush3.bf16.msra.mxu0 %v15056_v18  ;;  %v8811_v29 = vld [vmem:[#allocation12 + $0x70] sm:$0xff]  ;;  %v8814_v18 = vld [vmem:[#allocation12 + $0x88] sm:$0xff] }
0x146f   :  { %15059 = vmatprep.subr.bf16.mxu1 %v15058_v24  ;;  %15090 = vmatprep.subr.bf16.mxu0 %v18537_v0  ;;  %v8816_v24 = vld [vmem:[#allocation12 + $0x98] sm:$0xff]  ;;  %v15097_v16 = vpack.c.bf16 %v8814_v18, %v8811_v29  ;;  %v9030_v18 = vld [vmem:[%s18331_s18 + $0x30] sm:$0xff] }
0x1503   :  { %v8360_v54 = vpop.f32.mrb[52].mxu0 }
0x1504   :  { %v12486_v39 = vpop.f32.mrb[53].mxu0  ;;  %v8361_v42 = vadd.f32 %v8360_v54, %v8219_v51  ;;  %v8819_v54 = vld [vmem:[#allocation12 + $0xb0] sm:$0xff] }
0x1505   :  { %v15070_v23 = vpack.c.bf16 %v8819_v54, %v8816_v24  ;;  %v9031_v24 = vld [vmem:[%s18331_s18 + $0x38] sm:$0xff] }
0x1506   :  { %v15124_v54 = vpack.c.bf16 %v9031_v24, %v9030_v18 }
0x1523   :  { %v8495_v37 = vpop.f32.mrb[94].mxu1  ;;  %v8566_v48 = vpop.f32.mrb[54].mxu0 }
0x1524   :  { %v15483_v7 = vadd.f32 %v15482_v55, %v8495_v37  ;;  %v8497_v13 = vpop.f32.mrb[95].mxu1  ;;  %v12521_v36 = vpop.f32.mrb[55].mxu0  ;;  %v8567_v57 = vadd.f32 %v8566_v48, %v8425_v20  ;;  %v8822_v55 = vld [vmem:[#allocation12 + $0xc8] sm:$0xff]  ;;  %v8825_v37 = vld [vmem:[#allocation12 + $0xe0] sm:$0xff]  ;;  %v15072_v48 = vpack.c.bf16 %v8818_v60, %v8815_v6  ;;  %v8827_v20 = vld [vmem:[#allocation12 + $0xf0] sm:$0xff] }
0x1525   :  { %v15485_v33 = vadd.f32 %v15484_v44, %v8497_v13  ;;  %v15100_v44 = vpack.c.bf16 %v8820_v28, %v8817_v58  ;;  %v15074_v13 = vpack.c.bf16 %v8825_v37, %v8822_v55  ;;  %v8824_v36 = vld [vmem:[#allocation12 + $0xd8] sm:$0xff]  ;;  %v9036_v28 = vld [vmem:[%s18331_s18 + $0x60] sm:$0xff]  ;;  %v9037_v55 = vld [vmem:[%s18331_s18 + $0x68] sm:$0xff] }
0x1526   :  { %v10186_v45 = vmul.f32 -1.442695, %v15483_v7  ;;  %v8821_v7 = vld [vmem:[#allocation12 + $0xc0] sm:$0xff]  ;;  %v9035_v60 = vld [vmem:[%s18331_s18 + $0x58] sm:$0xff]  ;;  %v15133_v37 = vpack.c.bf16 %v9037_v55, %v9036_v28 }
0x1527   :  { %v10187_v61 = vmul.f32 -1.442695, %v15485_v33  ;;  %v8826_v33 = vld [vmem:[#allocation12 + $0xe8] sm:$0xff] }
0x1528   :  { %15775 = vpow2.f32 %v10186_v45  ;;  %v8823_v45 = vld [vmem:[#allocation12 + $0xd0] sm:$0xff] }
0x1529   :  { %15777 = vpow2.f32 %v10187_v61  ;;  %v8828_v61 = vld [vmem:[#allocation12 + $0xf8] sm:$0xff] }
0x1532   :  { %v15776_v50 = vpop.eup %15775 }
0x1533   :  { %v8574_v25 = vadd.f32 1.0, %v15776_v50  ;;  %v15778_v35 = vpop.eup %15777  ;;  %v8831_v50 = vld [vmem:[#allocation12 + $0x110] sm:$0xff] }
0x1534   :  { %v8581_v1 = vadd.f32 1.0, %v15778_v35  ;;  %v15103_v35 = vpack.c.bf16 %v8826_v33, %v8823_v45  ;;  %v15078_v51 = vpack.c.bf16 %v8831_v50, %v8828_v61  ;;  %v9120_v45 = vld [vmem:[#allocation7] sm:$0xff]  ;;  %v9123_v61 = vld [vmem:[#allocation7 + $0x18] sm:$0xff] }
0x1535   :  { %15779 = vrcp.f32 %v8574_v25  ;;  %v15076_v25 = vpack.c.bf16 %v8824_v36, %v8821_v7  ;;  %v9124_v36 = vld [vmem:[#allocation7 + $0x20] sm:$0xff]  ;;  %v15140_v50 = vpack.c.bf16 %v9123_v61, %v9120_v45 }
0x1536   :  { %15781 = vrcp.f32 %v8581_v1  ;;  %v8830_v1 = vld [vmem:[#allocation12 + $0x108] sm:$0xff] }
0x153f   :  { %v15780_v38 = vpop.eup %15779 }
0x1540   :  { %v8584_v15 = vmul.f32 %v15780_v38, %v8567_v57  ;;  %v15782_v43 = vpop.eup %15781  ;;  %v8829_v57 = vld [vmem:[#allocation12 + $0x100] sm:$0xff]  ;;  %v8832_v38 = vld [vmem:[#allocation12 + $0x118] sm:$0xff] }
0x1541   :  { %v8587_v27 = vsub.f32 1.0, %v15782_v43  ;;  %v8589_v31 = vmul.f32 %v15782_v43, %v17921_v32  ;;  %v8809_v32 = vld [vmem:[#allocation12 + $0x60] sm:$0xff]  ;;  %v15106_v43 = vpack.c.bf16 %v8832_v38, %v8829_v57  ;;  %v9133_v38 = vld [vmem:[#allocation7 + $0x68] sm:$0xff] }
0x1542   :  { %v8585_v30 = vadd.f32 %v8584_v15, %v8361_v42  ;;  %v15068_v39 = vpack.c.bf16 %v8812_v17, %v8809_v32  ;;  %v8834_v42 = vld [vmem:[#allocation12 + $0x128] sm:$0xff]  ;;  %v8837_v15 = vld [vmem:[#allocation12 + $0x140] sm:$0xff] }
0x1543   :  { %v9029_v17 = vld [vmem:[%s18331_s18 + $0x28] sm:$0xff] }
0x1544   :  { %15783 = vtanh.f32 %v8585_v30  ;;  %v15080_v30 = vpack.c.bf16 %v8830_v1, %v8827_v20  ;;  %v9126_v20 = vld [vmem:[#allocation7 + $0x30] sm:$0xff]  ;;  %v9129_v1 = vld [vmem:[#allocation7 + $0x48] sm:$0xff] }
0x1545   :  { %v15144_v57 = vpack.c.bf16 %v9129_v1, %v9126_v20 }
0x154e   :  { %v15784_v40 = vpop.eup %15783 }
0x154f   :  { %v8588_v19 = vmul.f32 %v15784_v40, %v8587_v27  ;;  %v15082_v27 = vpack.c.bf16 %v8837_v15, %v8834_v42  ;;  %v8840_v40 = vld [vmem:[#allocation12 + $0x158] sm:$0xff]  ;;  %v9136_v42 = vld [vmem:[#allocation7 + $0x80] sm:$0xff] }
0x1550   :  { %v15146_v15 = vpack.c.bf16 %v9136_v42, %v9133_v38 }
0x1551   :  { %v18069_v52 = vadd.f32 %v8589_v31, %v8588_v19  ;;  %v15109_v19 = vpack.c.bf16 %v8838_v62, %v8835_v11  ;;  %v8839_v31 = vld [vmem:[#allocation12 + $0x150] sm:$0xff] }
0x1552   :  { %v9138_v62 = vld [vmem:[#allocation7 + $0x90] sm:$0xff] }
0x1553   :  { %8721 = vmatmul.mubr.f32.vlgmr.msra.gmra.mrb[96].mxu1 %v18069_v52  ;;  %12555 = vmatmul.mubr.f32.vlgmr.msra.gmra.mrb[56].mxu0 %v18069_v52 }
0x1554   :  { %15061 = vmatpush1.bf16.msra.mxu1 %v15060_v34  ;;  %15092 = vmatpush3.bf16.msra.mxu0 %v15091_v2  ;;  %v15086_v34 = vpack.c.bf16 %v8843_v8, %v8840_v40  ;;  %v8842_v2 = vld [vmem:[#allocation12 + $0x168] sm:$0xff] }
0x1555   :  { %15063 = vmatprep.subr.bf16.mxu1 %v15062_v53  ;;  %15093 = vmatprep.subr.bf16.mxu0 %v18537_v0  ;;  %v8844_v53 = vld [vmem:[#allocation12 + $0x178] sm:$0xff]  ;;  %v15088_v46 = vpack.c.bf16 %v8842_v2, %v8839_v31  ;;  %v9141_v40 = vld [vmem:[#allocation7 + $0xa8] sm:$0xff] }
0x1556   :  { %8926 = vmatprep.mubr.f32.mxu1 %v18539_v3  ;;  %12589 = vmatprep.mubr.msk.f32.mxu0 %vm15995_vm0, %v18539_v3  ;;  %v15112_v41 = vpack.c.bf16 %v8844_v53, %v8841_v22  ;;  %v15152_v8 = vpack.c.bf16 %v9141_v40, %v9138_v62  ;;  %v9147_v2 = vld [vmem:[#allocation7 + $0xd8] sm:$0xff] }
0x1557   :  { %v9151_v53 = vld [vmem:[#allocation7 + $0xf8] sm:$0xff] }
0x1558   :  { %15065 = vmatpush1.bf16.msra.mxu1 %v15064_v5  ;;  %15095 = vmatpush3.bf16.msra.mxu0 %v15094_v9  ;;  %v9026_v5 = vld [vmem:[%s18331_s18 + $0x10] sm:$0xff]  ;;  %v9027_v9 = vld [vmem:[%s18331_s18 + $0x18] sm:$0xff] }
0x1559   :  { %15067 = vmatprep.subr.bf16.mxu1 %v15066_v12  ;;  %15096 = vmatprep.subr.bf16.mxu0 %v18537_v0  ;;  %v15118_v32 = vpack.c.bf16 %v9027_v9, %v9026_v5  ;;  %v9028_v12 = vld [vmem:[%s18331_s18 + $0x20] sm:$0xff]  ;;  %v9157_v5 = vld [vmem:[#allocation7 + $0x128] sm:$0xff] }
0x155a   :  { %v15121_v29 = vpack.c.bf16 %v9029_v17, %v9028_v12  ;;  %v9160_v9 = vld [vmem:[#allocation7 + $0x140] sm:$0xff]  ;;  %v9159_v17 = vld [vmem:[#allocation7 + $0x138] sm:$0xff] }
0x155b   :  { %v9156_v12 = vld [vmem:[#allocation7 + $0x120] sm:$0xff] }
0x155c   :  { %15069 = vmatpush1.bf16.msra.mxu1 %v15068_v39  ;;  %15098 = vmatpush3.bf16.msra.mxu0 %v15097_v16  ;;  %v9032_v39 = vld [vmem:[%s18331_s18 + $0x40] sm:$0xff]  ;;  %v9033_v16 = vld [vmem:[%s18331_s18 + $0x48] sm:$0xff] }
0x155d   :  { %15071 = vmatprep.subr.bf16.mxu1 %v15070_v23  ;;  %15099 = vmatprep.subr.bf16.mxu0 %v18537_v0  ;;  %v15127_v6 = vpack.c.bf16 %v9033_v16, %v9032_v39  ;;  %v9034_v23 = vld [vmem:[%s18331_s18 + $0x50] sm:$0xff]  ;;  %v8639_v39 = vld [vmem:[%s18329_s16] sm:$0x7] }
0x155e   :  { %v15130_v58 = vpack.c.bf16 %v9035_v60, %v9034_v23  ;;  %v8644_v16 = vrot.slane %v8639_v39, %v18828_v47  ;;  %v8648_v23 = vrot.slane %v8639_v39, %v18829_v21 }
0x1560   :  { %15073 = vmatpush1.bf16.msra.mxu1 %v15072_v48  ;;  %15101 = vmatpush3.bf16.msra.mxu0 %v15100_v44  ;;  %v9038_v48 = vld [vmem:[%s18331_s18 + $0x70] sm:$0xff]  ;;  %v9039_v44 = vld [vmem:[%s18331_s18 + $0x78] sm:$0xff] }
0x1561   :  { %15075 = vmatprep.subr.bf16.mxu1 %v15074_v13  ;;  %15102 = vmatprep.subr.bf16.mxu0 %v18537_v0  ;;  %v15136_v7 = vpack.c.bf16 %v9039_v44, %v9038_v48  ;;  %v9121_v13 = vld [vmem:[#allocation7 + $0x8] sm:$0xff] }
0x1562   :  { %v15138_v33 = vpack.c.bf16 %v9124_v36, %v9121_v13 }
0x1564   :  { %15077 = vmatpush1.bf16.msra.mxu1 %v15076_v25  ;;  %15104 = vmatpush3.bf16.msra.mxu0 %v15103_v35  ;;  %v9127_v25 = vld [vmem:[#allocation7 + $0x38] sm:$0xff]  ;;  %v9130_v35 = vld [vmem:[#allocation7 + $0x50] sm:$0xff] }
0x1565   :  { %15079 = vmatprep.subr.bf16.mxu1 %v15078_v51  ;;  %15105 = vmatprep.subr.bf16.mxu0 %v18537_v0  ;;  %v15142_v51 = vpack.c.bf16 %v9130_v35, %v9127_v25  ;;  %v8652_v35 = vrot.slane %v8639_v39, %v18830_v63  ;;  %v9164_v39 = vld [vmem:[#allocation7 + $0x160] sm:$0xff] }
0x1568   :  { %15081 = vmatpush1.bf16.msra.mxu1 %v15080_v30  ;;  %15107 = vmatpush3.bf16.msra.mxu0 %v15106_v43  ;;  %v9132_v30 = vld [vmem:[#allocation7 + $0x60] sm:$0xff]  ;;  %v9135_v43 = vld [vmem:[#allocation7 + $0x78] sm:$0xff] }
0x1569   :  { %15083 = vmatprep.subr.bf16.mxu1 %v15082_v27  ;;  %15108 = vmatprep.subr.bf16.mxu0 %v18537_v0  ;;  %v15148_v10 = vpack.c.bf16 %v9135_v43, %v9132_v30  ;;  %v9139_v27 = vld [vmem:[#allocation7 + $0x98] sm:$0xff]  ;;  %v9122_v43 = vld [vmem:[#allocation7 + $0x10] sm:$0xff] }
0x156a   :  { %v15150_v11 = vpack.c.bf16 %v9142_v26, %v9139_v27 }
0x156c   :  { %15085 = vmatpush1.bf16.msra.mxu1 %v15084_v59  ;;  %15110 = vmatpush3.bf16.msra.mxu0 %v15109_v19  ;;  %v9145_v59 = vld [vmem:[#allocation7 + $0xc8] sm:$0xff]  ;;  %v9148_v19 = vld [vmem:[#allocation7 + $0xe0] sm:$0xff] }
0x156d   :  { %15087 = vmatprep.subr.bf16.mxu1 %v15086_v34  ;;  %15111 = vmatprep.subr.bf16.mxu0 %v18537_v0  ;;  %v15154_v31 = vpack.c.bf16 %v9148_v19, %v9145_v59  ;;  %v9144_v34 = vld [vmem:[#allocation7 + $0xc0] sm:$0xff]  ;;  %v9131_v59 = vld [vmem:[#allocation7 + $0x58] sm:$0xff] }
0x156e   :  { %v15156_v22 = vpack.c.bf16 %v9147_v2, %v9144_v34  ;;  %v9137_v34 = vld [vmem:[#allocation7 + $0x88] sm:$0xff] }
0x1570   :  { %15089 = vmatpush1.bf16.msra.mxu1 %v15088_v46  ;;  %15113 = vmatpush3.bf16.msra.mxu0 %v15112_v41  ;;  %v9154_v46 = vld [vmem:[#allocation7 + $0x110] sm:$0xff] }
0x1571   :  { %15114 = vmatprep.subr.bf16.mxu1 %v18537_v0  ;;  %15139 = vmatprep.subr.bf16.mxu0 %v15138_v33  ;;  %v15158_v41 = vpack.c.bf16 %v9154_v46, %v9151_v53  ;;  %v9146_v46 = vld [vmem:[#allocation7 + $0xd0] sm:$0xff] }
0x1573   :  { %8927 = vmatmul.mubr.f32.vlgmr.msra.gmra.mrb[96].mxu1 %v18010_v56  ;;  %12590 = vmatmul.mubr.f32.vlgmr.msra.gmra.mrb[58].mxu0 %v18010_v56 }
0x1574   :  { %12624 = vmatprep.mubr.msk.f32.mxu1 %vm15995_vm0, %v18539_v3  ;;  %9249 = vmatprep.mubr.f32.mxu0 %v18539_v3 }
0x1575   :  { %15116 = vmatpush3.bf16.msra.mxu1 %v15115_v4  ;;  %15141 = vmatpush1.bf16.msra.mxu0 %v15140_v50  ;;  %v15160_v4 = vpack.c.bf16 %v9153_v49, %v9150_v14  ;;  %v9152_v49 = vld [vmem:[#allocation7 + $0x100] sm:$0xff] }
0x1576   :  { %15117 = vmatprep.subr.bf16.mxu1 %v18537_v0  ;;  %15143 = vmatprep.subr.bf16.mxu0 %v15142_v51 }
0x1579   :  { %15119 = vmatpush3.bf16.msra.mxu1 %v15118_v32  ;;  %15145 = vmatpush1.bf16.msra.mxu0 %v15144_v57  ;;  %v15162_v32 = vpack.c.bf16 %v9160_v9, %v9157_v5  ;;  %v9158_v9 = vld [vmem:[#allocation7 + $0x130] sm:$0xff] }
0x157a   :  { %15120 = vmatprep.subr.bf16.mxu1 %v18537_v0  ;;  %15147 = vmatprep.subr.bf16.mxu0 %v15146_v15 }
0x157d   :  { %15122 = vmatpush3.bf16.msra.mxu1 %v15121_v29  ;;  %15149 = vmatpush1.bf16.msra.mxu0 %v15148_v10  ;;  %v15164_v29 = vpack.c.bf16 %v9159_v17, %v9156_v12  ;;  %v9125_v10 = vld [vmem:[#allocation7 + $0x28] sm:$0xff]  ;;  %v9163_v17 = vld [vmem:[#allocation7 + $0x158] sm:$0xff] }
0x157e   :  { %15123 = vmatprep.subr.bf16.mxu1 %v18537_v0  ;;  %15151 = vmatprep.subr.bf16.mxu0 %v15150_v11  ;;  %v15171_v62 = vpack.c.bf16 %v9125_v10, %v9122_v43 }
0x1581   :  { %15125 = vmatpush3.bf16.msra.mxu1 %v15124_v54  ;;  %15153 = vmatpush1.bf16.msra.mxu0 %v15152_v8  ;;  %v8845_v54 = vld [vmem:[%s18330_s17] sm:$0x7] }
0x1582   :  { %15126 = vmatprep.subr.bf16.mxu1 %v18537_v0  ;;  %15155 = vmatprep.subr.bf16.mxu0 %v15154_v31  ;;  %v8854_v60 = vrot.slane %v8845_v54, %v18829_v21  ;;  %v8858_v25 = vrot.slane %v8845_v54, %v18830_v63  ;;  %v9128_v8 = vld [vmem:[#allocation7 + $0x40] sm:$0xff]  ;;  %v9134_v31 = vld [vmem:[#allocation7 + $0x70] sm:$0xff] }
0x1583   :  { %v15174_v19 = vpack.c.bf16 %v9131_v59, %v9128_v8  ;;  %v15177_v2 = vpack.c.bf16 %v9137_v34, %v9134_v31  ;;  %v9343_v8 = vld [vmem:[#allocation9 + $0x88] sm:$0xff]  ;;  %v9345_v59 = vld [vmem:[#allocation9 + $0x98] sm:$0xff] }
0x1585   :  { %15128 = vmatpush3.bf16.msra.mxu1 %v15127_v6  ;;  %15157 = vmatpush1.bf16.msra.mxu0 %v15156_v22  ;;  %v8850_v6 = vrot.slane %v8845_v54, %v18828_v47  ;;  %v9143_v22 = vld [vmem:[#allocation7 + $0xb8] sm:$0xff]  ;;  %v9165_v54 = vld [vmem:[#allocation7 + $0x168] sm:$0xff] }
0x1586   :  { %15129 = vmatprep.subr.bf16.mxu1 %v18537_v0  ;;  %15159 = vmatprep.subr.bf16.mxu0 %v15158_v41  ;;  %v9149_v41 = vld [vmem:[#allocation7 + $0xe8] sm:$0xff] }
0x1587   :  { %v15183_v14 = vpack.c.bf16 %v9149_v41, %v9146_v46  ;;  %v9349_v46 = vld [vmem:[#allocation9 + $0xb8] sm:$0xff]  ;;  %v9351_v41 = vld [vmem:[#allocation9 + $0xc8] sm:$0xff] }
0x1589   :  { %15131 = vmatpush3.bf16.msra.mxu1 %v15130_v58  ;;  %15161 = vmatpush1.bf16.msra.mxu0 %v15160_v4  ;;  %v15486_v58 = vadd.f32 %v8850_v6, %v8644_v16  ;;  %v9155_v4 = vld [vmem:[#allocation7 + $0x118] sm:$0xff] }
0x158a   :  { %15132 = vmatprep.subr.bf16.mxu1 %v18537_v0  ;;  %15163 = vmatprep.subr.bf16.mxu0 %v15162_v32  ;;  %v15186_v5 = vpack.c.bf16 %v9155_v4, %v9152_v49  ;;  %v9161_v32 = vld [vmem:[#allocation7 + $0x148] sm:$0xff]  ;;  %v9167_v6 = vld [vmem:[#allocation7 + $0x178] sm:$0xff] }
0x158b   :  { %v15189_v12 = vpack.c.bf16 %v9161_v32, %v9158_v9  ;;  %v9353_v32 = vld [vmem:[#allocation9 + $0xd8] sm:$0xff] }
0x158d   :  { %15134 = vmatpush3.bf16.msra.mxu1 %v15133_v37  ;;  %15165 = vmatpush1.bf16.msra.mxu0 %v15164_v29  ;;  %v15488_v37 = vadd.f32 %v8854_v60, %v8648_v23  ;;  %v9166_v29 = vld [vmem:[#allocation7 + $0x170] sm:$0xff]  ;;  %v15192_v23 = vpack.c.bf16 %v9167_v6, %v9164_v39  ;;  %v9327_v60 = vld [vmem:[#allocation9 + $0x8] sm:$0xff] }
0x158e   :  { %15135 = vmatprep.subr.bf16.mxu1 %v18537_v0  ;;  %v9356_v39 = vld [vmem:[#allocation9 + $0xf0] sm:$0xff]  ;;  %v9359_v6 = vld [vmem:[#allocation9 + $0x108] sm:$0xff] }
0x1591   :  { %15137 = vmatpush3.bf16.msra.mxu1 %v15136_v7 }
0x1592   :  { %15170 = vmatprep.subr.bf16.mxu1 %v18537_v0 }
0x1626   :  { %v8793_v18 = vpop.f32.mrb[56].mxu0 }
0x1627   :  { %v12556_v24 = vpop.f32.mrb[57].mxu0  ;;  %v8794_v57 = vadd.f32 %v8793_v18, %v8652_v35  ;;  %v15166_v18 = vpack.c.bf16 %v9166_v29, %v9163_v17  ;;  %v9332_v35 = vld [vmem:[#allocation9 + $0x30] sm:$0xff]  ;;  %v9355_v17 = vld [vmem:[#allocation9 + $0xe8] sm:$0xff]  ;;  %v9357_v29 = vld [vmem:[#allocation9 + $0xf8] sm:$0xff] }
0x1628   :  { %v9162_v24 = vld [vmem:[#allocation7 + $0x150] sm:$0xff] }
0x1629   :  { %v15168_v16 = vpack.c.bf16 %v9165_v54, %v9162_v24  ;;  %15167 = vmatprep.subr.bf16.mxu0 %v15166_v18  ;;  %v9360_v18 = vld [vmem:[#allocation9 + $0x110] sm:$0xff] }
0x162b   :  { %15169 = vmatpush1.bf16.msra.mxu0 %v15168_v16  ;;  %v15214_v16 = vpack.c.bf16 %v9360_v18, %v9357_v29  ;;  %v9572_v18 = vld [vmem:[#allocation10 + $0x98] sm:$0xff] }
0x1646   :  { %v8928_v28 = vpop.f32.mrb[96].mxu1  ;;  %v8999_v55 = vpop.f32.mrb[58].mxu0 }
0x1647   :  { %v15487_v48 = vadd.f32 %v15486_v58, %v8928_v28  ;;  %v8930_v44 = vpop.f32.mrb[97].mxu1  ;;  %v12591_v7 = vpop.f32.mrb[59].mxu0  ;;  %v9000_v51 = vadd.f32 %v8999_v55, %v8858_v25  ;;  %v9330_v58 = vld [vmem:[#allocation9 + $0x20] sm:$0xff] }
0x1648   :  { %v15489_v36 = vadd.f32 %v15488_v37, %v8930_v44  ;;  %v15194_v28 = vpack.c.bf16 %v9330_v58, %v9327_v60  ;;  %v18174_v55 = vld [vmem:[%s18332_s19] ss:$0 sm:$0xff]  ;;  %v9328_v44 = vld [vmem:[#allocation9 + $0x10] sm:$0xff]  ;;  %v9331_v7 = vld [vmem:[#allocation9 + $0x28] sm:$0xff] }
0x1649   :  { %v10188_v13 = vmul.f32 -1.442695, %v15487_v48  ;;  %v9326_v37 = vld [vmem:[#allocation9] sm:$0xff]  ;;  %v9329_v48 = vld [vmem:[#allocation9 + $0x18] sm:$0xff]  ;;  %v15227_v25 = vpack.c.bf16 %v9331_v7, %v9328_v44  ;;  %v9363_v58 = vld [vmem:[#allocation9 + $0x128] sm:$0xff] }
0x164a   :  { %v10189_v45 = vmul.f32 -1.442695, %v15489_v36  ;;  %15195 = vmatprep.subr.bf16.mxu0 %v15194_v28  ;;  %v9333_v36 = vld [vmem:[#allocation9 + $0x38] sm:$0xff]  ;;  %v9366_v28 = vld [vmem:[#allocation9 + $0x140] sm:$0xff] }
0x164b   :  { %15785 = vpow2.f32 %v10188_v13  ;;  %v9361_v60 = vld [vmem:[#allocation9 + $0x118] sm:$0xff]  ;;  %v9362_v44 = vld [vmem:[#allocation9 + $0x120] sm:$0xff]  ;;  %v15218_v7 = vpack.c.bf16 %v9366_v28, %v9363_v58  ;;  %v9578_v28 = vld [vmem:[#allocation10 + $0xc8] sm:$0xff] }
0x164c   :  { %15787 = vpow2.f32 %v10189_v45  ;;  %v9336_v45 = vld [vmem:[#allocation9 + $0x50] sm:$0xff] }
0x1655   :  { %v15786_v33 = vpop.eup %15785 }
0x1656   :  { %v9007_v61 = vadd.f32 1.0, %v15786_v33  ;;  %v15788_v50 = vpop.eup %15787 }
0x1657   :  { %v9014_v20 = vadd.f32 1.0, %v15788_v50  ;;  %v15196_v50 = vpack.c.bf16 %v9329_v48, %v9326_v37  ;;  %v15216_v37 = vpack.c.bf16 %v9359_v6, %v9356_v39  ;;  %v9571_v39 = vld [vmem:[#allocation10 + $0x90] sm:$0xff]  ;;  %v9573_v6 = vld [vmem:[#allocation10 + $0xa0] sm:$0xff] }
0x1658   :  { %15789 = vrcp.f32 %v9007_v61 }
0x1659   :  { %15791 = vrcp.f32 %v9014_v20  ;;  %v15822_v20 = vld [vmem:[%s18333_s20 + $0x10] sm:$0xff] }
0x1662   :  { %v15790_v1 = vpop.eup %15789 }
0x1663   :  { %v9017_v38 = vmul.f32 %v15790_v1, %v9000_v51  ;;  %v15792_v15 = vpop.eup %15791  ;;  %v15198_v1 = vpack.c.bf16 %v9336_v45, %v9333_v36  ;;  %v9364_v36 = vld [vmem:[#allocation9 + $0x130] sm:$0xff]  ;;  %v9367_v45 = vld [vmem:[#allocation9 + $0x148] sm:$0xff] }
0x1664   :  { %v9020_v30 = vsub.f32 1.0, %v15792_v15  ;;  %v9022_v11 = vmul.f32 %v15792_v15, %v18010_v56  ;;  %v9140_v56 = vld [vmem:[#allocation7 + $0xa0] sm:$0xff]  ;;  %v9339_v15 = vld [vmem:[#allocation9 + $0x68] sm:$0xff] }
0x1665   :  { %v9018_v42 = vadd.f32 %v9017_v38, %v8794_v57  ;;  %v15180_v53 = vpack.c.bf16 %v9143_v22, %v9140_v56  ;;  %v9335_v57 = vld [vmem:[#allocation9 + $0x48] sm:$0xff]  ;;  %v9334_v38 = vld [vmem:[#allocation9 + $0x40] sm:$0xff] }
0x1666   :  { %v15200_v43 = vpack.c.bf16 %v9335_v57, %v9332_v35  ;;  %v9347_v22 = vld [vmem:[#allocation9 + $0xa8] sm:$0xff]  ;;  %v9368_v35 = vld [vmem:[#allocation9 + $0x150] sm:$0xff]  ;;  %v9370_v57 = vld [vmem:[#allocation9 + $0x160] sm:$0xff] }
0x1667   :  { %15793 = vtanh.f32 %v9018_v42  ;;  %v9337_v42 = vld [vmem:[#allocation9 + $0x58] sm:$0xff] }
0x1668   :  { %v15230_v10 = vpack.c.bf16 %v9337_v42, %v9334_v38  ;;  %v9373_v38 = vld [vmem:[#allocation9 + $0x178] sm:$0xff] }
0x1671   :  { %v15794_v27 = vpop.eup %15793 }
0x1672   :  { %v9021_v26 = vmul.f32 %v15794_v27, %v9020_v30  ;;  %v9342_v30 = vld [vmem:[#allocation9 + $0x80] sm:$0xff] }
0x1673   :  { %v9338_v27 = vld [vmem:[#allocation9 + $0x60] sm:$0xff] }
0x1674   :  { %v18158_v40 = vadd.f32 %v9022_v11, %v9021_v26  ;;  %v15202_v26 = vpack.c.bf16 %v9342_v30, %v9339_v15  ;;  %v9341_v11 = vld [vmem:[#allocation9 + $0x78] sm:$0xff]  ;;  %v15248_v15 = vpack.c.bf16 %v9373_v38, %v9370_v57  ;;  %v9554_v30 = vld [vmem:[#allocation10 + $0x8] sm:$0xff] }
0x1675   :  { %v15204_v31 = vpack.c.bf16 %v9341_v11, %v9338_v27  ;;  %v9553_v27 = vld [vmem:[#allocation10] sm:$0xff]  ;;  %v9555_v11 = vld [vmem:[#allocation10 + $0x10] sm:$0xff]  ;;  %v9588_v38 = vld [vmem:[#allocation10 + $0x118] sm:$0xff] }
0x1676   :  { %12625 = vmatmul.mubr.f32.vlgmr.msra.gmra.mrb[98].mxu1 %v18158_v40 }
0x1677   :  { %15172 = vmatpush3.bf16.msra.mxu1 %v15171_v62  ;;  %12659 = vmatprep.mubr.msk.f32.mxu1 %vm15995_vm0, %v18539_v3  ;;  %v9340_v62 = vld [vmem:[#allocation9 + $0x70] sm:$0xff] }
0x1678   :  { %15173 = vmatprep.subr.bf16.mxu1 %v18537_v0  ;;  %v15233_v34 = vpack.c.bf16 %v9343_v8, %v9340_v62  ;;  %v9558_v8 = vld [vmem:[#allocation10 + $0x28] sm:$0xff] }
0x167b   :  { %15175 = vmatpush3.bf16.msra.mxu1 %v15174_v19  ;;  %v9348_v19 = vld [vmem:[#allocation9 + $0xb0] sm:$0xff] }
0x167c   :  { %15176 = vmatprep.subr.bf16.mxu1 %v18537_v0  ;;  %v15206_v56 = vpack.c.bf16 %v9348_v19, %v9345_v59  ;;  %v15283_v59 = vpack.c.bf16 %v9558_v8, %v9555_v11  ;;  %v9560_v19 = vld [vmem:[#allocation10 + $0x38] sm:$0xff] }
0x167d   :  { %v9596_v8 = vld [vmem:[#allocation10 + $0x158] sm:$0xff] }
0x167f   :  { %15178 = vmatpush3.bf16.msra.mxu1 %v15177_v2  ;;  %v9344_v2 = vld [vmem:[#allocation9 + $0x90] sm:$0xff] }
0x1680   :  { %15179 = vmatprep.subr.bf16.mxu1 %v18537_v0  ;;  %v15208_v49 = vpack.c.bf16 %v9347_v22, %v9344_v2  ;;  %v9559_v2 = vld [vmem:[#allocation10 + $0x30] sm:$0xff]  ;;  %v9561_v22 = vld [vmem:[#allocation10 + $0x40] sm:$0xff] }
0x1683   :  { %15181 = vmatpush3.bf16.msra.mxu1 %v15180_v53  ;;  %v9346_v53 = vld [vmem:[#allocation9 + $0xa0] sm:$0xff] }
0x1684   :  { %15182 = vmatprep.subr.bf16.mxu1 %v18537_v0  ;;  %v15236_v4 = vpack.c.bf16 %v9349_v46, %v9346_v53  ;;  %v9564_v46 = vld [vmem:[#allocation10 + $0x58] sm:$0xff] }
0x1687   :  { %15184 = vmatpush3.bf16.msra.mxu1 %v15183_v14  ;;  %v9354_v14 = vld [vmem:[#allocation9 + $0xe0] sm:$0xff] }
0x1688   :  { %15185 = vmatprep.subr.bf16.mxu1 %v18537_v0  ;;  %v15210_v9 = vpack.c.bf16 %v9354_v14, %v9351_v41  ;;  %v15286_v41 = vpack.c.bf16 %v9564_v46, %v9561_v22  ;;  %v9566_v14 = vld [vmem:[#allocation10 + $0x68] sm:$0xff]  ;;  %v9600_v22 = vld [vmem:[#allocation10 + $0x178] sm:$0xff]  ;;  %v9763_v46 = vld [vmem:[#allocation12 + $0x20] sm:$0xff] }
0x168b   :  { %15187 = vmatpush3.bf16.msra.mxu1 %v15186_v5  ;;  %v9350_v5 = vld [vmem:[#allocation9 + $0xc0] sm:$0xff] }
0x168c   :  { %15188 = vmatprep.subr.bf16.mxu1 %v18537_v0  ;;  %v15212_v24 = vpack.c.bf16 %v9353_v32, %v9350_v5  ;;  %v9565_v5 = vld [vmem:[#allocation10 + $0x60] sm:$0xff]  ;;  %v9567_v32 = vld [vmem:[#allocation10 + $0x70] sm:$0xff] }
0x168f   :  { %15190 = vmatpush3.bf16.msra.mxu1 %v15189_v12  ;;  %v9352_v12 = vld [vmem:[#allocation9 + $0xd0] sm:$0xff] }
0x1690   :  { %15191 = vmatprep.subr.bf16.mxu1 %v18537_v0  ;;  %v15239_v54 = vpack.c.bf16 %v9355_v17, %v9352_v12  ;;  %v9570_v17 = vld [vmem:[#allocation10 + $0x88] sm:$0xff] }
0x1691   :  { %v15289_v29 = vpack.c.bf16 %v9570_v17, %v9567_v32  ;;  %v9168_v32 = vld [vmem:[%s18325_s12] sm:$0x7] }
0x1693   :  { %15193 = vmatpush3.bf16.msra.mxu1 %v15192_v23  ;;  %v9358_v23 = vld [vmem:[#allocation9 + $0x100] sm:$0xff] }
0x1694   :  { %15226 = vmatprep.subr.bf16.mxu1 %v18537_v0  ;;  %v15242_v48 = vpack.c.bf16 %v9361_v60, %v9358_v23  ;;  %v9576_v60 = vld [vmem:[#allocation10 + $0xb8] sm:$0xff] }
0x1695   :  { %v15292_v58 = vpack.c.bf16 %v9576_v60, %v9573_v6 }
0x1749   :  { %v9113_v13 = vpop.f32.mrb[98].mxu1 }
0x174a   :  { %v9114_v33 = vadd.f32 %v18174_v55, %v9113_v13  ;;  %v12626_v61 = vpop.f32.mrb[99].mxu1  ;;  %v9365_v13 = vld [vmem:[#allocation9 + $0x138] sm:$0xff] }
0x174b   :  { %v9372_v61 = vld [vmem:[#allocation9 + $0x170] sm:$0xff] }
0x174c   :  { %v18180_v51 = vadd.f32 %v15822_v20, %v9114_v33  ;;  %v9369_v33 = vld [vmem:[#allocation9 + $0x158] sm:$0xff] }
0x174d   :  { %v15222_v20 = vpack.c.bf16 %v9372_v61, %v9369_v33  ;;  %v9584_v61 = vld [vmem:[#allocation10 + $0xf8] sm:$0xff] }
0x174e   :  { %10191 = vst [vmem:[%s18333_s20 + $0x18] sm:$0xff] %v18180_v51  ;;  %9250 = vmatmul.mubr.f32.vlgmr.msra.gmra.mrb[60].mxu0 %v18180_v51  ;;  %12660 = vmatmul.mubr.f32.vlgmr.msra.gmra.mrb[100].mxu1 %v18180_v51 }
0x174f   :  { %15197 = vmatpush1.bf16.msra.mxu0 %v15196_v50  ;;  %15228 = vmatpush3.bf16.msra.mxu1 %v15227_v25  ;;  %v15220_v50 = vpack.c.bf16 %v9365_v13, %v9362_v44  ;;  %v15245_v25 = vpack.c.bf16 %v9367_v45, %v9364_v36  ;;  %v9577_v44 = vld [vmem:[#allocation10 + $0xc0] sm:$0xff]  ;;  %v9579_v13 = vld [vmem:[#allocation10 + $0xd0] sm:$0xff]  ;;  %v9582_v45 = vld [vmem:[#allocation10 + $0xe8] sm:$0xff] }
0x1750   :  { %15199 = vmatprep.subr.bf16.mxu0 %v15198_v1  ;;  %15229 = vmatprep.subr.bf16.mxu1 %v18537_v0  ;;  %v9371_v1 = vld [vmem:[#allocation9 + $0x168] sm:$0xff]  ;;  %v15295_v33 = vpack.c.bf16 %v9582_v45, %v9579_v13 }
0x1751   :  { %9455 = vmatprep.mubr.f32.mxu0 %v18539_v3  ;;  %12694 = vmatprep.mubr.msk.f32.mxu1 %vm15995_vm0, %v18539_v3  ;;  %v15224_v42 = vpack.c.bf16 %v9371_v1, %v9368_v35  ;;  %v9583_v35 = vld [vmem:[#allocation10 + $0xf0] sm:$0xff]  ;;  %v9585_v1 = vld [vmem:[#allocation10 + $0x100] sm:$0xff] }
0x1753   :  { %15201 = vmatpush1.bf16.msra.mxu0 %v15200_v43  ;;  %15231 = vmatpush3.bf16.msra.mxu1 %v15230_v10  ;;  %v9557_v43 = vld [vmem:[#allocation10 + $0x20] sm:$0xff] }
0x1754   :  { %15203 = vmatprep.subr.bf16.mxu0 %v15202_v26  ;;  %15232 = vmatprep.subr.bf16.mxu1 %v18537_v0  ;;  %v15250_v10 = vpack.c.bf16 %v9557_v43, %v9554_v30  ;;  %v9556_v26 = vld [vmem:[#allocation10 + $0x18] sm:$0xff]  ;;  %v15298_v30 = vpack.c.bf16 %v9588_v38, %v9585_v1  ;;  %v9759_v1 = vld [vmem:[#allocation12] sm:$0xff] }
0x1755   :  { %v15252_v62 = vpack.c.bf16 %v9556_v26, %v9553_v27  ;;  %v9592_v27 = vld [vmem:[#allocation10 + $0x138] sm:$0xff]  ;;  %v9591_v26 = vld [vmem:[#allocation10 + $0x130] sm:$0xff] }
0x1756   :  { %v9762_v38 = vld [vmem:[#allocation12 + $0x18] sm:$0xff] }
0x1757   :  { %15205 = vmatpush1.bf16.msra.mxu0 %v15204_v31  ;;  %15234 = vmatpush3.bf16.msra.mxu1 %v15233_v34  ;;  %v9563_v31 = vld [vmem:[#allocation10 + $0x50] sm:$0xff] }
0x1758   :  { %15207 = vmatprep.subr.bf16.mxu0 %v15206_v56  ;;  %15235 = vmatprep.subr.bf16.mxu1 %v18537_v0  ;;  %v15254_v34 = vpack.c.bf16 %v9563_v31, %v9560_v19  ;;  %v9562_v56 = vld [vmem:[#allocation10 + $0x48] sm:$0xff] }
0x1759   :  { %v15256_v53 = vpack.c.bf16 %v9562_v56, %v9559_v2  ;;  %v9598_v2 = vld [vmem:[#allocation10 + $0x168] sm:$0xff]  ;;  %v9597_v56 = vld [vmem:[#allocation10 + $0x160] sm:$0xff] }
0x175b   :  { %15209 = vmatpush1.bf16.msra.mxu0 %v15208_v49  ;;  %15237 = vmatpush3.bf16.msra.mxu1 %v15236_v4  ;;  %v9569_v49 = vld [vmem:[#allocation10 + $0x80] sm:$0xff] }
0x175c   :  { %15211 = vmatprep.subr.bf16.mxu0 %v15210_v9  ;;  %15238 = vmatprep.subr.bf16.mxu1 %v18537_v0  ;;  %v15258_v4 = vpack.c.bf16 %v9569_v49, %v9566_v14  ;;  %v9568_v9 = vld [vmem:[#allocation10 + $0x78] sm:$0xff]  ;;  %v15304_v14 = vpack.c.bf16 %v9600_v22, %v9597_v56  ;;  %v9772_v56 = vld [vmem:[#allocation12 + $0x68] sm:$0xff]  ;;  %v9775_v22 = vld [vmem:[#allocation12 + $0x80] sm:$0xff] }
0x175d   :  { %v15260_v12 = vpack.c.bf16 %v9568_v9, %v9565_v5  ;;  %v9374_v9 = vld [vmem:[%s18326_s13] sm:$0x7] }
0x175e   :  { %v9379_v17 = vrot.slane %v9374_v9, %v18828_v47  ;;  %v9387_v13 = vrot.slane %v9374_v9, %v18830_v63 }
0x175f   :  { %15213 = vmatpush1.bf16.msra.mxu0 %v15212_v24  ;;  %15240 = vmatpush3.bf16.msra.mxu1 %v15239_v54  ;;  %v9575_v24 = vld [vmem:[#allocation10 + $0xb0] sm:$0xff] }
0x1760   :  { %15215 = vmatprep.subr.bf16.mxu0 %v15214_v16  ;;  %15241 = vmatprep.subr.bf16.mxu1 %v18537_v0  ;;  %v15262_v54 = vpack.c.bf16 %v9575_v24, %v9572_v18  ;;  %v9574_v16 = vld [vmem:[#allocation10 + $0xa8] sm:$0xff]  ;;  %v9383_v18 = vrot.slane %v9374_v9, %v18829_v21  ;;  %v9781_v9 = vld [vmem:[#allocation12 + $0xb0] sm:$0xff] }
0x1761   :  { %v15264_v23 = vpack.c.bf16 %v9574_v16, %v9571_v39 }
0x1763   :  { %15217 = vmatpush1.bf16.msra.mxu0 %v15216_v37  ;;  %15243 = vmatpush3.bf16.msra.mxu1 %v15242_v48  ;;  %v9581_v37 = vld [vmem:[#allocation10 + $0xe0] sm:$0xff] }
0x1764   :  { %15219 = vmatprep.subr.bf16.mxu0 %v15218_v7  ;;  %15244 = vmatprep.subr.bf16.mxu1 %v18537_v0  ;;  %v15266_v48 = vpack.c.bf16 %v9581_v37, %v9578_v28  ;;  %v9580_v7 = vld [vmem:[#allocation10 + $0xd8] sm:$0xff] }
0x1765   :  { %v15268_v36 = vpack.c.bf16 %v9580_v7, %v9577_v44 }
0x1767   :  { %15221 = vmatpush1.bf16.msra.mxu0 %v15220_v50  ;;  %15246 = vmatpush3.bf16.msra.mxu1 %v15245_v25  ;;  %v9587_v50 = vld [vmem:[#allocation10 + $0x110] sm:$0xff] }
0x1768   :  { %15223 = vmatprep.subr.bf16.mxu0 %v15222_v20  ;;  %15247 = vmatprep.subr.bf16.mxu1 %v18537_v0  ;;  %v15270_v25 = vpack.c.bf16 %v9587_v50, %v9584_v61  ;;  %v9586_v20 = vld [vmem:[#allocation10 + $0x108] sm:$0xff] }
0x1769   :  { %v15272_v57 = vpack.c.bf16 %v9586_v20, %v9583_v35 }
0x176b   :  { %15225 = vmatpush1.bf16.msra.mxu0 %v15224_v42  ;;  %15249 = vmatpush3.bf16.msra.mxu1 %v15248_v15  ;;  %v9590_v42 = vld [vmem:[#allocation10 + $0x128] sm:$0xff]  ;;  %v9593_v15 = vld [vmem:[#allocation10 + $0x140] sm:$0xff] }
0x176c   :  { %15282 = vmatprep.subr.bf16.mxu1 %v18537_v0  ;;  %15251 = vmatprep.subr.bf16.mxu0 %v15250_v10  ;;  %v15274_v43 = vpack.c.bf16 %v9593_v15, %v9590_v42  ;;  %v9589_v10 = vld [vmem:[#allocation10 + $0x120] sm:$0xff]  ;;  %v9761_v42 = vld [vmem:[#allocation12 + $0x10] sm:$0xff]  ;;  %v9764_v15 = vld [vmem:[#allocation12 + $0x28] sm:$0xff] }
0x176d   :  { %v15276_v11 = vpack.c.bf16 %v9592_v27, %v9589_v10  ;;  %v9769_v10 = vld [vmem:[#allocation12 + $0x50] sm:$0xff] }
0x176e   :  { %9456 = vmatmul.mubr.f32.vlgmr.msra.gmra.mrb[60].mxu0 %v18069_v52  ;;  %12695 = vmatmul.mubr.f32.vlgmr.msra.gmra.mrb[102].mxu1 %v18069_v52 }
0x176f   :  { %9682 = vmatprep.mubr.f32.mxu0 %v18539_v3  ;;  %12729 = vmatprep.mubr.msk.f32.mxu1 %vm15995_vm0, %v18539_v3 }
0x1770   :  { %15253 = vmatpush1.bf16.msra.mxu0 %v15252_v62  ;;  %15284 = vmatpush3.bf16.msra.mxu1 %v15283_v59  ;;  %v9594_v62 = vld [vmem:[#allocation10 + $0x148] sm:$0xff]  ;;  %v9599_v59 = vld [vmem:[#allocation10 + $0x170] sm:$0xff] }
0x1771   :  { %15285 = vmatprep.subr.bf16.mxu1 %v18537_v0  ;;  %15255 = vmatprep.subr.bf16.mxu0 %v15254_v34  ;;  %v15301_v19 = vpack.c.bf16 %v9594_v62, %v9591_v26  ;;  %v15278_v31 = vpack.c.bf16 %v9599_v59, %v9596_v8  ;;  %v9595_v34 = vld [vmem:[#allocation10 + $0x150] sm:$0xff]  ;;  %v15339_v62 = vpack.c.bf16 %v9764_v15, %v9761_v42  ;;  %v9798_v15 = vld [vmem:[#allocation12 + $0x138] sm:$0xff] }
0x1772   :  { %v9765_v8 = vld [vmem:[#allocation12 + $0x30] sm:$0xff] }
0x1774   :  { %15257 = vmatpush1.bf16.msra.mxu0 %v15256_v53  ;;  %15287 = vmatpush3.bf16.msra.mxu1 %v15286_v41  ;;  %v9760_v53 = vld [vmem:[#allocation12 + $0x8] sm:$0xff]  ;;  %v15280_v41 = vpack.c.bf16 %v9598_v2, %v9595_v34  ;;  %v9767_v34 = vld [vmem:[#allocation12 + $0x40] sm:$0xff]  ;;  %v9770_v2 = vld [vmem:[#allocation12 + $0x58] sm:$0xff] }
0x1775   :  { %15288 = vmatprep.subr.bf16.mxu1 %v18537_v0  ;;  %15259 = vmatprep.subr.bf16.mxu0 %v15258_v4  ;;  %v15306_v49 = vpack.c.bf16 %v9763_v46, %v9760_v53  ;;  %v15342_v46 = vpack.c.bf16 %v9770_v2, %v9767_v34 }
0x1778   :  { %15261 = vmatpush1.bf16.msra.mxu0 %v15260_v12  ;;  %15290 = vmatpush3.bf16.msra.mxu1 %v15289_v29  ;;  %v9173_v12 = vrot.slane %v9168_v32, %v18828_v47  ;;  %v9177_v29 = vrot.slane %v9168_v32, %v18829_v21 }
0x1779   :  { %15291 = vmatprep.subr.bf16.mxu1 %v18537_v0  ;;  %15263 = vmatprep.subr.bf16.mxu0 %v15262_v54 }
0x177a   :  { %v15490_v24 = vadd.f32 %v9379_v17, %v9173_v12  ;;  %v15492_v16 = vadd.f32 %v9383_v18, %v9177_v29  ;;  %v9777_v17 = vld [vmem:[#allocation12 + $0x90] sm:$0xff]  ;;  %v9780_v18 = vld [vmem:[#allocation12 + $0xa8] sm:$0xff] }
0x177c   :  { %15265 = vmatpush1.bf16.msra.mxu0 %v15264_v23  ;;  %15293 = vmatpush3.bf16.msra.mxu1 %v15292_v58 }
0x177d   :  { %15294 = vmatprep.subr.bf16.mxu1 %v18537_v0  ;;  %15267 = vmatprep.subr.bf16.mxu0 %v15266_v48 }
0x1780   :  { %15269 = vmatpush1.bf16.msra.mxu0 %v15268_v36  ;;  %15296 = vmatpush3.bf16.msra.mxu1 %v15295_v33  ;;  %v9181_v36 = vrot.slane %v9168_v32, %v18830_v63 }
0x1781   :  { %15297 = vmatprep.subr.bf16.mxu1 %v18537_v0  ;;  %15271 = vmatprep.subr.bf16.mxu0 %v15270_v25 }
0x1784   :  { %15273 = vmatpush1.bf16.msra.mxu0 %v15272_v57  ;;  %15299 = vmatpush3.bf16.msra.mxu1 %v15298_v30 }
0x1785   :  { %15275 = vmatprep.subr.bf16.mxu0 %v15274_v43  ;;  %15300 = vmatprep.subr.bf16.mxu1 %v18537_v0  ;;  %v9766_v43 = vld [vmem:[#allocation12 + $0x38] sm:$0xff] }
0x1788   :  { %15277 = vmatpush1.bf16.msra.mxu0 %v15276_v11  ;;  %15302 = vmatpush3.bf16.msra.mxu1 %v15301_v19  ;;  %v15308_v11 = vpack.c.bf16 %v9762_v38, %v9759_v1  ;;  %v15310_v19 = vpack.c.bf16 %v9769_v10, %v9766_v43  ;;  %v9795_v38 = vld [vmem:[#allocation12 + $0x120] sm:$0xff]  ;;  %v9800_v43 = vld [vmem:[#allocation12 + $0x148] sm:$0xff]  ;;  %v9802_v10 = vld [vmem:[#allocation12 + $0x158] sm:$0xff] }
0x1789   :  { %15279 = vmatprep.subr.bf16.mxu0 %v15278_v31  ;;  %15303 = vmatprep.subr.bf16.mxu1 %v18537_v0  ;;  %v9768_v31 = vld [vmem:[#allocation12 + $0x48] sm:$0xff] }
0x178a   :  { %v15312_v53 = vpack.c.bf16 %v9768_v31, %v9765_v8  ;;  %v9806_v31 = vld [vmem:[#allocation12 + $0x178] sm:$0xff] }
0x178c   :  { %15281 = vmatpush1.bf16.msra.mxu0 %v15280_v41  ;;  %15305 = vmatpush3.bf16.msra.mxu1 %v15304_v14  ;;  %v9771_v41 = vld [vmem:[#allocation12 + $0x60] sm:$0xff]  ;;  %v9774_v14 = vld [vmem:[#allocation12 + $0x78] sm:$0xff] }
0x178d   :  { %15307 = vmatprep.subr.bf16.mxu0 %v15306_v49  ;;  %15338 = vmatprep.subr.bf16.mxu1 %v18537_v0  ;;  %v9773_v49 = vld [vmem:[#allocation12 + $0x70] sm:$0xff]  ;;  %v15316_v32 = vpack.c.bf16 %v9774_v14, %v9771_v41  ;;  %v9991_v14 = vld [vmem:[%s18331_s18 + $0x28] sm:$0xff] }
0x1821   :  { %v9322_v4 = vpop.f32.mrb[100].mxu1 }
0x1822   :  { %v12661_v5 = vpop.f32.mrb[101].mxu1  ;;  %v9323_v50 = vadd.f32 %v9322_v4, %v9181_v36  ;;  %v9776_v4 = vld [vmem:[#allocation12 + $0x88] sm:$0xff] }
0x1823   :  { %v9778_v5 = vld [vmem:[#allocation12 + $0x98] sm:$0xff]  ;;  %v15345_v12 = vpack.c.bf16 %v9776_v4, %v9773_v49  ;;  %v9992_v4 = vld [vmem:[%s18331_s18 + $0x30] sm:$0xff] }
0x1824   :  { %v15318_v29 = vpack.c.bf16 %v9781_v9, %v9778_v5  ;;  %v9993_v5 = vld [vmem:[%s18331_s18 + $0x38] sm:$0xff] }
0x1825   :  { %v15372_v9 = vpack.c.bf16 %v9993_v5, %v9992_v4 }
0x1841   :  { %v9457_v54 = vpop.f32.mrb[60].mxu0  ;;  %v9528_v39 = vpop.f32.mrb[102].mxu1 }
0x1842   :  { %v15491_v6 = vadd.f32 %v15490_v24, %v9457_v54  ;;  %v9459_v23 = vpop.f32.mrb[61].mxu0  ;;  %v12696_v60 = vpop.f32.mrb[103].mxu1  ;;  %v9529_v33 = vadd.f32 %v9528_v39, %v9387_v13  ;;  %v9779_v24 = vld [vmem:[#allocation12 + $0xa0] sm:$0xff]  ;;  %v9782_v54 = vld [vmem:[#allocation12 + $0xb8] sm:$0xff]  ;;  %v9784_v39 = vld [vmem:[#allocation12 + $0xc8] sm:$0xff] }
0x1843   :  { %v15493_v28 = vadd.f32 %v15492_v16, %v9459_v23  ;;  %v9787_v16 = vld [vmem:[#allocation12 + $0xe0] sm:$0xff]  ;;  %v15348_v23 = vpack.c.bf16 %v9782_v54, %v9779_v24 }
0x1844   :  { %v10192_v58 = vmul.f32 -1.442695, %v15491_v6  ;;  %v15320_v6 = vpack.c.bf16 %v9780_v18, %v9777_v17  ;;  %v9783_v60 = vld [vmem:[#allocation12 + $0xc0] sm:$0xff]  ;;  %v9997_v18 = vld [vmem:[%s18331_s18 + $0x58] sm:$0xff] }
0x1845   :  { %v10193_v37 = vmul.f32 -1.442695, %v15493_v28  ;;  %v9786_v28 = vld [vmem:[#allocation12 + $0xd8] sm:$0xff]  ;;  %v9998_v54 = vld [vmem:[%s18331_s18 + $0x60] sm:$0xff] }
0x1846   :  { %15795 = vpow2.f32 %v10192_v58  ;;  %v15322_v58 = vpack.c.bf16 %v9787_v16, %v9784_v39  ;;  %v15324_v13 = vpack.c.bf16 %v9786_v28, %v9783_v60  ;;  %v9999_v39 = vld [vmem:[%s18331_s18 + $0x68] sm:$0xff] }
0x1847   :  { %15797 = vpow2.f32 %v10193_v37  ;;  %v9785_v37 = vld [vmem:[#allocation12 + $0xd0] sm:$0xff]  ;;  %v15381_v16 = vpack.c.bf16 %v9999_v39, %v9998_v54 }
0x1850   :  { %v15796_v48 = vpop.eup %15795 }
0x1851   :  { %v9536_v44 = vadd.f32 1.0, %v15796_v48  ;;  %v15798_v7 = vpop.eup %15797  ;;  %v9788_v48 = vld [vmem:[#allocation12 + $0xe8] sm:$0xff] }
0x1852   :  { %v9543_v45 = vadd.f32 1.0, %v15798_v7  ;;  %v9793_v7 = vld [vmem:[#allocation12 + $0x110] sm:$0xff]  ;;  %v15351_v36 = vpack.c.bf16 %v9788_v48, %v9785_v37  ;;  %v9807_v37 = vld [vmem:[%s18330_s17] sm:$0x7] }
0x1853   :  { %15799 = vrcp.f32 %v9536_v44  ;;  %v9790_v44 = vld [vmem:[#allocation12 + $0xf8] sm:$0xff]  ;;  %v9601_v48 = vld [vmem:[%s18329_s16] sm:$0x7] }
0x1854   :  { %15801 = vrcp.f32 %v9543_v45  ;;  %v9789_v45 = vld [vmem:[#allocation12 + $0xf0] sm:$0xff] }
0x185d   :  { %v15800_v61 = vpop.eup %15799 }
0x185e   :  { %v9546_v25 = vmul.f32 %v15800_v61, %v9529_v33  ;;  %v15802_v20 = vpop.eup %15801  ;;  %v15326_v33 = vpack.c.bf16 %v9793_v7, %v9790_v44  ;;  %v9792_v61 = vld [vmem:[#allocation12 + $0x108] sm:$0xff]  ;;  %v9606_v44 = vrot.slane %v9601_v48, %v18828_v47  ;;  %v9812_v7 = vrot.slane %v9807_v37, %v18828_v47 }
0x185f   :  { %v9549_v57 = vsub.f32 1.0, %v15802_v20  ;;  %v9551_v26 = vmul.f32 %v15802_v20, %v18069_v52  ;;  %v15314_v52 = vpack.c.bf16 %v9775_v22, %v9772_v56  ;;  %v9799_v20 = vld [vmem:[#allocation12 + $0x140] sm:$0xff]  ;;  %v15328_v1 = vpack.c.bf16 %v9792_v61, %v9789_v45  ;;  %v9987_v22 = vld [vmem:[%s18331_s18 + $0x8] sm:$0xff] }
0x1860   :  { %v9547_v35 = vadd.f32 %v9546_v25, %v9323_v50  ;;  %v9791_v50 = vld [vmem:[#allocation12 + $0x100] sm:$0xff]  ;;  %v9794_v25 = vld [vmem:[#allocation12 + $0x118] sm:$0xff] }
0x1861   :  { %v9986_v56 = vld [vmem:[%s18331_s18] sm:$0xff] }
0x1862   :  { %15803 = vtanh.f32 %v9547_v35  ;;  %v9796_v35 = vld [vmem:[#allocation12 + $0x128] sm:$0xff] }
0x1863   :  { %v15330_v42 = vpack.c.bf16 %v9799_v20, %v9796_v35 }
0x186c   :  { %v15804_v30 = vpop.eup %15803 }
0x186d   :  { %v9550_v27 = vmul.f32 %v15804_v30, %v9549_v57  ;;  %v15354_v57 = vpack.c.bf16 %v9794_v25, %v9791_v50  ;;  %v9797_v30 = vld [vmem:[#allocation12 + $0x130] sm:$0xff] }
0x186f   :  { %v9552_v59 = vadd.f32 %v9551_v26, %v9550_v27  ;;  %v9805_v27 = vld [vmem:[#allocation12 + $0x170] sm:$0xff]  ;;  %v15332_v26 = vpack.c.bf16 %v9798_v15, %v9795_v38  ;;  %v9820_v15 = vrot.slane %v9807_v37, %v18830_v63 }
0x1870   :  { %v15334_v8 = vpack.c.bf16 %v9805_v27, %v9802_v10 }
0x1871   :  { %9683 = vmatmul.mubr.f32.vlgmr.msra.gmra.mrb[62].mxu0 %v9552_v59  ;;  %12730 = vmatmul.mubr.f32.vlgmr.msra.gmra.mrb[104].mxu1 %v9552_v59  ;;  %v9804_v59 = vld [vmem:[#allocation12 + $0x168] sm:$0xff] }
0x1872   :  { %15309 = vmatpush1.bf16.msra.mxu0 %v15308_v11  ;;  %15340 = vmatpush3.bf16.msra.mxu1 %v15339_v62  ;;  %v15357_v11 = vpack.c.bf16 %v9800_v43, %v9797_v30  ;;  %v9801_v62 = vld [vmem:[#allocation12 + $0x150] sm:$0xff] }
0x1873   :  { %15311 = vmatprep.subr.bf16.mxu0 %v15310_v19  ;;  %15341 = vmatprep.subr.bf16.mxu1 %v18537_v0  ;;  %v9803_v19 = vld [vmem:[#allocation12 + $0x160] sm:$0xff]  ;;  %v15336_v34 = vpack.c.bf16 %v9804_v59, %v9801_v62 }
0x1874   :  { %9888 = vmatprep.mubr.f32.mxu0 %v18539_v3  ;;  %12764 = vmatprep.mubr.msk.f32.mxu1 %vm15995_vm0, %v18539_v3  ;;  %v15360_v2 = vpack.c.bf16 %v9806_v31, %v9803_v19 }
0x1876   :  { %15313 = vmatpush1.bf16.msra.mxu0 %v15312_v53  ;;  %15343 = vmatpush3.bf16.msra.mxu1 %v15342_v46  ;;  %v15363_v53 = vpack.c.bf16 %v9987_v22, %v9986_v56  ;;  %v9988_v46 = vld [vmem:[%s18331_s18 + $0x10] sm:$0xff] }
0x1877   :  { %15315 = vmatprep.subr.bf16.mxu0 %v15314_v52  ;;  %15344 = vmatprep.subr.bf16.mxu1 %v18537_v0  ;;  %v9990_v52 = vld [vmem:[%s18331_s18 + $0x20] sm:$0xff] }
0x1878   :  { %v15369_v49 = vpack.c.bf16 %v9991_v14, %v9990_v52 }
0x187a   :  { %15317 = vmatpush1.bf16.msra.mxu0 %v15316_v32  ;;  %15346 = vmatpush3.bf16.msra.mxu1 %v15345_v12  ;;  %v9994_v32 = vld [vmem:[%s18331_s18 + $0x40] sm:$0xff]  ;;  %v9995_v12 = vld [vmem:[%s18331_s18 + $0x48] sm:$0xff] }
0x187b   :  { %15319 = vmatprep.subr.bf16.mxu0 %v15318_v29  ;;  %15347 = vmatprep.subr.bf16.mxu1 %v18537_v0  ;;  %v15375_v17 = vpack.c.bf16 %v9995_v12, %v9994_v32  ;;  %v9996_v29 = vld [vmem:[%s18331_s18 + $0x50] sm:$0xff] }
0x187c   :  { %v15378_v24 = vpack.c.bf16 %v9997_v18, %v9996_v29 }
0x187e   :  { %15321 = vmatpush1.bf16.msra.mxu0 %v15320_v6  ;;  %15349 = vmatpush3.bf16.msra.mxu1 %v15348_v23  ;;  %v10000_v6 = vld [vmem:[%s18331_s18 + $0x70] sm:$0xff]  ;;  %v10001_v23 = vld [vmem:[%s18331_s18 + $0x78] sm:$0xff] }
0x187f   :  { %15323 = vmatprep.subr.bf16.mxu0 %v15322_v58  ;;  %15350 = vmatprep.subr.bf16.mxu1 %v18537_v0  ;;  %v15384_v60 = vpack.c.bf16 %v10001_v23, %v10000_v6 }
0x1882   :  { %15325 = vmatpush1.bf16.msra.mxu0 %v15324_v13  ;;  %15352 = vmatpush3.bf16.msra.mxu1 %v15351_v36  ;;  %v9610_v13 = vrot.slane %v9601_v48, %v18829_v21  ;;  %v9816_v36 = vrot.slane %v9807_v37, %v18829_v21  ;;  %v9614_v21 = vrot.slane %v9601_v48, %v18830_v63 }
0x1883   :  { %15327 = vmatprep.subr.bf16.mxu0 %v15326_v33  ;;  %15353 = vmatprep.subr.bf16.mxu1 %v18537_v0 }
0x1884   :  { %v15496_v61 = vadd.f32 %v9816_v36, %v9610_v13 }
0x1886   :  { %15329 = vmatpush1.bf16.msra.mxu0 %v15328_v1  ;;  %15355 = vmatpush3.bf16.msra.mxu1 %v15354_v57 }
0x1887   :  { %15331 = vmatprep.subr.bf16.mxu0 %v15330_v42  ;;  %15356 = vmatprep.subr.bf16.mxu1 %v18537_v0 }
0x188a   :  { %15333 = vmatpush1.bf16.msra.mxu0 %v15332_v26  ;;  %15358 = vmatpush3.bf16.msra.mxu1 %v15357_v11 }
0x188b   :  { %15335 = vmatprep.subr.bf16.mxu0 %v15334_v8  ;;  %15359 = vmatprep.subr.bf16.mxu1 %v18537_v0 }
0x188e   :  { %15337 = vmatpush1.bf16.msra.mxu0 %v15336_v34  ;;  %15361 = vmatpush3.bf16.msra.mxu1 %v15360_v2 }
0x188f   :  { %15362 = vmatprep.subr.bf16.mxu0 %v18537_v0 }
0x1891   :  { %9889 = vmatmul.mubr.f32.vlgmr.msra.gmra.mrb[62].mxu0 %v18158_v40  ;;  %12765 = vmatmul.mubr.f32.vlgmr.msra.gmra.mrb[106].mxu1 %v18158_v40 }
0x1892   :  { %12799 = vmatprep.mubr.msk.f32.mxu0 %vm15995_vm0, %v18539_v3  ;;  %15364 = vmatpush3.bf16.msra.mxu0 %v15363_v53  ;;  %v9989_v3 = vld [vmem:[%s18331_s18 + $0x18] sm:$0xff] }
0x1893   :  { %15365 = vmatprep.subr.bf16.mxu0 %v18537_v0  ;;  %v15366_v41 = vpack.c.bf16 %v9989_v3, %v9988_v46 }
0x1896   :  { %15367 = vmatpush3.bf16.msra.mxu0 %v15366_v41 }
0x1897   :  { %15368 = vmatprep.subr.bf16.mxu0 %v18537_v0 }
0x189a   :  { %15370 = vmatpush3.bf16.msra.mxu0 %v15369_v49 }
0x189b   :  { %15371 = vmatprep.subr.bf16.mxu0 %v18537_v0 }
0x189e   :  { %15373 = vmatpush3.bf16.msra.mxu0 %v15372_v9 }
0x189f   :  { %15374 = vmatprep.subr.bf16.mxu0 %v18537_v0 }
0x18a2   :  { %15376 = vmatpush3.bf16.msra.mxu0 %v15375_v17 }
0x18a3   :  { %15377 = vmatprep.subr.bf16.mxu0 %v18537_v0 }
0x18a6   :  { %15379 = vmatpush3.bf16.msra.mxu0 %v15378_v24 }
0x18a7   :  { %15380 = vmatprep.subr.bf16.mxu0 %v18537_v0 }
0x18aa   :  { %15382 = vmatpush3.bf16.msra.mxu0 %v15381_v16 }
0x18ab   :  { %15383 = vmatprep.subr.bf16.mxu0 %v18537_v0  ;;  %v15494_v0 = vadd.f32 %v9812_v7, %v9606_v44 }
0x18ae   :  { %15385 = vmatpush3.bf16.msra.mxu0 %v15384_v60 }
0x1944   :  { %v9755_v58 = vpop.f32.mrb[104].mxu1 }
0x1945   :  { %v12731_v28 = vpop.f32.mrb[105].mxu1  ;;  %v9756_v27 = vadd.f32 %v9755_v58, %v9614_v21 }
0x1964   :  { %v9890_v45 = vpop.f32.mrb[62].mxu0  ;;  %v9961_v33 = vpop.f32.mrb[106].mxu1 }
0x1965   :  { %v15495_v50 = vadd.f32 %v15494_v0, %v9890_v45  ;;  %v9892_v25 = vpop.f32.mrb[63].mxu0  ;;  %v12766_v35 = vpop.f32.mrb[107].mxu1  ;;  %v9962_v43 = vadd.f32 %v9961_v33, %v9820_v15 }
0x1966   :  { %v15497_v1 = vadd.f32 %v15496_v61, %v9892_v25 }
0x1967   :  { %v10194_v20 = vmul.f32 -1.442695, %v15495_v50 }
0x1968   :  { %v10195_v57 = vmul.f32 -1.442695, %v15497_v1 }
0x1969   :  { %15805 = vpow2.f32 %v10194_v20 }
0x196a   :  { %15807 = vpow2.f32 %v10195_v57 }
0x1973   :  { %v15806_v38 = vpop.eup %15805 }
0x1974   :  { %v9969_v42 = vadd.f32 1.0, %v15806_v38  ;;  %v15808_v47 = vpop.eup %15807 }
0x1975   :  { %v9976_v30 = vadd.f32 1.0, %v15808_v47 }
0x1976   :  { %15809 = vrcp.f32 %v9969_v42 }
0x1977   :  { %15811 = vrcp.f32 %v9976_v30 }
0x1980   :  { %v15810_v10 = vpop.eup %15809 }
0x1981   :  { %v9979_v26 = vmul.f32 %v15810_v10, %v9962_v43  ;;  %v15812_v62 = vpop.eup %15811 }
0x1982   :  { %v9982_v8 = vsub.f32 1.0, %v15812_v62  ;;  %v9984_v31 = vmul.f32 %v15812_v62, %v18158_v40 }
0x1983   :  { %v9980_v11 = vadd.f32 %v9979_v26, %v9756_v27 }
0x1985   :  { %15813 = vtanh.f32 %v9980_v11 }
0x198f   :  { %v15814_v59 = vpop.eup %15813 }
0x1990   :  { %v9983_v19 = vmul.f32 %v15814_v59, %v9982_v8 }
0x1992   :  { %v9985_v34 = vadd.f32 %v9984_v31, %v9983_v19 }
0x1994   :  { %12800 = vmatmul.mubr.f32.vlgmr.msra.gmra.mrb[64].mxu0 %v9985_v34 }
0x1a67   :  { %v10075_v2 = vpop.f32.mrb[64].mxu0 }
0x1a68   :  { %v10076_v56 = vadd.f32 %v18174_v55, %v10075_v2  ;;  %v12801_v63 = vpop.f32.mrb[65].mxu0 }
0x1a6a   :  { %v10079_v22 = vadd.f32 %v10076_v56, %v18180_v51 }
0x1a6c   :  { %10197 = vst [vmem:[%s18333_s20 + $0x20] sm:$0xff] %v10079_v22 }
0x1a6d   :  { %10086 = vsyncpa [#allocation3], 1 }
0x1a6e   :  { %10087 = vsyncpa [#allocation5], 1 }
0x1a6f   :  { %10088 = vsyncpa [#allocation8], 1 }
0x1a70   :  { %10089 = vsyncpa [#allocation11], 1 }

</bundles_post_ra>
